<compile_context>
chip_gen: v7x
topology: tpu7x:2x2x1
jax: 0.10.0
libtpu: 0.0.40
codegen_flags: <defaults>
</compile_context>

<pallas_src>
import jax
import jax.numpy as jnp
from jax.experimental import pallas as pl
from jax.experimental.pallas import tpu as pltpu


C_IN, H_IN, W_IN = 64, 3, 20
KH = KW = 3
C_OUT = 64
OW = W_IN - KW + 1                 # 18
FEAT_IN = W_IN * H_IN * C_IN       # 3840 = 30 * 128
FEAT_CONV = OW * C_OUT             # 1152 = 9 * 128
NPAD = 128                         # lane-dense padded fc width


def _elu(x):
    # ELU with alpha=1; clamp exp arg so the unselected branch stays finite.
    return jnp.where(x > 0, x, jnp.exp(jnp.minimum(x, 0.0)) - 1.0)


def _round_up(n, m):
    return ((n + m - 1) // m) * m


# ------------------------------ Pallas kernel ------------------------------ #

def fused_head_kernel(x_ref, wc_ref, scale_ref, shift_ref,
                      w1_ref, b1_ref, w2_ref, b2_ref,
                      w3_ref, b3_ref, w4_ref, b4_ref, o_ref):
    # conv5 as one banded matmul: (TB, 3840) @ (3840, 1152) -> f32 (TB, 1152).
    conv = jnp.dot(x_ref[...], wc_ref[...], preferred_element_type=jnp.float32)
    # Fused conv-bias + BatchNorm (inference) + ELU, all in f32, all in VMEM.
    y = _elu(conv * scale_ref[...] + shift_ref[...])

    h = _elu(jnp.dot(y.astype(jnp.bfloat16), w1_ref[...],
                     preferred_element_type=jnp.float32) + b1_ref[...])
    h = _elu(jnp.dot(h.astype(jnp.bfloat16), w2_ref[...],
                     preferred_element_type=jnp.float32) + b2_ref[...])
    h = _elu(jnp.dot(h.astype(jnp.bfloat16), w3_ref[...],
                     preferred_element_type=jnp.float32) + b3_ref[...])
    o_ref[...] = jnp.dot(h.astype(jnp.bfloat16), w4_ref[...],
                         preferred_element_type=jnp.float32) + b4_ref[...]


# ------------------------------ Parameters --------------------------------- #

def init_params(key):
    ks = jax.random.split(key, 20)

    def u(k, shape, fan_in):
        bound = 1.0 / jnp.sqrt(jnp.float32(fan_in))
        return jax.random.uniform(k, shape, jnp.float32, -bound, bound)

    def bn(k):
        k1, k2, k3, k4 = jax.random.split(k, 4)
        return dict(
            gamma=1.0 + 0.1 * jax.random.normal(k1, (64,), jnp.float32),
            beta=0.1 * jax.random.normal(k2, (64,), jnp.float32),
            mean=0.1 * jax.random.normal(k3, (64,), jnp.float32),
            var=jax.random.uniform(k4, (64,), jnp.float32, 0.5, 1.5),
        )

    return {
        'conv_w': u(ks[0], (64, 64, 3, 3), 64 * 9),   # (cout, cin, kh, kw)
        'conv_b': u(ks[1], (64,), 64 * 9),
        'clean_bn': bn(ks[2]),
        'adv_bn': bn(ks[3]),
        'fc1_w': u(ks[4], (100, 64 * 1 * 18), 64 * 18),
        'fc1_b': u(ks[5], (100,), 64 * 18),
        'fc2_w': u(ks[6], (50, 100), 100),
        'fc2_b': u(ks[7], (50,), 100),
        'fc3_w': u(ks[8], (10, 50), 50),
        'fc3_b': u(ks[9], (10,), 50),
        'fc4_w': u(ks[10], (1, 10), 10),
        'fc4_b': u(ks[11], (1,), 10),
    }


def prepare_params(params):
    """One-time weight re-layout (hoisted out of the forward pass)."""
    f32, bf16 = jnp.float32, jnp.bfloat16

    # conv5 -> banded (3840, 1152) matrix. xflat feature index = w*192 + h*64 + c;
    # output column index = w_out*64 + c_out.
    w2d = jnp.transpose(params['conv_w'], (3, 2, 1, 0)).reshape(KW * KH * C_IN, C_OUT)
    blk = KH * C_IN  # 192
    wc = jnp.zeros((FEAT_IN, FEAT_CONV), f32)
    for w in range(OW):
        wc = wc.at[w * blk:w * blk + KW * blk, w * C_OUT:(w + 1) * C_OUT].set(w2d)

    # Fold conv bias + BatchNorm (inference) into per-column scale/shift, for both tags.
    def fold(bn):
        s = bn['gamma'] / jnp.sqrt(bn['var'] + 1e-5)
        sh = (params['conv_b'] - bn['mean']) * s + bn['beta']
        return (jnp.tile(s, OW).reshape(1, FEAT_CONV).astype(f32),
                jnp.tile(sh, OW).reshape(1, FEAT_CONV).astype(f32))

    scale_c, shift_c = fold(params['clean_bn'])
    scale_a, shift_a = fold(params['adv_bn'])

    # fc1: permute columns (kernel flatten index is w*64+c; PyTorch is c*18+w), then pad.
    w1 = params['fc1_w'].reshape(100, C_OUT, OW).transpose(2, 1, 0).reshape(FEAT_CONV, 100)

    def pad2(w, rows, cols):
        return jnp.pad(w, ((0, rows - w.shape[0]), (0, cols - w.shape[1])))

    def pad1(b):
        return jnp.pad(b, (0, NPAD - b.shape[0])).reshape(1, NPAD).astype(f32)

    return {
        'wc': wc.astype(bf16),
        'scale_clean': scale_c, 'shift_clean': shift_c,
        'scale_adv': scale_a, 'shift_adv': shift_a,
        'w1': pad2(w1, FEAT_CONV, NPAD).astype(bf16), 'b1': pad1(params['fc1_b']),
        'w2': pad2(params['fc2_w'].T, NPAD, NPAD).astype(bf16), 'b2': pad1(params['fc2_b']),
        'w3': pad2(params['fc3_w'].T, NPAD, NPAD).astype(bf16), 'b3': pad1(params['fc3_b']),
        'w4': pad2(params['fc4_w'].T, NPAD, NPAD).astype(bf16), 'b4': pad1(params['fc4_b']),
    }


# ------------------------------- Forward ----------------------------------- #

def head_nvidia_forward(prep, x, tag='clean'):
    B = x.shape[0]
    assert x.shape[1:] == (C_IN, H_IN, W_IN)

    # NCHW -> (B, W, H, C) -> flat (B, 3840); feature index = w*192 + h*64 + c.
    xflat = jnp.transpose(x, (0, 3, 2, 1)).reshape(B, FEAT_IN).astype(jnp.bfloat16)

    # Batch blocking: block rows are a multiple of 8 (or the full padded batch).
    tb = min(256, _round_up(B, 8))
    bp = _round_up(B, tb)
    if bp != B:
        xflat = jnp.pad(xflat, ((0, bp - B), (0, 0)))

    if tag == 'clean':
        scale, shift = prep['scale_clean'], prep['shift_clean']
    else:
        scale, shift = prep['scale_adv'], prep['shift_adv']

    const = lambda i: (0, 0)  # weights stay resident; no re-DMA across grid steps
    in_specs = [
        pl.BlockSpec((tb, FEAT_IN), lambda i: (i, 0)),      # x block
        pl.BlockSpec((FEAT_IN, FEAT_CONV), const),          # banded conv weight
        pl.BlockSpec((1, FEAT_CONV), const),                # BN scale
        pl.BlockSpec((1, FEAT_CONV), const),                # BN shift
        pl.BlockSpec((FEAT_CONV, NPAD), const),             # fc1 w
        pl.BlockSpec((1, NPAD), const),                     # fc1 b
        pl.BlockSpec((NPAD, NPAD), const),                  # fc2 w
        pl.BlockSpec((1, NPAD), const),                     # fc2 b
        pl.BlockSpec((NPAD, NPAD), const),                  # fc3 w
        pl.BlockSpec((1, NPAD), const),                     # fc3 b
        pl.BlockSpec((NPAD, NPAD), const),                  # fc4 w
        pl.BlockSpec((1, NPAD), const),                     # fc4 b
    ]

    out = pl.pallas_call(
        fused_head_kernel,
        out_shape=jax.ShapeDtypeStruct((bp, NPAD), jnp.float32),
        grid=(bp // tb,),
        in_specs=in_specs,
        out_specs=pl.BlockSpec((tb, NPAD), lambda i: (i, 0)),
        compiler_params=pltpu.CompilerParams(
            dimension_semantics=("parallel",),
            vmem_limit_bytes=48 * 1024 * 1024),
    )(xflat, prep['wc'], scale, shift,
      prep['w1'], prep['b1'], prep['w2'], prep['b2'],
      prep['w3'], prep['b3'], prep['w4'], prep['b4'])

    return out[:B, :1]  # lane-dense (bp, 128) slab -> (B, 1)


if __name__ == "__main__":
    key = jax.random.PRNGKey(0)
    pkey, xkey = jax.random.split(key)
    params = init_params(pkey)
    prep = prepare_params(params)
    x = jax.random.normal(xkey, (2, C_IN, H_IN, W_IN), jnp.float32)

    out_clean = head_nvidia_forward(prep, x, tag='clean')
    out_adv = head_nvidia_forward(prep, x, tag='adv')
    jax.block_until_ready((out_clean, out_adv))

    assert out_clean.shape == (2, 1) and out_adv.shape == (2, 1)
    assert bool(jnp.all(jnp.isfinite(out_clean))) and bool(jnp.all(jnp.isfinite(out_adv)))
    print("KERNEL_OK")
</pallas_src>

<mosaic_0001>
module attributes {stable_mosaic.version = 11 : i64} {
  func.func @fused_head_kernel(%arg0: i32, %arg1: memref<8x3840xbf16, #tpu.memory_space<vmem>>, %arg2: memref<3840x1152xbf16, #tpu.memory_space<vmem>>, %arg3: memref<1x1152xf32, #tpu.memory_space<vmem>>, %arg4: memref<1x1152xf32, #tpu.memory_space<vmem>>, %arg5: memref<1152x128xbf16, #tpu.memory_space<vmem>>, %arg6: memref<1x128xf32, #tpu.memory_space<vmem>>, %arg7: memref<128x128xbf16, #tpu.memory_space<vmem>>, %arg8: memref<1x128xf32, #tpu.memory_space<vmem>>, %arg9: memref<128x128xbf16, #tpu.memory_space<vmem>>, %arg10: memref<1x128xf32, #tpu.memory_space<vmem>>, %arg11: memref<128x128xbf16, #tpu.memory_space<vmem>>, %arg12: memref<1x128xf32, #tpu.memory_space<vmem>>, %arg13: memref<8x128xf32, #tpu.memory_space<vmem>>) attributes {dimension_semantics = [#tpu.dimension_semantics<parallel>], iteration_bounds = array<i64: 1>, scalar_prefetch = 0 : i64, scratch_operands = 0 : i64, tpu.core_type = #tpu.core_type<tc>, window_params = [{transform_indices = @transform_0, window_bounds = array<i64: 8, 3840>}, {pipeline_mode = #tpu.pipeline_mode<synchronous>, transform_indices = @transform_1, window_bounds = array<i64: 3840, 1152>}, {pipeline_mode = #tpu.pipeline_mode<synchronous>, transform_indices = @transform_2, window_bounds = array<i64: 1, 1152>}, {pipeline_mode = #tpu.pipeline_mode<synchronous>, transform_indices = @transform_3, window_bounds = array<i64: 1, 1152>}, {pipeline_mode = #tpu.pipeline_mode<synchronous>, transform_indices = @transform_4, window_bounds = array<i64: 1152, 128>}, {pipeline_mode = #tpu.pipeline_mode<synchronous>, transform_indices = @transform_5, window_bounds = array<i64: 1, 128>}, {pipeline_mode = #tpu.pipeline_mode<synchronous>, transform_indices = @transform_6, window_bounds = array<i64: 128, 128>}, {pipeline_mode = #tpu.pipeline_mode<synchronous>, transform_indices = @transform_7, window_bounds = array<i64: 1, 128>}, {pipeline_mode = #tpu.pipeline_mode<synchronous>, transform_indices = @transform_8, window_bounds = array<i64: 128, 128>}, {pipeline_mode = #tpu.pipeline_mode<synchronous>, transform_indices = @transform_9, window_bounds = array<i64: 1, 128>}, {pipeline_mode = #tpu.pipeline_mode<synchronous>, transform_indices = @transform_10, window_bounds = array<i64: 128, 128>}, {pipeline_mode = #tpu.pipeline_mode<synchronous>, transform_indices = @transform_11, window_bounds = array<i64: 1, 128>}, {transform_indices = @transform_12, window_bounds = array<i64: 8, 128>}]} {
    %c0 = arith.constant 0 : index
    %c0_0 = arith.constant 0 : index
    %0 = vector.load %arg1[%c0, %c0_0] : memref<8x3840xbf16, #tpu.memory_space<vmem>>, vector<8x3840xbf16>
    %c0_1 = arith.constant 0 : index
    %c0_2 = arith.constant 0 : index
    %1 = vector.load %arg2[%c0_1, %c0_2] : memref<3840x1152xbf16, #tpu.memory_space<vmem>>, vector<3840x1152xbf16>
    %cst = arith.constant dense<0.000000e+00> : vector<8x1152xf32>
    %2 = tpu.matmul %0, %1, %cst {dimension_numbers = #tpu.dot_dimension_numbers<[1], [0], [0], [1], [0, 0, 1, 1], [], []>} : vector<8x3840xbf16>, vector<3840x1152xbf16>, vector<8x1152xf32> -> vector<8x1152xf32>
    %c0_3 = arith.constant 0 : index
    %c0_4 = arith.constant 0 : index
    %3 = vector.load %arg3[%c0_3, %c0_4] : memref<1x1152xf32, #tpu.memory_space<vmem>>, vector<1x1152xf32>
    %4 = vector.broadcast %3 : vector<1x1152xf32> to vector<8x1152xf32>
    %5 = arith.mulf %2, %4 : vector<8x1152xf32>
    %c0_5 = arith.constant 0 : index
    %c0_6 = arith.constant 0 : index
    %6 = vector.load %arg4[%c0_5, %c0_6] : memref<1x1152xf32, #tpu.memory_space<vmem>>, vector<1x1152xf32>
    %7 = vector.broadcast %6 : vector<1x1152xf32> to vector<8x1152xf32>
    %8 = arith.addf %5, %7 : vector<8x1152xf32>
    %cst_7 = arith.constant 0.000000e+00 : f32
    %9 = vector.broadcast %cst_7 : f32 to vector<8x1152xf32>
    %10 = arith.cmpf ogt, %8, %9 : vector<8x1152xf32>
    %cst_8 = arith.constant 0.000000e+00 : f32
    %11 = vector.broadcast %cst_8 : f32 to vector<8x1152xf32>
    %12 = arith.minimumf %8, %11 : vector<8x1152xf32>
    %13 = math.exp %12 : vector<8x1152xf32>
    %cst_9 = arith.constant 1.000000e+00 : f32
    %14 = vector.broadcast %cst_9 : f32 to vector<8x1152xf32>
    %15 = arith.subf %13, %14 : vector<8x1152xf32>
    %16 = arith.select %10, %8, %15 : vector<8x1152xi1>, vector<8x1152xf32>
    %17 = arith.truncf %16 : vector<8x1152xf32> to vector<8x1152xbf16>
    %c0_10 = arith.constant 0 : index
    %c0_11 = arith.constant 0 : index
    %18 = vector.load %arg5[%c0_10, %c0_11] : memref<1152x128xbf16, #tpu.memory_space<vmem>>, vector<1152x128xbf16>
    %cst_12 = arith.constant dense<0.000000e+00> : vector<8x128xf32>
    %19 = tpu.matmul %17, %18, %cst_12 {dimension_numbers = #tpu.dot_dimension_numbers<[1], [0], [0], [1], [0, 0, 1, 1], [], []>} : vector<8x1152xbf16>, vector<1152x128xbf16>, vector<8x128xf32> -> vector<8x128xf32>
    %c0_13 = arith.constant 0 : index
    %c0_14 = arith.constant 0 : index
    %20 = vector.load %arg6[%c0_13, %c0_14] : memref<1x128xf32, #tpu.memory_space<vmem>>, vector<1x128xf32>
    %21 = vector.broadcast %20 : vector<1x128xf32> to vector<8x128xf32>
    %22 = arith.addf %19, %21 : vector<8x128xf32>
    %cst_15 = arith.constant 0.000000e+00 : f32
    %23 = vector.broadcast %cst_15 : f32 to vector<8x128xf32>
    %24 = arith.cmpf ogt, %22, %23 : vector<8x128xf32>
    %cst_16 = arith.constant 0.000000e+00 : f32
    %25 = vector.broadcast %cst_16 : f32 to vector<8x128xf32>
    %26 = arith.minimumf %22, %25 : vector<8x128xf32>
    %27 = math.exp %26 : vector<8x128xf32>
    %cst_17 = arith.constant 1.000000e+00 : f32
    %28 = vector.broadcast %cst_17 : f32 to vector<8x128xf32>
    %29 = arith.subf %27, %28 : vector<8x128xf32>
    %30 = arith.select %24, %22, %29 : vector<8x128xi1>, vector<8x128xf32>
    %31 = arith.truncf %30 : vector<8x128xf32> to vector<8x128xbf16>
    %c0_18 = arith.constant 0 : index
    %c0_19 = arith.constant 0 : index
    %32 = vector.load %arg7[%c0_18, %c0_19] : memref<128x128xbf16, #tpu.memory_space<vmem>>, vector<128x128xbf16>
    %cst_20 = arith.constant dense<0.000000e+00> : vector<8x128xf32>
    %33 = tpu.matmul %31, %32, %cst_20 {dimension_numbers = #tpu.dot_dimension_numbers<[1], [0], [0], [1], [0, 0, 1, 1], [], []>} : vector<8x128xbf16>, vector<128x128xbf16>, vector<8x128xf32> -> vector<8x128xf32>
    %c0_21 = arith.constant 0 : index
    %c0_22 = arith.constant 0 : index
    %34 = vector.load %arg8[%c0_21, %c0_22] : memref<1x128xf32, #tpu.memory_space<vmem>>, vector<1x128xf32>
    %35 = vector.broadcast %34 : vector<1x128xf32> to vector<8x128xf32>
    %36 = arith.addf %33, %35 : vector<8x128xf32>
    %cst_23 = arith.constant 0.000000e+00 : f32
    %37 = vector.broadcast %cst_23 : f32 to vector<8x128xf32>
    %38 = arith.cmpf ogt, %36, %37 : vector<8x128xf32>
    %cst_24 = arith.constant 0.000000e+00 : f32
    %39 = vector.broadcast %cst_24 : f32 to vector<8x128xf32>
    %40 = arith.minimumf %36, %39 : vector<8x128xf32>
    %41 = math.exp %40 : vector<8x128xf32>
    %cst_25 = arith.constant 1.000000e+00 : f32
    %42 = vector.broadcast %cst_25 : f32 to vector<8x128xf32>
    %43 = arith.subf %41, %42 : vector<8x128xf32>
    %44 = arith.select %38, %36, %43 : vector<8x128xi1>, vector<8x128xf32>
    %45 = arith.truncf %44 : vector<8x128xf32> to vector<8x128xbf16>
    %c0_26 = arith.constant 0 : index
    %c0_27 = arith.constant 0 : index
    %46 = vector.load %arg9[%c0_26, %c0_27] : memref<128x128xbf16, #tpu.memory_space<vmem>>, vector<128x128xbf16>
    %cst_28 = arith.constant dense<0.000000e+00> : vector<8x128xf32>
    %47 = tpu.matmul %45, %46, %cst_28 {dimension_numbers = #tpu.dot_dimension_numbers<[1], [0], [0], [1], [0, 0, 1, 1], [], []>} : vector<8x128xbf16>, vector<128x128xbf16>, vector<8x128xf32> -> vector<8x128xf32>
    %c0_29 = arith.constant 0 : index
    %c0_30 = arith.constant 0 : index
    %48 = vector.load %arg10[%c0_29, %c0_30] : memref<1x128xf32, #tpu.memory_space<vmem>>, vector<1x128xf32>
    %49 = vector.broadcast %48 : vector<1x128xf32> to vector<8x128xf32>
    %50 = arith.addf %47, %49 : vector<8x128xf32>
    %cst_31 = arith.constant 0.000000e+00 : f32
    %51 = vector.broadcast %cst_31 : f32 to vector<8x128xf32>
    %52 = arith.cmpf ogt, %50, %51 : vector<8x128xf32>
    %cst_32 = arith.constant 0.000000e+00 : f32
    %53 = vector.broadcast %cst_32 : f32 to vector<8x128xf32>
    %54 = arith.minimumf %50, %53 : vector<8x128xf32>
    %55 = math.exp %54 : vector<8x128xf32>
    %cst_33 = arith.constant 1.000000e+00 : f32
    %56 = vector.broadcast %cst_33 : f32 to vector<8x128xf32>
    %57 = arith.subf %55, %56 : vector<8x128xf32>
    %58 = arith.select %52, %50, %57 : vector<8x128xi1>, vector<8x128xf32>
    %59 = arith.truncf %58 : vector<8x128xf32> to vector<8x128xbf16>
    %c0_34 = arith.constant 0 : index
    %c0_35 = arith.constant 0 : index
    %60 = vector.load %arg11[%c0_34, %c0_35] : memref<128x128xbf16, #tpu.memory_space<vmem>>, vector<128x128xbf16>
    %cst_36 = arith.constant dense<0.000000e+00> : vector<8x128xf32>
    %61 = tpu.matmul %59, %60, %cst_36 {dimension_numbers = #tpu.dot_dimension_numbers<[1], [0], [0], [1], [0, 0, 1, 1], [], []>} : vector<8x128xbf16>, vector<128x128xbf16>, vector<8x128xf32> -> vector<8x128xf32>
    %c0_37 = arith.constant 0 : index
    %c0_38 = arith.constant 0 : index
    %62 = vector.load %arg12[%c0_37, %c0_38] : memref<1x128xf32, #tpu.memory_space<vmem>>, vector<1x128xf32>
    %63 = vector.broadcast %62 : vector<1x128xf32> to vector<8x128xf32>
    %64 = arith.addf %61, %63 : vector<8x128xf32>
    %c0_39 = arith.constant 0 : index
    %c0_40 = arith.constant 0 : index
    %65 = vector.load %arg13[%c0_39, %c0_40] : memref<8x128xf32, #tpu.memory_space<vmem>>, vector<8x128xf32>
    tpu.vector_store %arg13[%c0_39, %c0_40], %64 {strides = array<i32>} : memref<8x128xf32, #tpu.memory_space<vmem>>, vector<8x128xf32>,
    return
  }
  func.func @transform_0(%arg0: i32) -> (i32, i32) {
    %c0_i32 = arith.constant 0 : i32
    %c0_i32_0 = arith.constant 0 : i32
    return %arg0, %c0_i32 : i32, i32
  }
  func.func @transform_1(%arg0: i32) -> (i32, i32) {
    %c0_i32 = arith.constant 0 : i32
    %c0_i32_0 = arith.constant 0 : i32
    %c0_i32_1 = arith.constant 0 : i32
    return %c0_i32, %c0_i32_0 : i32, i32
  }
  func.func @transform_2(%arg0: i32) -> (i32, i32) {
    %c0_i32 = arith.constant 0 : i32
    %c0_i32_0 = arith.constant 0 : i32
    %c0_i32_1 = arith.constant 0 : i32
    return %c0_i32, %c0_i32_0 : i32, i32
  }
  func.func @transform_3(%arg0: i32) -> (i32, i32) {
    %c0_i32 = arith.constant 0 : i32
    %c0_i32_0 = arith.constant 0 : i32
    %c0_i32_1 = arith.constant 0 : i32
    return %c0_i32, %c0_i32_0 : i32, i32
  }
  func.func @transform_4(%arg0: i32) -> (i32, i32) {
    %c0_i32 = arith.constant 0 : i32
    %c0_i32_0 = arith.constant 0 : i32
    %c0_i32_1 = arith.constant 0 : i32
    return %c0_i32, %c0_i32_0 : i32, i32
  }
  func.func @transform_5(%arg0: i32) -> (i32, i32) {
    %c0_i32 = arith.constant 0 : i32
    %c0_i32_0 = arith.constant 0 : i32
    %c0_i32_1 = arith.constant 0 : i32
    return %c0_i32, %c0_i32_0 : i32, i32
  }
  func.func @transform_6(%arg0: i32) -> (i32, i32) {
    %c0_i32 = arith.constant 0 : i32
    %c0_i32_0 = arith.constant 0 : i32
    %c0_i32_1 = arith.constant 0 : i32
    return %c0_i32, %c0_i32_0 : i32, i32
  }
  func.func @transform_7(%arg0: i32) -> (i32, i32) {
    %c0_i32 = arith.constant 0 : i32
    %c0_i32_0 = arith.constant 0 : i32
    %c0_i32_1 = arith.constant 0 : i32
    return %c0_i32, %c0_i32_0 : i32, i32
  }
  func.func @transform_8(%arg0: i32) -> (i32, i32) {
    %c0_i32 = arith.constant 0 : i32
    %c0_i32_0 = arith.constant 0 : i32
    %c0_i32_1 = arith.constant 0 : i32
    return %c0_i32, %c0_i32_0 : i32, i32
  }
  func.func @transform_9(%arg0: i32) -> (i32, i32) {
    %c0_i32 = arith.constant 0 : i32
    %c0_i32_0 = arith.constant 0 : i32
    %c0_i32_1 = arith.constant 0 : i32
    return %c0_i32, %c0_i32_0 : i32, i32
  }
  func.func @transform_10(%arg0: i32) -> (i32, i32) {
    %c0_i32 = arith.constant 0 : i32
    %c0_i32_0 = arith.constant 0 : i32
    %c0_i32_1 = arith.constant 0 : i32
    return %c0_i32, %c0_i32_0 : i32, i32
  }
  func.func @transform_11(%arg0: i32) -> (i32, i32) {
    %c0_i32 = arith.constant 0 : i32
    %c0_i32_0 = arith.constant 0 : i32
    %c0_i32_1 = arith.constant 0 : i32
    return %c0_i32, %c0_i32_0 : i32, i32
  }
  func.func @transform_12(%arg0: i32) -> (i32, i32) {
    %c0_i32 = arith.constant 0 : i32
    %c0_i32_0 = arith.constant 0 : i32
    return %arg0, %c0_i32 : i32, i32
  }
}

</mosaic_0001>

<bundles_post_ra>
// kernel: tpu_custom_call.1
= control target key start
LH: loop header
LB: loop body
LE: loop exit
PB: predicated region body
PF: predicated region fallthrough
CT: control target
= control target key end

     0   :  { %17 = vsyncpa [#allocation3], 0  ;;  %s25488_s0 = inlined_call_operand.hbm [shape: bf16[8,3840], index: 0, kind: input, shape index: {}]   ;;  %s25489_s1 = inlined_call_operand.hbm [shape: bf16[3840,1152], index: 1, kind: input, shape index: {}]   ;;  %s25490_s2 = inlined_call_operand.hbm [shape: f32[1,1152], index: 2, kind: input, shape index: {}]   ;;  %s25491_s3 = inlined_call_operand.hbm [shape: f32[1,1152], index: 3, kind: input, shape index: {}]   ;;  %s25492_s4 = inlined_call_operand.hbm [shape: bf16[1152,128], index: 4, kind: input, shape index: {}]   ;;  %s25493_s5 = inlined_call_operand.hbm [shape: f32[1,128], index: 5, kind: input, shape index: {}]   ;;  %s25494_s6 = inlined_call_operand.hbm [shape: bf16[128,128], index: 6, kind: input, shape index: {}]   ;;  %s25495_s7 = inlined_call_operand.hbm [shape: f32[1,128], index: 7, kind: input, shape index: {}]   ;;  %s25496_s8 = inlined_call_operand.hbm [shape: bf16[128,128], index: 8, kind: input, shape index: {}]   ;;  %s25497_s9 = inlined_call_operand.hbm [shape: f32[1,128], index: 9, kind: input, shape index: {}]   ;;  %s25498_s10 = inlined_call_operand.hbm [shape: bf16[128,128], index: 10, kind: input, shape index: {}]   ;;  %s25499_s11 = inlined_call_operand.hbm [shape: f32[1,128], index: 11, kind: input, shape index: {}]   ;;  %s25500_s12 = inlined_call_operand.hbm [shape: f32[8,128], index: 12, kind: output, shape index: {}]  }
   0x1   :  { %18 = vsyncpa [#allocation6], 0 }
   0x2   :  { %19 = vsyncpa [#allocation9], 0 }
   0x3   :  { %20 = vsyncpa [#allocation12], 0 }
   0x4   :  { %21 = vsyncpa [#allocation15], 0 }
   0x5   :  { %22 = vsyncpa [#allocation18], 0 }
   0x6   :  { %23 = vsyncpa [#allocation21], 0 }
   0x7   :  { %24 = vsyncpa [#allocation4], 0  ;;  %s24803_s21 = smov [#allocation5]   ;;  %s24501_s25 = scalar_lea.hbm %s25489_s1, 276480 }
   0x8   :  { %s40_s22 = sshll.u32 %s24803_s21, 4  ;;  %p24502_p0 = scmp.ne.s32.totalorder %s25489_s1, %s24501_s25  ;;  %s41_s22 = int_to_ptr.vmem [resolvable:$true] %s40_s22 }
   0x9   :  { %p24505_p1 = scmp.lt.u32.totalorder %s24501_s25, %s25489_s1 }
   0xb   :  { %p24507_p2 = pnand %p24505_p1, %p24502_p0 }
   0xd   :  { %24510 = shalt.err (!%p24507_p2)
}
   0xe   :  { %s24511_s30 = scalar_lea.vmem %s41_s22, 276480  ;;  %p24516_p4 = scmp.lt.s32.totalorder %s41_s22, %s41_s22 }
   0xf   :  { %p24512_p3 = scmp.ne.s32.totalorder %s41_s22, %s24511_s30  ;;  %p24517_p5 = scmp.lt.s32.totalorder %s24511_s30, %s24511_s30 }
  0x11   :  { %p24518_p6 = por %p24517_p5, %p24516_p4 }
  0x13   :  { %p24519_p7 = pnand %p24518_p6, %p24512_p3 }
  0x15   :  { %24522 = shalt.err (!%p24519_p7)
}
  0x16   :  { %s24804_s13 = smov 576   ;;  %s24805_s14 = smov 36  }
  0x17   :  { %46 = dma.hbm_to_vmem [thread:$0]  %s25489_s1, 276480, %s41_s22, [#allocation6], %s24804_s13, %s24804_s13, %s24805_s14  }
  0x18   :  { %s24806_s17 = smov [#allocation8]   ;;  %s24807_s19 = smov [#allocation11]  }
  0x19   :  { %s63_s18 = sshll.u32 %s24806_s17, 4  ;;  %s85_s20 = sshll.u32 %s24807_s19, 4  ;;  %s64_s18 = int_to_ptr.vmem [resolvable:$true] %s63_s18  ;;  %s86_s20 = int_to_ptr.vmem [resolvable:$true] %s85_s20 }
  0x1a   :  { %s24523_s24 = scalar_lea.hbm %s25491_s3, 144 }
  0x1b   :  { %p24524_p8 = scmp.ne.s32.totalorder %s25491_s3, %s24523_s24  ;;  %p24527_p9 = scmp.lt.u32.totalorder %s24523_s24, %s25491_s3 }
  0x1d   :  { %p24529_p10 = pnand %p24527_p9, %p24524_p8 }
  0x1f   :  { %24532 = shalt.err (!%p24529_p10)
}
  0x20   :  { %s24533_s1 = scalar_lea.vmem %s64_s18, 144  ;;  %s24537_s22 = scalar_lea.vmem %s64_s18, 160 }
  0x21   :  { %p24534_p11 = scmp.ne.s32.totalorder %s64_s18, %s24533_s1  ;;  %p24538_p12 = scmp.lt.s32.totalorder %s64_s18, %s64_s18 }
  0x22   :  { %p24539_p13 = scmp.lt.s32.totalorder %s24537_s22, %s24533_s1 }
  0x24   :  { %p24540_p0 = por %p24539_p13, %p24538_p12 }
  0x26   :  { %p24541_p1 = pnand %p24540_p0, %p24534_p11 }
  0x28   :  { %24544 = shalt.err (!%p24541_p1)
}
  0x29   :  { %66 = dma.hbm_to_vmem [thread:$0]  %s25491_s3, 144, %s64_s18, [#allocation9]  }
  0x2a   :  { %s24545_s15 = scalar_lea.hbm %s25493_s5, 16 }
  0x2b   :  { %p24546_p2 = scmp.ne.s32.totalorder %s25493_s5, %s24545_s15  ;;  %p24549_p3 = scmp.lt.u32.totalorder %s24545_s15, %s25493_s5 }
  0x2d   :  { %p24551_p4 = pnand %p24549_p3, %p24546_p2 }
  0x2f   :  { %24554 = shalt.err (!%p24551_p4)
}
  0x30   :  { %s24555_s23 = scalar_lea.vmem %s86_s20, 16  ;;  %s24559_s24 = scalar_lea.vmem %s86_s20, 32 }
  0x31   :  { %p24556_p5 = scmp.ne.s32.totalorder %s86_s20, %s24555_s23  ;;  %p24560_p6 = scmp.lt.s32.totalorder %s86_s20, %s86_s20 }
  0x32   :  { %p24561_p7 = scmp.lt.s32.totalorder %s24559_s24, %s24555_s23 }
  0x34   :  { %p24562_p8 = por %p24561_p7, %p24560_p6 }
  0x36   :  { %p24563_p9 = pnand %p24562_p8, %p24556_p5 }
  0x38   :  { %24566 = shalt.err (!%p24563_p9)
}
  0x39   :  { %88 = dma.hbm_to_vmem [thread:$0]  %s25493_s5, 16, %s86_s20, [#allocation12]  }
  0x3a   :  { %s24808_s25 = smov [#allocation14]   ;;  %s24809_s27 = smov [#allocation17]  }
  0x3b   :  { %s107_s26 = sshll.u32 %s24808_s25, 4  ;;  %s129_s28 = sshll.u32 %s24809_s27, 4  ;;  %s108_s26 = int_to_ptr.vmem [resolvable:$true] %s107_s26  ;;  %s130_s28 = int_to_ptr.vmem [resolvable:$true] %s129_s28 }
  0x3c   :  { %s24567_s29 = scalar_lea.hbm %s25495_s7, 16 }
  0x3d   :  { %p24568_p10 = scmp.ne.s32.totalorder %s25495_s7, %s24567_s29  ;;  %p24571_p11 = scmp.lt.u32.totalorder %s24567_s29, %s25495_s7 }
  0x3f   :  { %p24573_p12 = pnand %p24571_p11, %p24568_p10 }
  0x41   :  { %24576 = shalt.err (!%p24573_p12)
}
  0x42   :  { %s24577_s5 = scalar_lea.vmem %s108_s26, 16  ;;  %s24581_s20 = scalar_lea.vmem %s108_s26, 32 }
  0x43   :  { %p24578_p13 = scmp.ne.s32.totalorder %s108_s26, %s24577_s5  ;;  %p24582_p0 = scmp.lt.s32.totalorder %s108_s26, %s108_s26 }
  0x44   :  { %p24583_p1 = scmp.lt.s32.totalorder %s24581_s20, %s24577_s5 }
  0x46   :  { %p24584_p2 = por %p24583_p1, %p24582_p0 }
  0x48   :  { %p24585_p3 = pnand %p24584_p2, %p24578_p13 }
  0x4a   :  { %24588 = shalt.err (!%p24585_p3)
}
  0x4b   :  { %110 = dma.hbm_to_vmem [thread:$0]  %s25495_s7, 16, %s108_s26, [#allocation15]  }
  0x4c   :  { %s24589_s23 = scalar_lea.hbm %s25497_s9, 16 }
  0x4d   :  { %p24590_p4 = scmp.ne.s32.totalorder %s25497_s9, %s24589_s23  ;;  %p24593_p5 = scmp.lt.u32.totalorder %s24589_s23, %s25497_s9 }
  0x4f   :  { %p24595_p6 = pnand %p24593_p5, %p24590_p4 }
  0x51   :  { %24598 = shalt.err (!%p24595_p6)
}
  0x52   :  { %s24599_s27 = scalar_lea.vmem %s130_s28, 16  ;;  %s24603_s1 = scalar_lea.vmem %s130_s28, 32 }
  0x53   :  { %p24600_p7 = scmp.ne.s32.totalorder %s130_s28, %s24599_s27  ;;  %p24604_p8 = scmp.lt.s32.totalorder %s130_s28, %s130_s28 }
  0x54   :  { %p24605_p9 = scmp.lt.s32.totalorder %s24603_s1, %s24599_s27 }
  0x56   :  { %p24606_p10 = por %p24605_p9, %p24604_p8 }
  0x58   :  { %p24607_p11 = pnand %p24606_p10, %p24600_p7 }
  0x5a   :  { %24610 = shalt.err (!%p24607_p11)
}
  0x5b   :  { %132 = dma.hbm_to_vmem [thread:$0]  %s25497_s9, 16, %s130_s28, [#allocation18]  }
  0x5c   :  { %s24810_s22 = smov [#allocation2]   ;;  %s24811_s30 = smov [#allocation7]  }
  0x5d   :  { %s31_s29 = sshll.u32 %s24810_s22, 4  ;;  %s53_s13 = sshll.u32 %s24811_s30, 4  ;;  %s32_s29 = int_to_ptr.vmem [resolvable:$true] %s31_s29  ;;  %s54_s13 = int_to_ptr.vmem [resolvable:$true] %s53_s13 }
  0x5e   :  { %s24611_s5 = scalar_lea.hbm %s25488_s0, 1920 }
  0x5f   :  { %p24612_p12 = scmp.ne.s32.totalorder %s25488_s0, %s24611_s5  ;;  %p24615_p13 = scmp.lt.u32.totalorder %s24611_s5, %s25488_s0 }
  0x61   :  { %p24617_p0 = pnand %p24615_p13, %p24612_p12 }
  0x63   :  { %24620 = shalt.err (!%p24617_p0)
}
  0x64   :  { %s24621_s9 = scalar_lea.vmem %s32_s29, 1920  ;;  %p24626_p2 = scmp.lt.s32.totalorder %s32_s29, %s32_s29 }
  0x65   :  { %p24622_p1 = scmp.ne.s32.totalorder %s32_s29, %s24621_s9  ;;  %p24627_p3 = scmp.lt.s32.totalorder %s24621_s9, %s24621_s9 }
  0x67   :  { %p24628_p4 = por %p24627_p3, %p24626_p2 }
  0x69   :  { %p24629_p5 = pnand %p24628_p4, %p24622_p1 }
  0x6b   :  { %24632 = shalt.err (!%p24629_p5)
}
  0x6c   :  { %34 = dma.hbm_to_vmem [thread:$0]  %s25488_s0, 1920, %s32_s29, [#allocation3]  }
  0x6d   :  { %s24633_s3 = scalar_lea.hbm %s25490_s2, 144 }
  0x6e   :  { %p24634_p6 = scmp.ne.s32.totalorder %s25490_s2, %s24633_s3  ;;  %p24637_p7 = scmp.lt.u32.totalorder %s24633_s3, %s25490_s2 }
  0x70   :  { %p24639_p8 = pnand %p24637_p7, %p24634_p6 }
  0x72   :  { %24642 = shalt.err (!%p24639_p8)
}
  0x73   :  { %s24643_s7 = scalar_lea.vmem %s54_s13, 144  ;;  %s24647_s26 = scalar_lea.vmem %s54_s13, 160 }
  0x74   :  { %p24644_p9 = scmp.ne.s32.totalorder %s54_s13, %s24643_s7  ;;  %p24648_p10 = scmp.lt.s32.totalorder %s54_s13, %s54_s13 }
  0x75   :  { %p24649_p11 = scmp.lt.s32.totalorder %s24647_s26, %s24643_s7 }
  0x77   :  { %p24650_p12 = por %p24649_p11, %p24648_p10 }
  0x79   :  { %p24651_p13 = pnand %p24650_p12, %p24644_p9 }
  0x7b   :  { %24654 = shalt.err (!%p24651_p13)
}
  0x7c   :  { %56 = dma.hbm_to_vmem [thread:$0]  %s25490_s2, 144, %s54_s13, [#allocation6]  }
  0x7d   :  { %s24812_s29 = smov [#allocation10]   ;;  %s24655_s5 = scalar_lea.hbm %s25492_s4, 9216 }
  0x7e   :  { %s72_s30 = sshll.u32 %s24812_s29, 4  ;;  %p24656_p0 = scmp.ne.s32.totalorder %s25492_s4, %s24655_s5  ;;  %s73_s30 = int_to_ptr.vmem [resolvable:$true] %s72_s30 }
  0x7f   :  { %p24659_p1 = scmp.lt.u32.totalorder %s24655_s5, %s25492_s4 }
  0x81   :  { %p24661_p2 = pnand %p24659_p1, %p24656_p0 }
  0x83   :  { %24664 = shalt.err (!%p24661_p2)
}
  0x84   :  { %s24665_s9 = scalar_lea.vmem %s73_s30, 9216  ;;  %p24670_p4 = scmp.lt.s32.totalorder %s73_s30, %s73_s30 }
  0x85   :  { %p24666_p3 = scmp.ne.s32.totalorder %s73_s30, %s24665_s9  ;;  %p24671_p5 = scmp.lt.s32.totalorder %s24665_s9, %s24665_s9 }
  0x87   :  { %p24672_p6 = por %p24671_p5, %p24670_p4 }
  0x89   :  { %p24673_p7 = pnand %p24672_p6, %p24666_p3 }
  0x8b   :  { %24676 = shalt.err (!%p24673_p7)
}
  0x8c   :  { %s24813_s2 = smov 64   ;;  %s24814_s13 = smov 4  }
  0x8d   :  { %78 = dma.hbm_to_vmem [thread:$0]  %s25492_s4, 9216, %s73_s30, [#allocation9], %s24813_s2, %s24813_s2, %s24814_s13  }
  0x8e   :  { %s24815_s23 = smov [#allocation13]   ;;  %s24816_s3 = smov [#allocation16]  }
  0x8f   :  { %s94_s24 = sshll.u32 %s24815_s23, 4  ;;  %s116_s18 = sshll.u32 %s24816_s3, 4  ;;  %s95_s24 = int_to_ptr.vmem [resolvable:$true] %s94_s24  ;;  %s24986_s18 = int_to_ptr.vmem [resolvable:$true] %s116_s18 }
  0x90   :  { %s24677_s1 = scalar_lea.hbm %s25494_s6, 1024 }
  0x91   :  { %p24678_p8 = scmp.ne.s32.totalorder %s25494_s6, %s24677_s1  ;;  %p24681_p9 = scmp.lt.u32.totalorder %s24677_s1, %s25494_s6 }
  0x93   :  { %p24683_p10 = pnand %p24681_p9, %p24678_p8 }
  0x95   :  { %24686 = shalt.err (!%p24683_p10)
}
  0x96   :  { %s24687_s4 = scalar_lea.vmem %s95_s24, 1024  ;;  %p24692_p12 = scmp.lt.s32.totalorder %s95_s24, %s95_s24 }
  0x97   :  { %p24688_p11 = scmp.ne.s32.totalorder %s95_s24, %s24687_s4  ;;  %p24693_p13 = scmp.lt.s32.totalorder %s24687_s4, %s24687_s4 }
  0x99   :  { %p24694_p0 = por %p24693_p13, %p24692_p12 }
  0x9b   :  { %p24695_p1 = pnand %p24694_p0, %p24688_p11 }
  0x9d   :  { %24698 = shalt.err (!%p24695_p1)
}
  0x9e   :  { %100 = dma.hbm_to_vmem [thread:$0]  %s25494_s6, 1024, %s95_s24, [#allocation12], %s24813_s2, %s24813_s2, %s24814_s13  }
  0x9f   :  { %s24699_s5 = scalar_lea.hbm %s25496_s8, 1024 }
  0xa0   :  { %p24700_p2 = scmp.ne.s32.totalorder %s25496_s8, %s24699_s5  ;;  %p24703_p3 = scmp.lt.u32.totalorder %s24699_s5, %s25496_s8 }
  0xa2   :  { %p24705_p4 = pnand %p24703_p3, %p24700_p2 }
  0xa4   :  { %24708 = shalt.err (!%p24705_p4)
}
  0xa5   :  { %s24709_s9 = scalar_lea.vmem %s24986_s18, 1024  ;;  %p24714_p6 = scmp.lt.s32.totalorder %s24986_s18, %s24986_s18 }
  0xa6   :  { %p24710_p5 = scmp.ne.s32.totalorder %s24986_s18, %s24709_s9  ;;  %p24715_p7 = scmp.lt.s32.totalorder %s24709_s9, %s24709_s9 }
  0xa8   :  { %p24716_p8 = por %p24715_p7, %p24714_p6 }
  0xaa   :  { %p24717_p9 = pnand %p24716_p8, %p24710_p5 }
  0xac   :  { %24720 = shalt.err (!%p24717_p9)
}
  0xad   :  { %122 = dma.hbm_to_vmem [thread:$0]  %s25496_s8, 1024, %s24986_s18, [#allocation15], %s24813_s2, %s24813_s2, %s24814_s13  }
  0xae   :  { %s24817_s21 = smov [#allocation19]   ;;  %s24818_s24 = smov [#allocation20]  }
  0xaf   :  { %s138_s23 = sshll.u32 %s24817_s21, 4  ;;  %s151_s3 = sshll.u32 %s24818_s24, 4  ;;  %s139_s23 = int_to_ptr.vmem [resolvable:$true] %s138_s23  ;;  %s152_s3 = int_to_ptr.vmem [resolvable:$true] %s151_s3 }
  0xb0   :  { %s24721_s1 = scalar_lea.hbm %s25498_s10, 1024 }
  0xb1   :  { %p24722_p10 = scmp.ne.s32.totalorder %s25498_s10, %s24721_s1  ;;  %p24725_p11 = scmp.lt.u32.totalorder %s24721_s1, %s25498_s10 }
  0xb3   :  { %p24727_p12 = pnand %p24725_p11, %p24722_p10 }
  0xb5   :  { %24730 = shalt.err (!%p24727_p12)
}
  0xb6   :  { %s24731_s8 = scalar_lea.vmem %s139_s23, 1024  ;;  %p24736_p0 = scmp.lt.s32.totalorder %s139_s23, %s139_s23 }
  0xb7   :  { %p24732_p13 = scmp.ne.s32.totalorder %s139_s23, %s24731_s8  ;;  %p24737_p1 = scmp.lt.s32.totalorder %s24731_s8, %s24731_s8 }
  0xb9   :  { %p24738_p2 = por %p24737_p1, %p24736_p0 }
  0xbb   :  { %p24739_p3 = pnand %p24738_p2, %p24732_p13 }
  0xbd   :  { %24742 = shalt.err (!%p24739_p3)
}
  0xbe   :  { %144 = dma.hbm_to_vmem [thread:$0]  %s25498_s10, 1024, %s139_s23, [#allocation18], %s24813_s2, %s24813_s2, %s24814_s13  }
  0xbf   :  { %s24743_s14 = scalar_lea.hbm %s25499_s11, 16 }
  0xc0   :  { %p24744_p4 = scmp.ne.s32.totalorder %s25499_s11, %s24743_s14  ;;  %p24747_p5 = scmp.lt.u32.totalorder %s24743_s14, %s25499_s11 }
  0xc2   :  { %p24749_p6 = pnand %p24747_p5, %p24744_p4 }
  0xc4   :  { %24752 = shalt.err (!%p24749_p6)
}
  0xc5   :  { %s24753_s17 = scalar_lea.vmem %s152_s3, 16  ;;  %s24757_s19 = scalar_lea.vmem %s152_s3, 32 }
  0xc6   :  { %p24754_p7 = scmp.ne.s32.totalorder %s152_s3, %s24753_s17  ;;  %p24758_p8 = scmp.lt.s32.totalorder %s152_s3, %s152_s3 }
  0xc7   :  { %p24759_p9 = scmp.lt.s32.totalorder %s24757_s19, %s24753_s17 }
  0xc9   :  { %p24760_p10 = por %p24759_p9, %p24758_p8 }
  0xcb   :  { %p24761_p11 = pnand %p24760_p10, %p24754_p7 }
  0xcd   :  { %24764 = shalt.err (!%p24761_p11)
}
  0xce   :  { %154 = dma.hbm_to_vmem [thread:$0]  %s25499_s11, 16, %s152_s3, [#allocation21]  }
  0xcf   :  { %24787 = dma.done.wait [#allocation3], 1920  }
  0xd0   :  { %24788 = vsyncadd [#allocation3], 4294965376 }
  0xd1   :  { %24789 = dma.done.wait [#allocation6], 276624  }
  0xd2   :  { %24790 = vsyncadd [#allocation6], 4294690672 }
  0xd3   :  { %24791 = dma.done.wait [#allocation9], 9360  }
  0xd4   :  { %24792 = vsyncadd [#allocation9], 4294957936 }
  0xd5   :  { %24793 = dma.done.wait [#allocation12], 1040  }
  0xd6   :  { %24794 = vsyncadd [#allocation12], 4294966256 }
  0xd7   :  { %24795 = dma.done.wait [#allocation15], 1040  }
  0xd8   :  { %24796 = vsyncadd [#allocation15], 4294966256 }
  0xd9   :  { %24797 = dma.done.wait [#allocation18], 1040  }
  0xda   :  { %24798 = vsyncadd [#allocation18], 4294966256 }
  0xdb   :  { %24799 = dma.done.wait [#allocation21], 16  }
  0xdc   :  { %24800 = vsyncadd [#allocation21], 4294967280  ;;  %v21231_v0 = vld [vmem:[#allocation5 + $0x4] ss:$36 sps:$4 sm:$0xff]   ;;  %v21233_v1 = vld [vmem:[#allocation5 + $0xc] ss:$36 sps:$4 sm:$0xff]  }
  0xdd   :  { %13752 = vmatprep.subr.bf16.mxu0 %v21231_v0  ;;  %v21235_v2 = vld [vmem:[#allocation5] ss:$36 sps:$4 sm:$0xff]   ;;  %v21236_v3 = vld [vmem:[#allocation5 + $0x8] ss:$36 sps:$4 sm:$0xff]   ;;  %14367 = vmatprep.subr.bf16.mxu1 %v21233_v1  ;;  %v21239_v5 = vld [vmem:[#allocation5 + $0x54] ss:$36 sps:$4 sm:$0xff]  }
  0xde   :  { %v21237_v4 = vld [vmem:[#allocation5 + $0x4c] ss:$36 sps:$4 sm:$0xff]   ;;  %13753 = vmatpush1.bf16.msra.mxu0 %v21235_v2  ;;  %14368 = vmatpush1.bf16.msra.mxu1 %v21236_v3  ;;  %v21243_v8 = vld [vmem:[#allocation5 + $0x94] ss:$36 sps:$4 sm:$0xff]   ;;  %v21245_v9 = vld [vmem:[#allocation5 + $0x9c] ss:$36 sps:$4 sm:$0xff]  }
  0xdf   :  { %v21241_v6 = vld [vmem:[#allocation5 + $0x48] ss:$36 sps:$4 sm:$0xff]   ;;  %13754 = vmatprep.subr.bf16.mxu0 %v21237_v4  ;;  %v21242_v7 = vld [vmem:[#allocation5 + $0x50] ss:$36 sps:$4 sm:$0xff]   ;;  %14369 = vmatprep.subr.bf16.mxu1 %v21239_v5  ;;  %v21248_v11 = vld [vmem:[#allocation5 + $0x98] ss:$36 sps:$4 sm:$0xff]  }
  0xe0   :  { %v21247_v10 = vld [vmem:[#allocation5 + $0x90] ss:$36 sps:$4 sm:$0xff]   ;;  %v21249_v12 = vld [vmem:[#allocation5 + $0xdc] ss:$36 sps:$4 sm:$0xff]   ;;  %v21251_v13 = vld [vmem:[#allocation5 + $0xe4] ss:$36 sps:$4 sm:$0xff]  }
  0xe1   :  { %v21253_v14 = vld [vmem:[#allocation5 + $0xd8] ss:$36 sps:$4 sm:$0xff]   ;;  %v21254_v15 = vld [vmem:[#allocation5 + $0xe0] ss:$36 sps:$4 sm:$0xff]   ;;  %v21257_v17 = vld [vmem:[#allocation5 + $0x12c] ss:$36 sps:$4 sm:$0xff]  }
  0xe2   :  { %13755 = vmatpush1.bf16.msra.mxu0 %v21241_v6  ;;  %14370 = vmatpush1.bf16.msra.mxu1 %v21242_v7  ;;  %v21255_v16 = vld [vmem:[#allocation5 + $0x124] ss:$36 sps:$4 sm:$0xff]   ;;  %v21261_v20 = vld [vmem:[#allocation5 + $0x16c] ss:$36 sps:$4 sm:$0xff]   ;;  %v21263_v21 = vld [vmem:[#allocation5 + $0x174] ss:$36 sps:$4 sm:$0xff]  }
  0xe3   :  { %13756 = vmatprep.subr.bf16.mxu0 %v21243_v8  ;;  %14371 = vmatprep.subr.bf16.mxu1 %v21245_v9  ;;  %v21259_v18 = vld [vmem:[#allocation5 + $0x120] ss:$36 sps:$4 sm:$0xff]   ;;  %v21260_v19 = vld [vmem:[#allocation5 + $0x128] ss:$36 sps:$4 sm:$0xff]   ;;  %v21266_v23 = vld [vmem:[#allocation5 + $0x170] ss:$36 sps:$4 sm:$0xff]  }
  0xe4   :  { %v21265_v22 = vld [vmem:[#allocation5 + $0x168] ss:$36 sps:$4 sm:$0xff]   ;;  %v21267_v24 = vld [vmem:[#allocation5 + $0x1b4] ss:$36 sps:$4 sm:$0xff]   ;;  %v21269_v25 = vld [vmem:[#allocation5 + $0x1bc] ss:$36 sps:$4 sm:$0xff]  }
  0xe5   :  { %v21271_v26 = vld [vmem:[#allocation5 + $0x1b0] ss:$36 sps:$4 sm:$0xff]   ;;  %v21272_v27 = vld [vmem:[#allocation5 + $0x1b8] ss:$36 sps:$4 sm:$0xff]   ;;  %v21275_v29 = vld [vmem:[#allocation5 + $0x204] ss:$36 sps:$4 sm:$0xff]  }
  0xe6   :  { %13757 = vmatpush1.bf16.msra.mxu0 %v21247_v10  ;;  %14372 = vmatpush1.bf16.msra.mxu1 %v21248_v11  ;;  %v21273_v28 = vld [vmem:[#allocation5 + $0x1fc] ss:$36 sps:$4 sm:$0xff]   ;;  %v21279_v32 = vld [vmem:[#allocation5 + $0x244] ss:$36 sps:$4 sm:$0xff]   ;;  %v21281_v33 = vld [vmem:[#allocation5 + $0x24c] ss:$36 sps:$4 sm:$0xff]  }
  0xe7   :  { %13758 = vmatprep.subr.bf16.mxu0 %v21249_v12  ;;  %14373 = vmatprep.subr.bf16.mxu1 %v21251_v13  ;;  %v21277_v30 = vld [vmem:[#allocation5 + $0x1f8] ss:$36 sps:$4 sm:$0xff]   ;;  %v21278_v31 = vld [vmem:[#allocation5 + $0x200] ss:$36 sps:$4 sm:$0xff]   ;;  %v21284_v35 = vld [vmem:[#allocation5 + $0x248] ss:$36 sps:$4 sm:$0xff]  }
  0xe8   :  { %v21283_v34 = vld [vmem:[#allocation5 + $0x240] ss:$36 sps:$4 sm:$0xff]   ;;  %v21285_v36 = vld [vmem:[#allocation5 + $0x28c] ss:$36 sps:$4 sm:$0xff]   ;;  %v21287_v37 = vld [vmem:[#allocation5 + $0x294] ss:$36 sps:$4 sm:$0xff]  }
  0xe9   :  { %v21289_v38 = vld [vmem:[#allocation5 + $0x288] ss:$36 sps:$4 sm:$0xff]   ;;  %v21290_v39 = vld [vmem:[#allocation5 + $0x290] ss:$36 sps:$4 sm:$0xff]   ;;  %v21293_v41 = vld [vmem:[#allocation5 + $0x2dc] ss:$36 sps:$4 sm:$0xff]  }
  0xea   :  { %13759 = vmatpush1.bf16.msra.mxu0 %v21253_v14  ;;  %14374 = vmatpush1.bf16.msra.mxu1 %v21254_v15  ;;  %v21291_v40 = vld [vmem:[#allocation5 + $0x2d4] ss:$36 sps:$4 sm:$0xff]   ;;  %v21297_v44 = vld [vmem:[#allocation5 + $0x31c] ss:$36 sps:$4 sm:$0xff]   ;;  %v21299_v45 = vld [vmem:[#allocation5 + $0x324] ss:$36 sps:$4 sm:$0xff]  }
  0xeb   :  { %13760 = vmatprep.subr.bf16.mxu0 %v21255_v16  ;;  %14375 = vmatprep.subr.bf16.mxu1 %v21257_v17  ;;  %v21295_v42 = vld [vmem:[#allocation5 + $0x2d0] ss:$36 sps:$4 sm:$0xff]   ;;  %v21296_v43 = vld [vmem:[#allocation5 + $0x2d8] ss:$36 sps:$4 sm:$0xff]   ;;  %v192_v46 = vld [vmem:[#allocation2] sm:$0xff]  ;;  %vm24820_vm8 = vmmov 0  }
  0xec   :  { %v21301_v47 = vld [vmem:[#allocation5 + $0x318] ss:$36 sps:$4 sm:$0xff]   ;;  %v25050_v48 = vcombine.high %v192_v46, %v192_v46  ;;  %v21302_v49 = vld [vmem:[#allocation5 + $0x320] ss:$36 sps:$4 sm:$0xff]   ;;  %v21305_v51 = vld [vmem:[#allocation5 + $0x36c] ss:$36 sps:$4 sm:$0xff]   ;;  %v25054_v5 = vcombine.low %v192_v46, %v192_v46 }
  0xed   :  { %v21303_v50 = vld [vmem:[#allocation5 + $0x364] ss:$36 sps:$4 sm:$0xff]   ;;  %v21309_v54 = vld [vmem:[#allocation5 + $0x3ac] ss:$36 sps:$4 sm:$0xff]   ;;  %v21311_v55 = vld [vmem:[#allocation5 + $0x3b4] ss:$36 sps:$4 sm:$0xff]  }
  0xee   :  { %13761 = vmatpush1.bf16.msra.mxu0 %v21259_v18  ;;  %14376 = vmatpush1.bf16.msra.mxu1 %v21260_v19  ;;  %v21307_v52 = vld [vmem:[#allocation5 + $0x360] ss:$36 sps:$4 sm:$0xff]   ;;  %v21308_v53 = vld [vmem:[#allocation5 + $0x368] ss:$36 sps:$4 sm:$0xff]   ;;  %v21314_v57 = vld [vmem:[#allocation5 + $0x3b0] ss:$36 sps:$4 sm:$0xff]  }
  0xef   :  { %13762 = vmatprep.subr.bf16.mxu0 %v21261_v20  ;;  %14377 = vmatprep.subr.bf16.mxu1 %v21263_v21  ;;  %v21313_v56 = vld [vmem:[#allocation5 + $0x3a8] ss:$36 sps:$4 sm:$0xff]   ;;  %v21315_v58 = vld [vmem:[#allocation5 + $0x3f4] ss:$36 sps:$4 sm:$0xff]   ;;  %v21317_v59 = vld [vmem:[#allocation5 + $0x3fc] ss:$36 sps:$4 sm:$0xff]  }
  0xf0   :  { %13784 = vmatprep.mubr.bf16.mxu0 %v25050_v48  ;;  %14399 = vmatprep.mubr.bf16.mxu1 %v25050_v48  ;;  %v21319_v60 = vld [vmem:[#allocation5 + $0x3f0] ss:$36 sps:$4 sm:$0xff]   ;;  %v21320_v61 = vld [vmem:[#allocation5 + $0x3f8] ss:$36 sps:$4 sm:$0xff]   ;;  %v21323_v63 = vld [vmem:[#allocation5 + $0x444] ss:$36 sps:$4 sm:$0xff]  }
  0xf1   :  { %v21321_v62 = vld [vmem:[#allocation5 + $0x43c] ss:$36 sps:$4 sm:$0xff]   ;;  %v21330_v2 = vld [vmem:[#allocation5 + $0x484] ss:$36 sps:$4 sm:$0xff]   ;;  %v21333_v3 = vld [vmem:[#allocation5 + $0x48c] ss:$36 sps:$4 sm:$0xff]  }
  0xf2   :  { %13763 = vmatpush1.bf16.msra.mxu0 %v21265_v22  ;;  %14378 = vmatpush1.bf16.msra.mxu1 %v21266_v23  ;;  %v21325_v0 = vld [vmem:[#allocation5 + $0x438] ss:$36 sps:$4 sm:$0xff]   ;;  %v21326_v1 = vld [vmem:[#allocation5 + $0x440] ss:$36 sps:$4 sm:$0xff]   ;;  %v21331_v6 = vld [vmem:[#allocation5 + $0x488] ss:$36 sps:$4 sm:$0xff]  }
  0xf3   :  { %13764 = vmatprep.subr.bf16.mxu0 %v21267_v24  ;;  %14379 = vmatprep.subr.bf16.mxu1 %v21269_v25  ;;  %v21328_v4 = vld [vmem:[#allocation5 + $0x480] ss:$36 sps:$4 sm:$0xff]   ;;  %v21337_v7 = vld [vmem:[#allocation5 + $0x4cc] ss:$36 sps:$4 sm:$0xff]   ;;  %v21340_v8 = vld [vmem:[#allocation5 + $0x4d4] ss:$36 sps:$4 sm:$0xff]  }
  0xf4   :  { %v21335_v9 = vld [vmem:[#allocation5 + $0x4c8] ss:$36 sps:$4 sm:$0xff]   ;;  %v21338_v10 = vld [vmem:[#allocation5 + $0x4d0] ss:$36 sps:$4 sm:$0xff]   ;;  %v21346_v12 = vld [vmem:[#allocation5 + $0x51c] ss:$36 sps:$4 sm:$0xff]  }
  0xf5   :  { %v21343_v11 = vld [vmem:[#allocation5 + $0x514] ss:$36 sps:$4 sm:$0xff]   ;;  %v21349_v15 = vld [vmem:[#allocation5 + $0x55c] ss:$36 sps:$4 sm:$0xff]   ;;  %v21352_v16 = vld [vmem:[#allocation5 + $0x564] ss:$36 sps:$4 sm:$0xff]  }
  0xf6   :  { %13765 = vmatpush1.bf16.msra.mxu0 %v21271_v26  ;;  %14380 = vmatpush1.bf16.msra.mxu1 %v21272_v27  ;;  %v21341_v13 = vld [vmem:[#allocation5 + $0x510] ss:$36 sps:$4 sm:$0xff]   ;;  %v21344_v14 = vld [vmem:[#allocation5 + $0x518] ss:$36 sps:$4 sm:$0xff]   ;;  %v21350_v18 = vld [vmem:[#allocation5 + $0x560] ss:$36 sps:$4 sm:$0xff]  }
  0xf7   :  { %13766 = vmatprep.subr.bf16.mxu0 %v21273_v28  ;;  %14381 = vmatprep.subr.bf16.mxu1 %v21275_v29  ;;  %v21347_v17 = vld [vmem:[#allocation5 + $0x558] ss:$36 sps:$4 sm:$0xff]   ;;  %v21355_v19 = vld [vmem:[#allocation5 + $0x5a4] ss:$36 sps:$4 sm:$0xff]   ;;  %v21358_v20 = vld [vmem:[#allocation5 + $0x5ac] ss:$36 sps:$4 sm:$0xff]  }
  0xf8   :  { %v21353_v21 = vld [vmem:[#allocation5 + $0x5a0] ss:$36 sps:$4 sm:$0xff]   ;;  %v21356_v22 = vld [vmem:[#allocation5 + $0x5a8] ss:$36 sps:$4 sm:$0xff]   ;;  %v21364_v24 = vld [vmem:[#allocation5 + $0x5f4] ss:$36 sps:$4 sm:$0xff]  }
  0xf9   :  { %v21361_v23 = vld [vmem:[#allocation5 + $0x5ec] ss:$36 sps:$4 sm:$0xff]   ;;  %v21367_v27 = vld [vmem:[#allocation5 + $0x634] ss:$36 sps:$4 sm:$0xff]   ;;  %v21370_v28 = vld [vmem:[#allocation5 + $0x63c] ss:$36 sps:$4 sm:$0xff]  }
  0xfa   :  { %13767 = vmatpush1.bf16.msra.mxu0 %v21277_v30  ;;  %14382 = vmatpush1.bf16.msra.mxu1 %v21278_v31  ;;  %v21359_v25 = vld [vmem:[#allocation5 + $0x5e8] ss:$36 sps:$4 sm:$0xff]   ;;  %v21362_v26 = vld [vmem:[#allocation5 + $0x5f0] ss:$36 sps:$4 sm:$0xff]   ;;  %v21394_v46 = vld [vmem:[#allocation5 + $0x75c] ss:$36 sps:$4 sm:$0xff]  }
  0xfb   :  { %13768 = vmatprep.subr.bf16.mxu0 %v21279_v32  ;;  %14383 = vmatprep.subr.bf16.mxu1 %v21281_v33  ;;  %v25058_v29 = vld [vmem:[#allocation2 + $0x8] sm:$0xff]  ;;  %v21368_v32 = vld [vmem:[#allocation5 + $0x638] ss:$36 sps:$4 sm:$0xff]   ;;  %s24821_s11 = smov [#allocation22]  }
  0xfc   :  { %v25062_v30 = vcombine.high %v25058_v29, %v25058_v29  ;;  %v21365_v31 = vld [vmem:[#allocation5 + $0x630] ss:$36 sps:$4 sm:$0xff]   ;;  %v21373_v33 = vld [vmem:[#allocation5 + $0x67c] ss:$36 sps:$4 sm:$0xff]   ;;  %s18135_s13 = sshll.u32 %s24821_s11, 4  ;;  %s18136_s13 = int_to_ptr.vmem [resolvable:$true] %s18135_s13 }
  0xfd   :  { %s24765_s9 = scalar_lea.vmem %s18136_s13, 128  ;;  %p24770_p13 = scmp.lt.s32.totalorder %s18136_s13, %s18136_s13 }
  0xfe   :  { %13769 = vmatpush1.bf16.msra.mxu0 %v21283_v34  ;;  %14384 = vmatpush1.bf16.msra.mxu1 %v21284_v35  ;;  %v21376_v34 = vld [vmem:[#allocation5 + $0x684] ss:$36 sps:$4 sm:$0xff]   ;;  %v21371_v35 = vld [vmem:[#allocation5 + $0x678] ss:$36 sps:$4 sm:$0xff]   ;;  %p24766_p12 = scmp.ne.s32.totalorder %s18136_s13, %s24765_s9  ;;  %p24771_p0 = scmp.lt.s32.totalorder %s24765_s9, %s24765_s9 }
  0xff   :  { %13770 = vmatprep.subr.bf16.mxu0 %v21285_v36  ;;  %14385 = vmatprep.subr.bf16.mxu1 %v21287_v37  ;;  %v21374_v36 = vld [vmem:[#allocation5 + $0x680] ss:$36 sps:$4 sm:$0xff]  }
 0x100   :  { %v21379_v37 = vld [vmem:[#allocation5 + $0x6c4] ss:$36 sps:$4 sm:$0xff]   ;;  %p24772_p1 = por %p24771_p0, %p24770_p13 }
 0x102   :  { %13771 = vmatpush1.bf16.msra.mxu0 %v21289_v38  ;;  %14386 = vmatpush1.bf16.msra.mxu1 %v21290_v39  ;;  %v21382_v38 = vld [vmem:[#allocation5 + $0x6cc] ss:$36 sps:$4 sm:$0xff]   ;;  %v21377_v39 = vld [vmem:[#allocation5 + $0x6c0] ss:$36 sps:$4 sm:$0xff]   ;;  %p24773_p2 = pnand %p24772_p1, %p24766_p12 }
 0x103   :  { %13772 = vmatprep.subr.bf16.mxu0 %v21291_v40  ;;  %14387 = vmatprep.subr.bf16.mxu1 %v21293_v41  ;;  %v21380_v40 = vld [vmem:[#allocation5 + $0x6c8] ss:$36 sps:$4 sm:$0xff]  }
 0x104   :  { %v21385_v41 = vld [vmem:[#allocation5 + $0x70c] ss:$36 sps:$4 sm:$0xff]  }
 0x106   :  { %13773 = vmatpush1.bf16.msra.mxu0 %v21295_v42  ;;  %14388 = vmatpush1.bf16.msra.mxu1 %v21296_v43  ;;  %v21388_v42 = vld [vmem:[#allocation5 + $0x714] ss:$36 sps:$4 sm:$0xff]   ;;  %v21383_v43 = vld [vmem:[#allocation5 + $0x708] ss:$36 sps:$4 sm:$0xff]  }
 0x107   :  { %13774 = vmatprep.subr.bf16.mxu0 %v21297_v44  ;;  %14389 = vmatprep.subr.bf16.mxu1 %v21299_v45  ;;  %v21386_v44 = vld [vmem:[#allocation5 + $0x710] ss:$36 sps:$4 sm:$0xff]  }
 0x108   :  { %v21391_v45 = vld [vmem:[#allocation5 + $0x754] ss:$36 sps:$4 sm:$0xff]  }
 0x10a   :  { %13775 = vmatpush1.bf16.msra.mxu0 %v21301_v47  ;;  %14390 = vmatpush1.bf16.msra.mxu1 %v21302_v49  ;;  %v21389_v47 = vld [vmem:[#allocation5 + $0x750] ss:$36 sps:$4 sm:$0xff]   ;;  %v21392_v49 = vld [vmem:[#allocation5 + $0x758] ss:$36 sps:$4 sm:$0xff]  }
 0x10b   :  { %13776 = vmatprep.subr.bf16.mxu0 %v21303_v50  ;;  %14391 = vmatprep.subr.bf16.mxu1 %v21305_v51  ;;  %v21397_v50 = vld [vmem:[#allocation5 + $0x79c] ss:$36 sps:$4 sm:$0xff]   ;;  %v21400_v51 = vld [vmem:[#allocation5 + $0x7a4] ss:$36 sps:$4 sm:$0xff]  }
 0x10e   :  { %13777 = vmatpush1.bf16.msra.mxu0 %v21307_v52  ;;  %14392 = vmatpush1.bf16.msra.mxu1 %v21308_v53  ;;  %v21395_v52 = vld [vmem:[#allocation5 + $0x798] ss:$36 sps:$4 sm:$0xff]   ;;  %v21398_v53 = vld [vmem:[#allocation5 + $0x7a0] ss:$36 sps:$4 sm:$0xff]  }
 0x10f   :  { %13778 = vmatprep.subr.bf16.mxu0 %v21309_v54  ;;  %14393 = vmatprep.subr.bf16.mxu1 %v21311_v55  ;;  %v21403_v54 = vld [vmem:[#allocation5 + $0x7e4] ss:$36 sps:$4 sm:$0xff]   ;;  %v21406_v55 = vld [vmem:[#allocation5 + $0x7ec] ss:$36 sps:$4 sm:$0xff]  }
 0x112   :  { %13779 = vmatpush1.bf16.msra.mxu0 %v21313_v56  ;;  %14394 = vmatpush1.bf16.msra.mxu1 %v21314_v57  ;;  %v21401_v56 = vld [vmem:[#allocation5 + $0x7e0] ss:$36 sps:$4 sm:$0xff]   ;;  %v21404_v57 = vld [vmem:[#allocation5 + $0x7e8] ss:$36 sps:$4 sm:$0xff]  }
 0x113   :  { %13780 = vmatprep.subr.bf16.mxu0 %v21315_v58  ;;  %14395 = vmatprep.subr.bf16.mxu1 %v21317_v59  ;;  %v21409_v58 = vld [vmem:[#allocation5 + $0x82c] ss:$36 sps:$4 sm:$0xff]   ;;  %v21412_v59 = vld [vmem:[#allocation5 + $0x834] ss:$36 sps:$4 sm:$0xff]  }
 0x116   :  { %13781 = vmatpush1.bf16.msra.mxu0 %v21319_v60  ;;  %14396 = vmatpush1.bf16.msra.mxu1 %v21320_v61  ;;  %v21407_v60 = vld [vmem:[#allocation5 + $0x828] ss:$36 sps:$4 sm:$0xff]   ;;  %v21410_v61 = vld [vmem:[#allocation5 + $0x830] ss:$36 sps:$4 sm:$0xff]  }
 0x117   :  { %13782 = vmatprep.subr.bf16.mxu0 %v21321_v62  ;;  %14397 = vmatprep.subr.bf16.mxu1 %v21323_v63  ;;  %v21415_v62 = vld [vmem:[#allocation5 + $0x874] ss:$36 sps:$4 sm:$0xff]   ;;  %v21418_v63 = vld [vmem:[#allocation5 + $0x87c] ss:$36 sps:$4 sm:$0xff]  }
 0x11a   :  { %13783 = vmatpush1.bf16.msra.mxu0 %v21325_v0  ;;  %14398 = vmatpush1.bf16.msra.mxu1 %v21326_v1  ;;  %v21413_v0 = vld [vmem:[#allocation5 + $0x870] ss:$36 sps:$4 sm:$0xff]   ;;  %v21416_v1 = vld [vmem:[#allocation5 + $0x878] ss:$36 sps:$4 sm:$0xff]  }
 0x11b   :  { %13793 = vmatprep.subr.bf16.mxu0 %v21330_v2  ;;  %14408 = vmatprep.subr.bf16.mxu1 %v21333_v3  ;;  %v21421_v2 = vld [vmem:[#allocation5 + $0x8bc] ss:$36 sps:$4 sm:$0xff]   ;;  %v21424_v3 = vld [vmem:[#allocation5 + $0x8c4] ss:$36 sps:$4 sm:$0xff]  }
 0x11d   :  { %13785 = vmatmul.mubr.bf16.vlgmr.msra.gmra.mrb[0].mxu0 %v25054_v5  ;;  %14400 = vmatmul.mubr.bf16.vlgmr.msra.gmra.mrb[0].mxu1 %v25054_v5 }
 0x11e   :  { %13794 = vmatpush1.bf16.msra.mxu0 %v21328_v4  ;;  %14409 = vmatpush1.bf16.msra.mxu1 %v21331_v6  ;;  %v21419_v4 = vld [vmem:[#allocation5 + $0x8b8] ss:$36 sps:$4 sm:$0xff]   ;;  %v21422_v6 = vld [vmem:[#allocation5 + $0x8c0] ss:$36 sps:$4 sm:$0xff]  }
 0x11f   :  { %13795 = vmatprep.subr.bf16.mxu0 %v21337_v7  ;;  %14410 = vmatprep.subr.bf16.mxu1 %v21340_v8  ;;  %v21428_v7 = vld [vmem:[#allocation5 + $0x904] ss:$36 sps:$4 sm:$0xff]   ;;  %v21431_v8 = vld [vmem:[#allocation5 + $0x90c] ss:$36 sps:$4 sm:$0xff]  }
 0x120   :  { %13825 = vmatprep.mubr.bf16.mxu0 %v25062_v30  ;;  %14440 = vmatprep.mubr.bf16.mxu1 %v25062_v30 }
 0x122   :  { %13796 = vmatpush1.bf16.msra.mxu0 %v21335_v9  ;;  %14411 = vmatpush1.bf16.msra.mxu1 %v21338_v10  ;;  %v21426_v9 = vld [vmem:[#allocation5 + $0x900] ss:$36 sps:$4 sm:$0xff]   ;;  %v25068_v10 = vcombine.low %v25058_v29, %v25058_v29  ;;  %v21454_v29 = vld [vmem:[#allocation5 + $0xa28] ss:$36 sps:$4 sm:$0xff]  }
 0x123   :  { %13797 = vmatprep.subr.bf16.mxu0 %v21343_v11  ;;  %14412 = vmatprep.subr.bf16.mxu1 %v21346_v12  ;;  %v21429_v11 = vld [vmem:[#allocation5 + $0x908] ss:$36 sps:$4 sm:$0xff]  }
 0x124   :  { %v21435_v12 = vld [vmem:[#allocation5 + $0x94c] ss:$36 sps:$4 sm:$0xff]  }
 0x126   :  { %13798 = vmatpush1.bf16.msra.mxu0 %v21341_v13  ;;  %14413 = vmatpush1.bf16.msra.mxu1 %v21344_v14  ;;  %v25070_v13 = vld [vmem:[#allocation2 + $0x10] sm:$0xff] }
 0x127   :  { %13799 = vmatprep.subr.bf16.mxu0 %v21349_v15  ;;  %14414 = vmatprep.subr.bf16.mxu1 %v21352_v16  ;;  %v21438_v14 = vld [vmem:[#allocation5 + $0x954] ss:$36 sps:$4 sm:$0xff]   ;;  %v25074_v15 = vcombine.high %v25070_v13, %v25070_v13  ;;  %v21433_v16 = vld [vmem:[#allocation5 + $0x948] ss:$36 sps:$4 sm:$0xff]  }
 0x12a   :  { %13800 = vmatpush1.bf16.msra.mxu0 %v21347_v17  ;;  %14415 = vmatpush1.bf16.msra.mxu1 %v21350_v18  ;;  %v21436_v17 = vld [vmem:[#allocation5 + $0x950] ss:$36 sps:$4 sm:$0xff]  }
 0x12b   :  { %13801 = vmatprep.subr.bf16.mxu0 %v21355_v19  ;;  %14416 = vmatprep.subr.bf16.mxu1 %v21358_v20  ;;  %v21441_v18 = vld [vmem:[#allocation5 + $0x994] ss:$36 sps:$4 sm:$0xff]   ;;  %v21444_v19 = vld [vmem:[#allocation5 + $0x99c] ss:$36 sps:$4 sm:$0xff]  }
 0x12c   :  { %v21439_v20 = vld [vmem:[#allocation5 + $0x990] ss:$36 sps:$4 sm:$0xff]  }
 0x12e   :  { %13802 = vmatpush1.bf16.msra.mxu0 %v21353_v21  ;;  %14417 = vmatpush1.bf16.msra.mxu1 %v21356_v22  ;;  %v21442_v21 = vld [vmem:[#allocation5 + $0x998] ss:$36 sps:$4 sm:$0xff]  }
 0x12f   :  { %13803 = vmatprep.subr.bf16.mxu0 %v21361_v23  ;;  %14418 = vmatprep.subr.bf16.mxu1 %v21364_v24  ;;  %v21447_v22 = vld [vmem:[#allocation5 + $0x9dc] ss:$36 sps:$4 sm:$0xff]   ;;  %v21450_v23 = vld [vmem:[#allocation5 + $0x9e4] ss:$36 sps:$4 sm:$0xff]  }
 0x130   :  { %v21445_v24 = vld [vmem:[#allocation5 + $0x9d8] ss:$36 sps:$4 sm:$0xff]  }
 0x132   :  { %13804 = vmatpush1.bf16.msra.mxu0 %v21359_v25  ;;  %14419 = vmatpush1.bf16.msra.mxu1 %v21362_v26  ;;  %v21448_v25 = vld [vmem:[#allocation5 + $0x9e0] ss:$36 sps:$4 sm:$0xff]  }
 0x133   :  { %13805 = vmatprep.subr.bf16.mxu0 %v21367_v27  ;;  %14420 = vmatprep.subr.bf16.mxu1 %v21370_v28  ;;  %v21453_v26 = vld [vmem:[#allocation5 + $0xa24] ss:$36 sps:$4 sm:$0xff]   ;;  %v21456_v27 = vld [vmem:[#allocation5 + $0xa2c] ss:$36 sps:$4 sm:$0xff]  }
 0x134   :  { %v21451_v28 = vld [vmem:[#allocation5 + $0xa20] ss:$36 sps:$4 sm:$0xff]  }
 0x136   :  { %13806 = vmatpush1.bf16.msra.mxu0 %v21365_v31  ;;  %14421 = vmatpush1.bf16.msra.mxu1 %v21368_v32  ;;  %v21459_v31 = vld [vmem:[#allocation5 + $0xa6c] ss:$36 sps:$4 sm:$0xff]   ;;  %v21462_v32 = vld [vmem:[#allocation5 + $0xa74] ss:$36 sps:$4 sm:$0xff]  }
 0x137   :  { %13807 = vmatprep.subr.bf16.mxu0 %v21373_v33  ;;  %14422 = vmatprep.subr.bf16.mxu1 %v21376_v34  ;;  %v21457_v33 = vld [vmem:[#allocation5 + $0xa68] ss:$36 sps:$4 sm:$0xff]   ;;  %v21460_v34 = vld [vmem:[#allocation5 + $0xa70] ss:$36 sps:$4 sm:$0xff]  }
 0x13a   :  { %13808 = vmatpush1.bf16.msra.mxu0 %v21371_v35  ;;  %14423 = vmatpush1.bf16.msra.mxu1 %v21374_v36  ;;  %v21465_v35 = vld [vmem:[#allocation5 + $0xab4] ss:$36 sps:$4 sm:$0xff]   ;;  %v21468_v36 = vld [vmem:[#allocation5 + $0xabc] ss:$36 sps:$4 sm:$0xff]  }
 0x13b   :  { %13809 = vmatprep.subr.bf16.mxu0 %v21379_v37  ;;  %14424 = vmatprep.subr.bf16.mxu1 %v21382_v38  ;;  %v21463_v37 = vld [vmem:[#allocation5 + $0xab0] ss:$36 sps:$4 sm:$0xff]   ;;  %v21466_v38 = vld [vmem:[#allocation5 + $0xab8] ss:$36 sps:$4 sm:$0xff]  }
 0x13e   :  { %13810 = vmatpush1.bf16.msra.mxu0 %v21377_v39  ;;  %14425 = vmatpush1.bf16.msra.mxu1 %v21380_v40  ;;  %v21471_v39 = vld [vmem:[#allocation5 + $0xafc] ss:$36 sps:$4 sm:$0xff]   ;;  %v21474_v40 = vld [vmem:[#allocation5 + $0xb04] ss:$36 sps:$4 sm:$0xff]  }
 0x13f   :  { %13811 = vmatprep.subr.bf16.mxu0 %v21385_v41  ;;  %14426 = vmatprep.subr.bf16.mxu1 %v21388_v42  ;;  %v21469_v41 = vld [vmem:[#allocation5 + $0xaf8] ss:$36 sps:$4 sm:$0xff]   ;;  %v21472_v42 = vld [vmem:[#allocation5 + $0xb00] ss:$36 sps:$4 sm:$0xff]  }
 0x142   :  { %13812 = vmatpush1.bf16.msra.mxu0 %v21383_v43  ;;  %14427 = vmatpush1.bf16.msra.mxu1 %v21386_v44  ;;  %v21477_v43 = vld [vmem:[#allocation5 + $0xb44] ss:$36 sps:$4 sm:$0xff]   ;;  %v21480_v44 = vld [vmem:[#allocation5 + $0xb4c] ss:$36 sps:$4 sm:$0xff]  }
 0x143   :  { %13813 = vmatprep.subr.bf16.mxu0 %v21391_v45  ;;  %14428 = vmatprep.subr.bf16.mxu1 %v21394_v46  ;;  %v21475_v45 = vld [vmem:[#allocation5 + $0xb40] ss:$36 sps:$4 sm:$0xff]   ;;  %v21478_v46 = vld [vmem:[#allocation5 + $0xb48] ss:$36 sps:$4 sm:$0xff]  }
 0x146   :  { %13814 = vmatpush1.bf16.msra.mxu0 %v21389_v47  ;;  %14429 = vmatpush1.bf16.msra.mxu1 %v21392_v49  ;;  %v21483_v47 = vld [vmem:[#allocation5 + $0xb8c] ss:$36 sps:$4 sm:$0xff]   ;;  %v21486_v49 = vld [vmem:[#allocation5 + $0xb94] ss:$36 sps:$4 sm:$0xff]  }
 0x147   :  { %13815 = vmatprep.subr.bf16.mxu0 %v21397_v50  ;;  %14430 = vmatprep.subr.bf16.mxu1 %v21400_v51  ;;  %v21481_v50 = vld [vmem:[#allocation5 + $0xb88] ss:$36 sps:$4 sm:$0xff]   ;;  %v21484_v51 = vld [vmem:[#allocation5 + $0xb90] ss:$36 sps:$4 sm:$0xff]  }
 0x14a   :  { %13816 = vmatpush1.bf16.msra.mxu0 %v21395_v52  ;;  %14431 = vmatpush1.bf16.msra.mxu1 %v21398_v53  ;;  %v21489_v52 = vld [vmem:[#allocation5 + $0xbd4] ss:$36 sps:$4 sm:$0xff]   ;;  %v21492_v53 = vld [vmem:[#allocation5 + $0xbdc] ss:$36 sps:$4 sm:$0xff]  }
 0x14b   :  { %13817 = vmatprep.subr.bf16.mxu0 %v21403_v54  ;;  %14432 = vmatprep.subr.bf16.mxu1 %v21406_v55  ;;  %v21487_v54 = vld [vmem:[#allocation5 + $0xbd0] ss:$36 sps:$4 sm:$0xff]   ;;  %v21490_v55 = vld [vmem:[#allocation5 + $0xbd8] ss:$36 sps:$4 sm:$0xff]  }
 0x14e   :  { %13818 = vmatpush1.bf16.msra.mxu0 %v21401_v56  ;;  %14433 = vmatpush1.bf16.msra.mxu1 %v21404_v57  ;;  %v21495_v56 = vld [vmem:[#allocation5 + $0xc1c] ss:$36 sps:$4 sm:$0xff]   ;;  %v21498_v57 = vld [vmem:[#allocation5 + $0xc24] ss:$36 sps:$4 sm:$0xff]  }
 0x14f   :  { %13819 = vmatprep.subr.bf16.mxu0 %v21409_v58  ;;  %14434 = vmatprep.subr.bf16.mxu1 %v21412_v59  ;;  %v21493_v58 = vld [vmem:[#allocation5 + $0xc18] ss:$36 sps:$4 sm:$0xff]   ;;  %v21496_v59 = vld [vmem:[#allocation5 + $0xc20] ss:$36 sps:$4 sm:$0xff]  }
 0x152   :  { %13820 = vmatpush1.bf16.msra.mxu0 %v21407_v60  ;;  %14435 = vmatpush1.bf16.msra.mxu1 %v21410_v61  ;;  %v21501_v60 = vld [vmem:[#allocation5 + $0xc64] ss:$36 sps:$4 sm:$0xff]   ;;  %v21504_v61 = vld [vmem:[#allocation5 + $0xc6c] ss:$36 sps:$4 sm:$0xff]  }
 0x153   :  { %13821 = vmatprep.subr.bf16.mxu0 %v21415_v62  ;;  %14436 = vmatprep.subr.bf16.mxu1 %v21418_v63  ;;  %v21499_v62 = vld [vmem:[#allocation5 + $0xc60] ss:$36 sps:$4 sm:$0xff]   ;;  %v21502_v63 = vld [vmem:[#allocation5 + $0xc68] ss:$36 sps:$4 sm:$0xff]  }
 0x156   :  { %13822 = vmatpush1.bf16.msra.mxu0 %v21413_v0  ;;  %14437 = vmatpush1.bf16.msra.mxu1 %v21416_v1  ;;  %v21507_v0 = vld [vmem:[#allocation5 + $0xcac] ss:$36 sps:$4 sm:$0xff]   ;;  %v21510_v1 = vld [vmem:[#allocation5 + $0xcb4] ss:$36 sps:$4 sm:$0xff]  }
 0x157   :  { %13823 = vmatprep.subr.bf16.mxu0 %v21421_v2  ;;  %14438 = vmatprep.subr.bf16.mxu1 %v21424_v3  ;;  %v21505_v2 = vld [vmem:[#allocation5 + $0xca8] ss:$36 sps:$4 sm:$0xff]   ;;  %v21508_v3 = vld [vmem:[#allocation5 + $0xcb0] ss:$36 sps:$4 sm:$0xff]  }
 0x15a   :  { %13824 = vmatpush1.bf16.msra.mxu0 %v21419_v4  ;;  %14439 = vmatpush1.bf16.msra.mxu1 %v21422_v6  ;;  %v21513_v4 = vld [vmem:[#allocation5 + $0xcf4] ss:$36 sps:$4 sm:$0xff]   ;;  %v21516_v6 = vld [vmem:[#allocation5 + $0xcfc] ss:$36 sps:$4 sm:$0xff]  }
 0x15b   :  { %13834 = vmatprep.subr.bf16.mxu0 %v21428_v7  ;;  %14449 = vmatprep.subr.bf16.mxu1 %v21431_v8  ;;  %v21511_v7 = vld [vmem:[#allocation5 + $0xcf0] ss:$36 sps:$4 sm:$0xff]   ;;  %v21514_v8 = vld [vmem:[#allocation5 + $0xcf8] ss:$36 sps:$4 sm:$0xff]  }
 0x15d   :  { %13826 = vmatmul.mubr.bf16.vlgmr.msra.gmra.mrb[0].mxu0 %v25068_v10  ;;  %14441 = vmatmul.mubr.bf16.vlgmr.msra.gmra.mrb[0].mxu1 %v25068_v10 }
 0x15e   :  { %13835 = vmatpush1.bf16.msra.mxu0 %v21426_v9  ;;  %14450 = vmatpush1.bf16.msra.mxu1 %v21429_v11  ;;  %v21519_v9 = vld [vmem:[#allocation5 + $0xd3c] ss:$36 sps:$4 sm:$0xff]   ;;  %v21522_v11 = vld [vmem:[#allocation5 + $0xd44] ss:$36 sps:$4 sm:$0xff]  }
 0x15f   :  { %13836 = vmatprep.subr.bf16.mxu0 %v21435_v12  ;;  %14451 = vmatprep.subr.bf16.mxu1 %v21438_v14  ;;  %v21517_v12 = vld [vmem:[#allocation5 + $0xd38] ss:$36 sps:$4 sm:$0xff]   ;;  %v21520_v14 = vld [vmem:[#allocation5 + $0xd40] ss:$36 sps:$4 sm:$0xff]  }
 0x160   :  { %13866 = vmatprep.mubr.bf16.mxu0 %v25074_v15  ;;  %14481 = vmatprep.mubr.bf16.mxu1 %v25074_v15 }
 0x162   :  { %13837 = vmatpush1.bf16.msra.mxu0 %v21433_v16  ;;  %14452 = vmatpush1.bf16.msra.mxu1 %v21436_v17  ;;  %v21526_v16 = vld [vmem:[#allocation5 + $0xd84] ss:$36 sps:$4 sm:$0xff]   ;;  %v21529_v17 = vld [vmem:[#allocation5 + $0xd8c] ss:$36 sps:$4 sm:$0xff]  }
 0x163   :  { %13838 = vmatprep.subr.bf16.mxu0 %v21441_v18  ;;  %14453 = vmatprep.subr.bf16.mxu1 %v21444_v19  ;;  %v21524_v18 = vld [vmem:[#allocation5 + $0xd80] ss:$36 sps:$4 sm:$0xff]   ;;  %v21527_v19 = vld [vmem:[#allocation5 + $0xd88] ss:$36 sps:$4 sm:$0xff]  }
 0x166   :  { %13839 = vmatpush1.bf16.msra.mxu0 %v21439_v20  ;;  %14454 = vmatpush1.bf16.msra.mxu1 %v21442_v21  ;;  %v25082_v20 = vcombine.low %v25070_v13, %v25070_v13  ;;  %v25084_v21 = vld [vmem:[#allocation2 + $0x18] sm:$0xff]  ;;  %v21539_v13 = vld [vmem:[#allocation5 + $0xe14] ss:$36 sps:$4 sm:$0xff]  }
 0x167   :  { %13840 = vmatprep.subr.bf16.mxu0 %v21447_v22  ;;  %14455 = vmatprep.subr.bf16.mxu1 %v21450_v23  ;;  %v21533_v22 = vld [vmem:[#allocation5 + $0xdcc] ss:$36 sps:$4 sm:$0xff]   ;;  %v21536_v23 = vld [vmem:[#allocation5 + $0xdd4] ss:$36 sps:$4 sm:$0xff]  }
 0x16a   :  { %13841 = vmatpush1.bf16.msra.mxu0 %v21445_v24  ;;  %14456 = vmatpush1.bf16.msra.mxu1 %v21448_v25  ;;  %v25088_v24 = vcombine.high %v25084_v21, %v25084_v21  ;;  %v21531_v25 = vld [vmem:[#allocation5 + $0xdc8] ss:$36 sps:$4 sm:$0xff]  }
 0x16b   :  { %13842 = vmatprep.subr.bf16.mxu0 %v21453_v26  ;;  %14457 = vmatprep.subr.bf16.mxu1 %v21456_v27  ;;  %v21534_v26 = vld [vmem:[#allocation5 + $0xdd0] ss:$36 sps:$4 sm:$0xff]   ;;  %v21542_v27 = vld [vmem:[#allocation5 + $0xe1c] ss:$36 sps:$4 sm:$0xff]  }
 0x16e   :  { %13843 = vmatpush1.bf16.msra.mxu0 %v21451_v28  ;;  %14458 = vmatpush1.bf16.msra.mxu1 %v21454_v29  ;;  %v21537_v28 = vld [vmem:[#allocation5 + $0xe10] ss:$36 sps:$4 sm:$0xff]   ;;  %v21540_v29 = vld [vmem:[#allocation5 + $0xe18] ss:$36 sps:$4 sm:$0xff]  }
 0x16f   :  { %13844 = vmatprep.subr.bf16.mxu0 %v21459_v31  ;;  %14459 = vmatprep.subr.bf16.mxu1 %v21462_v32  ;;  %v21545_v31 = vld [vmem:[#allocation5 + $0xe5c] ss:$36 sps:$4 sm:$0xff]   ;;  %v21548_v32 = vld [vmem:[#allocation5 + $0xe64] ss:$36 sps:$4 sm:$0xff]  }
 0x172   :  { %13845 = vmatpush1.bf16.msra.mxu0 %v21457_v33  ;;  %14460 = vmatpush1.bf16.msra.mxu1 %v21460_v34  ;;  %v21543_v33 = vld [vmem:[#allocation5 + $0xe58] ss:$36 sps:$4 sm:$0xff]   ;;  %v21546_v34 = vld [vmem:[#allocation5 + $0xe60] ss:$36 sps:$4 sm:$0xff]  }
 0x173   :  { %13846 = vmatprep.subr.bf16.mxu0 %v21465_v35  ;;  %14461 = vmatprep.subr.bf16.mxu1 %v21468_v36  ;;  %v21551_v35 = vld [vmem:[#allocation5 + $0xea4] ss:$36 sps:$4 sm:$0xff]   ;;  %v21554_v36 = vld [vmem:[#allocation5 + $0xeac] ss:$36 sps:$4 sm:$0xff]  }
 0x176   :  { %13847 = vmatpush1.bf16.msra.mxu0 %v21463_v37  ;;  %14462 = vmatpush1.bf16.msra.mxu1 %v21466_v38  ;;  %v21549_v37 = vld [vmem:[#allocation5 + $0xea0] ss:$36 sps:$4 sm:$0xff]   ;;  %v21552_v38 = vld [vmem:[#allocation5 + $0xea8] ss:$36 sps:$4 sm:$0xff]  }
 0x177   :  { %13848 = vmatprep.subr.bf16.mxu0 %v21471_v39  ;;  %14463 = vmatprep.subr.bf16.mxu1 %v21474_v40  ;;  %v21557_v39 = vld [vmem:[#allocation5 + $0xeec] ss:$36 sps:$4 sm:$0xff]   ;;  %v21560_v40 = vld [vmem:[#allocation5 + $0xef4] ss:$36 sps:$4 sm:$0xff]  }
 0x17a   :  { %13849 = vmatpush1.bf16.msra.mxu0 %v21469_v41  ;;  %14464 = vmatpush1.bf16.msra.mxu1 %v21472_v42  ;;  %v21555_v41 = vld [vmem:[#allocation5 + $0xee8] ss:$36 sps:$4 sm:$0xff]   ;;  %v21558_v42 = vld [vmem:[#allocation5 + $0xef0] ss:$36 sps:$4 sm:$0xff]  }
 0x17b   :  { %13850 = vmatprep.subr.bf16.mxu0 %v21477_v43  ;;  %14465 = vmatprep.subr.bf16.mxu1 %v21480_v44  ;;  %v21563_v43 = vld [vmem:[#allocation5 + $0xf34] ss:$36 sps:$4 sm:$0xff]   ;;  %v21566_v44 = vld [vmem:[#allocation5 + $0xf3c] ss:$36 sps:$4 sm:$0xff]  }
 0x17e   :  { %13851 = vmatpush1.bf16.msra.mxu0 %v21475_v45  ;;  %14466 = vmatpush1.bf16.msra.mxu1 %v21478_v46  ;;  %v21561_v45 = vld [vmem:[#allocation5 + $0xf30] ss:$36 sps:$4 sm:$0xff]   ;;  %v21564_v46 = vld [vmem:[#allocation5 + $0xf38] ss:$36 sps:$4 sm:$0xff]  }
 0x17f   :  { %13852 = vmatprep.subr.bf16.mxu0 %v21483_v47  ;;  %14467 = vmatprep.subr.bf16.mxu1 %v21486_v49  ;;  %v21569_v47 = vld [vmem:[#allocation5 + $0xf7c] ss:$36 sps:$4 sm:$0xff]   ;;  %v21572_v49 = vld [vmem:[#allocation5 + $0xf84] ss:$36 sps:$4 sm:$0xff]  }
 0x182   :  { %13853 = vmatpush1.bf16.msra.mxu0 %v21481_v50  ;;  %14468 = vmatpush1.bf16.msra.mxu1 %v21484_v51  ;;  %v21567_v50 = vld [vmem:[#allocation5 + $0xf78] ss:$36 sps:$4 sm:$0xff]   ;;  %v21570_v51 = vld [vmem:[#allocation5 + $0xf80] ss:$36 sps:$4 sm:$0xff]  }
 0x183   :  { %13854 = vmatprep.subr.bf16.mxu0 %v21489_v52  ;;  %14469 = vmatprep.subr.bf16.mxu1 %v21492_v53  ;;  %v21575_v52 = vld [vmem:[#allocation5 + $0xfc4] ss:$36 sps:$4 sm:$0xff]   ;;  %v21578_v53 = vld [vmem:[#allocation5 + $0xfcc] ss:$36 sps:$4 sm:$0xff]  }
 0x186   :  { %13855 = vmatpush1.bf16.msra.mxu0 %v21487_v54  ;;  %14470 = vmatpush1.bf16.msra.mxu1 %v21490_v55  ;;  %v21573_v54 = vld [vmem:[#allocation5 + $0xfc0] ss:$36 sps:$4 sm:$0xff]   ;;  %v21576_v55 = vld [vmem:[#allocation5 + $0xfc8] ss:$36 sps:$4 sm:$0xff]  }
 0x187   :  { %13856 = vmatprep.subr.bf16.mxu0 %v21495_v56  ;;  %14471 = vmatprep.subr.bf16.mxu1 %v21498_v57  ;;  %v21581_v56 = vld [vmem:[#allocation5 + $0x100c] ss:$36 sps:$4 sm:$0xff]   ;;  %v21584_v57 = vld [vmem:[#allocation5 + $0x1014] ss:$36 sps:$4 sm:$0xff]  }
 0x18a   :  { %13857 = vmatpush1.bf16.msra.mxu0 %v21493_v58  ;;  %14472 = vmatpush1.bf16.msra.mxu1 %v21496_v59  ;;  %v21579_v58 = vld [vmem:[#allocation5 + $0x1008] ss:$36 sps:$4 sm:$0xff]   ;;  %v21582_v59 = vld [vmem:[#allocation5 + $0x1010] ss:$36 sps:$4 sm:$0xff]  }
 0x18b   :  { %13858 = vmatprep.subr.bf16.mxu0 %v21501_v60  ;;  %14473 = vmatprep.subr.bf16.mxu1 %v21504_v61  ;;  %v21587_v60 = vld [vmem:[#allocation5 + $0x1054] ss:$36 sps:$4 sm:$0xff]   ;;  %v21590_v61 = vld [vmem:[#allocation5 + $0x105c] ss:$36 sps:$4 sm:$0xff]  }
 0x18e   :  { %13859 = vmatpush1.bf16.msra.mxu0 %v21499_v62  ;;  %14474 = vmatpush1.bf16.msra.mxu1 %v21502_v63  ;;  %v21585_v62 = vld [vmem:[#allocation5 + $0x1050] ss:$36 sps:$4 sm:$0xff]   ;;  %v21588_v63 = vld [vmem:[#allocation5 + $0x1058] ss:$36 sps:$4 sm:$0xff]  }
 0x18f   :  { %13860 = vmatprep.subr.bf16.mxu0 %v21507_v0  ;;  %14475 = vmatprep.subr.bf16.mxu1 %v21510_v1  ;;  %v21593_v0 = vld [vmem:[#allocation5 + $0x109c] ss:$36 sps:$4 sm:$0xff]   ;;  %v21596_v1 = vld [vmem:[#allocation5 + $0x10a4] ss:$36 sps:$4 sm:$0xff]  }
 0x192   :  { %13861 = vmatpush1.bf16.msra.mxu0 %v21505_v2  ;;  %14476 = vmatpush1.bf16.msra.mxu1 %v21508_v3  ;;  %v21591_v2 = vld [vmem:[#allocation5 + $0x1098] ss:$36 sps:$4 sm:$0xff]   ;;  %v21594_v3 = vld [vmem:[#allocation5 + $0x10a0] ss:$36 sps:$4 sm:$0xff]  }
 0x193   :  { %13862 = vmatprep.subr.bf16.mxu0 %v21513_v4  ;;  %14477 = vmatprep.subr.bf16.mxu1 %v21516_v6  ;;  %v21599_v4 = vld [vmem:[#allocation5 + $0x10e4] ss:$36 sps:$4 sm:$0xff]   ;;  %v21602_v6 = vld [vmem:[#allocation5 + $0x10ec] ss:$36 sps:$4 sm:$0xff]  }
 0x196   :  { %13863 = vmatpush1.bf16.msra.mxu0 %v21511_v7  ;;  %14478 = vmatpush1.bf16.msra.mxu1 %v21514_v8  ;;  %v21597_v7 = vld [vmem:[#allocation5 + $0x10e0] ss:$36 sps:$4 sm:$0xff]   ;;  %v21600_v8 = vld [vmem:[#allocation5 + $0x10e8] ss:$36 sps:$4 sm:$0xff]  }
 0x197   :  { %13864 = vmatprep.subr.bf16.mxu0 %v21519_v9  ;;  %14479 = vmatprep.subr.bf16.mxu1 %v21522_v11  ;;  %v21605_v9 = vld [vmem:[#allocation5 + $0x112c] ss:$36 sps:$4 sm:$0xff]   ;;  %v21608_v11 = vld [vmem:[#allocation5 + $0x1134] ss:$36 sps:$4 sm:$0xff]  }
 0x19a   :  { %13865 = vmatpush1.bf16.msra.mxu0 %v21517_v12  ;;  %14480 = vmatpush1.bf16.msra.mxu1 %v21520_v14  ;;  %v21603_v12 = vld [vmem:[#allocation5 + $0x1128] ss:$36 sps:$4 sm:$0xff]   ;;  %v21606_v14 = vld [vmem:[#allocation5 + $0x1130] ss:$36 sps:$4 sm:$0xff]  }
 0x19b   :  { %13875 = vmatprep.subr.bf16.mxu0 %v21526_v16  ;;  %14490 = vmatprep.subr.bf16.mxu1 %v21529_v17  ;;  %v21611_v16 = vld [vmem:[#allocation5 + $0x1174] ss:$36 sps:$4 sm:$0xff]   ;;  %v21614_v17 = vld [vmem:[#allocation5 + $0x117c] ss:$36 sps:$4 sm:$0xff]  }
 0x19d   :  { %13867 = vmatmul.mubr.bf16.vlgmr.msra.gmra.mrb[0].mxu0 %v25082_v20  ;;  %14482 = vmatmul.mubr.bf16.vlgmr.msra.gmra.mrb[0].mxu1 %v25082_v20 }
 0x19e   :  { %13876 = vmatpush1.bf16.msra.mxu0 %v21524_v18  ;;  %14491 = vmatpush1.bf16.msra.mxu1 %v21527_v19  ;;  %v21609_v18 = vld [vmem:[#allocation5 + $0x1170] ss:$36 sps:$4 sm:$0xff]   ;;  %v21612_v19 = vld [vmem:[#allocation5 + $0x1178] ss:$36 sps:$4 sm:$0xff]  }
 0x19f   :  { %13877 = vmatprep.subr.bf16.mxu0 %v21533_v22  ;;  %14492 = vmatprep.subr.bf16.mxu1 %v21536_v23  ;;  %v21617_v22 = vld [vmem:[#allocation5 + $0x11bc] ss:$36 sps:$4 sm:$0xff]   ;;  %v21620_v23 = vld [vmem:[#allocation5 + $0x11c4] ss:$36 sps:$4 sm:$0xff]  }
 0x1a0   :  { %13907 = vmatprep.mubr.bf16.mxu0 %v25088_v24  ;;  %14522 = vmatprep.mubr.bf16.mxu1 %v25088_v24 }
 0x1a2   :  { %13878 = vmatpush1.bf16.msra.mxu0 %v21531_v25  ;;  %14493 = vmatpush1.bf16.msra.mxu1 %v21534_v26  ;;  %v21615_v25 = vld [vmem:[#allocation5 + $0x11b8] ss:$36 sps:$4 sm:$0xff]   ;;  %v21618_v26 = vld [vmem:[#allocation5 + $0x11c0] ss:$36 sps:$4 sm:$0xff]  }
 0x1a3   :  { %13879 = vmatprep.subr.bf16.mxu0 %v21539_v13  ;;  %14494 = vmatprep.subr.bf16.mxu1 %v21542_v27  ;;  %v21624_v13 = vld [vmem:[#allocation5 + $0x1204] ss:$36 sps:$4 sm:$0xff]   ;;  %v21627_v27 = vld [vmem:[#allocation5 + $0x120c] ss:$36 sps:$4 sm:$0xff]  }
 0x1a6   :  { %13880 = vmatpush1.bf16.msra.mxu0 %v21537_v28  ;;  %14495 = vmatpush1.bf16.msra.mxu1 %v21540_v29  ;;  %v21622_v28 = vld [vmem:[#allocation5 + $0x1200] ss:$36 sps:$4 sm:$0xff]   ;;  %v25096_v29 = vcombine.low %v25084_v21, %v25084_v21  ;;  %v21629_v21 = vld [vmem:[#allocation5 + $0x1248] ss:$36 sps:$4 sm:$0xff]  }
 0x1a7   :  { %13881 = vmatprep.subr.bf16.mxu0 %v21545_v31  ;;  %14496 = vmatprep.subr.bf16.mxu1 %v21548_v32  ;;  %v25098_v31 = vld [vmem:[#allocation2 + $0x20] sm:$0xff] }
 0x1a8   :  { %v21625_v32 = vld [vmem:[#allocation5 + $0x1208] ss:$36 sps:$4 sm:$0xff]  }
 0x1aa   :  { %13882 = vmatpush1.bf16.msra.mxu0 %v21543_v33  ;;  %14497 = vmatpush1.bf16.msra.mxu1 %v21546_v34  ;;  %v21631_v33 = vld [vmem:[#allocation5 + $0x124c] ss:$36 sps:$4 sm:$0xff]   ;;  %v21634_v34 = vld [vmem:[#allocation5 + $0x1254] ss:$36 sps:$4 sm:$0xff]  }
 0x1ab   :  { %13883 = vmatprep.subr.bf16.mxu0 %v21551_v35  ;;  %14498 = vmatprep.subr.bf16.mxu1 %v21554_v36  ;;  %v25102_v35 = vcombine.high %v25098_v31, %v25098_v31  ;;  %v21632_v36 = vld [vmem:[#allocation5 + $0x1250] ss:$36 sps:$4 sm:$0xff]  }
 0x1ae   :  { %13884 = vmatpush1.bf16.msra.mxu0 %v21549_v37  ;;  %14499 = vmatpush1.bf16.msra.mxu1 %v21552_v38  ;;  %v21637_v37 = vld [vmem:[#allocation5 + $0x1294] ss:$36 sps:$4 sm:$0xff]   ;;  %v21640_v38 = vld [vmem:[#allocation5 + $0x129c] ss:$36 sps:$4 sm:$0xff]  }
 0x1af   :  { %13885 = vmatprep.subr.bf16.mxu0 %v21557_v39  ;;  %14500 = vmatprep.subr.bf16.mxu1 %v21560_v40  ;;  %v21635_v39 = vld [vmem:[#allocation5 + $0x1290] ss:$36 sps:$4 sm:$0xff]   ;;  %v21638_v40 = vld [vmem:[#allocation5 + $0x1298] ss:$36 sps:$4 sm:$0xff]  }
 0x1b2   :  { %13886 = vmatpush1.bf16.msra.mxu0 %v21555_v41  ;;  %14501 = vmatpush1.bf16.msra.mxu1 %v21558_v42  ;;  %v21643_v41 = vld [vmem:[#allocation5 + $0x12dc] ss:$36 sps:$4 sm:$0xff]   ;;  %v21646_v42 = vld [vmem:[#allocation5 + $0x12e4] ss:$36 sps:$4 sm:$0xff]  }
 0x1b3   :  { %13887 = vmatprep.subr.bf16.mxu0 %v21563_v43  ;;  %14502 = vmatprep.subr.bf16.mxu1 %v21566_v44  ;;  %v21641_v43 = vld [vmem:[#allocation5 + $0x12d8] ss:$36 sps:$4 sm:$0xff]   ;;  %v21644_v44 = vld [vmem:[#allocation5 + $0x12e0] ss:$36 sps:$4 sm:$0xff]  }
 0x1b6   :  { %13888 = vmatpush1.bf16.msra.mxu0 %v21561_v45  ;;  %14503 = vmatpush1.bf16.msra.mxu1 %v21564_v46  ;;  %v21649_v45 = vld [vmem:[#allocation5 + $0x1324] ss:$36 sps:$4 sm:$0xff]   ;;  %v21652_v46 = vld [vmem:[#allocation5 + $0x132c] ss:$36 sps:$4 sm:$0xff]  }
 0x1b7   :  { %13889 = vmatprep.subr.bf16.mxu0 %v21569_v47  ;;  %14504 = vmatprep.subr.bf16.mxu1 %v21572_v49  ;;  %v21647_v47 = vld [vmem:[#allocation5 + $0x1320] ss:$36 sps:$4 sm:$0xff]   ;;  %v21650_v49 = vld [vmem:[#allocation5 + $0x1328] ss:$36 sps:$4 sm:$0xff]  }
 0x1ba   :  { %13890 = vmatpush1.bf16.msra.mxu0 %v21567_v50  ;;  %14505 = vmatpush1.bf16.msra.mxu1 %v21570_v51  ;;  %v21655_v50 = vld [vmem:[#allocation5 + $0x136c] ss:$36 sps:$4 sm:$0xff]   ;;  %v21658_v51 = vld [vmem:[#allocation5 + $0x1374] ss:$36 sps:$4 sm:$0xff]  }
 0x1bb   :  { %13891 = vmatprep.subr.bf16.mxu0 %v21575_v52  ;;  %14506 = vmatprep.subr.bf16.mxu1 %v21578_v53  ;;  %v21653_v52 = vld [vmem:[#allocation5 + $0x1368] ss:$36 sps:$4 sm:$0xff]   ;;  %v21656_v53 = vld [vmem:[#allocation5 + $0x1370] ss:$36 sps:$4 sm:$0xff]  }
 0x1be   :  { %13892 = vmatpush1.bf16.msra.mxu0 %v21573_v54  ;;  %14507 = vmatpush1.bf16.msra.mxu1 %v21576_v55  ;;  %v21661_v54 = vld [vmem:[#allocation5 + $0x13b4] ss:$36 sps:$4 sm:$0xff]   ;;  %v21664_v55 = vld [vmem:[#allocation5 + $0x13bc] ss:$36 sps:$4 sm:$0xff]  }
 0x1bf   :  { %13893 = vmatprep.subr.bf16.mxu0 %v21581_v56  ;;  %14508 = vmatprep.subr.bf16.mxu1 %v21584_v57  ;;  %v21659_v56 = vld [vmem:[#allocation5 + $0x13b0] ss:$36 sps:$4 sm:$0xff]   ;;  %v21662_v57 = vld [vmem:[#allocation5 + $0x13b8] ss:$36 sps:$4 sm:$0xff]  }
 0x1c2   :  { %13894 = vmatpush1.bf16.msra.mxu0 %v21579_v58  ;;  %14509 = vmatpush1.bf16.msra.mxu1 %v21582_v59  ;;  %v21667_v58 = vld [vmem:[#allocation5 + $0x13fc] ss:$36 sps:$4 sm:$0xff]   ;;  %v21670_v59 = vld [vmem:[#allocation5 + $0x1404] ss:$36 sps:$4 sm:$0xff]  }
 0x1c3   :  { %13895 = vmatprep.subr.bf16.mxu0 %v21587_v60  ;;  %14510 = vmatprep.subr.bf16.mxu1 %v21590_v61  ;;  %v21665_v60 = vld [vmem:[#allocation5 + $0x13f8] ss:$36 sps:$4 sm:$0xff]   ;;  %v21668_v61 = vld [vmem:[#allocation5 + $0x1400] ss:$36 sps:$4 sm:$0xff]  }
 0x1c6   :  { %13896 = vmatpush1.bf16.msra.mxu0 %v21585_v62  ;;  %14511 = vmatpush1.bf16.msra.mxu1 %v21588_v63  ;;  %v21673_v62 = vld [vmem:[#allocation5 + $0x1444] ss:$36 sps:$4 sm:$0xff]   ;;  %v21676_v63 = vld [vmem:[#allocation5 + $0x144c] ss:$36 sps:$4 sm:$0xff]  }
 0x1c7   :  { %13897 = vmatprep.subr.bf16.mxu0 %v21593_v0  ;;  %14512 = vmatprep.subr.bf16.mxu1 %v21596_v1  ;;  %v21671_v0 = vld [vmem:[#allocation5 + $0x1440] ss:$36 sps:$4 sm:$0xff]   ;;  %v21674_v1 = vld [vmem:[#allocation5 + $0x1448] ss:$36 sps:$4 sm:$0xff]  }
 0x1ca   :  { %13898 = vmatpush1.bf16.msra.mxu0 %v21591_v2  ;;  %14513 = vmatpush1.bf16.msra.mxu1 %v21594_v3  ;;  %v21679_v2 = vld [vmem:[#allocation5 + $0x148c] ss:$36 sps:$4 sm:$0xff]   ;;  %v21682_v3 = vld [vmem:[#allocation5 + $0x1494] ss:$36 sps:$4 sm:$0xff]  }
 0x1cb   :  { %13899 = vmatprep.subr.bf16.mxu0 %v21599_v4  ;;  %14514 = vmatprep.subr.bf16.mxu1 %v21602_v6  ;;  %v21677_v4 = vld [vmem:[#allocation5 + $0x1488] ss:$36 sps:$4 sm:$0xff]   ;;  %v21680_v6 = vld [vmem:[#allocation5 + $0x1490] ss:$36 sps:$4 sm:$0xff]  }
 0x1ce   :  { %13900 = vmatpush1.bf16.msra.mxu0 %v21597_v7  ;;  %14515 = vmatpush1.bf16.msra.mxu1 %v21600_v8  ;;  %v21685_v7 = vld [vmem:[#allocation5 + $0x14d4] ss:$36 sps:$4 sm:$0xff]   ;;  %v21688_v8 = vld [vmem:[#allocation5 + $0x14dc] ss:$36 sps:$4 sm:$0xff]  }
 0x1cf   :  { %13901 = vmatprep.subr.bf16.mxu0 %v21605_v9  ;;  %14516 = vmatprep.subr.bf16.mxu1 %v21608_v11  ;;  %v21683_v9 = vld [vmem:[#allocation5 + $0x14d0] ss:$36 sps:$4 sm:$0xff]   ;;  %v21686_v11 = vld [vmem:[#allocation5 + $0x14d8] ss:$36 sps:$4 sm:$0xff]  }
 0x1d2   :  { %13902 = vmatpush1.bf16.msra.mxu0 %v21603_v12  ;;  %14517 = vmatpush1.bf16.msra.mxu1 %v21606_v14  ;;  %v21691_v12 = vld [vmem:[#allocation5 + $0x151c] ss:$36 sps:$4 sm:$0xff]   ;;  %v21694_v14 = vld [vmem:[#allocation5 + $0x1524] ss:$36 sps:$4 sm:$0xff]  }
 0x1d3   :  { %13903 = vmatprep.subr.bf16.mxu0 %v21611_v16  ;;  %14518 = vmatprep.subr.bf16.mxu1 %v21614_v17  ;;  %v21689_v16 = vld [vmem:[#allocation5 + $0x1518] ss:$36 sps:$4 sm:$0xff]   ;;  %v21692_v17 = vld [vmem:[#allocation5 + $0x1520] ss:$36 sps:$4 sm:$0xff]  }
 0x1d6   :  { %13904 = vmatpush1.bf16.msra.mxu0 %v21609_v18  ;;  %14519 = vmatpush1.bf16.msra.mxu1 %v21612_v19  ;;  %v21697_v18 = vld [vmem:[#allocation5 + $0x1564] ss:$36 sps:$4 sm:$0xff]   ;;  %v21700_v19 = vld [vmem:[#allocation5 + $0x156c] ss:$36 sps:$4 sm:$0xff]  }
 0x1d7   :  { %13905 = vmatprep.subr.bf16.mxu0 %v21617_v22  ;;  %14520 = vmatprep.subr.bf16.mxu1 %v21620_v23  ;;  %v21695_v22 = vld [vmem:[#allocation5 + $0x1560] ss:$36 sps:$4 sm:$0xff]   ;;  %v21698_v23 = vld [vmem:[#allocation5 + $0x1568] ss:$36 sps:$4 sm:$0xff]  }
 0x1da   :  { %13906 = vmatpush1.bf16.msra.mxu0 %v21615_v25  ;;  %14521 = vmatpush1.bf16.msra.mxu1 %v21618_v26  ;;  %v21703_v25 = vld [vmem:[#allocation5 + $0x15ac] ss:$36 sps:$4 sm:$0xff]   ;;  %v21706_v26 = vld [vmem:[#allocation5 + $0x15b4] ss:$36 sps:$4 sm:$0xff]  }
 0x1db   :  { %13916 = vmatprep.subr.bf16.mxu0 %v21624_v13  ;;  %14531 = vmatprep.subr.bf16.mxu1 %v21627_v27  ;;  %v21701_v13 = vld [vmem:[#allocation5 + $0x15a8] ss:$36 sps:$4 sm:$0xff]   ;;  %v21704_v27 = vld [vmem:[#allocation5 + $0x15b0] ss:$36 sps:$4 sm:$0xff]  }
 0x1dd   :  { %13908 = vmatmul.mubr.bf16.vlgmr.msra.gmra.mrb[0].mxu0 %v25096_v29  ;;  %14523 = vmatmul.mubr.bf16.vlgmr.msra.gmra.mrb[0].mxu1 %v25096_v29 }
 0x1de   :  { %13917 = vmatpush1.bf16.msra.mxu0 %v21622_v28  ;;  %14532 = vmatpush1.bf16.msra.mxu1 %v21625_v32  ;;  %v21709_v28 = vld [vmem:[#allocation5 + $0x15f4] ss:$36 sps:$4 sm:$0xff]   ;;  %v21712_v32 = vld [vmem:[#allocation5 + $0x15fc] ss:$36 sps:$4 sm:$0xff]  }
 0x1df   :  { %13918 = vmatprep.subr.bf16.mxu0 %v21631_v33  ;;  %14533 = vmatprep.subr.bf16.mxu1 %v21634_v34  ;;  %v21707_v33 = vld [vmem:[#allocation5 + $0x15f0] ss:$36 sps:$4 sm:$0xff]   ;;  %v21710_v34 = vld [vmem:[#allocation5 + $0x15f8] ss:$36 sps:$4 sm:$0xff]  }
 0x1e0   :  { %13948 = vmatprep.mubr.bf16.mxu0 %v25102_v35  ;;  %14563 = vmatprep.mubr.bf16.mxu1 %v25102_v35 }
 0x1e2   :  { %13919 = vmatpush1.bf16.msra.mxu0 %v21629_v21  ;;  %14534 = vmatpush1.bf16.msra.mxu1 %v21632_v36  ;;  %v21715_v21 = vld [vmem:[#allocation5 + $0x163c] ss:$36 sps:$4 sm:$0xff]   ;;  %v21718_v36 = vld [vmem:[#allocation5 + $0x1644] ss:$36 sps:$4 sm:$0xff]  }
 0x1e3   :  { %13920 = vmatprep.subr.bf16.mxu0 %v21637_v37  ;;  %14535 = vmatprep.subr.bf16.mxu1 %v21640_v38  ;;  %v21713_v37 = vld [vmem:[#allocation5 + $0x1638] ss:$36 sps:$4 sm:$0xff]   ;;  %v21716_v38 = vld [vmem:[#allocation5 + $0x1640] ss:$36 sps:$4 sm:$0xff]  }
 0x1e6   :  { %13921 = vmatpush1.bf16.msra.mxu0 %v21635_v39  ;;  %14536 = vmatpush1.bf16.msra.mxu1 %v21638_v40  ;;  %v21722_v39 = vld [vmem:[#allocation5 + $0x1684] ss:$36 sps:$4 sm:$0xff]   ;;  %v21725_v40 = vld [vmem:[#allocation5 + $0x168c] ss:$36 sps:$4 sm:$0xff]  }
 0x1e7   :  { %13922 = vmatprep.subr.bf16.mxu0 %v21643_v41  ;;  %14537 = vmatprep.subr.bf16.mxu1 %v21646_v42  ;;  %v25108_v41 = vld [vmem:[#allocation2 + $0x28] sm:$0xff]  ;;  %v25112_v42 = vcombine.low %v25098_v31, %v25098_v31  ;;  %v21727_v31 = vld [vmem:[#allocation5 + $0x16c8] ss:$36 sps:$4 sm:$0xff]  }
 0x1ea   :  { %13923 = vmatpush1.bf16.msra.mxu0 %v21641_v43  ;;  %14538 = vmatpush1.bf16.msra.mxu1 %v21644_v44  ;;  %v21720_v43 = vld [vmem:[#allocation5 + $0x1680] ss:$36 sps:$4 sm:$0xff]   ;;  %v21723_v44 = vld [vmem:[#allocation5 + $0x1688] ss:$36 sps:$4 sm:$0xff]  }
 0x1eb   :  { %13924 = vmatprep.subr.bf16.mxu0 %v21649_v45  ;;  %14539 = vmatprep.subr.bf16.mxu1 %v21652_v46  ;;  %v21729_v45 = vld [vmem:[#allocation5 + $0x16cc] ss:$36 sps:$4 sm:$0xff]   ;;  %v21732_v46 = vld [vmem:[#allocation5 + $0x16d4] ss:$36 sps:$4 sm:$0xff]  }
 0x1ee   :  { %13925 = vmatpush1.bf16.msra.mxu0 %v21647_v47  ;;  %14540 = vmatpush1.bf16.msra.mxu1 %v21650_v49  ;;  %v25116_v47 = vcombine.high %v25108_v41, %v25108_v41  ;;  %v21730_v49 = vld [vmem:[#allocation5 + $0x16d0] ss:$36 sps:$4 sm:$0xff]  }
 0x1ef   :  { %13926 = vmatprep.subr.bf16.mxu0 %v21655_v50  ;;  %14541 = vmatprep.subr.bf16.mxu1 %v21658_v51  ;;  %v21735_v50 = vld [vmem:[#allocation5 + $0x1714] ss:$36 sps:$4 sm:$0xff]   ;;  %v21738_v51 = vld [vmem:[#allocation5 + $0x171c] ss:$36 sps:$4 sm:$0xff]  }
 0x1f2   :  { %13927 = vmatpush1.bf16.msra.mxu0 %v21653_v52  ;;  %14542 = vmatpush1.bf16.msra.mxu1 %v21656_v53  ;;  %v21733_v52 = vld [vmem:[#allocation5 + $0x1710] ss:$36 sps:$4 sm:$0xff]   ;;  %v21736_v53 = vld [vmem:[#allocation5 + $0x1718] ss:$36 sps:$4 sm:$0xff]  }
 0x1f3   :  { %13928 = vmatprep.subr.bf16.mxu0 %v21661_v54  ;;  %14543 = vmatprep.subr.bf16.mxu1 %v21664_v55  ;;  %v21741_v54 = vld [vmem:[#allocation5 + $0x175c] ss:$36 sps:$4 sm:$0xff]   ;;  %v21744_v55 = vld [vmem:[#allocation5 + $0x1764] ss:$36 sps:$4 sm:$0xff]  }
 0x1f6   :  { %13929 = vmatpush1.bf16.msra.mxu0 %v21659_v56  ;;  %14544 = vmatpush1.bf16.msra.mxu1 %v21662_v57  ;;  %v21739_v56 = vld [vmem:[#allocation5 + $0x1758] ss:$36 sps:$4 sm:$0xff]   ;;  %v21742_v57 = vld [vmem:[#allocation5 + $0x1760] ss:$36 sps:$4 sm:$0xff]  }
 0x1f7   :  { %13930 = vmatprep.subr.bf16.mxu0 %v21667_v58  ;;  %14545 = vmatprep.subr.bf16.mxu1 %v21670_v59  ;;  %v21747_v58 = vld [vmem:[#allocation5 + $0x17a4] ss:$36 sps:$4 sm:$0xff]   ;;  %v21750_v59 = vld [vmem:[#allocation5 + $0x17ac] ss:$36 sps:$4 sm:$0xff]  }
 0x1fa   :  { %13931 = vmatpush1.bf16.msra.mxu0 %v21665_v60  ;;  %14546 = vmatpush1.bf16.msra.mxu1 %v21668_v61  ;;  %v21745_v60 = vld [vmem:[#allocation5 + $0x17a0] ss:$36 sps:$4 sm:$0xff]   ;;  %v21748_v61 = vld [vmem:[#allocation5 + $0x17a8] ss:$36 sps:$4 sm:$0xff]  }
 0x1fb   :  { %13932 = vmatprep.subr.bf16.mxu0 %v21673_v62  ;;  %14547 = vmatprep.subr.bf16.mxu1 %v21676_v63  ;;  %v21753_v62 = vld [vmem:[#allocation5 + $0x17ec] ss:$36 sps:$4 sm:$0xff]   ;;  %v21756_v63 = vld [vmem:[#allocation5 + $0x17f4] ss:$36 sps:$4 sm:$0xff]  }
 0x1fe   :  { %13933 = vmatpush1.bf16.msra.mxu0 %v21671_v0  ;;  %14548 = vmatpush1.bf16.msra.mxu1 %v21674_v1  ;;  %v21751_v0 = vld [vmem:[#allocation5 + $0x17e8] ss:$36 sps:$4 sm:$0xff]   ;;  %v21754_v1 = vld [vmem:[#allocation5 + $0x17f0] ss:$36 sps:$4 sm:$0xff]  }
 0x1ff   :  { %13934 = vmatprep.subr.bf16.mxu0 %v21679_v2  ;;  %14549 = vmatprep.subr.bf16.mxu1 %v21682_v3  ;;  %v21759_v2 = vld [vmem:[#allocation5 + $0x1834] ss:$36 sps:$4 sm:$0xff]   ;;  %v21762_v3 = vld [vmem:[#allocation5 + $0x183c] ss:$36 sps:$4 sm:$0xff]  }
 0x202   :  { %13935 = vmatpush1.bf16.msra.mxu0 %v21677_v4  ;;  %14550 = vmatpush1.bf16.msra.mxu1 %v21680_v6  ;;  %v21757_v4 = vld [vmem:[#allocation5 + $0x1830] ss:$36 sps:$4 sm:$0xff]   ;;  %v21760_v6 = vld [vmem:[#allocation5 + $0x1838] ss:$36 sps:$4 sm:$0xff]  }
 0x203   :  { %13936 = vmatprep.subr.bf16.mxu0 %v21685_v7  ;;  %14551 = vmatprep.subr.bf16.mxu1 %v21688_v8  ;;  %v21765_v7 = vld [vmem:[#allocation5 + $0x187c] ss:$36 sps:$4 sm:$0xff]   ;;  %v21768_v8 = vld [vmem:[#allocation5 + $0x1884] ss:$36 sps:$4 sm:$0xff]  }
 0x206   :  { %13937 = vmatpush1.bf16.msra.mxu0 %v21683_v9  ;;  %14552 = vmatpush1.bf16.msra.mxu1 %v21686_v11  ;;  %v21763_v9 = vld [vmem:[#allocation5 + $0x1878] ss:$36 sps:$4 sm:$0xff]   ;;  %v21766_v11 = vld [vmem:[#allocation5 + $0x1880] ss:$36 sps:$4 sm:$0xff]  }
 0x207   :  { %13938 = vmatprep.subr.bf16.mxu0 %v21691_v12  ;;  %14553 = vmatprep.subr.bf16.mxu1 %v21694_v14  ;;  %v21771_v12 = vld [vmem:[#allocation5 + $0x18c4] ss:$36 sps:$4 sm:$0xff]   ;;  %v21774_v14 = vld [vmem:[#allocation5 + $0x18cc] ss:$36 sps:$4 sm:$0xff]  }
 0x20a   :  { %13939 = vmatpush1.bf16.msra.mxu0 %v21689_v16  ;;  %14554 = vmatpush1.bf16.msra.mxu1 %v21692_v17  ;;  %v21769_v16 = vld [vmem:[#allocation5 + $0x18c0] ss:$36 sps:$4 sm:$0xff]   ;;  %v21772_v17 = vld [vmem:[#allocation5 + $0x18c8] ss:$36 sps:$4 sm:$0xff]  }
 0x20b   :  { %13940 = vmatprep.subr.bf16.mxu0 %v21697_v18  ;;  %14555 = vmatprep.subr.bf16.mxu1 %v21700_v19  ;;  %v21777_v18 = vld [vmem:[#allocation5 + $0x190c] ss:$36 sps:$4 sm:$0xff]   ;;  %v21780_v19 = vld [vmem:[#allocation5 + $0x1914] ss:$36 sps:$4 sm:$0xff]  }
 0x20e   :  { %13941 = vmatpush1.bf16.msra.mxu0 %v21695_v22  ;;  %14556 = vmatpush1.bf16.msra.mxu1 %v21698_v23  ;;  %v21775_v22 = vld [vmem:[#allocation5 + $0x1908] ss:$36 sps:$4 sm:$0xff]   ;;  %v21778_v23 = vld [vmem:[#allocation5 + $0x1910] ss:$36 sps:$4 sm:$0xff]  }
 0x20f   :  { %13942 = vmatprep.subr.bf16.mxu0 %v21703_v25  ;;  %14557 = vmatprep.subr.bf16.mxu1 %v21706_v26  ;;  %v21783_v25 = vld [vmem:[#allocation5 + $0x1954] ss:$36 sps:$4 sm:$0xff]   ;;  %v21786_v26 = vld [vmem:[#allocation5 + $0x195c] ss:$36 sps:$4 sm:$0xff]  }
 0x212   :  { %13943 = vmatpush1.bf16.msra.mxu0 %v21701_v13  ;;  %14558 = vmatpush1.bf16.msra.mxu1 %v21704_v27  ;;  %v21781_v13 = vld [vmem:[#allocation5 + $0x1950] ss:$36 sps:$4 sm:$0xff]   ;;  %v21784_v27 = vld [vmem:[#allocation5 + $0x1958] ss:$36 sps:$4 sm:$0xff]  }
 0x213   :  { %13944 = vmatprep.subr.bf16.mxu0 %v21709_v28  ;;  %14559 = vmatprep.subr.bf16.mxu1 %v21712_v32  ;;  %v21789_v28 = vld [vmem:[#allocation5 + $0x199c] ss:$36 sps:$4 sm:$0xff]   ;;  %v21792_v32 = vld [vmem:[#allocation5 + $0x19a4] ss:$36 sps:$4 sm:$0xff]  }
 0x216   :  { %13945 = vmatpush1.bf16.msra.mxu0 %v21707_v33  ;;  %14560 = vmatpush1.bf16.msra.mxu1 %v21710_v34  ;;  %v21787_v33 = vld [vmem:[#allocation5 + $0x1998] ss:$36 sps:$4 sm:$0xff]   ;;  %v21790_v34 = vld [vmem:[#allocation5 + $0x19a0] ss:$36 sps:$4 sm:$0xff]  }
 0x217   :  { %13946 = vmatprep.subr.bf16.mxu0 %v21715_v21  ;;  %14561 = vmatprep.subr.bf16.mxu1 %v21718_v36  ;;  %v21795_v21 = vld [vmem:[#allocation5 + $0x19e4] ss:$36 sps:$4 sm:$0xff]   ;;  %v21798_v36 = vld [vmem:[#allocation5 + $0x19ec] ss:$36 sps:$4 sm:$0xff]  }
 0x21a   :  { %13947 = vmatpush1.bf16.msra.mxu0 %v21713_v37  ;;  %14562 = vmatpush1.bf16.msra.mxu1 %v21716_v38  ;;  %v21793_v37 = vld [vmem:[#allocation5 + $0x19e0] ss:$36 sps:$4 sm:$0xff]   ;;  %v21796_v38 = vld [vmem:[#allocation5 + $0x19e8] ss:$36 sps:$4 sm:$0xff]  }
 0x21b   :  { %13957 = vmatprep.subr.bf16.mxu0 %v21722_v39  ;;  %14572 = vmatprep.subr.bf16.mxu1 %v21725_v40  ;;  %v21801_v39 = vld [vmem:[#allocation5 + $0x1a2c] ss:$36 sps:$4 sm:$0xff]   ;;  %v21804_v40 = vld [vmem:[#allocation5 + $0x1a34] ss:$36 sps:$4 sm:$0xff]  }
 0x21d   :  { %13949 = vmatmul.mubr.bf16.vlgmr.msra.gmra.mrb[0].mxu0 %v25112_v42  ;;  %14564 = vmatmul.mubr.bf16.vlgmr.msra.gmra.mrb[0].mxu1 %v25112_v42 }
 0x21e   :  { %13958 = vmatpush1.bf16.msra.mxu0 %v21720_v43  ;;  %14573 = vmatpush1.bf16.msra.mxu1 %v21723_v44  ;;  %v21799_v43 = vld [vmem:[#allocation5 + $0x1a28] ss:$36 sps:$4 sm:$0xff]   ;;  %v21802_v44 = vld [vmem:[#allocation5 + $0x1a30] ss:$36 sps:$4 sm:$0xff]  }
 0x21f   :  { %13959 = vmatprep.subr.bf16.mxu0 %v21729_v45  ;;  %14574 = vmatprep.subr.bf16.mxu1 %v21732_v46  ;;  %v21807_v45 = vld [vmem:[#allocation5 + $0x1a74] ss:$36 sps:$4 sm:$0xff]   ;;  %v21810_v46 = vld [vmem:[#allocation5 + $0x1a7c] ss:$36 sps:$4 sm:$0xff]  }
 0x220   :  { %13989 = vmatprep.mubr.bf16.mxu0 %v25116_v47  ;;  %14604 = vmatprep.mubr.bf16.mxu1 %v25116_v47 }
 0x222   :  { %13960 = vmatpush1.bf16.msra.mxu0 %v21727_v31  ;;  %14575 = vmatpush1.bf16.msra.mxu1 %v21730_v49  ;;  %v21805_v31 = vld [vmem:[#allocation5 + $0x1a70] ss:$36 sps:$4 sm:$0xff]   ;;  %v21808_v49 = vld [vmem:[#allocation5 + $0x1a78] ss:$36 sps:$4 sm:$0xff]  }
 0x223   :  { %13961 = vmatprep.subr.bf16.mxu0 %v21735_v50  ;;  %14576 = vmatprep.subr.bf16.mxu1 %v21738_v51  ;;  %v21813_v50 = vld [vmem:[#allocation5 + $0x1abc] ss:$36 sps:$4 sm:$0xff]   ;;  %v21816_v51 = vld [vmem:[#allocation5 + $0x1ac4] ss:$36 sps:$4 sm:$0xff]  }
 0x226   :  { %13962 = vmatpush1.bf16.msra.mxu0 %v21733_v52  ;;  %14577 = vmatpush1.bf16.msra.mxu1 %v21736_v53  ;;  %v21811_v52 = vld [vmem:[#allocation5 + $0x1ab8] ss:$36 sps:$4 sm:$0xff]   ;;  %v21814_v53 = vld [vmem:[#allocation5 + $0x1ac0] ss:$36 sps:$4 sm:$0xff]  }
 0x227   :  { %13963 = vmatprep.subr.bf16.mxu0 %v21741_v54  ;;  %14578 = vmatprep.subr.bf16.mxu1 %v21744_v55  ;;  %v21820_v54 = vld [vmem:[#allocation5 + $0x1b04] ss:$36 sps:$4 sm:$0xff]   ;;  %v21823_v55 = vld [vmem:[#allocation5 + $0x1b0c] ss:$36 sps:$4 sm:$0xff]  }
 0x22a   :  { %13964 = vmatpush1.bf16.msra.mxu0 %v21739_v56  ;;  %14579 = vmatpush1.bf16.msra.mxu1 %v21742_v57  ;;  %v25122_v56 = vld [vmem:[#allocation2 + $0x30] sm:$0xff]  ;;  %v25126_v57 = vcombine.low %v25108_v41, %v25108_v41  ;;  %v21825_v41 = vld [vmem:[#allocation5 + $0x1b48] ss:$36 sps:$4 sm:$0xff]  }
 0x22b   :  { %13965 = vmatprep.subr.bf16.mxu0 %v21747_v58  ;;  %14580 = vmatprep.subr.bf16.mxu1 %v21750_v59  ;;  %v21818_v58 = vld [vmem:[#allocation5 + $0x1b00] ss:$36 sps:$4 sm:$0xff]   ;;  %v21821_v59 = vld [vmem:[#allocation5 + $0x1b08] ss:$36 sps:$4 sm:$0xff]  }
 0x22e   :  { %13966 = vmatpush1.bf16.msra.mxu0 %v21745_v60  ;;  %14581 = vmatpush1.bf16.msra.mxu1 %v21748_v61  ;;  %v21827_v60 = vld [vmem:[#allocation5 + $0x1b4c] ss:$36 sps:$4 sm:$0xff]   ;;  %v21830_v61 = vld [vmem:[#allocation5 + $0x1b54] ss:$36 sps:$4 sm:$0xff]  }
 0x22f   :  { %13967 = vmatprep.subr.bf16.mxu0 %v21753_v62  ;;  %14582 = vmatprep.subr.bf16.mxu1 %v21756_v63  ;;  %v25130_v62 = vcombine.high %v25122_v56, %v25122_v56  ;;  %v21828_v63 = vld [vmem:[#allocation5 + $0x1b50] ss:$36 sps:$4 sm:$0xff]  }
 0x232   :  { %13968 = vmatpush1.bf16.msra.mxu0 %v21751_v0  ;;  %14583 = vmatpush1.bf16.msra.mxu1 %v21754_v1  ;;  %v21833_v0 = vld [vmem:[#allocation5 + $0x1b94] ss:$36 sps:$4 sm:$0xff]   ;;  %v21836_v1 = vld [vmem:[#allocation5 + $0x1b9c] ss:$36 sps:$4 sm:$0xff]  }
 0x233   :  { %13969 = vmatprep.subr.bf16.mxu0 %v21759_v2  ;;  %14584 = vmatprep.subr.bf16.mxu1 %v21762_v3  ;;  %v21831_v2 = vld [vmem:[#allocation5 + $0x1b90] ss:$36 sps:$4 sm:$0xff]   ;;  %v21834_v3 = vld [vmem:[#allocation5 + $0x1b98] ss:$36 sps:$4 sm:$0xff]  }
 0x236   :  { %13970 = vmatpush1.bf16.msra.mxu0 %v21757_v4  ;;  %14585 = vmatpush1.bf16.msra.mxu1 %v21760_v6  ;;  %v21839_v4 = vld [vmem:[#allocation5 + $0x1bdc] ss:$36 sps:$4 sm:$0xff]   ;;  %v21842_v6 = vld [vmem:[#allocation5 + $0x1be4] ss:$36 sps:$4 sm:$0xff]  }
 0x237   :  { %13971 = vmatprep.subr.bf16.mxu0 %v21765_v7  ;;  %14586 = vmatprep.subr.bf16.mxu1 %v21768_v8  ;;  %v21837_v7 = vld [vmem:[#allocation5 + $0x1bd8] ss:$36 sps:$4 sm:$0xff]   ;;  %v21840_v8 = vld [vmem:[#allocation5 + $0x1be0] ss:$36 sps:$4 sm:$0xff]  }
 0x23a   :  { %13972 = vmatpush1.bf16.msra.mxu0 %v21763_v9  ;;  %14587 = vmatpush1.bf16.msra.mxu1 %v21766_v11  ;;  %v21845_v9 = vld [vmem:[#allocation5 + $0x1c24] ss:$36 sps:$4 sm:$0xff]   ;;  %v21848_v11 = vld [vmem:[#allocation5 + $0x1c2c] ss:$36 sps:$4 sm:$0xff]  }
 0x23b   :  { %13973 = vmatprep.subr.bf16.mxu0 %v21771_v12  ;;  %14588 = vmatprep.subr.bf16.mxu1 %v21774_v14  ;;  %v21843_v12 = vld [vmem:[#allocation5 + $0x1c20] ss:$36 sps:$4 sm:$0xff]   ;;  %v21846_v14 = vld [vmem:[#allocation5 + $0x1c28] ss:$36 sps:$4 sm:$0xff]  }
 0x23e   :  { %13974 = vmatpush1.bf16.msra.mxu0 %v21769_v16  ;;  %14589 = vmatpush1.bf16.msra.mxu1 %v21772_v17  ;;  %v21851_v16 = vld [vmem:[#allocation5 + $0x1c6c] ss:$36 sps:$4 sm:$0xff]   ;;  %v21854_v17 = vld [vmem:[#allocation5 + $0x1c74] ss:$36 sps:$4 sm:$0xff]  }
 0x23f   :  { %13975 = vmatprep.subr.bf16.mxu0 %v21777_v18  ;;  %14590 = vmatprep.subr.bf16.mxu1 %v21780_v19  ;;  %v21849_v18 = vld [vmem:[#allocation5 + $0x1c68] ss:$36 sps:$4 sm:$0xff]   ;;  %v21852_v19 = vld [vmem:[#allocation5 + $0x1c70] ss:$36 sps:$4 sm:$0xff]  }
 0x242   :  { %13976 = vmatpush1.bf16.msra.mxu0 %v21775_v22  ;;  %14591 = vmatpush1.bf16.msra.mxu1 %v21778_v23  ;;  %v21857_v22 = vld [vmem:[#allocation5 + $0x1cb4] ss:$36 sps:$4 sm:$0xff]   ;;  %v21860_v23 = vld [vmem:[#allocation5 + $0x1cbc] ss:$36 sps:$4 sm:$0xff]  }
 0x243   :  { %13977 = vmatprep.subr.bf16.mxu0 %v21783_v25  ;;  %14592 = vmatprep.subr.bf16.mxu1 %v21786_v26  ;;  %v21855_v25 = vld [vmem:[#allocation5 + $0x1cb0] ss:$36 sps:$4 sm:$0xff]   ;;  %v21858_v26 = vld [vmem:[#allocation5 + $0x1cb8] ss:$36 sps:$4 sm:$0xff]  }
 0x246   :  { %13978 = vmatpush1.bf16.msra.mxu0 %v21781_v13  ;;  %14593 = vmatpush1.bf16.msra.mxu1 %v21784_v27  ;;  %v21863_v13 = vld [vmem:[#allocation5 + $0x1cfc] ss:$36 sps:$4 sm:$0xff]   ;;  %v21866_v27 = vld [vmem:[#allocation5 + $0x1d04] ss:$36 sps:$4 sm:$0xff]  }
 0x247   :  { %13979 = vmatprep.subr.bf16.mxu0 %v21789_v28  ;;  %14594 = vmatprep.subr.bf16.mxu1 %v21792_v32  ;;  %v21861_v28 = vld [vmem:[#allocation5 + $0x1cf8] ss:$36 sps:$4 sm:$0xff]   ;;  %v21864_v32 = vld [vmem:[#allocation5 + $0x1d00] ss:$36 sps:$4 sm:$0xff]  }
 0x24a   :  { %13980 = vmatpush1.bf16.msra.mxu0 %v21787_v33  ;;  %14595 = vmatpush1.bf16.msra.mxu1 %v21790_v34  ;;  %v21869_v33 = vld [vmem:[#allocation5 + $0x1d44] ss:$36 sps:$4 sm:$0xff]   ;;  %v21872_v34 = vld [vmem:[#allocation5 + $0x1d4c] ss:$36 sps:$4 sm:$0xff]  }
 0x24b   :  { %13981 = vmatprep.subr.bf16.mxu0 %v21795_v21  ;;  %14596 = vmatprep.subr.bf16.mxu1 %v21798_v36  ;;  %v21867_v21 = vld [vmem:[#allocation5 + $0x1d40] ss:$36 sps:$4 sm:$0xff]   ;;  %v21870_v36 = vld [vmem:[#allocation5 + $0x1d48] ss:$36 sps:$4 sm:$0xff]  }
 0x24e   :  { %13982 = vmatpush1.bf16.msra.mxu0 %v21793_v37  ;;  %14597 = vmatpush1.bf16.msra.mxu1 %v21796_v38  ;;  %v21875_v37 = vld [vmem:[#allocation5 + $0x1d8c] ss:$36 sps:$4 sm:$0xff]   ;;  %v21878_v38 = vld [vmem:[#allocation5 + $0x1d94] ss:$36 sps:$4 sm:$0xff]  }
 0x24f   :  { %13983 = vmatprep.subr.bf16.mxu0 %v21801_v39  ;;  %14598 = vmatprep.subr.bf16.mxu1 %v21804_v40  ;;  %v21873_v39 = vld [vmem:[#allocation5 + $0x1d88] ss:$36 sps:$4 sm:$0xff]   ;;  %v21876_v40 = vld [vmem:[#allocation5 + $0x1d90] ss:$36 sps:$4 sm:$0xff]  }
 0x252   :  { %13984 = vmatpush1.bf16.msra.mxu0 %v21799_v43  ;;  %14599 = vmatpush1.bf16.msra.mxu1 %v21802_v44  ;;  %v21881_v43 = vld [vmem:[#allocation5 + $0x1dd4] ss:$36 sps:$4 sm:$0xff]   ;;  %v21884_v44 = vld [vmem:[#allocation5 + $0x1ddc] ss:$36 sps:$4 sm:$0xff]  }
 0x253   :  { %13985 = vmatprep.subr.bf16.mxu0 %v21807_v45  ;;  %14600 = vmatprep.subr.bf16.mxu1 %v21810_v46  ;;  %v21879_v45 = vld [vmem:[#allocation5 + $0x1dd0] ss:$36 sps:$4 sm:$0xff]   ;;  %v21882_v46 = vld [vmem:[#allocation5 + $0x1dd8] ss:$36 sps:$4 sm:$0xff]  }
 0x256   :  { %13986 = vmatpush1.bf16.msra.mxu0 %v21805_v31  ;;  %14601 = vmatpush1.bf16.msra.mxu1 %v21808_v49  ;;  %v21887_v31 = vld [vmem:[#allocation5 + $0x1e1c] ss:$36 sps:$4 sm:$0xff]   ;;  %v21890_v49 = vld [vmem:[#allocation5 + $0x1e24] ss:$36 sps:$4 sm:$0xff]  }
 0x257   :  { %13987 = vmatprep.subr.bf16.mxu0 %v21813_v50  ;;  %14602 = vmatprep.subr.bf16.mxu1 %v21816_v51  ;;  %v21885_v50 = vld [vmem:[#allocation5 + $0x1e18] ss:$36 sps:$4 sm:$0xff]   ;;  %v21888_v51 = vld [vmem:[#allocation5 + $0x1e20] ss:$36 sps:$4 sm:$0xff]  }
 0x25a   :  { %13988 = vmatpush1.bf16.msra.mxu0 %v21811_v52  ;;  %14603 = vmatpush1.bf16.msra.mxu1 %v21814_v53  ;;  %v21893_v52 = vld [vmem:[#allocation5 + $0x1e64] ss:$36 sps:$4 sm:$0xff]   ;;  %v21896_v53 = vld [vmem:[#allocation5 + $0x1e6c] ss:$36 sps:$4 sm:$0xff]  }
 0x25b   :  { %13998 = vmatprep.subr.bf16.mxu0 %v21820_v54  ;;  %14613 = vmatprep.subr.bf16.mxu1 %v21823_v55  ;;  %v21891_v54 = vld [vmem:[#allocation5 + $0x1e60] ss:$36 sps:$4 sm:$0xff]   ;;  %v21894_v55 = vld [vmem:[#allocation5 + $0x1e68] ss:$36 sps:$4 sm:$0xff]  }
 0x25d   :  { %13990 = vmatmul.mubr.bf16.vlgmr.msra.gmra.mrb[0].mxu0 %v25126_v57  ;;  %14605 = vmatmul.mubr.bf16.vlgmr.msra.gmra.mrb[0].mxu1 %v25126_v57 }
 0x25e   :  { %13999 = vmatpush1.bf16.msra.mxu0 %v21818_v58  ;;  %14614 = vmatpush1.bf16.msra.mxu1 %v21821_v59  ;;  %v21899_v58 = vld [vmem:[#allocation5 + $0x1eac] ss:$36 sps:$4 sm:$0xff]   ;;  %v21902_v59 = vld [vmem:[#allocation5 + $0x1eb4] ss:$36 sps:$4 sm:$0xff]  }
 0x25f   :  { %14000 = vmatprep.subr.bf16.mxu0 %v21827_v60  ;;  %14615 = vmatprep.subr.bf16.mxu1 %v21830_v61  ;;  %v21897_v60 = vld [vmem:[#allocation5 + $0x1ea8] ss:$36 sps:$4 sm:$0xff]   ;;  %v21900_v61 = vld [vmem:[#allocation5 + $0x1eb0] ss:$36 sps:$4 sm:$0xff]  }
 0x260   :  { %14030 = vmatprep.mubr.bf16.mxu0 %v25130_v62  ;;  %14645 = vmatprep.mubr.bf16.mxu1 %v25130_v62 }
 0x262   :  { %14001 = vmatpush1.bf16.msra.mxu0 %v21825_v41  ;;  %14616 = vmatpush1.bf16.msra.mxu1 %v21828_v63  ;;  %v21905_v41 = vld [vmem:[#allocation5 + $0x1ef4] ss:$36 sps:$4 sm:$0xff]   ;;  %v21908_v63 = vld [vmem:[#allocation5 + $0x1efc] ss:$36 sps:$4 sm:$0xff]  }
 0x263   :  { %14002 = vmatprep.subr.bf16.mxu0 %v21833_v0  ;;  %14617 = vmatprep.subr.bf16.mxu1 %v21836_v1  ;;  %v21903_v0 = vld [vmem:[#allocation5 + $0x1ef0] ss:$36 sps:$4 sm:$0xff]   ;;  %v21906_v1 = vld [vmem:[#allocation5 + $0x1ef8] ss:$36 sps:$4 sm:$0xff]  }
 0x266   :  { %14003 = vmatpush1.bf16.msra.mxu0 %v21831_v2  ;;  %14618 = vmatpush1.bf16.msra.mxu1 %v21834_v3  ;;  %v21911_v2 = vld [vmem:[#allocation5 + $0x1f3c] ss:$36 sps:$4 sm:$0xff]   ;;  %v21914_v3 = vld [vmem:[#allocation5 + $0x1f44] ss:$36 sps:$4 sm:$0xff]  }
 0x267   :  { %14004 = vmatprep.subr.bf16.mxu0 %v21839_v4  ;;  %14619 = vmatprep.subr.bf16.mxu1 %v21842_v6  ;;  %v21909_v4 = vld [vmem:[#allocation5 + $0x1f38] ss:$36 sps:$4 sm:$0xff]   ;;  %v21912_v6 = vld [vmem:[#allocation5 + $0x1f40] ss:$36 sps:$4 sm:$0xff]  }
 0x26a   :  { %14005 = vmatpush1.bf16.msra.mxu0 %v21837_v7  ;;  %14620 = vmatpush1.bf16.msra.mxu1 %v21840_v8  ;;  %v21918_v7 = vld [vmem:[#allocation5 + $0x1f84] ss:$36 sps:$4 sm:$0xff]   ;;  %v21921_v8 = vld [vmem:[#allocation5 + $0x1f8c] ss:$36 sps:$4 sm:$0xff]  }
 0x26b   :  { %14006 = vmatprep.subr.bf16.mxu0 %v21845_v9  ;;  %14621 = vmatprep.subr.bf16.mxu1 %v21848_v11  ;;  %v25136_v9 = vld [vmem:[#allocation2 + $0x38] sm:$0xff]  ;;  %v25140_v11 = vcombine.low %v25122_v56, %v25122_v56  ;;  %v21923_v56 = vld [vmem:[#allocation5 + $0x1fc8] ss:$36 sps:$4 sm:$0xff]  }
 0x26e   :  { %14007 = vmatpush1.bf16.msra.mxu0 %v21843_v12  ;;  %14622 = vmatpush1.bf16.msra.mxu1 %v21846_v14  ;;  %v21916_v12 = vld [vmem:[#allocation5 + $0x1f80] ss:$36 sps:$4 sm:$0xff]   ;;  %v21919_v14 = vld [vmem:[#allocation5 + $0x1f88] ss:$36 sps:$4 sm:$0xff]  }
 0x26f   :  { %14008 = vmatprep.subr.bf16.mxu0 %v21851_v16  ;;  %14623 = vmatprep.subr.bf16.mxu1 %v21854_v17  ;;  %v21925_v16 = vld [vmem:[#allocation5 + $0x1fcc] ss:$36 sps:$4 sm:$0xff]   ;;  %v21928_v17 = vld [vmem:[#allocation5 + $0x1fd4] ss:$36 sps:$4 sm:$0xff]  }
 0x272   :  { %14009 = vmatpush1.bf16.msra.mxu0 %v21849_v18  ;;  %14624 = vmatpush1.bf16.msra.mxu1 %v21852_v19  ;;  %v25144_v18 = vcombine.high %v25136_v9, %v25136_v9  ;;  %v21926_v19 = vld [vmem:[#allocation5 + $0x1fd0] ss:$36 sps:$4 sm:$0xff]  }
 0x273   :  { %14010 = vmatprep.subr.bf16.mxu0 %v21857_v22  ;;  %14625 = vmatprep.subr.bf16.mxu1 %v21860_v23  ;;  %v21931_v22 = vld [vmem:[#allocation5 + $0x2014] ss:$36 sps:$4 sm:$0xff]   ;;  %v21934_v23 = vld [vmem:[#allocation5 + $0x201c] ss:$36 sps:$4 sm:$0xff]  }
 0x276   :  { %14011 = vmatpush1.bf16.msra.mxu0 %v21855_v25  ;;  %14626 = vmatpush1.bf16.msra.mxu1 %v21858_v26  ;;  %v21929_v25 = vld [vmem:[#allocation5 + $0x2010] ss:$36 sps:$4 sm:$0xff]   ;;  %v21932_v26 = vld [vmem:[#allocation5 + $0x2018] ss:$36 sps:$4 sm:$0xff]  }
 0x277   :  { %14012 = vmatprep.subr.bf16.mxu0 %v21863_v13  ;;  %14627 = vmatprep.subr.bf16.mxu1 %v21866_v27  ;;  %v21937_v13 = vld [vmem:[#allocation5 + $0x205c] ss:$36 sps:$4 sm:$0xff]   ;;  %v21940_v27 = vld [vmem:[#allocation5 + $0x2064] ss:$36 sps:$4 sm:$0xff]  }
 0x27a   :  { %14013 = vmatpush1.bf16.msra.mxu0 %v21861_v28  ;;  %14628 = vmatpush1.bf16.msra.mxu1 %v21864_v32  ;;  %v21935_v28 = vld [vmem:[#allocation5 + $0x2058] ss:$36 sps:$4 sm:$0xff]   ;;  %v21938_v32 = vld [vmem:[#allocation5 + $0x2060] ss:$36 sps:$4 sm:$0xff]  }
 0x27b   :  { %14014 = vmatprep.subr.bf16.mxu0 %v21869_v33  ;;  %14629 = vmatprep.subr.bf16.mxu1 %v21872_v34  ;;  %v21943_v33 = vld [vmem:[#allocation5 + $0x20a4] ss:$36 sps:$4 sm:$0xff]   ;;  %v21946_v34 = vld [vmem:[#allocation5 + $0x20ac] ss:$36 sps:$4 sm:$0xff]  }
 0x27e   :  { %14015 = vmatpush1.bf16.msra.mxu0 %v21867_v21  ;;  %14630 = vmatpush1.bf16.msra.mxu1 %v21870_v36  ;;  %v21941_v21 = vld [vmem:[#allocation5 + $0x20a0] ss:$36 sps:$4 sm:$0xff]   ;;  %v21944_v36 = vld [vmem:[#allocation5 + $0x20a8] ss:$36 sps:$4 sm:$0xff]  }
 0x27f   :  { %14016 = vmatprep.subr.bf16.mxu0 %v21875_v37  ;;  %14631 = vmatprep.subr.bf16.mxu1 %v21878_v38  ;;  %v21949_v37 = vld [vmem:[#allocation5 + $0x20ec] ss:$36 sps:$4 sm:$0xff]   ;;  %v21952_v38 = vld [vmem:[#allocation5 + $0x20f4] ss:$36 sps:$4 sm:$0xff]  }
 0x282   :  { %14017 = vmatpush1.bf16.msra.mxu0 %v21873_v39  ;;  %14632 = vmatpush1.bf16.msra.mxu1 %v21876_v40  ;;  %v21947_v39 = vld [vmem:[#allocation5 + $0x20e8] ss:$36 sps:$4 sm:$0xff]   ;;  %v21950_v40 = vld [vmem:[#allocation5 + $0x20f0] ss:$36 sps:$4 sm:$0xff]  }
 0x283   :  { %14018 = vmatprep.subr.bf16.mxu0 %v21881_v43  ;;  %14633 = vmatprep.subr.bf16.mxu1 %v21884_v44  ;;  %v21955_v43 = vld [vmem:[#allocation5 + $0x2134] ss:$36 sps:$4 sm:$0xff]   ;;  %v21958_v44 = vld [vmem:[#allocation5 + $0x213c] ss:$36 sps:$4 sm:$0xff]  }
 0x286   :  { %14019 = vmatpush1.bf16.msra.mxu0 %v21879_v45  ;;  %14634 = vmatpush1.bf16.msra.mxu1 %v21882_v46  ;;  %v21953_v45 = vld [vmem:[#allocation5 + $0x2130] ss:$36 sps:$4 sm:$0xff]   ;;  %v21956_v46 = vld [vmem:[#allocation5 + $0x2138] ss:$36 sps:$4 sm:$0xff]  }
 0x287   :  { %14020 = vmatprep.subr.bf16.mxu0 %v21887_v31  ;;  %14635 = vmatprep.subr.bf16.mxu1 %v21890_v49  ;;  %v21961_v31 = vld [vmem:[#allocation5 + $0x217c] ss:$36 sps:$4 sm:$0xff]   ;;  %v21964_v49 = vld [vmem:[#allocation5 + $0x2184] ss:$36 sps:$4 sm:$0xff]  }
 0x28a   :  { %14021 = vmatpush1.bf16.msra.mxu0 %v21885_v50  ;;  %14636 = vmatpush1.bf16.msra.mxu1 %v21888_v51  ;;  %v21959_v50 = vld [vmem:[#allocation5 + $0x2178] ss:$36 sps:$4 sm:$0xff]   ;;  %v21962_v51 = vld [vmem:[#allocation5 + $0x2180] ss:$36 sps:$4 sm:$0xff]  }
 0x28b   :  { %14022 = vmatprep.subr.bf16.mxu0 %v21893_v52  ;;  %14637 = vmatprep.subr.bf16.mxu1 %v21896_v53  ;;  %v21967_v52 = vld [vmem:[#allocation5 + $0x21c4] ss:$36 sps:$4 sm:$0xff]   ;;  %v21970_v53 = vld [vmem:[#allocation5 + $0x21cc] ss:$36 sps:$4 sm:$0xff]  }
 0x28e   :  { %14023 = vmatpush1.bf16.msra.mxu0 %v21891_v54  ;;  %14638 = vmatpush1.bf16.msra.mxu1 %v21894_v55  ;;  %v21965_v54 = vld [vmem:[#allocation5 + $0x21c0] ss:$36 sps:$4 sm:$0xff]   ;;  %v21968_v55 = vld [vmem:[#allocation5 + $0x21c8] ss:$36 sps:$4 sm:$0xff]  }
 0x28f   :  { %14024 = vmatprep.subr.bf16.mxu0 %v21899_v58  ;;  %14639 = vmatprep.subr.bf16.mxu1 %v21902_v59  ;;  %v21973_v58 = vld [vmem:[#allocation5 + $0x220c] ss:$36 sps:$4 sm:$0xff]   ;;  %v21976_v59 = vld [vmem:[#allocation5 + $0x2214] ss:$36 sps:$4 sm:$0xff]  }
 0x292   :  { %14025 = vmatpush1.bf16.msra.mxu0 %v21897_v60  ;;  %14640 = vmatpush1.bf16.msra.mxu1 %v21900_v61  ;;  %v21971_v60 = vld [vmem:[#allocation5 + $0x2208] ss:$36 sps:$4 sm:$0xff]   ;;  %v21974_v61 = vld [vmem:[#allocation5 + $0x2210] ss:$36 sps:$4 sm:$0xff]  }
 0x293   :  { %14026 = vmatprep.subr.bf16.mxu0 %v21905_v41  ;;  %14641 = vmatprep.subr.bf16.mxu1 %v21908_v63  ;;  %v21979_v41 = vld [vmem:[#allocation5 + $0x2254] ss:$36 sps:$4 sm:$0xff]   ;;  %v21982_v63 = vld [vmem:[#allocation5 + $0x225c] ss:$36 sps:$4 sm:$0xff]  }
 0x296   :  { %14027 = vmatpush1.bf16.msra.mxu0 %v21903_v0  ;;  %14642 = vmatpush1.bf16.msra.mxu1 %v21906_v1  ;;  %v21977_v0 = vld [vmem:[#allocation5 + $0x2250] ss:$36 sps:$4 sm:$0xff]   ;;  %v21980_v1 = vld [vmem:[#allocation5 + $0x2258] ss:$36 sps:$4 sm:$0xff]  }
 0x297   :  { %14028 = vmatprep.subr.bf16.mxu0 %v21911_v2  ;;  %14643 = vmatprep.subr.bf16.mxu1 %v21914_v3  ;;  %v21985_v2 = vld [vmem:[#allocation5 + $0x229c] ss:$36 sps:$4 sm:$0xff]   ;;  %v21988_v3 = vld [vmem:[#allocation5 + $0x22a4] ss:$36 sps:$4 sm:$0xff]  }
 0x29a   :  { %14029 = vmatpush1.bf16.msra.mxu0 %v21909_v4  ;;  %14644 = vmatpush1.bf16.msra.mxu1 %v21912_v6  ;;  %v21983_v4 = vld [vmem:[#allocation5 + $0x2298] ss:$36 sps:$4 sm:$0xff]   ;;  %v21986_v6 = vld [vmem:[#allocation5 + $0x22a0] ss:$36 sps:$4 sm:$0xff]  }
 0x29b   :  { %14039 = vmatprep.subr.bf16.mxu0 %v21918_v7  ;;  %14654 = vmatprep.subr.bf16.mxu1 %v21921_v8  ;;  %v21991_v7 = vld [vmem:[#allocation5 + $0x22e4] ss:$36 sps:$4 sm:$0xff]   ;;  %v21994_v8 = vld [vmem:[#allocation5 + $0x22ec] ss:$36 sps:$4 sm:$0xff]  }
 0x29d   :  { %14031 = vmatmul.mubr.bf16.vlgmr.msra.gmra.mrb[0].mxu0 %v25140_v11  ;;  %14646 = vmatmul.mubr.bf16.vlgmr.msra.gmra.mrb[0].mxu1 %v25140_v11 }
 0x29e   :  { %14040 = vmatpush1.bf16.msra.mxu0 %v21916_v12  ;;  %14655 = vmatpush1.bf16.msra.mxu1 %v21919_v14  ;;  %v21989_v12 = vld [vmem:[#allocation5 + $0x22e0] ss:$36 sps:$4 sm:$0xff]   ;;  %v21992_v14 = vld [vmem:[#allocation5 + $0x22e8] ss:$36 sps:$4 sm:$0xff]  }
 0x29f   :  { %14041 = vmatprep.subr.bf16.mxu0 %v21925_v16  ;;  %14656 = vmatprep.subr.bf16.mxu1 %v21928_v17  ;;  %v21997_v16 = vld [vmem:[#allocation5 + $0x232c] ss:$36 sps:$4 sm:$0xff]   ;;  %v22000_v17 = vld [vmem:[#allocation5 + $0x2334] ss:$36 sps:$4 sm:$0xff]  }
 0x2a0   :  { %14071 = vmatprep.mubr.bf16.mxu0 %v25144_v18  ;;  %14686 = vmatprep.mubr.bf16.mxu1 %v25144_v18 }
 0x2a2   :  { %14042 = vmatpush1.bf16.msra.mxu0 %v21923_v56  ;;  %14657 = vmatpush1.bf16.msra.mxu1 %v21926_v19  ;;  %v21995_v56 = vld [vmem:[#allocation5 + $0x2328] ss:$36 sps:$4 sm:$0xff]   ;;  %v21998_v19 = vld [vmem:[#allocation5 + $0x2330] ss:$36 sps:$4 sm:$0xff]  }
 0x2a3   :  { %14043 = vmatprep.subr.bf16.mxu0 %v21931_v22  ;;  %14658 = vmatprep.subr.bf16.mxu1 %v21934_v23  ;;  %v22003_v22 = vld [vmem:[#allocation5 + $0x2374] ss:$36 sps:$4 sm:$0xff]   ;;  %v22006_v23 = vld [vmem:[#allocation5 + $0x237c] ss:$36 sps:$4 sm:$0xff]  }
 0x2a6   :  { %14044 = vmatpush1.bf16.msra.mxu0 %v21929_v25  ;;  %14659 = vmatpush1.bf16.msra.mxu1 %v21932_v26  ;;  %v22001_v25 = vld [vmem:[#allocation5 + $0x2370] ss:$36 sps:$4 sm:$0xff]   ;;  %v22004_v26 = vld [vmem:[#allocation5 + $0x2378] ss:$36 sps:$4 sm:$0xff]  }
 0x2a7   :  { %14045 = vmatprep.subr.bf16.mxu0 %v21937_v13  ;;  %14660 = vmatprep.subr.bf16.mxu1 %v21940_v27  ;;  %v22009_v13 = vld [vmem:[#allocation5 + $0x23bc] ss:$36 sps:$4 sm:$0xff]   ;;  %v22012_v27 = vld [vmem:[#allocation5 + $0x23c4] ss:$36 sps:$4 sm:$0xff]  }
 0x2aa   :  { %14046 = vmatpush1.bf16.msra.mxu0 %v21935_v28  ;;  %14661 = vmatpush1.bf16.msra.mxu1 %v21938_v32  ;;  %v22007_v28 = vld [vmem:[#allocation5 + $0x23b8] ss:$36 sps:$4 sm:$0xff]   ;;  %v22010_v32 = vld [vmem:[#allocation5 + $0x23c0] ss:$36 sps:$4 sm:$0xff]  }
 0x2ab   :  { %14047 = vmatprep.subr.bf16.mxu0 %v21943_v33  ;;  %14662 = vmatprep.subr.bf16.mxu1 %v21946_v34  ;;  %v22016_v33 = vld [vmem:[#allocation5 + $0x2404] ss:$36 sps:$4 sm:$0xff]   ;;  %v22019_v34 = vld [vmem:[#allocation5 + $0x240c] ss:$36 sps:$4 sm:$0xff]  }
 0x2ae   :  { %14048 = vmatpush1.bf16.msra.mxu0 %v21941_v21  ;;  %14663 = vmatpush1.bf16.msra.mxu1 %v21944_v36  ;;  %v25150_v21 = vld [vmem:[#allocation2 + $0x40] sm:$0xff]  ;;  %v25154_v36 = vcombine.low %v25136_v9, %v25136_v9 }
 0x2af   :  { %14049 = vmatprep.subr.bf16.mxu0 %v21949_v37  ;;  %14664 = vmatprep.subr.bf16.mxu1 %v21952_v38  ;;  %v22014_v37 = vld [vmem:[#allocation5 + $0x2400] ss:$36 sps:$4 sm:$0xff]   ;;  %v22017_v38 = vld [vmem:[#allocation5 + $0x2408] ss:$36 sps:$4 sm:$0xff]  }
 0x2b0   :  { %v22021_v9 = vld [vmem:[#allocation5 + $0x2448] ss:$36 sps:$4 sm:$0xff]  }
 0x2b2   :  { %14050 = vmatpush1.bf16.msra.mxu0 %v21947_v39  ;;  %14665 = vmatpush1.bf16.msra.mxu1 %v21950_v40  ;;  %v22023_v39 = vld [vmem:[#allocation5 + $0x244c] ss:$36 sps:$4 sm:$0xff]   ;;  %v22026_v40 = vld [vmem:[#allocation5 + $0x2454] ss:$36 sps:$4 sm:$0xff]  }
 0x2b3   :  { %14051 = vmatprep.subr.bf16.mxu0 %v21955_v43  ;;  %14666 = vmatprep.subr.bf16.mxu1 %v21958_v44  ;;  %v25158_v43 = vcombine.high %v25150_v21, %v25150_v21  ;;  %v22024_v44 = vld [vmem:[#allocation5 + $0x2450] ss:$36 sps:$4 sm:$0xff]  }
 0x2b6   :  { %14052 = vmatpush1.bf16.msra.mxu0 %v21953_v45  ;;  %14667 = vmatpush1.bf16.msra.mxu1 %v21956_v46  ;;  %v22029_v45 = vld [vmem:[#allocation5 + $0x2494] ss:$36 sps:$4 sm:$0xff]   ;;  %v22032_v46 = vld [vmem:[#allocation5 + $0x249c] ss:$36 sps:$4 sm:$0xff]  }
 0x2b7   :  { %14053 = vmatprep.subr.bf16.mxu0 %v21961_v31  ;;  %14668 = vmatprep.subr.bf16.mxu1 %v21964_v49  ;;  %v22027_v31 = vld [vmem:[#allocation5 + $0x2490] ss:$36 sps:$4 sm:$0xff]   ;;  %v22030_v49 = vld [vmem:[#allocation5 + $0x2498] ss:$36 sps:$4 sm:$0xff]  }
 0x2ba   :  { %14054 = vmatpush1.bf16.msra.mxu0 %v21959_v50  ;;  %14669 = vmatpush1.bf16.msra.mxu1 %v21962_v51  ;;  %v22035_v50 = vld [vmem:[#allocation5 + $0x24dc] ss:$36 sps:$4 sm:$0xff]   ;;  %v22038_v51 = vld [vmem:[#allocation5 + $0x24e4] ss:$36 sps:$4 sm:$0xff]  }
 0x2bb   :  { %14055 = vmatprep.subr.bf16.mxu0 %v21967_v52  ;;  %14670 = vmatprep.subr.bf16.mxu1 %v21970_v53  ;;  %v22033_v52 = vld [vmem:[#allocation5 + $0x24d8] ss:$36 sps:$4 sm:$0xff]   ;;  %v22036_v53 = vld [vmem:[#allocation5 + $0x24e0] ss:$36 sps:$4 sm:$0xff]  }
 0x2be   :  { %14056 = vmatpush1.bf16.msra.mxu0 %v21965_v54  ;;  %14671 = vmatpush1.bf16.msra.mxu1 %v21968_v55  ;;  %v22041_v54 = vld [vmem:[#allocation5 + $0x2524] ss:$36 sps:$4 sm:$0xff]   ;;  %v22044_v55 = vld [vmem:[#allocation5 + $0x252c] ss:$36 sps:$4 sm:$0xff]  }
 0x2bf   :  { %14057 = vmatprep.subr.bf16.mxu0 %v21973_v58  ;;  %14672 = vmatprep.subr.bf16.mxu1 %v21976_v59  ;;  %v22039_v58 = vld [vmem:[#allocation5 + $0x2520] ss:$36 sps:$4 sm:$0xff]   ;;  %v22042_v59 = vld [vmem:[#allocation5 + $0x2528] ss:$36 sps:$4 sm:$0xff]  }
 0x2c2   :  { %14058 = vmatpush1.bf16.msra.mxu0 %v21971_v60  ;;  %14673 = vmatpush1.bf16.msra.mxu1 %v21974_v61  ;;  %v22047_v60 = vld [vmem:[#allocation5 + $0x256c] ss:$36 sps:$4 sm:$0xff]   ;;  %v22050_v61 = vld [vmem:[#allocation5 + $0x2574] ss:$36 sps:$4 sm:$0xff]  }
 0x2c3   :  { %14059 = vmatprep.subr.bf16.mxu0 %v21979_v41  ;;  %14674 = vmatprep.subr.bf16.mxu1 %v21982_v63  ;;  %v22045_v41 = vld [vmem:[#allocation5 + $0x2568] ss:$36 sps:$4 sm:$0xff]   ;;  %v22048_v63 = vld [vmem:[#allocation5 + $0x2570] ss:$36 sps:$4 sm:$0xff]  }
 0x2c6   :  { %14060 = vmatpush1.bf16.msra.mxu0 %v21977_v0  ;;  %14675 = vmatpush1.bf16.msra.mxu1 %v21980_v1  ;;  %v22053_v0 = vld [vmem:[#allocation5 + $0x25b4] ss:$36 sps:$4 sm:$0xff]   ;;  %v22056_v1 = vld [vmem:[#allocation5 + $0x25bc] ss:$36 sps:$4 sm:$0xff]  }
 0x2c7   :  { %14061 = vmatprep.subr.bf16.mxu0 %v21985_v2  ;;  %14676 = vmatprep.subr.bf16.mxu1 %v21988_v3  ;;  %v22051_v2 = vld [vmem:[#allocation5 + $0x25b0] ss:$36 sps:$4 sm:$0xff]   ;;  %v22054_v3 = vld [vmem:[#allocation5 + $0x25b8] ss:$36 sps:$4 sm:$0xff]  }
 0x2ca   :  { %14062 = vmatpush1.bf16.msra.mxu0 %v21983_v4  ;;  %14677 = vmatpush1.bf16.msra.mxu1 %v21986_v6  ;;  %v22059_v4 = vld [vmem:[#allocation5 + $0x25fc] ss:$36 sps:$4 sm:$0xff]   ;;  %v22062_v6 = vld [vmem:[#allocation5 + $0x2604] ss:$36 sps:$4 sm:$0xff]  }
 0x2cb   :  { %14063 = vmatprep.subr.bf16.mxu0 %v21991_v7  ;;  %14678 = vmatprep.subr.bf16.mxu1 %v21994_v8  ;;  %v22057_v7 = vld [vmem:[#allocation5 + $0x25f8] ss:$36 sps:$4 sm:$0xff]   ;;  %v22060_v8 = vld [vmem:[#allocation5 + $0x2600] ss:$36 sps:$4 sm:$0xff]  }
 0x2ce   :  { %14064 = vmatpush1.bf16.msra.mxu0 %v21989_v12  ;;  %14679 = vmatpush1.bf16.msra.mxu1 %v21992_v14  ;;  %v22065_v12 = vld [vmem:[#allocation5 + $0x2644] ss:$36 sps:$4 sm:$0xff]   ;;  %v22068_v14 = vld [vmem:[#allocation5 + $0x264c] ss:$36 sps:$4 sm:$0xff]  }
 0x2cf   :  { %14065 = vmatprep.subr.bf16.mxu0 %v21997_v16  ;;  %14680 = vmatprep.subr.bf16.mxu1 %v22000_v17  ;;  %v22063_v16 = vld [vmem:[#allocation5 + $0x2640] ss:$36 sps:$4 sm:$0xff]   ;;  %v22066_v17 = vld [vmem:[#allocation5 + $0x2648] ss:$36 sps:$4 sm:$0xff]  }
 0x2d2   :  { %14066 = vmatpush1.bf16.msra.mxu0 %v21995_v56  ;;  %14681 = vmatpush1.bf16.msra.mxu1 %v21998_v19  ;;  %v22071_v56 = vld [vmem:[#allocation5 + $0x268c] ss:$36 sps:$4 sm:$0xff]   ;;  %v22074_v19 = vld [vmem:[#allocation5 + $0x2694] ss:$36 sps:$4 sm:$0xff]  }
 0x2d3   :  { %14067 = vmatprep.subr.bf16.mxu0 %v22003_v22  ;;  %14682 = vmatprep.subr.bf16.mxu1 %v22006_v23  ;;  %v22069_v22 = vld [vmem:[#allocation5 + $0x2688] ss:$36 sps:$4 sm:$0xff]   ;;  %v22072_v23 = vld [vmem:[#allocation5 + $0x2690] ss:$36 sps:$4 sm:$0xff]  }
 0x2d6   :  { %14068 = vmatpush1.bf16.msra.mxu0 %v22001_v25  ;;  %14683 = vmatpush1.bf16.msra.mxu1 %v22004_v26  ;;  %v22077_v25 = vld [vmem:[#allocation5 + $0x26d4] ss:$36 sps:$4 sm:$0xff]   ;;  %v22080_v26 = vld [vmem:[#allocation5 + $0x26dc] ss:$36 sps:$4 sm:$0xff]  }
 0x2d7   :  { %14069 = vmatprep.subr.bf16.mxu0 %v22009_v13  ;;  %14684 = vmatprep.subr.bf16.mxu1 %v22012_v27  ;;  %v22075_v13 = vld [vmem:[#allocation5 + $0x26d0] ss:$36 sps:$4 sm:$0xff]   ;;  %v22078_v27 = vld [vmem:[#allocation5 + $0x26d8] ss:$36 sps:$4 sm:$0xff]  }
 0x2da   :  { %14070 = vmatpush1.bf16.msra.mxu0 %v22007_v28  ;;  %14685 = vmatpush1.bf16.msra.mxu1 %v22010_v32  ;;  %v22083_v28 = vld [vmem:[#allocation5 + $0x271c] ss:$36 sps:$4 sm:$0xff]   ;;  %v22086_v32 = vld [vmem:[#allocation5 + $0x2724] ss:$36 sps:$4 sm:$0xff]  }
 0x2db   :  { %14080 = vmatprep.subr.bf16.mxu0 %v22016_v33  ;;  %14695 = vmatprep.subr.bf16.mxu1 %v22019_v34  ;;  %v22081_v33 = vld [vmem:[#allocation5 + $0x2718] ss:$36 sps:$4 sm:$0xff]   ;;  %v22084_v34 = vld [vmem:[#allocation5 + $0x2720] ss:$36 sps:$4 sm:$0xff]  }
 0x2dd   :  { %14072 = vmatmul.mubr.bf16.vlgmr.msra.gmra.mrb[0].mxu0 %v25154_v36  ;;  %14687 = vmatmul.mubr.bf16.vlgmr.msra.gmra.mrb[0].mxu1 %v25154_v36 }
 0x2de   :  { %14081 = vmatpush1.bf16.msra.mxu0 %v22014_v37  ;;  %14696 = vmatpush1.bf16.msra.mxu1 %v22017_v38  ;;  %v22089_v37 = vld [vmem:[#allocation5 + $0x2764] ss:$36 sps:$4 sm:$0xff]   ;;  %v22092_v38 = vld [vmem:[#allocation5 + $0x276c] ss:$36 sps:$4 sm:$0xff]  }
 0x2df   :  { %14082 = vmatprep.subr.bf16.mxu0 %v22023_v39  ;;  %14697 = vmatprep.subr.bf16.mxu1 %v22026_v40  ;;  %v22087_v39 = vld [vmem:[#allocation5 + $0x2760] ss:$36 sps:$4 sm:$0xff]   ;;  %v22090_v40 = vld [vmem:[#allocation5 + $0x2768] ss:$36 sps:$4 sm:$0xff]  }
 0x2e0   :  { %14112 = vmatprep.mubr.bf16.mxu0 %v25158_v43  ;;  %14727 = vmatprep.mubr.bf16.mxu1 %v25158_v43 }
 0x2e2   :  { %14083 = vmatpush1.bf16.msra.mxu0 %v22021_v9  ;;  %14698 = vmatpush1.bf16.msra.mxu1 %v22024_v44  ;;  %v22095_v9 = vld [vmem:[#allocation5 + $0x27ac] ss:$36 sps:$4 sm:$0xff]   ;;  %v22098_v44 = vld [vmem:[#allocation5 + $0x27b4] ss:$36 sps:$4 sm:$0xff]  }
 0x2e3   :  { %14084 = vmatprep.subr.bf16.mxu0 %v22029_v45  ;;  %14699 = vmatprep.subr.bf16.mxu1 %v22032_v46  ;;  %v22093_v45 = vld [vmem:[#allocation5 + $0x27a8] ss:$36 sps:$4 sm:$0xff]   ;;  %v22096_v46 = vld [vmem:[#allocation5 + $0x27b0] ss:$36 sps:$4 sm:$0xff]  }
 0x2e6   :  { %14085 = vmatpush1.bf16.msra.mxu0 %v22027_v31  ;;  %14700 = vmatpush1.bf16.msra.mxu1 %v22030_v49  ;;  %v22101_v31 = vld [vmem:[#allocation5 + $0x27f4] ss:$36 sps:$4 sm:$0xff]   ;;  %v22104_v49 = vld [vmem:[#allocation5 + $0x27fc] ss:$36 sps:$4 sm:$0xff]  }
 0x2e7   :  { %14086 = vmatprep.subr.bf16.mxu0 %v22035_v50  ;;  %14701 = vmatprep.subr.bf16.mxu1 %v22038_v51  ;;  %v22099_v50 = vld [vmem:[#allocation5 + $0x27f0] ss:$36 sps:$4 sm:$0xff]   ;;  %v22102_v51 = vld [vmem:[#allocation5 + $0x27f8] ss:$36 sps:$4 sm:$0xff]  }
 0x2ea   :  { %14087 = vmatpush1.bf16.msra.mxu0 %v22033_v52  ;;  %14702 = vmatpush1.bf16.msra.mxu1 %v22036_v53  ;;  %v22107_v52 = vld [vmem:[#allocation5 + $0x283c] ss:$36 sps:$4 sm:$0xff]   ;;  %v22110_v53 = vld [vmem:[#allocation5 + $0x2844] ss:$36 sps:$4 sm:$0xff]  }
 0x2eb   :  { %14088 = vmatprep.subr.bf16.mxu0 %v22041_v54  ;;  %14703 = vmatprep.subr.bf16.mxu1 %v22044_v55  ;;  %v22105_v54 = vld [vmem:[#allocation5 + $0x2838] ss:$36 sps:$4 sm:$0xff]   ;;  %v22108_v55 = vld [vmem:[#allocation5 + $0x2840] ss:$36 sps:$4 sm:$0xff]  }
 0x2ee   :  { %14089 = vmatpush1.bf16.msra.mxu0 %v22039_v58  ;;  %14704 = vmatpush1.bf16.msra.mxu1 %v22042_v59  ;;  %v22114_v58 = vld [vmem:[#allocation5 + $0x2884] ss:$36 sps:$4 sm:$0xff]   ;;  %v22117_v59 = vld [vmem:[#allocation5 + $0x288c] ss:$36 sps:$4 sm:$0xff]  }
 0x2ef   :  { %14090 = vmatprep.subr.bf16.mxu0 %v22047_v60  ;;  %14705 = vmatprep.subr.bf16.mxu1 %v22050_v61  ;;  %v25164_v60 = vld [vmem:[#allocation2 + $0x48] sm:$0xff]  ;;  %v25168_v61 = vcombine.low %v25150_v21, %v25150_v21  ;;  %v22119_v21 = vld [vmem:[#allocation5 + $0x28c8] ss:$36 sps:$4 sm:$0xff]  }
 0x2f2   :  { %14091 = vmatpush1.bf16.msra.mxu0 %v22045_v41  ;;  %14706 = vmatpush1.bf16.msra.mxu1 %v22048_v63  ;;  %v22112_v41 = vld [vmem:[#allocation5 + $0x2880] ss:$36 sps:$4 sm:$0xff]   ;;  %v22115_v63 = vld [vmem:[#allocation5 + $0x2888] ss:$36 sps:$4 sm:$0xff]  }
 0x2f3   :  { %14092 = vmatprep.subr.bf16.mxu0 %v22053_v0  ;;  %14707 = vmatprep.subr.bf16.mxu1 %v22056_v1  ;;  %v22121_v0 = vld [vmem:[#allocation5 + $0x28cc] ss:$36 sps:$4 sm:$0xff]   ;;  %v22124_v1 = vld [vmem:[#allocation5 + $0x28d4] ss:$36 sps:$4 sm:$0xff]  }
 0x2f6   :  { %14093 = vmatpush1.bf16.msra.mxu0 %v22051_v2  ;;  %14708 = vmatpush1.bf16.msra.mxu1 %v22054_v3  ;;  %v25172_v2 = vcombine.high %v25164_v60, %v25164_v60  ;;  %v22122_v3 = vld [vmem:[#allocation5 + $0x28d0] ss:$36 sps:$4 sm:$0xff]  }
 0x2f7   :  { %14094 = vmatprep.subr.bf16.mxu0 %v22059_v4  ;;  %14709 = vmatprep.subr.bf16.mxu1 %v22062_v6  ;;  %v22127_v4 = vld [vmem:[#allocation5 + $0x2914] ss:$36 sps:$4 sm:$0xff]   ;;  %v22130_v6 = vld [vmem:[#allocation5 + $0x291c] ss:$36 sps:$4 sm:$0xff]  }
 0x2fa   :  { %14095 = vmatpush1.bf16.msra.mxu0 %v22057_v7  ;;  %14710 = vmatpush1.bf16.msra.mxu1 %v22060_v8  ;;  %v22125_v7 = vld [vmem:[#allocation5 + $0x2910] ss:$36 sps:$4 sm:$0xff]   ;;  %v22128_v8 = vld [vmem:[#allocation5 + $0x2918] ss:$36 sps:$4 sm:$0xff]  }
 0x2fb   :  { %14096 = vmatprep.subr.bf16.mxu0 %v22065_v12  ;;  %14711 = vmatprep.subr.bf16.mxu1 %v22068_v14  ;;  %v22133_v12 = vld [vmem:[#allocation5 + $0x295c] ss:$36 sps:$4 sm:$0xff]   ;;  %v22136_v14 = vld [vmem:[#allocation5 + $0x2964] ss:$36 sps:$4 sm:$0xff]  }
 0x2fe   :  { %14097 = vmatpush1.bf16.msra.mxu0 %v22063_v16  ;;  %14712 = vmatpush1.bf16.msra.mxu1 %v22066_v17  ;;  %v22131_v16 = vld [vmem:[#allocation5 + $0x2958] ss:$36 sps:$4 sm:$0xff]   ;;  %v22134_v17 = vld [vmem:[#allocation5 + $0x2960] ss:$36 sps:$4 sm:$0xff]  }
 0x2ff   :  { %14098 = vmatprep.subr.bf16.mxu0 %v22071_v56  ;;  %14713 = vmatprep.subr.bf16.mxu1 %v22074_v19  ;;  %v22139_v56 = vld [vmem:[#allocation5 + $0x29a4] ss:$36 sps:$4 sm:$0xff]   ;;  %v22142_v19 = vld [vmem:[#allocation5 + $0x29ac] ss:$36 sps:$4 sm:$0xff]  }
 0x302   :  { %14099 = vmatpush1.bf16.msra.mxu0 %v22069_v22  ;;  %14714 = vmatpush1.bf16.msra.mxu1 %v22072_v23  ;;  %v22137_v22 = vld [vmem:[#allocation5 + $0x29a0] ss:$36 sps:$4 sm:$0xff]   ;;  %v22140_v23 = vld [vmem:[#allocation5 + $0x29a8] ss:$36 sps:$4 sm:$0xff]  }
 0x303   :  { %14100 = vmatprep.subr.bf16.mxu0 %v22077_v25  ;;  %14715 = vmatprep.subr.bf16.mxu1 %v22080_v26  ;;  %v22145_v25 = vld [vmem:[#allocation5 + $0x29ec] ss:$36 sps:$4 sm:$0xff]   ;;  %v22148_v26 = vld [vmem:[#allocation5 + $0x29f4] ss:$36 sps:$4 sm:$0xff]  }
 0x306   :  { %14101 = vmatpush1.bf16.msra.mxu0 %v22075_v13  ;;  %14716 = vmatpush1.bf16.msra.mxu1 %v22078_v27  ;;  %v22143_v13 = vld [vmem:[#allocation5 + $0x29e8] ss:$36 sps:$4 sm:$0xff]   ;;  %v22146_v27 = vld [vmem:[#allocation5 + $0x29f0] ss:$36 sps:$4 sm:$0xff]  }
 0x307   :  { %14102 = vmatprep.subr.bf16.mxu0 %v22083_v28  ;;  %14717 = vmatprep.subr.bf16.mxu1 %v22086_v32  ;;  %v22151_v28 = vld [vmem:[#allocation5 + $0x2a34] ss:$36 sps:$4 sm:$0xff]   ;;  %v22154_v32 = vld [vmem:[#allocation5 + $0x2a3c] ss:$36 sps:$4 sm:$0xff]  }
 0x30a   :  { %14103 = vmatpush1.bf16.msra.mxu0 %v22081_v33  ;;  %14718 = vmatpush1.bf16.msra.mxu1 %v22084_v34  ;;  %v22149_v33 = vld [vmem:[#allocation5 + $0x2a30] ss:$36 sps:$4 sm:$0xff]   ;;  %v22152_v34 = vld [vmem:[#allocation5 + $0x2a38] ss:$36 sps:$4 sm:$0xff]  }
 0x30b   :  { %14104 = vmatprep.subr.bf16.mxu0 %v22089_v37  ;;  %14719 = vmatprep.subr.bf16.mxu1 %v22092_v38  ;;  %v22157_v37 = vld [vmem:[#allocation5 + $0x2a7c] ss:$36 sps:$4 sm:$0xff]   ;;  %v22160_v38 = vld [vmem:[#allocation5 + $0x2a84] ss:$36 sps:$4 sm:$0xff]  }
 0x30e   :  { %14105 = vmatpush1.bf16.msra.mxu0 %v22087_v39  ;;  %14720 = vmatpush1.bf16.msra.mxu1 %v22090_v40  ;;  %v22155_v39 = vld [vmem:[#allocation5 + $0x2a78] ss:$36 sps:$4 sm:$0xff]   ;;  %v22158_v40 = vld [vmem:[#allocation5 + $0x2a80] ss:$36 sps:$4 sm:$0xff]  }
 0x30f   :  { %14106 = vmatprep.subr.bf16.mxu0 %v22095_v9  ;;  %14721 = vmatprep.subr.bf16.mxu1 %v22098_v44  ;;  %v22163_v9 = vld [vmem:[#allocation5 + $0x2ac4] ss:$36 sps:$4 sm:$0xff]   ;;  %v22166_v44 = vld [vmem:[#allocation5 + $0x2acc] ss:$36 sps:$4 sm:$0xff]  }
 0x312   :  { %14107 = vmatpush1.bf16.msra.mxu0 %v22093_v45  ;;  %14722 = vmatpush1.bf16.msra.mxu1 %v22096_v46  ;;  %v22161_v45 = vld [vmem:[#allocation5 + $0x2ac0] ss:$36 sps:$4 sm:$0xff]   ;;  %v22164_v46 = vld [vmem:[#allocation5 + $0x2ac8] ss:$36 sps:$4 sm:$0xff]  }
 0x313   :  { %14108 = vmatprep.subr.bf16.mxu0 %v22101_v31  ;;  %14723 = vmatprep.subr.bf16.mxu1 %v22104_v49  ;;  %v22169_v31 = vld [vmem:[#allocation5 + $0x2b0c] ss:$36 sps:$4 sm:$0xff]   ;;  %v22172_v49 = vld [vmem:[#allocation5 + $0x2b14] ss:$36 sps:$4 sm:$0xff]  }
 0x316   :  { %14109 = vmatpush1.bf16.msra.mxu0 %v22099_v50  ;;  %14724 = vmatpush1.bf16.msra.mxu1 %v22102_v51  ;;  %v22167_v50 = vld [vmem:[#allocation5 + $0x2b08] ss:$36 sps:$4 sm:$0xff]   ;;  %v22170_v51 = vld [vmem:[#allocation5 + $0x2b10] ss:$36 sps:$4 sm:$0xff]  }
 0x317   :  { %14110 = vmatprep.subr.bf16.mxu0 %v22107_v52  ;;  %14725 = vmatprep.subr.bf16.mxu1 %v22110_v53  ;;  %v22175_v52 = vld [vmem:[#allocation5 + $0x2b54] ss:$36 sps:$4 sm:$0xff]   ;;  %v22178_v53 = vld [vmem:[#allocation5 + $0x2b5c] ss:$36 sps:$4 sm:$0xff]  }
 0x31a   :  { %14111 = vmatpush1.bf16.msra.mxu0 %v22105_v54  ;;  %14726 = vmatpush1.bf16.msra.mxu1 %v22108_v55  ;;  %v22173_v54 = vld [vmem:[#allocation5 + $0x2b50] ss:$36 sps:$4 sm:$0xff]   ;;  %v22176_v55 = vld [vmem:[#allocation5 + $0x2b58] ss:$36 sps:$4 sm:$0xff]  }
 0x31b   :  { %14121 = vmatprep.subr.bf16.mxu0 %v22114_v58  ;;  %14736 = vmatprep.subr.bf16.mxu1 %v22117_v59  ;;  %v22181_v58 = vld [vmem:[#allocation5 + $0x2b9c] ss:$36 sps:$4 sm:$0xff]   ;;  %v22184_v59 = vld [vmem:[#allocation5 + $0x2ba4] ss:$36 sps:$4 sm:$0xff]  }
 0x31d   :  { %14113 = vmatmul.mubr.bf16.vlgmr.msra.gmra.mrb[0].mxu0 %v25168_v61  ;;  %14728 = vmatmul.mubr.bf16.vlgmr.msra.gmra.mrb[0].mxu1 %v25168_v61 }
 0x31e   :  { %14122 = vmatpush1.bf16.msra.mxu0 %v22112_v41  ;;  %14737 = vmatpush1.bf16.msra.mxu1 %v22115_v63  ;;  %v22179_v41 = vld [vmem:[#allocation5 + $0x2b98] ss:$36 sps:$4 sm:$0xff]   ;;  %v22182_v63 = vld [vmem:[#allocation5 + $0x2ba0] ss:$36 sps:$4 sm:$0xff]  }
 0x31f   :  { %14123 = vmatprep.subr.bf16.mxu0 %v22121_v0  ;;  %14738 = vmatprep.subr.bf16.mxu1 %v22124_v1  ;;  %v22187_v0 = vld [vmem:[#allocation5 + $0x2be4] ss:$36 sps:$4 sm:$0xff]   ;;  %v22190_v1 = vld [vmem:[#allocation5 + $0x2bec] ss:$36 sps:$4 sm:$0xff]  }
 0x320   :  { %14153 = vmatprep.mubr.bf16.mxu0 %v25172_v2  ;;  %14768 = vmatprep.mubr.bf16.mxu1 %v25172_v2 }
 0x322   :  { %14124 = vmatpush1.bf16.msra.mxu0 %v22119_v21  ;;  %14739 = vmatpush1.bf16.msra.mxu1 %v22122_v3  ;;  %v22185_v21 = vld [vmem:[#allocation5 + $0x2be0] ss:$36 sps:$4 sm:$0xff]   ;;  %v22188_v3 = vld [vmem:[#allocation5 + $0x2be8] ss:$36 sps:$4 sm:$0xff]  }
 0x323   :  { %14125 = vmatprep.subr.bf16.mxu0 %v22127_v4  ;;  %14740 = vmatprep.subr.bf16.mxu1 %v22130_v6  ;;  %v22193_v4 = vld [vmem:[#allocation5 + $0x2c2c] ss:$36 sps:$4 sm:$0xff]   ;;  %v22196_v6 = vld [vmem:[#allocation5 + $0x2c34] ss:$36 sps:$4 sm:$0xff]  }
 0x326   :  { %14126 = vmatpush1.bf16.msra.mxu0 %v22125_v7  ;;  %14741 = vmatpush1.bf16.msra.mxu1 %v22128_v8  ;;  %v22191_v7 = vld [vmem:[#allocation5 + $0x2c28] ss:$36 sps:$4 sm:$0xff]   ;;  %v22194_v8 = vld [vmem:[#allocation5 + $0x2c30] ss:$36 sps:$4 sm:$0xff]  }
 0x327   :  { %14127 = vmatprep.subr.bf16.mxu0 %v22133_v12  ;;  %14742 = vmatprep.subr.bf16.mxu1 %v22136_v14  ;;  %v22199_v12 = vld [vmem:[#allocation5 + $0x2c74] ss:$36 sps:$4 sm:$0xff]   ;;  %v22202_v14 = vld [vmem:[#allocation5 + $0x2c7c] ss:$36 sps:$4 sm:$0xff]  }
 0x32a   :  { %14128 = vmatpush1.bf16.msra.mxu0 %v22131_v16  ;;  %14743 = vmatpush1.bf16.msra.mxu1 %v22134_v17  ;;  %v22197_v16 = vld [vmem:[#allocation5 + $0x2c70] ss:$36 sps:$4 sm:$0xff]   ;;  %v22200_v17 = vld [vmem:[#allocation5 + $0x2c78] ss:$36 sps:$4 sm:$0xff]  }
 0x32b   :  { %14129 = vmatprep.subr.bf16.mxu0 %v22139_v56  ;;  %14744 = vmatprep.subr.bf16.mxu1 %v22142_v19  ;;  %v22205_v56 = vld [vmem:[#allocation5 + $0x2cbc] ss:$36 sps:$4 sm:$0xff]   ;;  %v22208_v19 = vld [vmem:[#allocation5 + $0x2cc4] ss:$36 sps:$4 sm:$0xff]  }
 0x32e   :  { %14130 = vmatpush1.bf16.msra.mxu0 %v22137_v22  ;;  %14745 = vmatpush1.bf16.msra.mxu1 %v22140_v23  ;;  %v22203_v22 = vld [vmem:[#allocation5 + $0x2cb8] ss:$36 sps:$4 sm:$0xff]   ;;  %v22206_v23 = vld [vmem:[#allocation5 + $0x2cc0] ss:$36 sps:$4 sm:$0xff]  }
 0x32f   :  { %14131 = vmatprep.subr.bf16.mxu0 %v22145_v25  ;;  %14746 = vmatprep.subr.bf16.mxu1 %v22148_v26  ;;  %v22212_v25 = vld [vmem:[#allocation5 + $0x2d04] ss:$36 sps:$4 sm:$0xff]   ;;  %v22215_v26 = vld [vmem:[#allocation5 + $0x2d0c] ss:$36 sps:$4 sm:$0xff]  }
 0x332   :  { %14132 = vmatpush1.bf16.msra.mxu0 %v22143_v13  ;;  %14747 = vmatpush1.bf16.msra.mxu1 %v22146_v27  ;;  %v25178_v13 = vld [vmem:[#allocation2 + $0x50] sm:$0xff]  ;;  %v25182_v27 = vcombine.low %v25164_v60, %v25164_v60  ;;  %v22217_v60 = vld [vmem:[#allocation5 + $0x2d48] ss:$36 sps:$4 sm:$0xff]  }
 0x333   :  { %14133 = vmatprep.subr.bf16.mxu0 %v22151_v28  ;;  %14748 = vmatprep.subr.bf16.mxu1 %v22154_v32  ;;  %v22210_v28 = vld [vmem:[#allocation5 + $0x2d00] ss:$36 sps:$4 sm:$0xff]   ;;  %v22213_v32 = vld [vmem:[#allocation5 + $0x2d08] ss:$36 sps:$4 sm:$0xff]  }
 0x336   :  { %14134 = vmatpush1.bf16.msra.mxu0 %v22149_v33  ;;  %14749 = vmatpush1.bf16.msra.mxu1 %v22152_v34  ;;  %v22219_v33 = vld [vmem:[#allocation5 + $0x2d4c] ss:$36 sps:$4 sm:$0xff]   ;;  %v22222_v34 = vld [vmem:[#allocation5 + $0x2d54] ss:$36 sps:$4 sm:$0xff]  }
 0x337   :  { %14135 = vmatprep.subr.bf16.mxu0 %v22157_v37  ;;  %14750 = vmatprep.subr.bf16.mxu1 %v22160_v38  ;;  %v25186_v37 = vcombine.high %v25178_v13, %v25178_v13  ;;  %v22220_v38 = vld [vmem:[#allocation5 + $0x2d50] ss:$36 sps:$4 sm:$0xff]  }
 0x33a   :  { %14136 = vmatpush1.bf16.msra.mxu0 %v22155_v39  ;;  %14751 = vmatpush1.bf16.msra.mxu1 %v22158_v40  ;;  %v22225_v39 = vld [vmem:[#allocation5 + $0x2d94] ss:$36 sps:$4 sm:$0xff]   ;;  %v22228_v40 = vld [vmem:[#allocation5 + $0x2d9c] ss:$36 sps:$4 sm:$0xff]  }
 0x33b   :  { %14137 = vmatprep.subr.bf16.mxu0 %v22163_v9  ;;  %14752 = vmatprep.subr.bf16.mxu1 %v22166_v44  ;;  %v22223_v9 = vld [vmem:[#allocation5 + $0x2d90] ss:$36 sps:$4 sm:$0xff]   ;;  %v22226_v44 = vld [vmem:[#allocation5 + $0x2d98] ss:$36 sps:$4 sm:$0xff]  }
 0x33e   :  { %14138 = vmatpush1.bf16.msra.mxu0 %v22161_v45  ;;  %14753 = vmatpush1.bf16.msra.mxu1 %v22164_v46  ;;  %v22231_v45 = vld [vmem:[#allocation5 + $0x2ddc] ss:$36 sps:$4 sm:$0xff]   ;;  %v22234_v46 = vld [vmem:[#allocation5 + $0x2de4] ss:$36 sps:$4 sm:$0xff]  }
 0x33f   :  { %14139 = vmatprep.subr.bf16.mxu0 %v22169_v31  ;;  %14754 = vmatprep.subr.bf16.mxu1 %v22172_v49  ;;  %v22229_v31 = vld [vmem:[#allocation5 + $0x2dd8] ss:$36 sps:$4 sm:$0xff]   ;;  %v22232_v49 = vld [vmem:[#allocation5 + $0x2de0] ss:$36 sps:$4 sm:$0xff]  }
 0x342   :  { %14140 = vmatpush1.bf16.msra.mxu0 %v22167_v50  ;;  %14755 = vmatpush1.bf16.msra.mxu1 %v22170_v51  ;;  %v22237_v50 = vld [vmem:[#allocation5 + $0x2e24] ss:$36 sps:$4 sm:$0xff]   ;;  %v22240_v51 = vld [vmem:[#allocation5 + $0x2e2c] ss:$36 sps:$4 sm:$0xff]  }
 0x343   :  { %14141 = vmatprep.subr.bf16.mxu0 %v22175_v52  ;;  %14756 = vmatprep.subr.bf16.mxu1 %v22178_v53  ;;  %v22235_v52 = vld [vmem:[#allocation5 + $0x2e20] ss:$36 sps:$4 sm:$0xff]   ;;  %v22238_v53 = vld [vmem:[#allocation5 + $0x2e28] ss:$36 sps:$4 sm:$0xff]  }
 0x346   :  { %14142 = vmatpush1.bf16.msra.mxu0 %v22173_v54  ;;  %14757 = vmatpush1.bf16.msra.mxu1 %v22176_v55  ;;  %v22243_v54 = vld [vmem:[#allocation5 + $0x2e6c] ss:$36 sps:$4 sm:$0xff]   ;;  %v22246_v55 = vld [vmem:[#allocation5 + $0x2e74] ss:$36 sps:$4 sm:$0xff]  }
 0x347   :  { %14143 = vmatprep.subr.bf16.mxu0 %v22181_v58  ;;  %14758 = vmatprep.subr.bf16.mxu1 %v22184_v59  ;;  %v22241_v58 = vld [vmem:[#allocation5 + $0x2e68] ss:$36 sps:$4 sm:$0xff]   ;;  %v22244_v59 = vld [vmem:[#allocation5 + $0x2e70] ss:$36 sps:$4 sm:$0xff]  }
 0x34a   :  { %14144 = vmatpush1.bf16.msra.mxu0 %v22179_v41  ;;  %14759 = vmatpush1.bf16.msra.mxu1 %v22182_v63  ;;  %v22249_v41 = vld [vmem:[#allocation5 + $0x2eb4] ss:$36 sps:$4 sm:$0xff]   ;;  %v22252_v63 = vld [vmem:[#allocation5 + $0x2ebc] ss:$36 sps:$4 sm:$0xff]  }
 0x34b   :  { %14145 = vmatprep.subr.bf16.mxu0 %v22187_v0  ;;  %14760 = vmatprep.subr.bf16.mxu1 %v22190_v1  ;;  %v22247_v0 = vld [vmem:[#allocation5 + $0x2eb0] ss:$36 sps:$4 sm:$0xff]   ;;  %v22250_v1 = vld [vmem:[#allocation5 + $0x2eb8] ss:$36 sps:$4 sm:$0xff]  }
 0x34e   :  { %14146 = vmatpush1.bf16.msra.mxu0 %v22185_v21  ;;  %14761 = vmatpush1.bf16.msra.mxu1 %v22188_v3  ;;  %v22255_v21 = vld [vmem:[#allocation5 + $0x2efc] ss:$36 sps:$4 sm:$0xff]   ;;  %v22258_v3 = vld [vmem:[#allocation5 + $0x2f04] ss:$36 sps:$4 sm:$0xff]  }
 0x34f   :  { %14147 = vmatprep.subr.bf16.mxu0 %v22193_v4  ;;  %14762 = vmatprep.subr.bf16.mxu1 %v22196_v6  ;;  %v22253_v4 = vld [vmem:[#allocation5 + $0x2ef8] ss:$36 sps:$4 sm:$0xff]   ;;  %v22256_v6 = vld [vmem:[#allocation5 + $0x2f00] ss:$36 sps:$4 sm:$0xff]  }
 0x352   :  { %14148 = vmatpush1.bf16.msra.mxu0 %v22191_v7  ;;  %14763 = vmatpush1.bf16.msra.mxu1 %v22194_v8  ;;  %v22261_v7 = vld [vmem:[#allocation5 + $0x2f44] ss:$36 sps:$4 sm:$0xff]   ;;  %v22264_v8 = vld [vmem:[#allocation5 + $0x2f4c] ss:$36 sps:$4 sm:$0xff]  }
 0x353   :  { %14149 = vmatprep.subr.bf16.mxu0 %v22199_v12  ;;  %14764 = vmatprep.subr.bf16.mxu1 %v22202_v14  ;;  %v22259_v12 = vld [vmem:[#allocation5 + $0x2f40] ss:$36 sps:$4 sm:$0xff]   ;;  %v22262_v14 = vld [vmem:[#allocation5 + $0x2f48] ss:$36 sps:$4 sm:$0xff]  }
 0x356   :  { %14150 = vmatpush1.bf16.msra.mxu0 %v22197_v16  ;;  %14765 = vmatpush1.bf16.msra.mxu1 %v22200_v17  ;;  %v22267_v16 = vld [vmem:[#allocation5 + $0x2f8c] ss:$36 sps:$4 sm:$0xff]   ;;  %v22270_v17 = vld [vmem:[#allocation5 + $0x2f94] ss:$36 sps:$4 sm:$0xff]  }
 0x357   :  { %14151 = vmatprep.subr.bf16.mxu0 %v22205_v56  ;;  %14766 = vmatprep.subr.bf16.mxu1 %v22208_v19  ;;  %v22265_v56 = vld [vmem:[#allocation5 + $0x2f88] ss:$36 sps:$4 sm:$0xff]   ;;  %v22268_v19 = vld [vmem:[#allocation5 + $0x2f90] ss:$36 sps:$4 sm:$0xff]  }
 0x35a   :  { %14152 = vmatpush1.bf16.msra.mxu0 %v22203_v22  ;;  %14767 = vmatpush1.bf16.msra.mxu1 %v22206_v23  ;;  %v22273_v22 = vld [vmem:[#allocation5 + $0x2fd4] ss:$36 sps:$4 sm:$0xff]   ;;  %v22276_v23 = vld [vmem:[#allocation5 + $0x2fdc] ss:$36 sps:$4 sm:$0xff]  }
 0x35b   :  { %14162 = vmatprep.subr.bf16.mxu0 %v22212_v25  ;;  %14777 = vmatprep.subr.bf16.mxu1 %v22215_v26  ;;  %v22271_v25 = vld [vmem:[#allocation5 + $0x2fd0] ss:$36 sps:$4 sm:$0xff]   ;;  %v22274_v26 = vld [vmem:[#allocation5 + $0x2fd8] ss:$36 sps:$4 sm:$0xff]  }
 0x35d   :  { %14154 = vmatmul.mubr.bf16.vlgmr.msra.gmra.mrb[0].mxu0 %v25182_v27  ;;  %14769 = vmatmul.mubr.bf16.vlgmr.msra.gmra.mrb[0].mxu1 %v25182_v27 }
 0x35e   :  { %14163 = vmatpush1.bf16.msra.mxu0 %v22210_v28  ;;  %14778 = vmatpush1.bf16.msra.mxu1 %v22213_v32  ;;  %v22279_v28 = vld [vmem:[#allocation5 + $0x301c] ss:$36 sps:$4 sm:$0xff]   ;;  %v22282_v32 = vld [vmem:[#allocation5 + $0x3024] ss:$36 sps:$4 sm:$0xff]  }
 0x35f   :  { %14164 = vmatprep.subr.bf16.mxu0 %v22219_v33  ;;  %14779 = vmatprep.subr.bf16.mxu1 %v22222_v34  ;;  %v22277_v33 = vld [vmem:[#allocation5 + $0x3018] ss:$36 sps:$4 sm:$0xff]   ;;  %v22280_v34 = vld [vmem:[#allocation5 + $0x3020] ss:$36 sps:$4 sm:$0xff]  }
 0x360   :  { %14194 = vmatprep.mubr.bf16.mxu0 %v25186_v37  ;;  %14809 = vmatprep.mubr.bf16.mxu1 %v25186_v37 }
 0x362   :  { %14165 = vmatpush1.bf16.msra.mxu0 %v22217_v60  ;;  %14780 = vmatpush1.bf16.msra.mxu1 %v22220_v38  ;;  %v22285_v60 = vld [vmem:[#allocation5 + $0x3064] ss:$36 sps:$4 sm:$0xff]   ;;  %v22288_v38 = vld [vmem:[#allocation5 + $0x306c] ss:$36 sps:$4 sm:$0xff]  }
 0x363   :  { %14166 = vmatprep.subr.bf16.mxu0 %v22225_v39  ;;  %14781 = vmatprep.subr.bf16.mxu1 %v22228_v40  ;;  %v22283_v39 = vld [vmem:[#allocation5 + $0x3060] ss:$36 sps:$4 sm:$0xff]   ;;  %v22286_v40 = vld [vmem:[#allocation5 + $0x3068] ss:$36 sps:$4 sm:$0xff]  }
 0x366   :  { %14167 = vmatpush1.bf16.msra.mxu0 %v22223_v9  ;;  %14782 = vmatpush1.bf16.msra.mxu1 %v22226_v44  ;;  %v22291_v9 = vld [vmem:[#allocation5 + $0x30ac] ss:$36 sps:$4 sm:$0xff]   ;;  %v22294_v44 = vld [vmem:[#allocation5 + $0x30b4] ss:$36 sps:$4 sm:$0xff]  }
 0x367   :  { %14168 = vmatprep.subr.bf16.mxu0 %v22231_v45  ;;  %14783 = vmatprep.subr.bf16.mxu1 %v22234_v46  ;;  %v22289_v45 = vld [vmem:[#allocation5 + $0x30a8] ss:$36 sps:$4 sm:$0xff]   ;;  %v22292_v46 = vld [vmem:[#allocation5 + $0x30b0] ss:$36 sps:$4 sm:$0xff]  }
 0x36a   :  { %14169 = vmatpush1.bf16.msra.mxu0 %v22229_v31  ;;  %14784 = vmatpush1.bf16.msra.mxu1 %v22232_v49  ;;  %v22297_v31 = vld [vmem:[#allocation5 + $0x30f4] ss:$36 sps:$4 sm:$0xff]   ;;  %v22300_v49 = vld [vmem:[#allocation5 + $0x30fc] ss:$36 sps:$4 sm:$0xff]  }
 0x36b   :  { %14170 = vmatprep.subr.bf16.mxu0 %v22237_v50  ;;  %14785 = vmatprep.subr.bf16.mxu1 %v22240_v51  ;;  %v22295_v50 = vld [vmem:[#allocation5 + $0x30f0] ss:$36 sps:$4 sm:$0xff]   ;;  %v22298_v51 = vld [vmem:[#allocation5 + $0x30f8] ss:$36 sps:$4 sm:$0xff]  }
 0x36e   :  { %14171 = vmatpush1.bf16.msra.mxu0 %v22235_v52  ;;  %14786 = vmatpush1.bf16.msra.mxu1 %v22238_v53  ;;  %v22303_v52 = vld [vmem:[#allocation5 + $0x313c] ss:$36 sps:$4 sm:$0xff]   ;;  %v22306_v53 = vld [vmem:[#allocation5 + $0x3144] ss:$36 sps:$4 sm:$0xff]  }
 0x36f   :  { %14172 = vmatprep.subr.bf16.mxu0 %v22243_v54  ;;  %14787 = vmatprep.subr.bf16.mxu1 %v22246_v55  ;;  %v22301_v54 = vld [vmem:[#allocation5 + $0x3138] ss:$36 sps:$4 sm:$0xff]   ;;  %v22304_v55 = vld [vmem:[#allocation5 + $0x3140] ss:$36 sps:$4 sm:$0xff]  }
 0x372   :  { %14173 = vmatpush1.bf16.msra.mxu0 %v22241_v58  ;;  %14788 = vmatpush1.bf16.msra.mxu1 %v22244_v59  ;;  %v22310_v58 = vld [vmem:[#allocation5 + $0x3184] ss:$36 sps:$4 sm:$0xff]   ;;  %v22313_v59 = vld [vmem:[#allocation5 + $0x318c] ss:$36 sps:$4 sm:$0xff]  }
 0x373   :  { %14174 = vmatprep.subr.bf16.mxu0 %v22249_v41  ;;  %14789 = vmatprep.subr.bf16.mxu1 %v22252_v63  ;;  %v25192_v41 = vld [vmem:[#allocation2 + $0x58] sm:$0xff]  ;;  %v25196_v63 = vcombine.low %v25178_v13, %v25178_v13  ;;  %v22315_v13 = vld [vmem:[#allocation5 + $0x31c8] ss:$36 sps:$4 sm:$0xff]  }
 0x376   :  { %14175 = vmatpush1.bf16.msra.mxu0 %v22247_v0  ;;  %14790 = vmatpush1.bf16.msra.mxu1 %v22250_v1  ;;  %v22308_v0 = vld [vmem:[#allocation5 + $0x3180] ss:$36 sps:$4 sm:$0xff]   ;;  %v22311_v1 = vld [vmem:[#allocation5 + $0x3188] ss:$36 sps:$4 sm:$0xff]  }
 0x377   :  { %14176 = vmatprep.subr.bf16.mxu0 %v22255_v21  ;;  %14791 = vmatprep.subr.bf16.mxu1 %v22258_v3  ;;  %v22317_v21 = vld [vmem:[#allocation5 + $0x31cc] ss:$36 sps:$4 sm:$0xff]   ;;  %v22320_v3 = vld [vmem:[#allocation5 + $0x31d4] ss:$36 sps:$4 sm:$0xff]  }
 0x37a   :  { %14177 = vmatpush1.bf16.msra.mxu0 %v22253_v4  ;;  %14792 = vmatpush1.bf16.msra.mxu1 %v22256_v6  ;;  %v25200_v4 = vcombine.high %v25192_v41, %v25192_v41  ;;  %v22318_v6 = vld [vmem:[#allocation5 + $0x31d0] ss:$36 sps:$4 sm:$0xff]  }
 0x37b   :  { %14178 = vmatprep.subr.bf16.mxu0 %v22261_v7  ;;  %14793 = vmatprep.subr.bf16.mxu1 %v22264_v8  ;;  %v22323_v7 = vld [vmem:[#allocation5 + $0x3214] ss:$36 sps:$4 sm:$0xff]   ;;  %v22326_v8 = vld [vmem:[#allocation5 + $0x321c] ss:$36 sps:$4 sm:$0xff]  }
 0x37e   :  { %14179 = vmatpush1.bf16.msra.mxu0 %v22259_v12  ;;  %14794 = vmatpush1.bf16.msra.mxu1 %v22262_v14  ;;  %v22321_v12 = vld [vmem:[#allocation5 + $0x3210] ss:$36 sps:$4 sm:$0xff]   ;;  %v22324_v14 = vld [vmem:[#allocation5 + $0x3218] ss:$36 sps:$4 sm:$0xff]  }
 0x37f   :  { %14180 = vmatprep.subr.bf16.mxu0 %v22267_v16  ;;  %14795 = vmatprep.subr.bf16.mxu1 %v22270_v17  ;;  %v22329_v16 = vld [vmem:[#allocation5 + $0x325c] ss:$36 sps:$4 sm:$0xff]   ;;  %v22332_v17 = vld [vmem:[#allocation5 + $0x3264] ss:$36 sps:$4 sm:$0xff]  }
 0x382   :  { %14181 = vmatpush1.bf16.msra.mxu0 %v22265_v56  ;;  %14796 = vmatpush1.bf16.msra.mxu1 %v22268_v19  ;;  %v22327_v56 = vld [vmem:[#allocation5 + $0x3258] ss:$36 sps:$4 sm:$0xff]   ;;  %v22330_v19 = vld [vmem:[#allocation5 + $0x3260] ss:$36 sps:$4 sm:$0xff]  }
 0x383   :  { %14182 = vmatprep.subr.bf16.mxu0 %v22273_v22  ;;  %14797 = vmatprep.subr.bf16.mxu1 %v22276_v23  ;;  %v22335_v22 = vld [vmem:[#allocation5 + $0x32a4] ss:$36 sps:$4 sm:$0xff]   ;;  %v22338_v23 = vld [vmem:[#allocation5 + $0x32ac] ss:$36 sps:$4 sm:$0xff]  }
 0x386   :  { %14183 = vmatpush1.bf16.msra.mxu0 %v22271_v25  ;;  %14798 = vmatpush1.bf16.msra.mxu1 %v22274_v26  ;;  %v22333_v25 = vld [vmem:[#allocation5 + $0x32a0] ss:$36 sps:$4 sm:$0xff]   ;;  %v22336_v26 = vld [vmem:[#allocation5 + $0x32a8] ss:$36 sps:$4 sm:$0xff]  }
 0x387   :  { %14184 = vmatprep.subr.bf16.mxu0 %v22279_v28  ;;  %14799 = vmatprep.subr.bf16.mxu1 %v22282_v32  ;;  %v22341_v28 = vld [vmem:[#allocation5 + $0x32ec] ss:$36 sps:$4 sm:$0xff]   ;;  %v22344_v32 = vld [vmem:[#allocation5 + $0x32f4] ss:$36 sps:$4 sm:$0xff]  }
 0x38a   :  { %14185 = vmatpush1.bf16.msra.mxu0 %v22277_v33  ;;  %14800 = vmatpush1.bf16.msra.mxu1 %v22280_v34  ;;  %v22339_v33 = vld [vmem:[#allocation5 + $0x32e8] ss:$36 sps:$4 sm:$0xff]   ;;  %v22342_v34 = vld [vmem:[#allocation5 + $0x32f0] ss:$36 sps:$4 sm:$0xff]  }
 0x38b   :  { %14186 = vmatprep.subr.bf16.mxu0 %v22285_v60  ;;  %14801 = vmatprep.subr.bf16.mxu1 %v22288_v38  ;;  %v22347_v60 = vld [vmem:[#allocation5 + $0x3334] ss:$36 sps:$4 sm:$0xff]   ;;  %v22350_v38 = vld [vmem:[#allocation5 + $0x333c] ss:$36 sps:$4 sm:$0xff]  }
 0x38e   :  { %14187 = vmatpush1.bf16.msra.mxu0 %v22283_v39  ;;  %14802 = vmatpush1.bf16.msra.mxu1 %v22286_v40  ;;  %v22345_v39 = vld [vmem:[#allocation5 + $0x3330] ss:$36 sps:$4 sm:$0xff]   ;;  %v22348_v40 = vld [vmem:[#allocation5 + $0x3338] ss:$36 sps:$4 sm:$0xff]  }
 0x38f   :  { %14188 = vmatprep.subr.bf16.mxu0 %v22291_v9  ;;  %14803 = vmatprep.subr.bf16.mxu1 %v22294_v44  ;;  %v22353_v9 = vld [vmem:[#allocation5 + $0x337c] ss:$36 sps:$4 sm:$0xff]   ;;  %v22356_v44 = vld [vmem:[#allocation5 + $0x3384] ss:$36 sps:$4 sm:$0xff]  }
 0x392   :  { %14189 = vmatpush1.bf16.msra.mxu0 %v22289_v45  ;;  %14804 = vmatpush1.bf16.msra.mxu1 %v22292_v46  ;;  %v22351_v45 = vld [vmem:[#allocation5 + $0x3378] ss:$36 sps:$4 sm:$0xff]   ;;  %v22354_v46 = vld [vmem:[#allocation5 + $0x3380] ss:$36 sps:$4 sm:$0xff]  }
 0x393   :  { %14190 = vmatprep.subr.bf16.mxu0 %v22297_v31  ;;  %14805 = vmatprep.subr.bf16.mxu1 %v22300_v49  ;;  %v22359_v31 = vld [vmem:[#allocation5 + $0x33c4] ss:$36 sps:$4 sm:$0xff]   ;;  %v22362_v49 = vld [vmem:[#allocation5 + $0x33cc] ss:$36 sps:$4 sm:$0xff]  }
 0x396   :  { %14191 = vmatpush1.bf16.msra.mxu0 %v22295_v50  ;;  %14806 = vmatpush1.bf16.msra.mxu1 %v22298_v51  ;;  %v22357_v50 = vld [vmem:[#allocation5 + $0x33c0] ss:$36 sps:$4 sm:$0xff]   ;;  %v22360_v51 = vld [vmem:[#allocation5 + $0x33c8] ss:$36 sps:$4 sm:$0xff]  }
 0x397   :  { %14192 = vmatprep.subr.bf16.mxu0 %v22303_v52  ;;  %14807 = vmatprep.subr.bf16.mxu1 %v22306_v53  ;;  %v22365_v52 = vld [vmem:[#allocation5 + $0x340c] ss:$36 sps:$4 sm:$0xff]   ;;  %v22368_v53 = vld [vmem:[#allocation5 + $0x3414] ss:$36 sps:$4 sm:$0xff]  }
 0x39a   :  { %14193 = vmatpush1.bf16.msra.mxu0 %v22301_v54  ;;  %14808 = vmatpush1.bf16.msra.mxu1 %v22304_v55  ;;  %v22363_v54 = vld [vmem:[#allocation5 + $0x3408] ss:$36 sps:$4 sm:$0xff]   ;;  %v22366_v55 = vld [vmem:[#allocation5 + $0x3410] ss:$36 sps:$4 sm:$0xff]  }
 0x39b   :  { %14203 = vmatprep.subr.bf16.mxu0 %v22310_v58  ;;  %14818 = vmatprep.subr.bf16.mxu1 %v22313_v59  ;;  %v22371_v58 = vld [vmem:[#allocation5 + $0x3454] ss:$36 sps:$4 sm:$0xff]   ;;  %v22374_v59 = vld [vmem:[#allocation5 + $0x345c] ss:$36 sps:$4 sm:$0xff]  }
 0x39d   :  { %14195 = vmatmul.mubr.bf16.vlgmr.msra.gmra.mrb[0].mxu0 %v25196_v63  ;;  %14810 = vmatmul.mubr.bf16.vlgmr.msra.gmra.mrb[0].mxu1 %v25196_v63 }
 0x39e   :  { %14204 = vmatpush1.bf16.msra.mxu0 %v22308_v0  ;;  %14819 = vmatpush1.bf16.msra.mxu1 %v22311_v1  ;;  %v22369_v0 = vld [vmem:[#allocation5 + $0x3450] ss:$36 sps:$4 sm:$0xff]   ;;  %v22372_v1 = vld [vmem:[#allocation5 + $0x3458] ss:$36 sps:$4 sm:$0xff]  }
 0x39f   :  { %14205 = vmatprep.subr.bf16.mxu0 %v22317_v21  ;;  %14820 = vmatprep.subr.bf16.mxu1 %v22320_v3  ;;  %v22377_v21 = vld [vmem:[#allocation5 + $0x349c] ss:$36 sps:$4 sm:$0xff]   ;;  %v22380_v3 = vld [vmem:[#allocation5 + $0x34a4] ss:$36 sps:$4 sm:$0xff]  }
 0x3a0   :  { %14235 = vmatprep.mubr.bf16.mxu0 %v25200_v4  ;;  %14850 = vmatprep.mubr.bf16.mxu1 %v25200_v4 }
 0x3a2   :  { %14206 = vmatpush1.bf16.msra.mxu0 %v22315_v13  ;;  %14821 = vmatpush1.bf16.msra.mxu1 %v22318_v6  ;;  %v22375_v13 = vld [vmem:[#allocation5 + $0x3498] ss:$36 sps:$4 sm:$0xff]   ;;  %v22378_v6 = vld [vmem:[#allocation5 + $0x34a0] ss:$36 sps:$4 sm:$0xff]  }
 0x3a3   :  { %14207 = vmatprep.subr.bf16.mxu0 %v22323_v7  ;;  %14822 = vmatprep.subr.bf16.mxu1 %v22326_v8  ;;  %v22383_v7 = vld [vmem:[#allocation5 + $0x34e4] ss:$36 sps:$4 sm:$0xff]   ;;  %v22386_v8 = vld [vmem:[#allocation5 + $0x34ec] ss:$36 sps:$4 sm:$0xff]  }
 0x3a6   :  { %14208 = vmatpush1.bf16.msra.mxu0 %v22321_v12  ;;  %14823 = vmatpush1.bf16.msra.mxu1 %v22324_v14  ;;  %v22381_v12 = vld [vmem:[#allocation5 + $0x34e0] ss:$36 sps:$4 sm:$0xff]   ;;  %v22384_v14 = vld [vmem:[#allocation5 + $0x34e8] ss:$36 sps:$4 sm:$0xff]  }
 0x3a7   :  { %14209 = vmatprep.subr.bf16.mxu0 %v22329_v16  ;;  %14824 = vmatprep.subr.bf16.mxu1 %v22332_v17  ;;  %v22389_v16 = vld [vmem:[#allocation5 + $0x352c] ss:$36 sps:$4 sm:$0xff]   ;;  %v22392_v17 = vld [vmem:[#allocation5 + $0x3534] ss:$36 sps:$4 sm:$0xff]  }
 0x3aa   :  { %14210 = vmatpush1.bf16.msra.mxu0 %v22327_v56  ;;  %14825 = vmatpush1.bf16.msra.mxu1 %v22330_v19  ;;  %v22387_v56 = vld [vmem:[#allocation5 + $0x3528] ss:$36 sps:$4 sm:$0xff]   ;;  %v22390_v19 = vld [vmem:[#allocation5 + $0x3530] ss:$36 sps:$4 sm:$0xff]  }
 0x3ab   :  { %14211 = vmatprep.subr.bf16.mxu0 %v22335_v22  ;;  %14826 = vmatprep.subr.bf16.mxu1 %v22338_v23  ;;  %v22395_v22 = vld [vmem:[#allocation5 + $0x3574] ss:$36 sps:$4 sm:$0xff]   ;;  %v22398_v23 = vld [vmem:[#allocation5 + $0x357c] ss:$36 sps:$4 sm:$0xff]  }
 0x3ae   :  { %14212 = vmatpush1.bf16.msra.mxu0 %v22333_v25  ;;  %14827 = vmatpush1.bf16.msra.mxu1 %v22336_v26  ;;  %v22393_v25 = vld [vmem:[#allocation5 + $0x3570] ss:$36 sps:$4 sm:$0xff]   ;;  %v22396_v26 = vld [vmem:[#allocation5 + $0x3578] ss:$36 sps:$4 sm:$0xff]  }
 0x3af   :  { %14213 = vmatprep.subr.bf16.mxu0 %v22341_v28  ;;  %14828 = vmatprep.subr.bf16.mxu1 %v22344_v32  ;;  %v22401_v28 = vld [vmem:[#allocation5 + $0x35bc] ss:$36 sps:$4 sm:$0xff]   ;;  %v22404_v32 = vld [vmem:[#allocation5 + $0x35c4] ss:$36 sps:$4 sm:$0xff]  }
 0x3b2   :  { %14214 = vmatpush1.bf16.msra.mxu0 %v22339_v33  ;;  %14829 = vmatpush1.bf16.msra.mxu1 %v22342_v34  ;;  %v22399_v33 = vld [vmem:[#allocation5 + $0x35b8] ss:$36 sps:$4 sm:$0xff]   ;;  %v22402_v34 = vld [vmem:[#allocation5 + $0x35c0] ss:$36 sps:$4 sm:$0xff]  }
 0x3b3   :  { %14215 = vmatprep.subr.bf16.mxu0 %v22347_v60  ;;  %14830 = vmatprep.subr.bf16.mxu1 %v22350_v38  ;;  %v22408_v60 = vld [vmem:[#allocation5 + $0x3604] ss:$36 sps:$4 sm:$0xff]   ;;  %v22411_v38 = vld [vmem:[#allocation5 + $0x360c] ss:$36 sps:$4 sm:$0xff]  }
 0x3b6   :  { %14216 = vmatpush1.bf16.msra.mxu0 %v22345_v39  ;;  %14831 = vmatpush1.bf16.msra.mxu1 %v22348_v40  ;;  %v25206_v39 = vld [vmem:[#allocation2 + $0x60] sm:$0xff]  ;;  %v25210_v40 = vcombine.low %v25192_v41, %v25192_v41 }
 0x3b7   :  { %14217 = vmatprep.subr.bf16.mxu0 %v22353_v9  ;;  %14832 = vmatprep.subr.bf16.mxu1 %v22356_v44  ;;  %v22406_v9 = vld [vmem:[#allocation5 + $0x3600] ss:$36 sps:$4 sm:$0xff]   ;;  %v22409_v44 = vld [vmem:[#allocation5 + $0x3608] ss:$36 sps:$4 sm:$0xff]  }
 0x3b8   :  { %v22413_v41 = vld [vmem:[#allocation5 + $0x3648] ss:$36 sps:$4 sm:$0xff]  }
 0x3ba   :  { %14218 = vmatpush1.bf16.msra.mxu0 %v22351_v45  ;;  %14833 = vmatpush1.bf16.msra.mxu1 %v22354_v46  ;;  %v22415_v45 = vld [vmem:[#allocation5 + $0x364c] ss:$36 sps:$4 sm:$0xff]   ;;  %v22418_v46 = vld [vmem:[#allocation5 + $0x3654] ss:$36 sps:$4 sm:$0xff]  }
 0x3bb   :  { %14219 = vmatprep.subr.bf16.mxu0 %v22359_v31  ;;  %14834 = vmatprep.subr.bf16.mxu1 %v22362_v49  ;;  %v25214_v31 = vcombine.high %v25206_v39, %v25206_v39  ;;  %v22416_v49 = vld [vmem:[#allocation5 + $0x3650] ss:$36 sps:$4 sm:$0xff]  }
 0x3be   :  { %14220 = vmatpush1.bf16.msra.mxu0 %v22357_v50  ;;  %14835 = vmatpush1.bf16.msra.mxu1 %v22360_v51  ;;  %v22421_v50 = vld [vmem:[#allocation5 + $0x3694] ss:$36 sps:$4 sm:$0xff]   ;;  %v22424_v51 = vld [vmem:[#allocation5 + $0x369c] ss:$36 sps:$4 sm:$0xff]  }
 0x3bf   :  { %14221 = vmatprep.subr.bf16.mxu0 %v22365_v52  ;;  %14836 = vmatprep.subr.bf16.mxu1 %v22368_v53  ;;  %v22419_v52 = vld [vmem:[#allocation5 + $0x3690] ss:$36 sps:$4 sm:$0xff]   ;;  %v22422_v53 = vld [vmem:[#allocation5 + $0x3698] ss:$36 sps:$4 sm:$0xff]  }
 0x3c2   :  { %14222 = vmatpush1.bf16.msra.mxu0 %v22363_v54  ;;  %14837 = vmatpush1.bf16.msra.mxu1 %v22366_v55  ;;  %v22427_v54 = vld [vmem:[#allocation5 + $0x36dc] ss:$36 sps:$4 sm:$0xff]   ;;  %v22430_v55 = vld [vmem:[#allocation5 + $0x36e4] ss:$36 sps:$4 sm:$0xff]  }
 0x3c3   :  { %14223 = vmatprep.subr.bf16.mxu0 %v22371_v58  ;;  %14838 = vmatprep.subr.bf16.mxu1 %v22374_v59  ;;  %v22425_v58 = vld [vmem:[#allocation5 + $0x36d8] ss:$36 sps:$4 sm:$0xff]   ;;  %v22428_v59 = vld [vmem:[#allocation5 + $0x36e0] ss:$36 sps:$4 sm:$0xff]  }
 0x3c6   :  { %14224 = vmatpush1.bf16.msra.mxu0 %v22369_v0  ;;  %14839 = vmatpush1.bf16.msra.mxu1 %v22372_v1  ;;  %v22433_v0 = vld [vmem:[#allocation5 + $0x3724] ss:$36 sps:$4 sm:$0xff]   ;;  %v22436_v1 = vld [vmem:[#allocation5 + $0x372c] ss:$36 sps:$4 sm:$0xff]  }
 0x3c7   :  { %14225 = vmatprep.subr.bf16.mxu0 %v22377_v21  ;;  %14840 = vmatprep.subr.bf16.mxu1 %v22380_v3  ;;  %v22431_v21 = vld [vmem:[#allocation5 + $0x3720] ss:$36 sps:$4 sm:$0xff]   ;;  %v22434_v3 = vld [vmem:[#allocation5 + $0x3728] ss:$36 sps:$4 sm:$0xff]  }
 0x3ca   :  { %14226 = vmatpush1.bf16.msra.mxu0 %v22375_v13  ;;  %14841 = vmatpush1.bf16.msra.mxu1 %v22378_v6  ;;  %v22439_v13 = vld [vmem:[#allocation5 + $0x376c] ss:$36 sps:$4 sm:$0xff]   ;;  %v22442_v6 = vld [vmem:[#allocation5 + $0x3774] ss:$36 sps:$4 sm:$0xff]  }
 0x3cb   :  { %14227 = vmatprep.subr.bf16.mxu0 %v22383_v7  ;;  %14842 = vmatprep.subr.bf16.mxu1 %v22386_v8  ;;  %v22437_v7 = vld [vmem:[#allocation5 + $0x3768] ss:$36 sps:$4 sm:$0xff]   ;;  %v22440_v8 = vld [vmem:[#allocation5 + $0x3770] ss:$36 sps:$4 sm:$0xff]  }
 0x3ce   :  { %14228 = vmatpush1.bf16.msra.mxu0 %v22381_v12  ;;  %14843 = vmatpush1.bf16.msra.mxu1 %v22384_v14  ;;  %v22445_v12 = vld [vmem:[#allocation5 + $0x37b4] ss:$36 sps:$4 sm:$0xff]   ;;  %v22448_v14 = vld [vmem:[#allocation5 + $0x37bc] ss:$36 sps:$4 sm:$0xff]  }
 0x3cf   :  { %14229 = vmatprep.subr.bf16.mxu0 %v22389_v16  ;;  %14844 = vmatprep.subr.bf16.mxu1 %v22392_v17  ;;  %v22443_v16 = vld [vmem:[#allocation5 + $0x37b0] ss:$36 sps:$4 sm:$0xff]   ;;  %v22446_v17 = vld [vmem:[#allocation5 + $0x37b8] ss:$36 sps:$4 sm:$0xff]  }
 0x3d2   :  { %14230 = vmatpush1.bf16.msra.mxu0 %v22387_v56  ;;  %14845 = vmatpush1.bf16.msra.mxu1 %v22390_v19  ;;  %v22451_v56 = vld [vmem:[#allocation5 + $0x37fc] ss:$36 sps:$4 sm:$0xff]   ;;  %v22454_v19 = vld [vmem:[#allocation5 + $0x3804] ss:$36 sps:$4 sm:$0xff]  }
 0x3d3   :  { %14231 = vmatprep.subr.bf16.mxu0 %v22395_v22  ;;  %14846 = vmatprep.subr.bf16.mxu1 %v22398_v23  ;;  %v22449_v22 = vld [vmem:[#allocation5 + $0x37f8] ss:$36 sps:$4 sm:$0xff]   ;;  %v22452_v23 = vld [vmem:[#allocation5 + $0x3800] ss:$36 sps:$4 sm:$0xff]  }
 0x3d6   :  { %14232 = vmatpush1.bf16.msra.mxu0 %v22393_v25  ;;  %14847 = vmatpush1.bf16.msra.mxu1 %v22396_v26  ;;  %v22457_v25 = vld [vmem:[#allocation5 + $0x3844] ss:$36 sps:$4 sm:$0xff]   ;;  %v22460_v26 = vld [vmem:[#allocation5 + $0x384c] ss:$36 sps:$4 sm:$0xff]  }
 0x3d7   :  { %14233 = vmatprep.subr.bf16.mxu0 %v22401_v28  ;;  %14848 = vmatprep.subr.bf16.mxu1 %v22404_v32  ;;  %v22455_v28 = vld [vmem:[#allocation5 + $0x3840] ss:$36 sps:$4 sm:$0xff]   ;;  %v22458_v32 = vld [vmem:[#allocation5 + $0x3848] ss:$36 sps:$4 sm:$0xff]  }
 0x3da   :  { %14234 = vmatpush1.bf16.msra.mxu0 %v22399_v33  ;;  %14849 = vmatpush1.bf16.msra.mxu1 %v22402_v34  ;;  %v22463_v33 = vld [vmem:[#allocation5 + $0x388c] ss:$36 sps:$4 sm:$0xff]   ;;  %v22466_v34 = vld [vmem:[#allocation5 + $0x3894] ss:$36 sps:$4 sm:$0xff]  }
 0x3db   :  { %14244 = vmatprep.subr.bf16.mxu0 %v22408_v60  ;;  %14859 = vmatprep.subr.bf16.mxu1 %v22411_v38  ;;  %v22461_v60 = vld [vmem:[#allocation5 + $0x3888] ss:$36 sps:$4 sm:$0xff]   ;;  %v22464_v38 = vld [vmem:[#allocation5 + $0x3890] ss:$36 sps:$4 sm:$0xff]  }
 0x3dd   :  { %14236 = vmatmul.mubr.bf16.vlgmr.msra.gmra.mrb[0].mxu0 %v25210_v40  ;;  %14851 = vmatmul.mubr.bf16.vlgmr.msra.gmra.mrb[0].mxu1 %v25210_v40 }
 0x3de   :  { %14245 = vmatpush1.bf16.msra.mxu0 %v22406_v9  ;;  %14860 = vmatpush1.bf16.msra.mxu1 %v22409_v44  ;;  %v22469_v9 = vld [vmem:[#allocation5 + $0x38d4] ss:$36 sps:$4 sm:$0xff]   ;;  %v22472_v44 = vld [vmem:[#allocation5 + $0x38dc] ss:$36 sps:$4 sm:$0xff]  }
 0x3df   :  { %14246 = vmatprep.subr.bf16.mxu0 %v22415_v45  ;;  %14861 = vmatprep.subr.bf16.mxu1 %v22418_v46  ;;  %v22467_v45 = vld [vmem:[#allocation5 + $0x38d0] ss:$36 sps:$4 sm:$0xff]   ;;  %v22470_v46 = vld [vmem:[#allocation5 + $0x38d8] ss:$36 sps:$4 sm:$0xff]  }
 0x3e0   :  { %14276 = vmatprep.mubr.bf16.mxu0 %v25214_v31  ;;  %14891 = vmatprep.mubr.bf16.mxu1 %v25214_v31 }
 0x3e2   :  { %14247 = vmatpush1.bf16.msra.mxu0 %v22413_v41  ;;  %14862 = vmatpush1.bf16.msra.mxu1 %v22416_v49  ;;  %v22475_v41 = vld [vmem:[#allocation5 + $0x391c] ss:$36 sps:$4 sm:$0xff]   ;;  %v22478_v49 = vld [vmem:[#allocation5 + $0x3924] ss:$36 sps:$4 sm:$0xff]  }
 0x3e3   :  { %14248 = vmatprep.subr.bf16.mxu0 %v22421_v50  ;;  %14863 = vmatprep.subr.bf16.mxu1 %v22424_v51  ;;  %v22473_v50 = vld [vmem:[#allocation5 + $0x3918] ss:$36 sps:$4 sm:$0xff]   ;;  %v22476_v51 = vld [vmem:[#allocation5 + $0x3920] ss:$36 sps:$4 sm:$0xff]  }
 0x3e6   :  { %14249 = vmatpush1.bf16.msra.mxu0 %v22419_v52  ;;  %14864 = vmatpush1.bf16.msra.mxu1 %v22422_v53  ;;  %v22481_v52 = vld [vmem:[#allocation5 + $0x3964] ss:$36 sps:$4 sm:$0xff]   ;;  %v22484_v53 = vld [vmem:[#allocation5 + $0x396c] ss:$36 sps:$4 sm:$0xff]  }
 0x3e7   :  { %14250 = vmatprep.subr.bf16.mxu0 %v22427_v54  ;;  %14865 = vmatprep.subr.bf16.mxu1 %v22430_v55  ;;  %v22479_v54 = vld [vmem:[#allocation5 + $0x3960] ss:$36 sps:$4 sm:$0xff]   ;;  %v22482_v55 = vld [vmem:[#allocation5 + $0x3968] ss:$36 sps:$4 sm:$0xff]  }
 0x3ea   :  { %14251 = vmatpush1.bf16.msra.mxu0 %v22425_v58  ;;  %14866 = vmatpush1.bf16.msra.mxu1 %v22428_v59  ;;  %v22487_v58 = vld [vmem:[#allocation5 + $0x39ac] ss:$36 sps:$4 sm:$0xff]   ;;  %v22490_v59 = vld [vmem:[#allocation5 + $0x39b4] ss:$36 sps:$4 sm:$0xff]  }
 0x3eb   :  { %14252 = vmatprep.subr.bf16.mxu0 %v22433_v0  ;;  %14867 = vmatprep.subr.bf16.mxu1 %v22436_v1  ;;  %v22485_v0 = vld [vmem:[#allocation5 + $0x39a8] ss:$36 sps:$4 sm:$0xff]   ;;  %v22488_v1 = vld [vmem:[#allocation5 + $0x39b0] ss:$36 sps:$4 sm:$0xff]  }
 0x3ee   :  { %14253 = vmatpush1.bf16.msra.mxu0 %v22431_v21  ;;  %14868 = vmatpush1.bf16.msra.mxu1 %v22434_v3  ;;  %v22493_v21 = vld [vmem:[#allocation5 + $0x39f4] ss:$36 sps:$4 sm:$0xff]   ;;  %v22496_v3 = vld [vmem:[#allocation5 + $0x39fc] ss:$36 sps:$4 sm:$0xff]  }
 0x3ef   :  { %14254 = vmatprep.subr.bf16.mxu0 %v22439_v13  ;;  %14869 = vmatprep.subr.bf16.mxu1 %v22442_v6  ;;  %v22491_v13 = vld [vmem:[#allocation5 + $0x39f0] ss:$36 sps:$4 sm:$0xff]   ;;  %v22494_v6 = vld [vmem:[#allocation5 + $0x39f8] ss:$36 sps:$4 sm:$0xff]  }
 0x3f2   :  { %14255 = vmatpush1.bf16.msra.mxu0 %v22437_v7  ;;  %14870 = vmatpush1.bf16.msra.mxu1 %v22440_v8  ;;  %v22499_v7 = vld [vmem:[#allocation5 + $0x3a3c] ss:$36 sps:$4 sm:$0xff]   ;;  %v22502_v8 = vld [vmem:[#allocation5 + $0x3a44] ss:$36 sps:$4 sm:$0xff]  }
 0x3f3   :  { %14256 = vmatprep.subr.bf16.mxu0 %v22445_v12  ;;  %14871 = vmatprep.subr.bf16.mxu1 %v22448_v14  ;;  %v22497_v12 = vld [vmem:[#allocation5 + $0x3a38] ss:$36 sps:$4 sm:$0xff]   ;;  %v22500_v14 = vld [vmem:[#allocation5 + $0x3a40] ss:$36 sps:$4 sm:$0xff]  }
 0x3f6   :  { %14257 = vmatpush1.bf16.msra.mxu0 %v22443_v16  ;;  %14872 = vmatpush1.bf16.msra.mxu1 %v22446_v17  ;;  %v22506_v16 = vld [vmem:[#allocation5 + $0x3a84] ss:$36 sps:$4 sm:$0xff]   ;;  %v22509_v17 = vld [vmem:[#allocation5 + $0x3a8c] ss:$36 sps:$4 sm:$0xff]  }
 0x3f7   :  { %14258 = vmatprep.subr.bf16.mxu0 %v22451_v56  ;;  %14873 = vmatprep.subr.bf16.mxu1 %v22454_v19  ;;  %v22504_v56 = vld [vmem:[#allocation5 + $0x3a80] ss:$36 sps:$4 sm:$0xff]   ;;  %v22507_v19 = vld [vmem:[#allocation5 + $0x3a88] ss:$36 sps:$4 sm:$0xff]  }
 0x3fa   :  { %14259 = vmatpush1.bf16.msra.mxu0 %v22449_v22  ;;  %14874 = vmatpush1.bf16.msra.mxu1 %v22452_v23  ;;  %v25222_v22 = vcombine.low %v25206_v39, %v25206_v39  ;;  %v25224_v23 = vld [vmem:[#allocation2 + $0x68] sm:$0xff]  ;;  %v22511_v39 = vld [vmem:[#allocation5 + $0x3ac8] ss:$36 sps:$4 sm:$0xff]  }
 0x3fb   :  { %14260 = vmatprep.subr.bf16.mxu0 %v22457_v25  ;;  %14875 = vmatprep.subr.bf16.mxu1 %v22460_v26  ;;  %v22513_v25 = vld [vmem:[#allocation5 + $0x3acc] ss:$36 sps:$4 sm:$0xff]   ;;  %v22516_v26 = vld [vmem:[#allocation5 + $0x3ad4] ss:$36 sps:$4 sm:$0xff]  }
 0x3fe   :  { %14261 = vmatpush1.bf16.msra.mxu0 %v22455_v28  ;;  %14876 = vmatpush1.bf16.msra.mxu1 %v22458_v32  ;;  %v25228_v28 = vcombine.high %v25224_v23, %v25224_v23  ;;  %v22514_v32 = vld [vmem:[#allocation5 + $0x3ad0] ss:$36 sps:$4 sm:$0xff]  }
 0x3ff   :  { %14262 = vmatprep.subr.bf16.mxu0 %v22463_v33  ;;  %14877 = vmatprep.subr.bf16.mxu1 %v22466_v34  ;;  %v22519_v33 = vld [vmem:[#allocation5 + $0x3b14] ss:$36 sps:$4 sm:$0xff]   ;;  %v22522_v34 = vld [vmem:[#allocation5 + $0x3b1c] ss:$36 sps:$4 sm:$0xff]  }
 0x402   :  { %14263 = vmatpush1.bf16.msra.mxu0 %v22461_v60  ;;  %14878 = vmatpush1.bf16.msra.mxu1 %v22464_v38  ;;  %v22517_v60 = vld [vmem:[#allocation5 + $0x3b10] ss:$36 sps:$4 sm:$0xff]   ;;  %v22520_v38 = vld [vmem:[#allocation5 + $0x3b18] ss:$36 sps:$4 sm:$0xff]  }
 0x403   :  { %14264 = vmatprep.subr.bf16.mxu0 %v22469_v9  ;;  %14879 = vmatprep.subr.bf16.mxu1 %v22472_v44  ;;  %v22525_v9 = vld [vmem:[#allocation5 + $0x3b5c] ss:$36 sps:$4 sm:$0xff]   ;;  %v22528_v44 = vld [vmem:[#allocation5 + $0x3b64] ss:$36 sps:$4 sm:$0xff]  }
 0x406   :  { %14265 = vmatpush1.bf16.msra.mxu0 %v22467_v45  ;;  %14880 = vmatpush1.bf16.msra.mxu1 %v22470_v46  ;;  %v22523_v45 = vld [vmem:[#allocation5 + $0x3b58] ss:$36 sps:$4 sm:$0xff]   ;;  %v22526_v46 = vld [vmem:[#allocation5 + $0x3b60] ss:$36 sps:$4 sm:$0xff]  }
 0x407   :  { %14266 = vmatprep.subr.bf16.mxu0 %v22475_v41  ;;  %14881 = vmatprep.subr.bf16.mxu1 %v22478_v49  ;;  %v22531_v41 = vld [vmem:[#allocation5 + $0x3ba4] ss:$36 sps:$4 sm:$0xff]   ;;  %v22534_v49 = vld [vmem:[#allocation5 + $0x3bac] ss:$36 sps:$4 sm:$0xff]  }
 0x40a   :  { %14267 = vmatpush1.bf16.msra.mxu0 %v22473_v50  ;;  %14882 = vmatpush1.bf16.msra.mxu1 %v22476_v51  ;;  %v22529_v50 = vld [vmem:[#allocation5 + $0x3ba0] ss:$36 sps:$4 sm:$0xff]   ;;  %v22532_v51 = vld [vmem:[#allocation5 + $0x3ba8] ss:$36 sps:$4 sm:$0xff]  }
 0x40b   :  { %14268 = vmatprep.subr.bf16.mxu0 %v22481_v52  ;;  %14883 = vmatprep.subr.bf16.mxu1 %v22484_v53  ;;  %v22537_v52 = vld [vmem:[#allocation5 + $0x3bec] ss:$36 sps:$4 sm:$0xff]   ;;  %v22540_v53 = vld [vmem:[#allocation5 + $0x3bf4] ss:$36 sps:$4 sm:$0xff]  }
 0x40e   :  { %14269 = vmatpush1.bf16.msra.mxu0 %v22479_v54  ;;  %14884 = vmatpush1.bf16.msra.mxu1 %v22482_v55  ;;  %v22535_v54 = vld [vmem:[#allocation5 + $0x3be8] ss:$36 sps:$4 sm:$0xff]   ;;  %v22538_v55 = vld [vmem:[#allocation5 + $0x3bf0] ss:$36 sps:$4 sm:$0xff]  }
 0x40f   :  { %14270 = vmatprep.subr.bf16.mxu0 %v22487_v58  ;;  %14885 = vmatprep.subr.bf16.mxu1 %v22490_v59  ;;  %v22543_v58 = vld [vmem:[#allocation5 + $0x3c34] ss:$36 sps:$4 sm:$0xff]   ;;  %v22546_v59 = vld [vmem:[#allocation5 + $0x3c3c] ss:$36 sps:$4 sm:$0xff]  }
 0x412   :  { %14271 = vmatpush1.bf16.msra.mxu0 %v22485_v0  ;;  %14886 = vmatpush1.bf16.msra.mxu1 %v22488_v1  ;;  %v22541_v0 = vld [vmem:[#allocation5 + $0x3c30] ss:$36 sps:$4 sm:$0xff]   ;;  %v22544_v1 = vld [vmem:[#allocation5 + $0x3c38] ss:$36 sps:$4 sm:$0xff]  }
 0x413   :  { %14272 = vmatprep.subr.bf16.mxu0 %v22493_v21  ;;  %14887 = vmatprep.subr.bf16.mxu1 %v22496_v3  ;;  %v22549_v21 = vld [vmem:[#allocation5 + $0x3c7c] ss:$36 sps:$4 sm:$0xff]   ;;  %v22552_v3 = vld [vmem:[#allocation5 + $0x3c84] ss:$36 sps:$4 sm:$0xff]  }
 0x416   :  { %14273 = vmatpush1.bf16.msra.mxu0 %v22491_v13  ;;  %14888 = vmatpush1.bf16.msra.mxu1 %v22494_v6  ;;  %v22547_v13 = vld [vmem:[#allocation5 + $0x3c78] ss:$36 sps:$4 sm:$0xff]   ;;  %v22550_v6 = vld [vmem:[#allocation5 + $0x3c80] ss:$36 sps:$4 sm:$0xff]  }
 0x417   :  { %14274 = vmatprep.subr.bf16.mxu0 %v22499_v7  ;;  %14889 = vmatprep.subr.bf16.mxu1 %v22502_v8  ;;  %v22555_v7 = vld [vmem:[#allocation5 + $0x3cc4] ss:$36 sps:$4 sm:$0xff]   ;;  %v22558_v8 = vld [vmem:[#allocation5 + $0x3ccc] ss:$36 sps:$4 sm:$0xff]  }
 0x41a   :  { %14275 = vmatpush1.bf16.msra.mxu0 %v22497_v12  ;;  %14890 = vmatpush1.bf16.msra.mxu1 %v22500_v14  ;;  %v22553_v12 = vld [vmem:[#allocation5 + $0x3cc0] ss:$36 sps:$4 sm:$0xff]   ;;  %v22556_v14 = vld [vmem:[#allocation5 + $0x3cc8] ss:$36 sps:$4 sm:$0xff]  }
 0x41b   :  { %14285 = vmatprep.subr.bf16.mxu0 %v22506_v16  ;;  %14900 = vmatprep.subr.bf16.mxu1 %v22509_v17  ;;  %v22561_v16 = vld [vmem:[#allocation5 + $0x3d0c] ss:$36 sps:$4 sm:$0xff]   ;;  %v22564_v17 = vld [vmem:[#allocation5 + $0x3d14] ss:$36 sps:$4 sm:$0xff]  }
 0x41d   :  { %14277 = vmatmul.mubr.bf16.vlgmr.msra.gmra.mrb[0].mxu0 %v25222_v22  ;;  %14892 = vmatmul.mubr.bf16.vlgmr.msra.gmra.mrb[0].mxu1 %v25222_v22 }
 0x41e   :  { %14286 = vmatpush1.bf16.msra.mxu0 %v22504_v56  ;;  %14901 = vmatpush1.bf16.msra.mxu1 %v22507_v19  ;;  %v22559_v56 = vld [vmem:[#allocation5 + $0x3d08] ss:$36 sps:$4 sm:$0xff]   ;;  %v22562_v19 = vld [vmem:[#allocation5 + $0x3d10] ss:$36 sps:$4 sm:$0xff]  }
 0x41f   :  { %14287 = vmatprep.subr.bf16.mxu0 %v22513_v25  ;;  %14902 = vmatprep.subr.bf16.mxu1 %v22516_v26  ;;  %v22567_v25 = vld [vmem:[#allocation5 + $0x3d54] ss:$36 sps:$4 sm:$0xff]   ;;  %v22570_v26 = vld [vmem:[#allocation5 + $0x3d5c] ss:$36 sps:$4 sm:$0xff]  }
 0x420   :  { %14317 = vmatprep.mubr.bf16.mxu0 %v25228_v28  ;;  %14932 = vmatprep.mubr.bf16.mxu1 %v25228_v28 }
 0x422   :  { %14288 = vmatpush1.bf16.msra.mxu0 %v22511_v39  ;;  %14903 = vmatpush1.bf16.msra.mxu1 %v22514_v32  ;;  %v22565_v39 = vld [vmem:[#allocation5 + $0x3d50] ss:$36 sps:$4 sm:$0xff]   ;;  %v22568_v32 = vld [vmem:[#allocation5 + $0x3d58] ss:$36 sps:$4 sm:$0xff]  }
 0x423   :  { %14289 = vmatprep.subr.bf16.mxu0 %v22519_v33  ;;  %14904 = vmatprep.subr.bf16.mxu1 %v22522_v34  ;;  %v22573_v33 = vld [vmem:[#allocation5 + $0x3d9c] ss:$36 sps:$4 sm:$0xff]   ;;  %v22576_v34 = vld [vmem:[#allocation5 + $0x3da4] ss:$36 sps:$4 sm:$0xff]  }
 0x426   :  { %14290 = vmatpush1.bf16.msra.mxu0 %v22517_v60  ;;  %14905 = vmatpush1.bf16.msra.mxu1 %v22520_v38  ;;  %v22571_v60 = vld [vmem:[#allocation5 + $0x3d98] ss:$36 sps:$4 sm:$0xff]   ;;  %v22574_v38 = vld [vmem:[#allocation5 + $0x3da0] ss:$36 sps:$4 sm:$0xff]  }
 0x427   :  { %14291 = vmatprep.subr.bf16.mxu0 %v22525_v9  ;;  %14906 = vmatprep.subr.bf16.mxu1 %v22528_v44  ;;  %v22579_v9 = vld [vmem:[#allocation5 + $0x3de4] ss:$36 sps:$4 sm:$0xff]   ;;  %v22582_v44 = vld [vmem:[#allocation5 + $0x3dec] ss:$36 sps:$4 sm:$0xff]  }
 0x42a   :  { %14292 = vmatpush1.bf16.msra.mxu0 %v22523_v45  ;;  %14907 = vmatpush1.bf16.msra.mxu1 %v22526_v46  ;;  %v22577_v45 = vld [vmem:[#allocation5 + $0x3de0] ss:$36 sps:$4 sm:$0xff]   ;;  %v22580_v46 = vld [vmem:[#allocation5 + $0x3de8] ss:$36 sps:$4 sm:$0xff]  }
 0x42b   :  { %14293 = vmatprep.subr.bf16.mxu0 %v22531_v41  ;;  %14908 = vmatprep.subr.bf16.mxu1 %v22534_v49  ;;  %v22585_v41 = vld [vmem:[#allocation5 + $0x3e2c] ss:$36 sps:$4 sm:$0xff]   ;;  %v22588_v49 = vld [vmem:[#allocation5 + $0x3e34] ss:$36 sps:$4 sm:$0xff]  }
 0x42e   :  { %14294 = vmatpush1.bf16.msra.mxu0 %v22529_v50  ;;  %14909 = vmatpush1.bf16.msra.mxu1 %v22532_v51  ;;  %v22583_v50 = vld [vmem:[#allocation5 + $0x3e28] ss:$36 sps:$4 sm:$0xff]   ;;  %v22586_v51 = vld [vmem:[#allocation5 + $0x3e30] ss:$36 sps:$4 sm:$0xff]  }
 0x42f   :  { %14295 = vmatprep.subr.bf16.mxu0 %v22537_v52  ;;  %14910 = vmatprep.subr.bf16.mxu1 %v22540_v53  ;;  %v22591_v52 = vld [vmem:[#allocation5 + $0x3e74] ss:$36 sps:$4 sm:$0xff]   ;;  %v22594_v53 = vld [vmem:[#allocation5 + $0x3e7c] ss:$36 sps:$4 sm:$0xff]  }
 0x432   :  { %14296 = vmatpush1.bf16.msra.mxu0 %v22535_v54  ;;  %14911 = vmatpush1.bf16.msra.mxu1 %v22538_v55  ;;  %v22589_v54 = vld [vmem:[#allocation5 + $0x3e70] ss:$36 sps:$4 sm:$0xff]   ;;  %v22592_v55 = vld [vmem:[#allocation5 + $0x3e78] ss:$36 sps:$4 sm:$0xff]  }
 0x433   :  { %14297 = vmatprep.subr.bf16.mxu0 %v22543_v58  ;;  %14912 = vmatprep.subr.bf16.mxu1 %v22546_v59  ;;  %v22597_v58 = vld [vmem:[#allocation5 + $0x3ebc] ss:$36 sps:$4 sm:$0xff]   ;;  %v22600_v59 = vld [vmem:[#allocation5 + $0x3ec4] ss:$36 sps:$4 sm:$0xff]  }
 0x436   :  { %14298 = vmatpush1.bf16.msra.mxu0 %v22541_v0  ;;  %14913 = vmatpush1.bf16.msra.mxu1 %v22544_v1  ;;  %v22595_v0 = vld [vmem:[#allocation5 + $0x3eb8] ss:$36 sps:$4 sm:$0xff]   ;;  %v22598_v1 = vld [vmem:[#allocation5 + $0x3ec0] ss:$36 sps:$4 sm:$0xff]  }
 0x437   :  { %14299 = vmatprep.subr.bf16.mxu0 %v22549_v21  ;;  %14914 = vmatprep.subr.bf16.mxu1 %v22552_v3  ;;  %v22604_v21 = vld [vmem:[#allocation5 + $0x3f04] ss:$36 sps:$4 sm:$0xff]   ;;  %v22607_v3 = vld [vmem:[#allocation5 + $0x3f0c] ss:$36 sps:$4 sm:$0xff]  }
 0x43a   :  { %14300 = vmatpush1.bf16.msra.mxu0 %v22547_v13  ;;  %14915 = vmatpush1.bf16.msra.mxu1 %v22550_v6  ;;  %v25234_v13 = vld [vmem:[#allocation2 + $0x70] sm:$0xff]  ;;  %v25238_v6 = vcombine.low %v25224_v23, %v25224_v23  ;;  %v22609_v23 = vld [vmem:[#allocation5 + $0x3f48] ss:$36 sps:$4 sm:$0xff]  }
 0x43b   :  { %14301 = vmatprep.subr.bf16.mxu0 %v22555_v7  ;;  %14916 = vmatprep.subr.bf16.mxu1 %v22558_v8  ;;  %v22602_v7 = vld [vmem:[#allocation5 + $0x3f00] ss:$36 sps:$4 sm:$0xff]   ;;  %v22605_v8 = vld [vmem:[#allocation5 + $0x3f08] ss:$36 sps:$4 sm:$0xff]  }
 0x43e   :  { %14302 = vmatpush1.bf16.msra.mxu0 %v22553_v12  ;;  %14917 = vmatpush1.bf16.msra.mxu1 %v22556_v14  ;;  %v22611_v12 = vld [vmem:[#allocation5 + $0x3f4c] ss:$36 sps:$4 sm:$0xff]   ;;  %v22614_v14 = vld [vmem:[#allocation5 + $0x3f54] ss:$36 sps:$4 sm:$0xff]  }
 0x43f   :  { %14303 = vmatprep.subr.bf16.mxu0 %v22561_v16  ;;  %14918 = vmatprep.subr.bf16.mxu1 %v22564_v17  ;;  %v25242_v16 = vcombine.high %v25234_v13, %v25234_v13  ;;  %v22612_v17 = vld [vmem:[#allocation5 + $0x3f50] ss:$36 sps:$4 sm:$0xff]  }
 0x442   :  { %14304 = vmatpush1.bf16.msra.mxu0 %v22559_v56  ;;  %14919 = vmatpush1.bf16.msra.mxu1 %v22562_v19  ;;  %v22617_v56 = vld [vmem:[#allocation5 + $0x3f94] ss:$36 sps:$4 sm:$0xff]   ;;  %v22620_v19 = vld [vmem:[#allocation5 + $0x3f9c] ss:$36 sps:$4 sm:$0xff]  }
 0x443   :  { %14305 = vmatprep.subr.bf16.mxu0 %v22567_v25  ;;  %14920 = vmatprep.subr.bf16.mxu1 %v22570_v26  ;;  %v22615_v25 = vld [vmem:[#allocation5 + $0x3f90] ss:$36 sps:$4 sm:$0xff]   ;;  %v22618_v26 = vld [vmem:[#allocation5 + $0x3f98] ss:$36 sps:$4 sm:$0xff]  }
 0x446   :  { %14306 = vmatpush1.bf16.msra.mxu0 %v22565_v39  ;;  %14921 = vmatpush1.bf16.msra.mxu1 %v22568_v32  ;;  %v22623_v39 = vld [vmem:[#allocation5 + $0x3fdc] ss:$36 sps:$4 sm:$0xff]   ;;  %v22626_v32 = vld [vmem:[#allocation5 + $0x3fe4] ss:$36 sps:$4 sm:$0xff]  }
 0x447   :  { %14307 = vmatprep.subr.bf16.mxu0 %v22573_v33  ;;  %14922 = vmatprep.subr.bf16.mxu1 %v22576_v34  ;;  %v22621_v33 = vld [vmem:[#allocation5 + $0x3fd8] ss:$36 sps:$4 sm:$0xff]   ;;  %v22624_v34 = vld [vmem:[#allocation5 + $0x3fe0] ss:$36 sps:$4 sm:$0xff]  }
 0x44a   :  { %14308 = vmatpush1.bf16.msra.mxu0 %v22571_v60  ;;  %14923 = vmatpush1.bf16.msra.mxu1 %v22574_v38  ;;  %v22629_v60 = vld [vmem:[#allocation5 + $0x4024] ss:$36 sps:$4 sm:$0xff]   ;;  %v22632_v38 = vld [vmem:[#allocation5 + $0x402c] ss:$36 sps:$4 sm:$0xff]  }
 0x44b   :  { %14309 = vmatprep.subr.bf16.mxu0 %v22579_v9  ;;  %14924 = vmatprep.subr.bf16.mxu1 %v22582_v44  ;;  %v22627_v9 = vld [vmem:[#allocation5 + $0x4020] ss:$36 sps:$4 sm:$0xff]   ;;  %v22630_v44 = vld [vmem:[#allocation5 + $0x4028] ss:$36 sps:$4 sm:$0xff]  }
 0x44e   :  { %14310 = vmatpush1.bf16.msra.mxu0 %v22577_v45  ;;  %14925 = vmatpush1.bf16.msra.mxu1 %v22580_v46  ;;  %v22635_v45 = vld [vmem:[#allocation5 + $0x406c] ss:$36 sps:$4 sm:$0xff]   ;;  %v22638_v46 = vld [vmem:[#allocation5 + $0x4074] ss:$36 sps:$4 sm:$0xff]  }
 0x44f   :  { %14311 = vmatprep.subr.bf16.mxu0 %v22585_v41  ;;  %14926 = vmatprep.subr.bf16.mxu1 %v22588_v49  ;;  %v22633_v41 = vld [vmem:[#allocation5 + $0x4068] ss:$36 sps:$4 sm:$0xff]   ;;  %v22636_v49 = vld [vmem:[#allocation5 + $0x4070] ss:$36 sps:$4 sm:$0xff]  }
 0x452   :  { %14312 = vmatpush1.bf16.msra.mxu0 %v22583_v50  ;;  %14927 = vmatpush1.bf16.msra.mxu1 %v22586_v51  ;;  %v22641_v50 = vld [vmem:[#allocation5 + $0x40b4] ss:$36 sps:$4 sm:$0xff]   ;;  %v22644_v51 = vld [vmem:[#allocation5 + $0x40bc] ss:$36 sps:$4 sm:$0xff]  }
 0x453   :  { %14313 = vmatprep.subr.bf16.mxu0 %v22591_v52  ;;  %14928 = vmatprep.subr.bf16.mxu1 %v22594_v53  ;;  %v22639_v52 = vld [vmem:[#allocation5 + $0x40b0] ss:$36 sps:$4 sm:$0xff]   ;;  %v22642_v53 = vld [vmem:[#allocation5 + $0x40b8] ss:$36 sps:$4 sm:$0xff]  }
 0x456   :  { %14314 = vmatpush1.bf16.msra.mxu0 %v22589_v54  ;;  %14929 = vmatpush1.bf16.msra.mxu1 %v22592_v55  ;;  %v22647_v54 = vld [vmem:[#allocation5 + $0x40fc] ss:$36 sps:$4 sm:$0xff]   ;;  %v22650_v55 = vld [vmem:[#allocation5 + $0x4104] ss:$36 sps:$4 sm:$0xff]  }
 0x457   :  { %14315 = vmatprep.subr.bf16.mxu0 %v22597_v58  ;;  %14930 = vmatprep.subr.bf16.mxu1 %v22600_v59  ;;  %v22645_v58 = vld [vmem:[#allocation5 + $0x40f8] ss:$36 sps:$4 sm:$0xff]   ;;  %v22648_v59 = vld [vmem:[#allocation5 + $0x4100] ss:$36 sps:$4 sm:$0xff]  }
 0x45a   :  { %14316 = vmatpush1.bf16.msra.mxu0 %v22595_v0  ;;  %14931 = vmatpush1.bf16.msra.mxu1 %v22598_v1  ;;  %v22653_v0 = vld [vmem:[#allocation5 + $0x4144] ss:$36 sps:$4 sm:$0xff]   ;;  %v22656_v1 = vld [vmem:[#allocation5 + $0x414c] ss:$36 sps:$4 sm:$0xff]  }
 0x45b   :  { %14326 = vmatprep.subr.bf16.mxu0 %v22604_v21  ;;  %14941 = vmatprep.subr.bf16.mxu1 %v22607_v3  ;;  %v22651_v21 = vld [vmem:[#allocation5 + $0x4140] ss:$36 sps:$4 sm:$0xff]   ;;  %v22654_v3 = vld [vmem:[#allocation5 + $0x4148] ss:$36 sps:$4 sm:$0xff]  }
 0x45d   :  { %14318 = vmatmul.mubr.bf16.vlgmr.msra.gmra.mrb[0].mxu0 %v25238_v6  ;;  %14933 = vmatmul.mubr.bf16.vlgmr.msra.gmra.mrb[0].mxu1 %v25238_v6 }
 0x45e   :  { %14327 = vmatpush1.bf16.msra.mxu0 %v22602_v7  ;;  %14942 = vmatpush1.bf16.msra.mxu1 %v22605_v8  ;;  %v22659_v7 = vld [vmem:[#allocation5 + $0x418c] ss:$36 sps:$4 sm:$0xff]   ;;  %v22662_v8 = vld [vmem:[#allocation5 + $0x4194] ss:$36 sps:$4 sm:$0xff]  }
 0x45f   :  { %14328 = vmatprep.subr.bf16.mxu0 %v22611_v12  ;;  %14943 = vmatprep.subr.bf16.mxu1 %v22614_v14  ;;  %v22657_v12 = vld [vmem:[#allocation5 + $0x4188] ss:$36 sps:$4 sm:$0xff]   ;;  %v22660_v14 = vld [vmem:[#allocation5 + $0x4190] ss:$36 sps:$4 sm:$0xff]  }
 0x460   :  { %14358 = vmatprep.mubr.bf16.mxu0 %v25242_v16  ;;  %14973 = vmatprep.mubr.bf16.mxu1 %v25242_v16 }
 0x462   :  { %14329 = vmatpush1.bf16.msra.mxu0 %v22609_v23  ;;  %14944 = vmatpush1.bf16.msra.mxu1 %v22612_v17  ;;  %v22665_v23 = vld [vmem:[#allocation5 + $0x41d4] ss:$36 sps:$4 sm:$0xff]   ;;  %v22668_v17 = vld [vmem:[#allocation5 + $0x41dc] ss:$36 sps:$4 sm:$0xff]  }
 0x463   :  { %14330 = vmatprep.subr.bf16.mxu0 %v22617_v56  ;;  %14945 = vmatprep.subr.bf16.mxu1 %v22620_v19  ;;  %v22663_v56 = vld [vmem:[#allocation5 + $0x41d0] ss:$36 sps:$4 sm:$0xff]   ;;  %v22666_v19 = vld [vmem:[#allocation5 + $0x41d8] ss:$36 sps:$4 sm:$0xff]  }
 0x466   :  { %14331 = vmatpush1.bf16.msra.mxu0 %v22615_v25  ;;  %14946 = vmatpush1.bf16.msra.mxu1 %v22618_v26  ;;  %v22671_v25 = vld [vmem:[#allocation5 + $0x421c] ss:$36 sps:$4 sm:$0xff]   ;;  %v22674_v26 = vld [vmem:[#allocation5 + $0x4224] ss:$36 sps:$4 sm:$0xff]  }
 0x467   :  { %14332 = vmatprep.subr.bf16.mxu0 %v22623_v39  ;;  %14947 = vmatprep.subr.bf16.mxu1 %v22626_v32  ;;  %v22669_v39 = vld [vmem:[#allocation5 + $0x4218] ss:$36 sps:$4 sm:$0xff]   ;;  %v22672_v32 = vld [vmem:[#allocation5 + $0x4220] ss:$36 sps:$4 sm:$0xff]  }
 0x46a   :  { %14333 = vmatpush1.bf16.msra.mxu0 %v22621_v33  ;;  %14948 = vmatpush1.bf16.msra.mxu1 %v22624_v34  ;;  %v22677_v33 = vld [vmem:[#allocation5 + $0x4264] ss:$36 sps:$4 sm:$0xff]   ;;  %v22680_v34 = vld [vmem:[#allocation5 + $0x426c] ss:$36 sps:$4 sm:$0xff]  }
 0x46b   :  { %14334 = vmatprep.subr.bf16.mxu0 %v22629_v60  ;;  %14949 = vmatprep.subr.bf16.mxu1 %v22632_v38  ;;  %v22675_v60 = vld [vmem:[#allocation5 + $0x4260] ss:$36 sps:$4 sm:$0xff]   ;;  %v22678_v38 = vld [vmem:[#allocation5 + $0x4268] ss:$36 sps:$4 sm:$0xff]  }
 0x46e   :  { %14335 = vmatpush1.bf16.msra.mxu0 %v22627_v9  ;;  %14950 = vmatpush1.bf16.msra.mxu1 %v22630_v44  ;;  %v22683_v9 = vld [vmem:[#allocation5 + $0x42ac] ss:$36 sps:$4 sm:$0xff]   ;;  %v22686_v44 = vld [vmem:[#allocation5 + $0x42b4] ss:$36 sps:$4 sm:$0xff]  }
 0x46f   :  { %14336 = vmatprep.subr.bf16.mxu0 %v22635_v45  ;;  %14951 = vmatprep.subr.bf16.mxu1 %v22638_v46  ;;  %v22681_v45 = vld [vmem:[#allocation5 + $0x42a8] ss:$36 sps:$4 sm:$0xff]   ;;  %v22684_v46 = vld [vmem:[#allocation5 + $0x42b0] ss:$36 sps:$4 sm:$0xff]  }
 0x472   :  { %14337 = vmatpush1.bf16.msra.mxu0 %v22633_v41  ;;  %14952 = vmatpush1.bf16.msra.mxu1 %v22636_v49  ;;  %v22689_v41 = vld [vmem:[#allocation5 + $0x42f4] ss:$36 sps:$4 sm:$0xff]   ;;  %v22692_v49 = vld [vmem:[#allocation5 + $0x42fc] ss:$36 sps:$4 sm:$0xff]  }
 0x473   :  { %14338 = vmatprep.subr.bf16.mxu0 %v22641_v50  ;;  %14953 = vmatprep.subr.bf16.mxu1 %v22644_v51  ;;  %v22687_v50 = vld [vmem:[#allocation5 + $0x42f0] ss:$36 sps:$4 sm:$0xff]   ;;  %v22690_v51 = vld [vmem:[#allocation5 + $0x42f8] ss:$36 sps:$4 sm:$0xff]  }
 0x476   :  { %14339 = vmatpush1.bf16.msra.mxu0 %v22639_v52  ;;  %14954 = vmatpush1.bf16.msra.mxu1 %v22642_v53  ;;  %v22695_v52 = vld [vmem:[#allocation5 + $0x433c] ss:$36 sps:$4 sm:$0xff]   ;;  %v22698_v53 = vld [vmem:[#allocation5 + $0x4344] ss:$36 sps:$4 sm:$0xff]  }
 0x477   :  { %14340 = vmatprep.subr.bf16.mxu0 %v22647_v54  ;;  %14955 = vmatprep.subr.bf16.mxu1 %v22650_v55  ;;  %v22693_v54 = vld [vmem:[#allocation5 + $0x4338] ss:$36 sps:$4 sm:$0xff]   ;;  %v22696_v55 = vld [vmem:[#allocation5 + $0x4340] ss:$36 sps:$4 sm:$0xff]  }
 0x47a   :  { %14341 = vmatpush1.bf16.msra.mxu0 %v22645_v58  ;;  %14956 = vmatpush1.bf16.msra.mxu1 %v22648_v59  ;;  %v22703_v58 = vld [vmem:[#allocation5 + $0x14] ss:$36 sps:$4 sm:$0xff]   ;;  %v22706_v59 = vld [vmem:[#allocation5 + $0x1c] ss:$36 sps:$4 sm:$0xff]  }
 0x47b   :  { %14342 = vmatprep.subr.bf16.mxu0 %v22653_v0  ;;  %14957 = vmatprep.subr.bf16.mxu1 %v22656_v1  ;;  %v25250_v0 = vcombine.low %v25234_v13, %v25234_v13  ;;  %v22701_v1 = vld [vmem:[#allocation5 + $0x10] ss:$36 sps:$4 sm:$0xff]   ;;  %v22715_v13 = vld [vmem:[#allocation5 + $0xa4] ss:$36 sps:$4 sm:$0xff]  }
 0x47e   :  { %14343 = vmatpush1.bf16.msra.mxu0 %v22651_v21  ;;  %14958 = vmatpush1.bf16.msra.mxu1 %v22654_v3  ;;  %v22704_v21 = vld [vmem:[#allocation5 + $0x18] ss:$36 sps:$4 sm:$0xff]  }
 0x47f   :  { %14344 = vmatprep.subr.bf16.mxu0 %v22659_v7  ;;  %14959 = vmatprep.subr.bf16.mxu1 %v22662_v8  ;;  %v22709_v3 = vld [vmem:[#allocation5 + $0x5c] ss:$36 sps:$4 sm:$0xff]   ;;  %v22712_v7 = vld [vmem:[#allocation5 + $0x64] ss:$36 sps:$4 sm:$0xff]  }
 0x480   :  { %v22707_v8 = vld [vmem:[#allocation5 + $0x58] ss:$36 sps:$4 sm:$0xff]  }
 0x482   :  { %14345 = vmatpush1.bf16.msra.mxu0 %v22657_v12  ;;  %14960 = vmatpush1.bf16.msra.mxu1 %v22660_v14  ;;  %v22710_v12 = vld [vmem:[#allocation5 + $0x60] ss:$36 sps:$4 sm:$0xff]   ;;  %v22718_v14 = vld [vmem:[#allocation5 + $0xac] ss:$36 sps:$4 sm:$0xff]  }
 0x483   :  { %14346 = vmatprep.subr.bf16.mxu0 %v22665_v23  ;;  %14961 = vmatprep.subr.bf16.mxu1 %v22668_v17  ;;  %v22713_v23 = vld [vmem:[#allocation5 + $0xa0] ss:$36 sps:$4 sm:$0xff]   ;;  %v22716_v17 = vld [vmem:[#allocation5 + $0xa8] ss:$36 sps:$4 sm:$0xff]  }
 0x486   :  { %14347 = vmatpush1.bf16.msra.mxu0 %v22663_v56  ;;  %14962 = vmatpush1.bf16.msra.mxu1 %v22666_v19  ;;  %v22721_v56 = vld [vmem:[#allocation5 + $0xec] ss:$36 sps:$4 sm:$0xff]   ;;  %v22724_v19 = vld [vmem:[#allocation5 + $0xf4] ss:$36 sps:$4 sm:$0xff]  }
 0x487   :  { %14348 = vmatprep.subr.bf16.mxu0 %v22671_v25  ;;  %14963 = vmatprep.subr.bf16.mxu1 %v22674_v26  ;;  %v22719_v25 = vld [vmem:[#allocation5 + $0xe8] ss:$36 sps:$4 sm:$0xff]   ;;  %v22722_v26 = vld [vmem:[#allocation5 + $0xf0] ss:$36 sps:$4 sm:$0xff]  }
 0x48a   :  { %14349 = vmatpush1.bf16.msra.mxu0 %v22669_v39  ;;  %14964 = vmatpush1.bf16.msra.mxu1 %v22672_v32  ;;  %v22727_v39 = vld [vmem:[#allocation5 + $0x134] ss:$36 sps:$4 sm:$0xff]   ;;  %v22730_v32 = vld [vmem:[#allocation5 + $0x13c] ss:$36 sps:$4 sm:$0xff]  }
 0x48b   :  { %14350 = vmatprep.subr.bf16.mxu0 %v22677_v33  ;;  %14965 = vmatprep.subr.bf16.mxu1 %v22680_v34  ;;  %v22725_v33 = vld [vmem:[#allocation5 + $0x130] ss:$36 sps:$4 sm:$0xff]   ;;  %v22728_v34 = vld [vmem:[#allocation5 + $0x138] ss:$36 sps:$4 sm:$0xff]  }
 0x48e   :  { %14351 = vmatpush1.bf16.msra.mxu0 %v22675_v60  ;;  %14966 = vmatpush1.bf16.msra.mxu1 %v22678_v38  ;;  %v22733_v60 = vld [vmem:[#allocation5 + $0x17c] ss:$36 sps:$4 sm:$0xff]   ;;  %v22736_v38 = vld [vmem:[#allocation5 + $0x184] ss:$36 sps:$4 sm:$0xff]  }
 0x48f   :  { %14352 = vmatprep.subr.bf16.mxu0 %v22683_v9  ;;  %14967 = vmatprep.subr.bf16.mxu1 %v22686_v44  ;;  %v22731_v9 = vld [vmem:[#allocation5 + $0x178] ss:$36 sps:$4 sm:$0xff]   ;;  %v22734_v44 = vld [vmem:[#allocation5 + $0x180] ss:$36 sps:$4 sm:$0xff]  }
 0x492   :  { %14353 = vmatpush1.bf16.msra.mxu0 %v22681_v45  ;;  %14968 = vmatpush1.bf16.msra.mxu1 %v22684_v46  ;;  %v22739_v45 = vld [vmem:[#allocation5 + $0x1c4] ss:$36 sps:$4 sm:$0xff]   ;;  %v22742_v46 = vld [vmem:[#allocation5 + $0x1cc] ss:$36 sps:$4 sm:$0xff]  }
 0x493   :  { %14354 = vmatprep.subr.bf16.mxu0 %v22689_v41  ;;  %14969 = vmatprep.subr.bf16.mxu1 %v22692_v49  ;;  %v22737_v41 = vld [vmem:[#allocation5 + $0x1c0] ss:$36 sps:$4 sm:$0xff]   ;;  %v22740_v49 = vld [vmem:[#allocation5 + $0x1c8] ss:$36 sps:$4 sm:$0xff]  }
 0x496   :  { %14355 = vmatpush1.bf16.msra.mxu0 %v22687_v50  ;;  %14970 = vmatpush1.bf16.msra.mxu1 %v22690_v51  ;;  %v22745_v50 = vld [vmem:[#allocation5 + $0x20c] ss:$36 sps:$4 sm:$0xff]   ;;  %v22748_v51 = vld [vmem:[#allocation5 + $0x214] ss:$36 sps:$4 sm:$0xff]  }
 0x497   :  { %14356 = vmatprep.subr.bf16.mxu0 %v22695_v52  ;;  %14971 = vmatprep.subr.bf16.mxu1 %v22698_v53  ;;  %v22743_v52 = vld [vmem:[#allocation5 + $0x208] ss:$36 sps:$4 sm:$0xff]   ;;  %v22746_v53 = vld [vmem:[#allocation5 + $0x210] ss:$36 sps:$4 sm:$0xff]  }
 0x49a   :  { %14357 = vmatpush1.bf16.msra.mxu0 %v22693_v54  ;;  %14972 = vmatpush1.bf16.msra.mxu1 %v22696_v55  ;;  %v22751_v54 = vld [vmem:[#allocation5 + $0x254] ss:$36 sps:$4 sm:$0xff]   ;;  %v22754_v55 = vld [vmem:[#allocation5 + $0x25c] ss:$36 sps:$4 sm:$0xff]  }
 0x49b   :  { %14982 = vmatprep.subr.bf16.mxu0 %v22703_v58  ;;  %15597 = vmatprep.subr.bf16.mxu1 %v22706_v59  ;;  %v22749_v58 = vld [vmem:[#allocation5 + $0x250] ss:$36 sps:$4 sm:$0xff]   ;;  %v22752_v59 = vld [vmem:[#allocation5 + $0x258] ss:$36 sps:$4 sm:$0xff]  }
 0x49d   :  { %14359 = vmatmul.mubr.bf16.vlgmr.msra.gmra.mrb[0].mxu0 %v25250_v0  ;;  %14974 = vmatmul.mubr.bf16.vlgmr.msra.gmra.mrb[0].mxu1 %v25250_v0 }
 0x49e   :  { %14983 = vmatpush1.bf16.msra.mxu0 %v22701_v1  ;;  %15598 = vmatpush1.bf16.msra.mxu1 %v22704_v21  ;;  %v22757_v1 = vld [vmem:[#allocation5 + $0x29c] ss:$36 sps:$4 sm:$0xff]   ;;  %v22760_v21 = vld [vmem:[#allocation5 + $0x2a4] ss:$36 sps:$4 sm:$0xff]  }
 0x49f   :  { %14984 = vmatprep.subr.bf16.mxu0 %v22709_v3  ;;  %15599 = vmatprep.subr.bf16.mxu1 %v22712_v7  ;;  %v22755_v3 = vld [vmem:[#allocation5 + $0x298] ss:$36 sps:$4 sm:$0xff]   ;;  %v22758_v7 = vld [vmem:[#allocation5 + $0x2a0] ss:$36 sps:$4 sm:$0xff]  }
 0x4a0   :  { %15014 = vmatprep.mubr.bf16.mxu0 %v25050_v48  ;;  %15629 = vmatprep.mubr.bf16.mxu1 %v25050_v48 }
 0x4a2   :  { %14985 = vmatpush1.bf16.msra.mxu0 %v22707_v8  ;;  %15600 = vmatpush1.bf16.msra.mxu1 %v22710_v12  ;;  %v22763_v8 = vld [vmem:[#allocation5 + $0x2e4] ss:$36 sps:$4 sm:$0xff]   ;;  %v22766_v12 = vld [vmem:[#allocation5 + $0x2ec] ss:$36 sps:$4 sm:$0xff]  }
 0x4a3   :  { %14986 = vmatprep.subr.bf16.mxu0 %v22715_v13  ;;  %15601 = vmatprep.subr.bf16.mxu1 %v22718_v14  ;;  %v22761_v13 = vld [vmem:[#allocation5 + $0x2e0] ss:$36 sps:$4 sm:$0xff]   ;;  %v22764_v14 = vld [vmem:[#allocation5 + $0x2e8] ss:$36 sps:$4 sm:$0xff]  }
 0x4a6   :  { %14987 = vmatpush1.bf16.msra.mxu0 %v22713_v23  ;;  %15602 = vmatpush1.bf16.msra.mxu1 %v22716_v17  ;;  %v22769_v23 = vld [vmem:[#allocation5 + $0x32c] ss:$36 sps:$4 sm:$0xff]   ;;  %v22772_v17 = vld [vmem:[#allocation5 + $0x334] ss:$36 sps:$4 sm:$0xff]  }
 0x4a7   :  { %14988 = vmatprep.subr.bf16.mxu0 %v22721_v56  ;;  %15603 = vmatprep.subr.bf16.mxu1 %v22724_v19  ;;  %v22767_v56 = vld [vmem:[#allocation5 + $0x328] ss:$36 sps:$4 sm:$0xff]   ;;  %v22770_v19 = vld [vmem:[#allocation5 + $0x330] ss:$36 sps:$4 sm:$0xff]  }
 0x4aa   :  { %14989 = vmatpush1.bf16.msra.mxu0 %v22719_v25  ;;  %15604 = vmatpush1.bf16.msra.mxu1 %v22722_v26  ;;  %v22775_v25 = vld [vmem:[#allocation5 + $0x374] ss:$36 sps:$4 sm:$0xff]   ;;  %v22778_v26 = vld [vmem:[#allocation5 + $0x37c] ss:$36 sps:$4 sm:$0xff]  }
 0x4ab   :  { %14990 = vmatprep.subr.bf16.mxu0 %v22727_v39  ;;  %15605 = vmatprep.subr.bf16.mxu1 %v22730_v32  ;;  %v22773_v39 = vld [vmem:[#allocation5 + $0x370] ss:$36 sps:$4 sm:$0xff]   ;;  %v22776_v32 = vld [vmem:[#allocation5 + $0x378] ss:$36 sps:$4 sm:$0xff]  }
 0x4ae   :  { %14991 = vmatpush1.bf16.msra.mxu0 %v22725_v33  ;;  %15606 = vmatpush1.bf16.msra.mxu1 %v22728_v34  ;;  %v22781_v33 = vld [vmem:[#allocation5 + $0x3bc] ss:$36 sps:$4 sm:$0xff]   ;;  %v22784_v34 = vld [vmem:[#allocation5 + $0x3c4] ss:$36 sps:$4 sm:$0xff]  }
 0x4af   :  { %14992 = vmatprep.subr.bf16.mxu0 %v22733_v60  ;;  %15607 = vmatprep.subr.bf16.mxu1 %v22736_v38  ;;  %v22779_v60 = vld [vmem:[#allocation5 + $0x3b8] ss:$36 sps:$4 sm:$0xff]   ;;  %v22782_v38 = vld [vmem:[#allocation5 + $0x3c0] ss:$36 sps:$4 sm:$0xff]  }
 0x4b2   :  { %14993 = vmatpush1.bf16.msra.mxu0 %v22731_v9  ;;  %15608 = vmatpush1.bf16.msra.mxu1 %v22734_v44  ;;  %v22787_v9 = vld [vmem:[#allocation5 + $0x404] ss:$36 sps:$4 sm:$0xff]   ;;  %v22790_v44 = vld [vmem:[#allocation5 + $0x40c] ss:$36 sps:$4 sm:$0xff]  }
 0x4b3   :  { %14994 = vmatprep.subr.bf16.mxu0 %v22739_v45  ;;  %15609 = vmatprep.subr.bf16.mxu1 %v22742_v46  ;;  %v22785_v45 = vld [vmem:[#allocation5 + $0x400] ss:$36 sps:$4 sm:$0xff]   ;;  %v22788_v46 = vld [vmem:[#allocation5 + $0x408] ss:$36 sps:$4 sm:$0xff]  }
 0x4b6   :  { %14995 = vmatpush1.bf16.msra.mxu0 %v22737_v41  ;;  %15610 = vmatpush1.bf16.msra.mxu1 %v22740_v49  ;;  %v22793_v41 = vld [vmem:[#allocation5 + $0x44c] ss:$36 sps:$4 sm:$0xff]   ;;  %v22796_v49 = vld [vmem:[#allocation5 + $0x454] ss:$36 sps:$4 sm:$0xff]  }
 0x4b7   :  { %14996 = vmatprep.subr.bf16.mxu0 %v22745_v50  ;;  %15611 = vmatprep.subr.bf16.mxu1 %v22748_v51  ;;  %v22791_v50 = vld [vmem:[#allocation5 + $0x448] ss:$36 sps:$4 sm:$0xff]   ;;  %v22794_v51 = vld [vmem:[#allocation5 + $0x450] ss:$36 sps:$4 sm:$0xff]  }
 0x4ba   :  { %14997 = vmatpush1.bf16.msra.mxu0 %v22743_v52  ;;  %15612 = vmatpush1.bf16.msra.mxu1 %v22746_v53  ;;  %v22799_v52 = vld [vmem:[#allocation5 + $0x494] ss:$36 sps:$4 sm:$0xff]   ;;  %v22802_v53 = vld [vmem:[#allocation5 + $0x49c] ss:$36 sps:$4 sm:$0xff]  }
 0x4bb   :  { %14998 = vmatprep.subr.bf16.mxu0 %v22751_v54  ;;  %15613 = vmatprep.subr.bf16.mxu1 %v22754_v55  ;;  %v22797_v54 = vld [vmem:[#allocation5 + $0x490] ss:$36 sps:$4 sm:$0xff]   ;;  %v22800_v55 = vld [vmem:[#allocation5 + $0x498] ss:$36 sps:$4 sm:$0xff]  }
 0x4be   :  { %14999 = vmatpush1.bf16.msra.mxu0 %v22749_v58  ;;  %15614 = vmatpush1.bf16.msra.mxu1 %v22752_v59  ;;  %v22805_v58 = vld [vmem:[#allocation5 + $0x4dc] ss:$36 sps:$4 sm:$0xff]   ;;  %v22808_v59 = vld [vmem:[#allocation5 + $0x4e4] ss:$36 sps:$4 sm:$0xff]  }
 0x4bf   :  { %15000 = vmatprep.subr.bf16.mxu0 %v22757_v1  ;;  %15615 = vmatprep.subr.bf16.mxu1 %v22760_v21  ;;  %v22803_v1 = vld [vmem:[#allocation5 + $0x4d8] ss:$36 sps:$4 sm:$0xff]   ;;  %v22806_v21 = vld [vmem:[#allocation5 + $0x4e0] ss:$36 sps:$4 sm:$0xff]  }
 0x4c2   :  { %15001 = vmatpush1.bf16.msra.mxu0 %v22755_v3  ;;  %15616 = vmatpush1.bf16.msra.mxu1 %v22758_v7  ;;  %v22811_v3 = vld [vmem:[#allocation5 + $0x524] ss:$36 sps:$4 sm:$0xff]   ;;  %v22814_v7 = vld [vmem:[#allocation5 + $0x52c] ss:$36 sps:$4 sm:$0xff]  }
 0x4c3   :  { %15002 = vmatprep.subr.bf16.mxu0 %v22763_v8  ;;  %15617 = vmatprep.subr.bf16.mxu1 %v22766_v12  ;;  %v22809_v8 = vld [vmem:[#allocation5 + $0x520] ss:$36 sps:$4 sm:$0xff]   ;;  %v22812_v12 = vld [vmem:[#allocation5 + $0x528] ss:$36 sps:$4 sm:$0xff]  }
 0x4c6   :  { %15003 = vmatpush1.bf16.msra.mxu0 %v22761_v13  ;;  %15618 = vmatpush1.bf16.msra.mxu1 %v22764_v14  ;;  %v22817_v13 = vld [vmem:[#allocation5 + $0x56c] ss:$36 sps:$4 sm:$0xff]   ;;  %v22820_v14 = vld [vmem:[#allocation5 + $0x574] ss:$36 sps:$4 sm:$0xff]  }
 0x4c7   :  { %15004 = vmatprep.subr.bf16.mxu0 %v22769_v23  ;;  %15619 = vmatprep.subr.bf16.mxu1 %v22772_v17  ;;  %v22815_v23 = vld [vmem:[#allocation5 + $0x568] ss:$36 sps:$4 sm:$0xff]   ;;  %v22818_v17 = vld [vmem:[#allocation5 + $0x570] ss:$36 sps:$4 sm:$0xff]  }
 0x4ca   :  { %15005 = vmatpush1.bf16.msra.mxu0 %v22767_v56  ;;  %15620 = vmatpush1.bf16.msra.mxu1 %v22770_v19  ;;  %v22823_v56 = vld [vmem:[#allocation5 + $0x5b4] ss:$36 sps:$4 sm:$0xff]   ;;  %v22826_v19 = vld [vmem:[#allocation5 + $0x5bc] ss:$36 sps:$4 sm:$0xff]  }
 0x4cb   :  { %15006 = vmatprep.subr.bf16.mxu0 %v22775_v25  ;;  %15621 = vmatprep.subr.bf16.mxu1 %v22778_v26  ;;  %v22821_v25 = vld [vmem:[#allocation5 + $0x5b0] ss:$36 sps:$4 sm:$0xff]   ;;  %v22824_v26 = vld [vmem:[#allocation5 + $0x5b8] ss:$36 sps:$4 sm:$0xff]  }
 0x4ce   :  { %15007 = vmatpush1.bf16.msra.mxu0 %v22773_v39  ;;  %15622 = vmatpush1.bf16.msra.mxu1 %v22776_v32  ;;  %v22829_v39 = vld [vmem:[#allocation5 + $0x5fc] ss:$36 sps:$4 sm:$0xff]   ;;  %v22832_v32 = vld [vmem:[#allocation5 + $0x604] ss:$36 sps:$4 sm:$0xff]  }
 0x4cf   :  { %15008 = vmatprep.subr.bf16.mxu0 %v22781_v33  ;;  %15623 = vmatprep.subr.bf16.mxu1 %v22784_v34  ;;  %v22827_v33 = vld [vmem:[#allocation5 + $0x5f8] ss:$36 sps:$4 sm:$0xff]   ;;  %v22830_v34 = vld [vmem:[#allocation5 + $0x600] ss:$36 sps:$4 sm:$0xff]  }
 0x4d2   :  { %15009 = vmatpush1.bf16.msra.mxu0 %v22779_v60  ;;  %15624 = vmatpush1.bf16.msra.mxu1 %v22782_v38  ;;  %v22835_v60 = vld [vmem:[#allocation5 + $0x644] ss:$36 sps:$4 sm:$0xff]   ;;  %v22838_v38 = vld [vmem:[#allocation5 + $0x64c] ss:$36 sps:$4 sm:$0xff]  }
 0x4d3   :  { %15010 = vmatprep.subr.bf16.mxu0 %v22787_v9  ;;  %15625 = vmatprep.subr.bf16.mxu1 %v22790_v44  ;;  %v22833_v9 = vld [vmem:[#allocation5 + $0x640] ss:$36 sps:$4 sm:$0xff]   ;;  %v22836_v44 = vld [vmem:[#allocation5 + $0x648] ss:$36 sps:$4 sm:$0xff]  }
 0x4d6   :  { %15011 = vmatpush1.bf16.msra.mxu0 %v22785_v45  ;;  %15626 = vmatpush1.bf16.msra.mxu1 %v22788_v46  ;;  %v22841_v45 = vld [vmem:[#allocation5 + $0x68c] ss:$36 sps:$4 sm:$0xff]   ;;  %v22844_v46 = vld [vmem:[#allocation5 + $0x694] ss:$36 sps:$4 sm:$0xff]  }
 0x4d7   :  { %15012 = vmatprep.subr.bf16.mxu0 %v22793_v41  ;;  %15627 = vmatprep.subr.bf16.mxu1 %v22796_v49  ;;  %v22839_v41 = vld [vmem:[#allocation5 + $0x688] ss:$36 sps:$4 sm:$0xff]   ;;  %v22842_v49 = vld [vmem:[#allocation5 + $0x690] ss:$36 sps:$4 sm:$0xff]  }
 0x4da   :  { %15013 = vmatpush1.bf16.msra.mxu0 %v22791_v50  ;;  %15628 = vmatpush1.bf16.msra.mxu1 %v22794_v51  ;;  %v22847_v50 = vld [vmem:[#allocation5 + $0x6d4] ss:$36 sps:$4 sm:$0xff]   ;;  %v22850_v51 = vld [vmem:[#allocation5 + $0x6dc] ss:$36 sps:$4 sm:$0xff]  }
 0x4db   :  { %15023 = vmatprep.subr.bf16.mxu0 %v22799_v52  ;;  %15638 = vmatprep.subr.bf16.mxu1 %v22802_v53  ;;  %v22845_v52 = vld [vmem:[#allocation5 + $0x6d0] ss:$36 sps:$4 sm:$0xff]   ;;  %v22848_v53 = vld [vmem:[#allocation5 + $0x6d8] ss:$36 sps:$4 sm:$0xff]  }
 0x4dd   :  { %15015 = vmatmul.mubr.bf16.vlgmr.msra.gmra.mrb[4].mxu0 %v25054_v5  ;;  %15630 = vmatmul.mubr.bf16.vlgmr.msra.gmra.mrb[4].mxu1 %v25054_v5 }
 0x4de   :  { %15024 = vmatpush1.bf16.msra.mxu0 %v22797_v54  ;;  %15639 = vmatpush1.bf16.msra.mxu1 %v22800_v55  ;;  %v22853_v54 = vld [vmem:[#allocation5 + $0x71c] ss:$36 sps:$4 sm:$0xff]   ;;  %v22856_v55 = vld [vmem:[#allocation5 + $0x724] ss:$36 sps:$4 sm:$0xff]  }
 0x4df   :  { %15025 = vmatprep.subr.bf16.mxu0 %v22805_v58  ;;  %15640 = vmatprep.subr.bf16.mxu1 %v22808_v59  ;;  %v22851_v58 = vld [vmem:[#allocation5 + $0x718] ss:$36 sps:$4 sm:$0xff]   ;;  %v22854_v59 = vld [vmem:[#allocation5 + $0x720] ss:$36 sps:$4 sm:$0xff]  }
 0x4e0   :  { %15055 = vmatprep.mubr.bf16.mxu0 %v25062_v30  ;;  %15670 = vmatprep.mubr.bf16.mxu1 %v25062_v30 }
 0x4e2   :  { %15026 = vmatpush1.bf16.msra.mxu0 %v22803_v1  ;;  %15641 = vmatpush1.bf16.msra.mxu1 %v22806_v21  ;;  %v22859_v1 = vld [vmem:[#allocation5 + $0x764] ss:$36 sps:$4 sm:$0xff]   ;;  %v22862_v21 = vld [vmem:[#allocation5 + $0x76c] ss:$36 sps:$4 sm:$0xff]  }
 0x4e3   :  { %15027 = vmatprep.subr.bf16.mxu0 %v22811_v3  ;;  %15642 = vmatprep.subr.bf16.mxu1 %v22814_v7  ;;  %v22857_v3 = vld [vmem:[#allocation5 + $0x760] ss:$36 sps:$4 sm:$0xff]   ;;  %v22860_v7 = vld [vmem:[#allocation5 + $0x768] ss:$36 sps:$4 sm:$0xff]  }
 0x4e6   :  { %15028 = vmatpush1.bf16.msra.mxu0 %v22809_v8  ;;  %15643 = vmatpush1.bf16.msra.mxu1 %v22812_v12  ;;  %v22865_v8 = vld [vmem:[#allocation5 + $0x7ac] ss:$36 sps:$4 sm:$0xff]   ;;  %v22868_v12 = vld [vmem:[#allocation5 + $0x7b4] ss:$36 sps:$4 sm:$0xff]  }
 0x4e7   :  { %15029 = vmatprep.subr.bf16.mxu0 %v22817_v13  ;;  %15644 = vmatprep.subr.bf16.mxu1 %v22820_v14  ;;  %v22863_v13 = vld [vmem:[#allocation5 + $0x7a8] ss:$36 sps:$4 sm:$0xff]   ;;  %v22866_v14 = vld [vmem:[#allocation5 + $0x7b0] ss:$36 sps:$4 sm:$0xff]  }
 0x4ea   :  { %15030 = vmatpush1.bf16.msra.mxu0 %v22815_v23  ;;  %15645 = vmatpush1.bf16.msra.mxu1 %v22818_v17  ;;  %v22871_v23 = vld [vmem:[#allocation5 + $0x7f4] ss:$36 sps:$4 sm:$0xff]   ;;  %v22874_v17 = vld [vmem:[#allocation5 + $0x7fc] ss:$36 sps:$4 sm:$0xff]  }
 0x4eb   :  { %15031 = vmatprep.subr.bf16.mxu0 %v22823_v56  ;;  %15646 = vmatprep.subr.bf16.mxu1 %v22826_v19  ;;  %v22869_v56 = vld [vmem:[#allocation5 + $0x7f0] ss:$36 sps:$4 sm:$0xff]   ;;  %v22872_v19 = vld [vmem:[#allocation5 + $0x7f8] ss:$36 sps:$4 sm:$0xff]  }
 0x4ee   :  { %15032 = vmatpush1.bf16.msra.mxu0 %v22821_v25  ;;  %15647 = vmatpush1.bf16.msra.mxu1 %v22824_v26  ;;  %v22877_v25 = vld [vmem:[#allocation5 + $0x83c] ss:$36 sps:$4 sm:$0xff]   ;;  %v22880_v26 = vld [vmem:[#allocation5 + $0x844] ss:$36 sps:$4 sm:$0xff]  }
 0x4ef   :  { %15033 = vmatprep.subr.bf16.mxu0 %v22829_v39  ;;  %15648 = vmatprep.subr.bf16.mxu1 %v22832_v32  ;;  %v22875_v39 = vld [vmem:[#allocation5 + $0x838] ss:$36 sps:$4 sm:$0xff]   ;;  %v22878_v32 = vld [vmem:[#allocation5 + $0x840] ss:$36 sps:$4 sm:$0xff]  }
 0x4f2   :  { %15034 = vmatpush1.bf16.msra.mxu0 %v22827_v33  ;;  %15649 = vmatpush1.bf16.msra.mxu1 %v22830_v34  ;;  %v22883_v33 = vld [vmem:[#allocation5 + $0x884] ss:$36 sps:$4 sm:$0xff]   ;;  %v22886_v34 = vld [vmem:[#allocation5 + $0x88c] ss:$36 sps:$4 sm:$0xff]  }
 0x4f3   :  { %15035 = vmatprep.subr.bf16.mxu0 %v22835_v60  ;;  %15650 = vmatprep.subr.bf16.mxu1 %v22838_v38  ;;  %v22881_v60 = vld [vmem:[#allocation5 + $0x880] ss:$36 sps:$4 sm:$0xff]   ;;  %v22884_v38 = vld [vmem:[#allocation5 + $0x888] ss:$36 sps:$4 sm:$0xff]  }
 0x4f6   :  { %15036 = vmatpush1.bf16.msra.mxu0 %v22833_v9  ;;  %15651 = vmatpush1.bf16.msra.mxu1 %v22836_v44  ;;  %v22889_v9 = vld [vmem:[#allocation5 + $0x8cc] ss:$36 sps:$4 sm:$0xff]   ;;  %v22892_v44 = vld [vmem:[#allocation5 + $0x8d4] ss:$36 sps:$4 sm:$0xff]  }
 0x4f7   :  { %15037 = vmatprep.subr.bf16.mxu0 %v22841_v45  ;;  %15652 = vmatprep.subr.bf16.mxu1 %v22844_v46  ;;  %v22887_v45 = vld [vmem:[#allocation5 + $0x8c8] ss:$36 sps:$4 sm:$0xff]   ;;  %v22890_v46 = vld [vmem:[#allocation5 + $0x8d0] ss:$36 sps:$4 sm:$0xff]  }
 0x4fa   :  { %15038 = vmatpush1.bf16.msra.mxu0 %v22839_v41  ;;  %15653 = vmatpush1.bf16.msra.mxu1 %v22842_v49  ;;  %v22895_v41 = vld [vmem:[#allocation5 + $0x914] ss:$36 sps:$4 sm:$0xff]   ;;  %v22898_v49 = vld [vmem:[#allocation5 + $0x91c] ss:$36 sps:$4 sm:$0xff]  }
 0x4fb   :  { %15039 = vmatprep.subr.bf16.mxu0 %v22847_v50  ;;  %15654 = vmatprep.subr.bf16.mxu1 %v22850_v51  ;;  %v22893_v50 = vld [vmem:[#allocation5 + $0x910] ss:$36 sps:$4 sm:$0xff]   ;;  %v22896_v51 = vld [vmem:[#allocation5 + $0x918] ss:$36 sps:$4 sm:$0xff]  }
 0x4fe   :  { %15040 = vmatpush1.bf16.msra.mxu0 %v22845_v52  ;;  %15655 = vmatpush1.bf16.msra.mxu1 %v22848_v53  ;;  %v22901_v52 = vld [vmem:[#allocation5 + $0x95c] ss:$36 sps:$4 sm:$0xff]   ;;  %v22904_v53 = vld [vmem:[#allocation5 + $0x964] ss:$36 sps:$4 sm:$0xff]  }
 0x4ff   :  { %15041 = vmatprep.subr.bf16.mxu0 %v22853_v54  ;;  %15656 = vmatprep.subr.bf16.mxu1 %v22856_v55  ;;  %v22899_v54 = vld [vmem:[#allocation5 + $0x958] ss:$36 sps:$4 sm:$0xff]   ;;  %v22902_v55 = vld [vmem:[#allocation5 + $0x960] ss:$36 sps:$4 sm:$0xff]  }
 0x502   :  { %15042 = vmatpush1.bf16.msra.mxu0 %v22851_v58  ;;  %15657 = vmatpush1.bf16.msra.mxu1 %v22854_v59  ;;  %v22907_v58 = vld [vmem:[#allocation5 + $0x9a4] ss:$36 sps:$4 sm:$0xff]   ;;  %v22910_v59 = vld [vmem:[#allocation5 + $0x9ac] ss:$36 sps:$4 sm:$0xff]  }
 0x503   :  { %15043 = vmatprep.subr.bf16.mxu0 %v22859_v1  ;;  %15658 = vmatprep.subr.bf16.mxu1 %v22862_v21  ;;  %v22905_v1 = vld [vmem:[#allocation5 + $0x9a0] ss:$36 sps:$4 sm:$0xff]   ;;  %v22908_v21 = vld [vmem:[#allocation5 + $0x9a8] ss:$36 sps:$4 sm:$0xff]  }
 0x506   :  { %15044 = vmatpush1.bf16.msra.mxu0 %v22857_v3  ;;  %15659 = vmatpush1.bf16.msra.mxu1 %v22860_v7  ;;  %v22913_v3 = vld [vmem:[#allocation5 + $0x9ec] ss:$36 sps:$4 sm:$0xff]   ;;  %v22916_v7 = vld [vmem:[#allocation5 + $0x9f4] ss:$36 sps:$4 sm:$0xff]  }
 0x507   :  { %15045 = vmatprep.subr.bf16.mxu0 %v22865_v8  ;;  %15660 = vmatprep.subr.bf16.mxu1 %v22868_v12  ;;  %v22911_v8 = vld [vmem:[#allocation5 + $0x9e8] ss:$36 sps:$4 sm:$0xff]   ;;  %v22914_v12 = vld [vmem:[#allocation5 + $0x9f0] ss:$36 sps:$4 sm:$0xff]  }
 0x50a   :  { %15046 = vmatpush1.bf16.msra.mxu0 %v22863_v13  ;;  %15661 = vmatpush1.bf16.msra.mxu1 %v22866_v14  ;;  %v22919_v13 = vld [vmem:[#allocation5 + $0xa34] ss:$36 sps:$4 sm:$0xff]   ;;  %v22922_v14 = vld [vmem:[#allocation5 + $0xa3c] ss:$36 sps:$4 sm:$0xff]  }
 0x50b   :  { %15047 = vmatprep.subr.bf16.mxu0 %v22871_v23  ;;  %15662 = vmatprep.subr.bf16.mxu1 %v22874_v17  ;;  %v22917_v23 = vld [vmem:[#allocation5 + $0xa30] ss:$36 sps:$4 sm:$0xff]   ;;  %v22920_v17 = vld [vmem:[#allocation5 + $0xa38] ss:$36 sps:$4 sm:$0xff]  }
 0x50e   :  { %15048 = vmatpush1.bf16.msra.mxu0 %v22869_v56  ;;  %15663 = vmatpush1.bf16.msra.mxu1 %v22872_v19  ;;  %v22925_v56 = vld [vmem:[#allocation5 + $0xa7c] ss:$36 sps:$4 sm:$0xff]   ;;  %v22928_v19 = vld [vmem:[#allocation5 + $0xa84] ss:$36 sps:$4 sm:$0xff]  }
 0x50f   :  { %15049 = vmatprep.subr.bf16.mxu0 %v22877_v25  ;;  %15664 = vmatprep.subr.bf16.mxu1 %v22880_v26  ;;  %v22923_v25 = vld [vmem:[#allocation5 + $0xa78] ss:$36 sps:$4 sm:$0xff]   ;;  %v22926_v26 = vld [vmem:[#allocation5 + $0xa80] ss:$36 sps:$4 sm:$0xff]  }
 0x512   :  { %15050 = vmatpush1.bf16.msra.mxu0 %v22875_v39  ;;  %15665 = vmatpush1.bf16.msra.mxu1 %v22878_v32  ;;  %v22931_v39 = vld [vmem:[#allocation5 + $0xac4] ss:$36 sps:$4 sm:$0xff]   ;;  %v22934_v32 = vld [vmem:[#allocation5 + $0xacc] ss:$36 sps:$4 sm:$0xff]  }
 0x513   :  { %15051 = vmatprep.subr.bf16.mxu0 %v22883_v33  ;;  %15666 = vmatprep.subr.bf16.mxu1 %v22886_v34  ;;  %v22929_v33 = vld [vmem:[#allocation5 + $0xac0] ss:$36 sps:$4 sm:$0xff]   ;;  %v22932_v34 = vld [vmem:[#allocation5 + $0xac8] ss:$36 sps:$4 sm:$0xff]  }
 0x516   :  { %15052 = vmatpush1.bf16.msra.mxu0 %v22881_v60  ;;  %15667 = vmatpush1.bf16.msra.mxu1 %v22884_v38  ;;  %v22937_v60 = vld [vmem:[#allocation5 + $0xb0c] ss:$36 sps:$4 sm:$0xff]   ;;  %v22940_v38 = vld [vmem:[#allocation5 + $0xb14] ss:$36 sps:$4 sm:$0xff]  }
 0x517   :  { %15053 = vmatprep.subr.bf16.mxu0 %v22889_v9  ;;  %15668 = vmatprep.subr.bf16.mxu1 %v22892_v44  ;;  %v22935_v9 = vld [vmem:[#allocation5 + $0xb08] ss:$36 sps:$4 sm:$0xff]   ;;  %v22938_v44 = vld [vmem:[#allocation5 + $0xb10] ss:$36 sps:$4 sm:$0xff]  }
 0x51a   :  { %15054 = vmatpush1.bf16.msra.mxu0 %v22887_v45  ;;  %15669 = vmatpush1.bf16.msra.mxu1 %v22890_v46  ;;  %v22943_v45 = vld [vmem:[#allocation5 + $0xb54] ss:$36 sps:$4 sm:$0xff]   ;;  %v22946_v46 = vld [vmem:[#allocation5 + $0xb5c] ss:$36 sps:$4 sm:$0xff]  }
 0x51b   :  { %15064 = vmatprep.subr.bf16.mxu0 %v22895_v41  ;;  %15679 = vmatprep.subr.bf16.mxu1 %v22898_v49  ;;  %v22941_v41 = vld [vmem:[#allocation5 + $0xb50] ss:$36 sps:$4 sm:$0xff]   ;;  %v22944_v49 = vld [vmem:[#allocation5 + $0xb58] ss:$36 sps:$4 sm:$0xff]  }
 0x51d   :  { %15056 = vmatmul.mubr.bf16.vlgmr.msra.gmra.mrb[4].mxu0 %v25068_v10  ;;  %15671 = vmatmul.mubr.bf16.vlgmr.msra.gmra.mrb[4].mxu1 %v25068_v10 }
 0x51e   :  { %15065 = vmatpush1.bf16.msra.mxu0 %v22893_v50  ;;  %15680 = vmatpush1.bf16.msra.mxu1 %v22896_v51  ;;  %v22949_v50 = vld [vmem:[#allocation5 + $0xb9c] ss:$36 sps:$4 sm:$0xff]   ;;  %v22952_v51 = vld [vmem:[#allocation5 + $0xba4] ss:$36 sps:$4 sm:$0xff]  }
 0x51f   :  { %15066 = vmatprep.subr.bf16.mxu0 %v22901_v52  ;;  %15681 = vmatprep.subr.bf16.mxu1 %v22904_v53  ;;  %v22947_v52 = vld [vmem:[#allocation5 + $0xb98] ss:$36 sps:$4 sm:$0xff]   ;;  %v22950_v53 = vld [vmem:[#allocation5 + $0xba0] ss:$36 sps:$4 sm:$0xff]  }
 0x520   :  { %15096 = vmatprep.mubr.bf16.mxu0 %v25074_v15  ;;  %15711 = vmatprep.mubr.bf16.mxu1 %v25074_v15 }
 0x522   :  { %15067 = vmatpush1.bf16.msra.mxu0 %v22899_v54  ;;  %15682 = vmatpush1.bf16.msra.mxu1 %v22902_v55  ;;  %v22955_v54 = vld [vmem:[#allocation5 + $0xbe4] ss:$36 sps:$4 sm:$0xff]   ;;  %v22958_v55 = vld [vmem:[#allocation5 + $0xbec] ss:$36 sps:$4 sm:$0xff]  }
 0x523   :  { %15068 = vmatprep.subr.bf16.mxu0 %v22907_v58  ;;  %15683 = vmatprep.subr.bf16.mxu1 %v22910_v59  ;;  %v22953_v58 = vld [vmem:[#allocation5 + $0xbe0] ss:$36 sps:$4 sm:$0xff]   ;;  %v22956_v59 = vld [vmem:[#allocation5 + $0xbe8] ss:$36 sps:$4 sm:$0xff]  }
 0x526   :  { %15069 = vmatpush1.bf16.msra.mxu0 %v22905_v1  ;;  %15684 = vmatpush1.bf16.msra.mxu1 %v22908_v21  ;;  %v22961_v1 = vld [vmem:[#allocation5 + $0xc2c] ss:$36 sps:$4 sm:$0xff]   ;;  %v22964_v21 = vld [vmem:[#allocation5 + $0xc34] ss:$36 sps:$4 sm:$0xff]  }
 0x527   :  { %15070 = vmatprep.subr.bf16.mxu0 %v22913_v3  ;;  %15685 = vmatprep.subr.bf16.mxu1 %v22916_v7  ;;  %v22959_v3 = vld [vmem:[#allocation5 + $0xc28] ss:$36 sps:$4 sm:$0xff]   ;;  %v22962_v7 = vld [vmem:[#allocation5 + $0xc30] ss:$36 sps:$4 sm:$0xff]  }
 0x52a   :  { %15071 = vmatpush1.bf16.msra.mxu0 %v22911_v8  ;;  %15686 = vmatpush1.bf16.msra.mxu1 %v22914_v12  ;;  %v22967_v8 = vld [vmem:[#allocation5 + $0xc74] ss:$36 sps:$4 sm:$0xff]   ;;  %v22970_v12 = vld [vmem:[#allocation5 + $0xc7c] ss:$36 sps:$4 sm:$0xff]  }
 0x52b   :  { %15072 = vmatprep.subr.bf16.mxu0 %v22919_v13  ;;  %15687 = vmatprep.subr.bf16.mxu1 %v22922_v14  ;;  %v22965_v13 = vld [vmem:[#allocation5 + $0xc70] ss:$36 sps:$4 sm:$0xff]   ;;  %v22968_v14 = vld [vmem:[#allocation5 + $0xc78] ss:$36 sps:$4 sm:$0xff]  }
 0x52e   :  { %15073 = vmatpush1.bf16.msra.mxu0 %v22917_v23  ;;  %15688 = vmatpush1.bf16.msra.mxu1 %v22920_v17  ;;  %v22973_v23 = vld [vmem:[#allocation5 + $0xcbc] ss:$36 sps:$4 sm:$0xff]   ;;  %v22976_v17 = vld [vmem:[#allocation5 + $0xcc4] ss:$36 sps:$4 sm:$0xff]  }
 0x52f   :  { %15074 = vmatprep.subr.bf16.mxu0 %v22925_v56  ;;  %15689 = vmatprep.subr.bf16.mxu1 %v22928_v19  ;;  %v22971_v56 = vld [vmem:[#allocation5 + $0xcb8] ss:$36 sps:$4 sm:$0xff]   ;;  %v22974_v19 = vld [vmem:[#allocation5 + $0xcc0] ss:$36 sps:$4 sm:$0xff]  }
 0x532   :  { %15075 = vmatpush1.bf16.msra.mxu0 %v22923_v25  ;;  %15690 = vmatpush1.bf16.msra.mxu1 %v22926_v26  ;;  %v22979_v25 = vld [vmem:[#allocation5 + $0xd04] ss:$36 sps:$4 sm:$0xff]   ;;  %v22982_v26 = vld [vmem:[#allocation5 + $0xd0c] ss:$36 sps:$4 sm:$0xff]  }
 0x533   :  { %15076 = vmatprep.subr.bf16.mxu0 %v22931_v39  ;;  %15691 = vmatprep.subr.bf16.mxu1 %v22934_v32  ;;  %v22977_v39 = vld [vmem:[#allocation5 + $0xd00] ss:$36 sps:$4 sm:$0xff]   ;;  %v22980_v32 = vld [vmem:[#allocation5 + $0xd08] ss:$36 sps:$4 sm:$0xff]  }
 0x536   :  { %15077 = vmatpush1.bf16.msra.mxu0 %v22929_v33  ;;  %15692 = vmatpush1.bf16.msra.mxu1 %v22932_v34  ;;  %v22985_v33 = vld [vmem:[#allocation5 + $0xd4c] ss:$36 sps:$4 sm:$0xff]   ;;  %v22988_v34 = vld [vmem:[#allocation5 + $0xd54] ss:$36 sps:$4 sm:$0xff]  }
 0x537   :  { %15078 = vmatprep.subr.bf16.mxu0 %v22937_v60  ;;  %15693 = vmatprep.subr.bf16.mxu1 %v22940_v38  ;;  %v22983_v60 = vld [vmem:[#allocation5 + $0xd48] ss:$36 sps:$4 sm:$0xff]   ;;  %v22986_v38 = vld [vmem:[#allocation5 + $0xd50] ss:$36 sps:$4 sm:$0xff]  }
 0x53a   :  { %15079 = vmatpush1.bf16.msra.mxu0 %v22935_v9  ;;  %15694 = vmatpush1.bf16.msra.mxu1 %v22938_v44  ;;  %v22991_v9 = vld [vmem:[#allocation5 + $0xd94] ss:$36 sps:$4 sm:$0xff]   ;;  %v22994_v44 = vld [vmem:[#allocation5 + $0xd9c] ss:$36 sps:$4 sm:$0xff]  }
 0x53b   :  { %15080 = vmatprep.subr.bf16.mxu0 %v22943_v45  ;;  %15695 = vmatprep.subr.bf16.mxu1 %v22946_v46  ;;  %v22989_v45 = vld [vmem:[#allocation5 + $0xd90] ss:$36 sps:$4 sm:$0xff]   ;;  %v22992_v46 = vld [vmem:[#allocation5 + $0xd98] ss:$36 sps:$4 sm:$0xff]  }
 0x53e   :  { %15081 = vmatpush1.bf16.msra.mxu0 %v22941_v41  ;;  %15696 = vmatpush1.bf16.msra.mxu1 %v22944_v49  ;;  %v22997_v41 = vld [vmem:[#allocation5 + $0xddc] ss:$36 sps:$4 sm:$0xff]   ;;  %v23000_v49 = vld [vmem:[#allocation5 + $0xde4] ss:$36 sps:$4 sm:$0xff]  }
 0x53f   :  { %15082 = vmatprep.subr.bf16.mxu0 %v22949_v50  ;;  %15697 = vmatprep.subr.bf16.mxu1 %v22952_v51  ;;  %v22995_v50 = vld [vmem:[#allocation5 + $0xdd8] ss:$36 sps:$4 sm:$0xff]   ;;  %v22998_v51 = vld [vmem:[#allocation5 + $0xde0] ss:$36 sps:$4 sm:$0xff]  }
 0x542   :  { %15083 = vmatpush1.bf16.msra.mxu0 %v22947_v52  ;;  %15698 = vmatpush1.bf16.msra.mxu1 %v22950_v53  ;;  %v23003_v52 = vld [vmem:[#allocation5 + $0xe24] ss:$36 sps:$4 sm:$0xff]   ;;  %v23006_v53 = vld [vmem:[#allocation5 + $0xe2c] ss:$36 sps:$4 sm:$0xff]  }
 0x543   :  { %15084 = vmatprep.subr.bf16.mxu0 %v22955_v54  ;;  %15699 = vmatprep.subr.bf16.mxu1 %v22958_v55  ;;  %v23001_v54 = vld [vmem:[#allocation5 + $0xe20] ss:$36 sps:$4 sm:$0xff]   ;;  %v23004_v55 = vld [vmem:[#allocation5 + $0xe28] ss:$36 sps:$4 sm:$0xff]  }
 0x546   :  { %15085 = vmatpush1.bf16.msra.mxu0 %v22953_v58  ;;  %15700 = vmatpush1.bf16.msra.mxu1 %v22956_v59  ;;  %v23009_v58 = vld [vmem:[#allocation5 + $0xe6c] ss:$36 sps:$4 sm:$0xff]   ;;  %v23012_v59 = vld [vmem:[#allocation5 + $0xe74] ss:$36 sps:$4 sm:$0xff]  }
 0x547   :  { %15086 = vmatprep.subr.bf16.mxu0 %v22961_v1  ;;  %15701 = vmatprep.subr.bf16.mxu1 %v22964_v21  ;;  %v23007_v1 = vld [vmem:[#allocation5 + $0xe68] ss:$36 sps:$4 sm:$0xff]   ;;  %v23010_v21 = vld [vmem:[#allocation5 + $0xe70] ss:$36 sps:$4 sm:$0xff]  }
 0x54a   :  { %15087 = vmatpush1.bf16.msra.mxu0 %v22959_v3  ;;  %15702 = vmatpush1.bf16.msra.mxu1 %v22962_v7  ;;  %v23015_v3 = vld [vmem:[#allocation5 + $0xeb4] ss:$36 sps:$4 sm:$0xff]   ;;  %v23018_v7 = vld [vmem:[#allocation5 + $0xebc] ss:$36 sps:$4 sm:$0xff]  }
 0x54b   :  { %15088 = vmatprep.subr.bf16.mxu0 %v22967_v8  ;;  %15703 = vmatprep.subr.bf16.mxu1 %v22970_v12  ;;  %v23013_v8 = vld [vmem:[#allocation5 + $0xeb0] ss:$36 sps:$4 sm:$0xff]   ;;  %v23016_v12 = vld [vmem:[#allocation5 + $0xeb8] ss:$36 sps:$4 sm:$0xff]  }
 0x54e   :  { %15089 = vmatpush1.bf16.msra.mxu0 %v22965_v13  ;;  %15704 = vmatpush1.bf16.msra.mxu1 %v22968_v14  ;;  %v23021_v13 = vld [vmem:[#allocation5 + $0xefc] ss:$36 sps:$4 sm:$0xff]   ;;  %v23024_v14 = vld [vmem:[#allocation5 + $0xf04] ss:$36 sps:$4 sm:$0xff]  }
 0x54f   :  { %15090 = vmatprep.subr.bf16.mxu0 %v22973_v23  ;;  %15705 = vmatprep.subr.bf16.mxu1 %v22976_v17  ;;  %v23019_v23 = vld [vmem:[#allocation5 + $0xef8] ss:$36 sps:$4 sm:$0xff]   ;;  %v23022_v17 = vld [vmem:[#allocation5 + $0xf00] ss:$36 sps:$4 sm:$0xff]  }
 0x552   :  { %15091 = vmatpush1.bf16.msra.mxu0 %v22971_v56  ;;  %15706 = vmatpush1.bf16.msra.mxu1 %v22974_v19  ;;  %v23027_v56 = vld [vmem:[#allocation5 + $0xf44] ss:$36 sps:$4 sm:$0xff]   ;;  %v23030_v19 = vld [vmem:[#allocation5 + $0xf4c] ss:$36 sps:$4 sm:$0xff]  }
 0x553   :  { %15092 = vmatprep.subr.bf16.mxu0 %v22979_v25  ;;  %15707 = vmatprep.subr.bf16.mxu1 %v22982_v26 }
 0x556   :  { %15093 = vmatpush1.bf16.msra.mxu0 %v22977_v39  ;;  %15708 = vmatpush1.bf16.msra.mxu1 %v22980_v32 }
 0x557   :  { %15094 = vmatprep.subr.bf16.mxu0 %v22985_v33  ;;  %15709 = vmatprep.subr.bf16.mxu1 %v22988_v34 }
 0x55a   :  { %15095 = vmatpush1.bf16.msra.mxu0 %v22983_v60  ;;  %15710 = vmatpush1.bf16.msra.mxu1 %v22986_v38  ;;  %v23025_v60 = vld [vmem:[#allocation5 + $0xf40] ss:$36 sps:$4 sm:$0xff]   ;;  %v23028_v38 = vld [vmem:[#allocation5 + $0xf48] ss:$36 sps:$4 sm:$0xff]  }
 0x55b   :  { %15105 = vmatprep.subr.bf16.mxu0 %v22991_v9  ;;  %15720 = vmatprep.subr.bf16.mxu1 %v22994_v44 }
 0x55d   :  { %15097 = vmatmul.mubr.bf16.vlgmr.msra.gmra.mrb[4].mxu0 %v25082_v20  ;;  %15712 = vmatmul.mubr.bf16.vlgmr.msra.gmra.mrb[4].mxu1 %v25082_v20 }
 0x55e   :  { %15106 = vmatpush1.bf16.msra.mxu0 %v22989_v45  ;;  %15721 = vmatpush1.bf16.msra.mxu1 %v22992_v46  ;;  %v23033_v45 = vld [vmem:[#allocation5 + $0xf8c] ss:$36 sps:$4 sm:$0xff]   ;;  %v23036_v46 = vld [vmem:[#allocation5 + $0xf94] ss:$36 sps:$4 sm:$0xff]  }
 0x55f   :  { %15107 = vmatprep.subr.bf16.mxu0 %v22997_v41  ;;  %15722 = vmatprep.subr.bf16.mxu1 %v23000_v49  ;;  %v23031_v41 = vld [vmem:[#allocation5 + $0xf88] ss:$36 sps:$4 sm:$0xff]   ;;  %v23034_v49 = vld [vmem:[#allocation5 + $0xf90] ss:$36 sps:$4 sm:$0xff]  }
 0x560   :  { %15137 = vmatprep.mubr.bf16.mxu0 %v25088_v24  ;;  %15752 = vmatprep.mubr.bf16.mxu1 %v25088_v24 }
 0x562   :  { %15108 = vmatpush1.bf16.msra.mxu0 %v22995_v50  ;;  %15723 = vmatpush1.bf16.msra.mxu1 %v22998_v51  ;;  %v23039_v50 = vld [vmem:[#allocation5 + $0xfd4] ss:$36 sps:$4 sm:$0xff]   ;;  %v23042_v51 = vld [vmem:[#allocation5 + $0xfdc] ss:$36 sps:$4 sm:$0xff]  }
 0x563   :  { %15109 = vmatprep.subr.bf16.mxu0 %v23003_v52  ;;  %15724 = vmatprep.subr.bf16.mxu1 %v23006_v53  ;;  %v23037_v52 = vld [vmem:[#allocation5 + $0xfd0] ss:$36 sps:$4 sm:$0xff]   ;;  %v23040_v53 = vld [vmem:[#allocation5 + $0xfd8] ss:$36 sps:$4 sm:$0xff]  }
 0x566   :  { %15110 = vmatpush1.bf16.msra.mxu0 %v23001_v54  ;;  %15725 = vmatpush1.bf16.msra.mxu1 %v23004_v55  ;;  %v23045_v54 = vld [vmem:[#allocation5 + $0x101c] ss:$36 sps:$4 sm:$0xff]   ;;  %v23048_v55 = vld [vmem:[#allocation5 + $0x1024] ss:$36 sps:$4 sm:$0xff]  }
 0x567   :  { %15111 = vmatprep.subr.bf16.mxu0 %v23009_v58  ;;  %15726 = vmatprep.subr.bf16.mxu1 %v23012_v59  ;;  %v23043_v58 = vld [vmem:[#allocation5 + $0x1018] ss:$36 sps:$4 sm:$0xff]   ;;  %v23046_v59 = vld [vmem:[#allocation5 + $0x1020] ss:$36 sps:$4 sm:$0xff]  }
 0x56a   :  { %15112 = vmatpush1.bf16.msra.mxu0 %v23007_v1  ;;  %15727 = vmatpush1.bf16.msra.mxu1 %v23010_v21  ;;  %v23051_v1 = vld [vmem:[#allocation5 + $0x1064] ss:$36 sps:$4 sm:$0xff]   ;;  %v23054_v21 = vld [vmem:[#allocation5 + $0x106c] ss:$36 sps:$4 sm:$0xff]  }
 0x56b   :  { %15113 = vmatprep.subr.bf16.mxu0 %v23015_v3  ;;  %15728 = vmatprep.subr.bf16.mxu1 %v23018_v7  ;;  %v23049_v3 = vld [vmem:[#allocation5 + $0x1060] ss:$36 sps:$4 sm:$0xff]   ;;  %v23052_v7 = vld [vmem:[#allocation5 + $0x1068] ss:$36 sps:$4 sm:$0xff]  }
 0x56e   :  { %15114 = vmatpush1.bf16.msra.mxu0 %v23013_v8  ;;  %15729 = vmatpush1.bf16.msra.mxu1 %v23016_v12  ;;  %v23057_v8 = vld [vmem:[#allocation5 + $0x10ac] ss:$36 sps:$4 sm:$0xff]   ;;  %v23060_v12 = vld [vmem:[#allocation5 + $0x10b4] ss:$36 sps:$4 sm:$0xff]  }
 0x56f   :  { %15115 = vmatprep.subr.bf16.mxu0 %v23021_v13  ;;  %15730 = vmatprep.subr.bf16.mxu1 %v23024_v14  ;;  %v23055_v13 = vld [vmem:[#allocation5 + $0x10a8] ss:$36 sps:$4 sm:$0xff]   ;;  %v23058_v14 = vld [vmem:[#allocation5 + $0x10b0] ss:$36 sps:$4 sm:$0xff]  }
 0x570   :  { %v25268_v25 = vpop.f32.mrb[0].mxu0  ;;  %v25270_v26 = vpop.f32.mrb[0].mxu1 }
 0x571   :  { %v25272_v39 = vpop.f32.mrb[1].mxu0  ;;  %v25274_v32 = vpop.f32.mrb[1].mxu1 }
 0x572   :  { %v14364_v33 = vpop.f32.mrb[2].mxu0  ;;  %v14979_v34 = vpop.f32.mrb[2].mxu1  ;;  %15116 = vmatpush1.bf16.msra.mxu0 %v23019_v23  ;;  %15731 = vmatpush1.bf16.msra.mxu1 %v23022_v17  ;;  %v23063_v23 = vld [vmem:[#allocation5 + $0x10f4] ss:$36 sps:$4 sm:$0xff]   ;;  %v23066_v17 = vld [vmem:[#allocation5 + $0x10fc] ss:$36 sps:$4 sm:$0xff]  }
 0x573   :  { %v14365_v9 = vpop.f32.mrb[3].mxu0  ;;  %v14980_v44 = vpop.f32.mrb[3].mxu1  ;;  %15117 = vmatprep.subr.bf16.mxu0 %v23027_v56  ;;  %15732 = vmatprep.subr.bf16.mxu1 %v23030_v19  ;;  %v23061_v56 = vld [vmem:[#allocation5 + $0x10f0] ss:$36 sps:$4 sm:$0xff]   ;;  %v23064_v19 = vld [vmem:[#allocation5 + $0x10f8] ss:$36 sps:$4 sm:$0xff]  }
 0x574   :  { %v23069_v33 = vld [vmem:[#allocation5 + $0x113c] ss:$36 sps:$4 sm:$0xff]   ;;  %v23072_v34 = vld [vmem:[#allocation5 + $0x1144] ss:$36 sps:$4 sm:$0xff]   ;;  %v23078_v44 = vld [vmem:[#allocation5 + $0x118c] ss:$36 sps:$4 sm:$0xff]  }
 0x575   :  { %v23075_v9 = vld [vmem:[#allocation5 + $0x1184] ss:$36 sps:$4 sm:$0xff]  }
 0x576   :  { %15118 = vmatpush1.bf16.msra.mxu0 %v23025_v60  ;;  %15733 = vmatpush1.bf16.msra.mxu1 %v23028_v38  ;;  %v23067_v60 = vld [vmem:[#allocation5 + $0x1138] ss:$36 sps:$4 sm:$0xff]   ;;  %v23070_v38 = vld [vmem:[#allocation5 + $0x1140] ss:$36 sps:$4 sm:$0xff]  }
 0x577   :  { %15119 = vmatprep.subr.bf16.mxu0 %v23033_v45  ;;  %15734 = vmatprep.subr.bf16.mxu1 %v23036_v46  ;;  %v23073_v45 = vld [vmem:[#allocation5 + $0x1180] ss:$36 sps:$4 sm:$0xff]   ;;  %v23076_v46 = vld [vmem:[#allocation5 + $0x1188] ss:$36 sps:$4 sm:$0xff]  }
 0x57a   :  { %15120 = vmatpush1.bf16.msra.mxu0 %v23031_v41  ;;  %15735 = vmatpush1.bf16.msra.mxu1 %v23034_v49  ;;  %v23081_v41 = vld [vmem:[#allocation5 + $0x11cc] ss:$36 sps:$4 sm:$0xff]   ;;  %v23084_v49 = vld [vmem:[#allocation5 + $0x11d4] ss:$36 sps:$4 sm:$0xff]  }
 0x57b   :  { %15121 = vmatprep.subr.bf16.mxu0 %v23039_v50  ;;  %15736 = vmatprep.subr.bf16.mxu1 %v23042_v51  ;;  %v23079_v50 = vld [vmem:[#allocation5 + $0x11c8] ss:$36 sps:$4 sm:$0xff]   ;;  %v23082_v51 = vld [vmem:[#allocation5 + $0x11d0] ss:$36 sps:$4 sm:$0xff]  }
 0x57e   :  { %15122 = vmatpush1.bf16.msra.mxu0 %v23037_v52  ;;  %15737 = vmatpush1.bf16.msra.mxu1 %v23040_v53  ;;  %v23087_v52 = vld [vmem:[#allocation5 + $0x1214] ss:$36 sps:$4 sm:$0xff]   ;;  %v23090_v53 = vld [vmem:[#allocation5 + $0x121c] ss:$36 sps:$4 sm:$0xff]  }
 0x57f   :  { %15123 = vmatprep.subr.bf16.mxu0 %v23045_v54  ;;  %15738 = vmatprep.subr.bf16.mxu1 %v23048_v55  ;;  %v23085_v54 = vld [vmem:[#allocation5 + $0x1210] ss:$36 sps:$4 sm:$0xff]   ;;  %v23088_v55 = vld [vmem:[#allocation5 + $0x1218] ss:$36 sps:$4 sm:$0xff]  }
 0x582   :  { %15124 = vmatpush1.bf16.msra.mxu0 %v23043_v58  ;;  %15739 = vmatpush1.bf16.msra.mxu1 %v23046_v59  ;;  %v23093_v58 = vld [vmem:[#allocation5 + $0x125c] ss:$36 sps:$4 sm:$0xff]   ;;  %v23096_v59 = vld [vmem:[#allocation5 + $0x1264] ss:$36 sps:$4 sm:$0xff]  }
 0x583   :  { %15125 = vmatprep.subr.bf16.mxu0 %v23051_v1  ;;  %15740 = vmatprep.subr.bf16.mxu1 %v23054_v21  ;;  %v23091_v1 = vld [vmem:[#allocation5 + $0x1258] ss:$36 sps:$4 sm:$0xff]   ;;  %v23094_v21 = vld [vmem:[#allocation5 + $0x1260] ss:$36 sps:$4 sm:$0xff]  }
 0x586   :  { %15126 = vmatpush1.bf16.msra.mxu0 %v23049_v3  ;;  %15741 = vmatpush1.bf16.msra.mxu1 %v23052_v7  ;;  %v23099_v3 = vld [vmem:[#allocation5 + $0x12a4] ss:$36 sps:$4 sm:$0xff]   ;;  %v23102_v7 = vld [vmem:[#allocation5 + $0x12ac] ss:$36 sps:$4 sm:$0xff]  }
 0x587   :  { %15127 = vmatprep.subr.bf16.mxu0 %v23057_v8  ;;  %15742 = vmatprep.subr.bf16.mxu1 %v23060_v12  ;;  %v23097_v8 = vld [vmem:[#allocation5 + $0x12a0] ss:$36 sps:$4 sm:$0xff]   ;;  %v23100_v12 = vld [vmem:[#allocation5 + $0x12a8] ss:$36 sps:$4 sm:$0xff]  }
 0x58a   :  { %15128 = vmatpush1.bf16.msra.mxu0 %v23055_v13  ;;  %15743 = vmatpush1.bf16.msra.mxu1 %v23058_v14  ;;  %v23105_v13 = vld [vmem:[#allocation5 + $0x12ec] ss:$36 sps:$4 sm:$0xff]   ;;  %v23108_v14 = vld [vmem:[#allocation5 + $0x12f4] ss:$36 sps:$4 sm:$0xff]  }
 0x58b   :  { %15129 = vmatprep.subr.bf16.mxu0 %v23063_v23  ;;  %15744 = vmatprep.subr.bf16.mxu1 %v23066_v17  ;;  %v23103_v23 = vld [vmem:[#allocation5 + $0x12e8] ss:$36 sps:$4 sm:$0xff]   ;;  %v23106_v17 = vld [vmem:[#allocation5 + $0x12f0] ss:$36 sps:$4 sm:$0xff]  }
 0x58e   :  { %15130 = vmatpush1.bf16.msra.mxu0 %v23061_v56  ;;  %15745 = vmatpush1.bf16.msra.mxu1 %v23064_v19  ;;  %v23111_v56 = vld [vmem:[#allocation5 + $0x1334] ss:$36 sps:$4 sm:$0xff]   ;;  %v23114_v19 = vld [vmem:[#allocation5 + $0x133c] ss:$36 sps:$4 sm:$0xff]  }
 0x58f   :  { %15131 = vmatprep.subr.bf16.mxu0 %v23069_v33  ;;  %15746 = vmatprep.subr.bf16.mxu1 %v23072_v34  ;;  %v23109_v33 = vld [vmem:[#allocation5 + $0x1330] ss:$36 sps:$4 sm:$0xff]   ;;  %v23112_v34 = vld [vmem:[#allocation5 + $0x1338] ss:$36 sps:$4 sm:$0xff]  }
 0x592   :  { %15132 = vmatpush1.bf16.msra.mxu0 %v23067_v60  ;;  %15747 = vmatpush1.bf16.msra.mxu1 %v23070_v38  ;;  %v23117_v60 = vld [vmem:[#allocation5 + $0x137c] ss:$36 sps:$4 sm:$0xff]   ;;  %v23120_v38 = vld [vmem:[#allocation5 + $0x1384] ss:$36 sps:$4 sm:$0xff]  }
 0x593   :  { %15133 = vmatprep.subr.bf16.mxu0 %v23075_v9  ;;  %15748 = vmatprep.subr.bf16.mxu1 %v23078_v44  ;;  %v23115_v9 = vld [vmem:[#allocation5 + $0x1378] ss:$36 sps:$4 sm:$0xff]   ;;  %v23118_v44 = vld [vmem:[#allocation5 + $0x1380] ss:$36 sps:$4 sm:$0xff]  }
 0x596   :  { %15134 = vmatpush1.bf16.msra.mxu0 %v23073_v45  ;;  %15749 = vmatpush1.bf16.msra.mxu1 %v23076_v46  ;;  %v23123_v45 = vld [vmem:[#allocation5 + $0x13c4] ss:$36 sps:$4 sm:$0xff]   ;;  %v23126_v46 = vld [vmem:[#allocation5 + $0x13cc] ss:$36 sps:$4 sm:$0xff]  }
 0x597   :  { %15135 = vmatprep.subr.bf16.mxu0 %v23081_v41  ;;  %15750 = vmatprep.subr.bf16.mxu1 %v23084_v49  ;;  %v23121_v41 = vld [vmem:[#allocation5 + $0x13c0] ss:$36 sps:$4 sm:$0xff]   ;;  %v23124_v49 = vld [vmem:[#allocation5 + $0x13c8] ss:$36 sps:$4 sm:$0xff]  }
 0x59a   :  { %15136 = vmatpush1.bf16.msra.mxu0 %v23079_v50  ;;  %15751 = vmatpush1.bf16.msra.mxu1 %v23082_v51  ;;  %v23129_v50 = vld [vmem:[#allocation5 + $0x140c] ss:$36 sps:$4 sm:$0xff]   ;;  %v23132_v51 = vld [vmem:[#allocation5 + $0x1414] ss:$36 sps:$4 sm:$0xff]  }
 0x59b   :  { %15146 = vmatprep.subr.bf16.mxu0 %v23087_v52  ;;  %15761 = vmatprep.subr.bf16.mxu1 %v23090_v53  ;;  %v23127_v52 = vld [vmem:[#allocation5 + $0x1408] ss:$36 sps:$4 sm:$0xff]   ;;  %v23130_v53 = vld [vmem:[#allocation5 + $0x1410] ss:$36 sps:$4 sm:$0xff]  }
 0x59d   :  { %15138 = vmatmul.mubr.bf16.vlgmr.msra.gmra.mrb[4].mxu0 %v25096_v29  ;;  %15753 = vmatmul.mubr.bf16.vlgmr.msra.gmra.mrb[4].mxu1 %v25096_v29 }
 0x59e   :  { %15147 = vmatpush1.bf16.msra.mxu0 %v23085_v54  ;;  %15762 = vmatpush1.bf16.msra.mxu1 %v23088_v55  ;;  %v23135_v54 = vld [vmem:[#allocation5 + $0x1454] ss:$36 sps:$4 sm:$0xff]   ;;  %v23138_v55 = vld [vmem:[#allocation5 + $0x145c] ss:$36 sps:$4 sm:$0xff]  }
 0x59f   :  { %15148 = vmatprep.subr.bf16.mxu0 %v23093_v58  ;;  %15763 = vmatprep.subr.bf16.mxu1 %v23096_v59  ;;  %v23133_v58 = vld [vmem:[#allocation5 + $0x1450] ss:$36 sps:$4 sm:$0xff]   ;;  %v23136_v59 = vld [vmem:[#allocation5 + $0x1458] ss:$36 sps:$4 sm:$0xff]  }
 0x5a0   :  { %15178 = vmatprep.mubr.bf16.mxu0 %v25102_v35  ;;  %15793 = vmatprep.mubr.bf16.mxu1 %v25102_v35 }
 0x5a2   :  { %15149 = vmatpush1.bf16.msra.mxu0 %v23091_v1  ;;  %15764 = vmatpush1.bf16.msra.mxu1 %v23094_v21  ;;  %v23141_v1 = vld [vmem:[#allocation5 + $0x149c] ss:$36 sps:$4 sm:$0xff]   ;;  %v23144_v21 = vld [vmem:[#allocation5 + $0x14a4] ss:$36 sps:$4 sm:$0xff]  }
 0x5a3   :  { %15150 = vmatprep.subr.bf16.mxu0 %v23099_v3  ;;  %15765 = vmatprep.subr.bf16.mxu1 %v23102_v7  ;;  %v23139_v3 = vld [vmem:[#allocation5 + $0x1498] ss:$36 sps:$4 sm:$0xff]   ;;  %v23142_v7 = vld [vmem:[#allocation5 + $0x14a0] ss:$36 sps:$4 sm:$0xff]  }
 0x5a6   :  { %15151 = vmatpush1.bf16.msra.mxu0 %v23097_v8  ;;  %15766 = vmatpush1.bf16.msra.mxu1 %v23100_v12  ;;  %v23147_v8 = vld [vmem:[#allocation5 + $0x14e4] ss:$36 sps:$4 sm:$0xff]   ;;  %v23150_v12 = vld [vmem:[#allocation5 + $0x14ec] ss:$36 sps:$4 sm:$0xff]  }
 0x5a7   :  { %15152 = vmatprep.subr.bf16.mxu0 %v23105_v13  ;;  %15767 = vmatprep.subr.bf16.mxu1 %v23108_v14  ;;  %v23145_v13 = vld [vmem:[#allocation5 + $0x14e0] ss:$36 sps:$4 sm:$0xff]   ;;  %v23148_v14 = vld [vmem:[#allocation5 + $0x14e8] ss:$36 sps:$4 sm:$0xff]  }
 0x5aa   :  { %15153 = vmatpush1.bf16.msra.mxu0 %v23103_v23  ;;  %15768 = vmatpush1.bf16.msra.mxu1 %v23106_v17  ;;  %v23153_v23 = vld [vmem:[#allocation5 + $0x152c] ss:$36 sps:$4 sm:$0xff]   ;;  %v23156_v17 = vld [vmem:[#allocation5 + $0x1534] ss:$36 sps:$4 sm:$0xff]  }
 0x5ab   :  { %15154 = vmatprep.subr.bf16.mxu0 %v23111_v56  ;;  %15769 = vmatprep.subr.bf16.mxu1 %v23114_v19  ;;  %v23151_v56 = vld [vmem:[#allocation5 + $0x1528] ss:$36 sps:$4 sm:$0xff]   ;;  %v23154_v19 = vld [vmem:[#allocation5 + $0x1530] ss:$36 sps:$4 sm:$0xff]  }
 0x5ae   :  { %15155 = vmatpush1.bf16.msra.mxu0 %v23109_v33  ;;  %15770 = vmatpush1.bf16.msra.mxu1 %v23112_v34  ;;  %v23159_v33 = vld [vmem:[#allocation5 + $0x1574] ss:$36 sps:$4 sm:$0xff]   ;;  %v23162_v34 = vld [vmem:[#allocation5 + $0x157c] ss:$36 sps:$4 sm:$0xff]  }
 0x5af   :  { %15156 = vmatprep.subr.bf16.mxu0 %v23117_v60  ;;  %15771 = vmatprep.subr.bf16.mxu1 %v23120_v38  ;;  %v23157_v60 = vld [vmem:[#allocation5 + $0x1570] ss:$36 sps:$4 sm:$0xff]   ;;  %v23160_v38 = vld [vmem:[#allocation5 + $0x1578] ss:$36 sps:$4 sm:$0xff]  }
 0x5b2   :  { %15157 = vmatpush1.bf16.msra.mxu0 %v23115_v9  ;;  %15772 = vmatpush1.bf16.msra.mxu1 %v23118_v44  ;;  %v23165_v9 = vld [vmem:[#allocation5 + $0x15bc] ss:$36 sps:$4 sm:$0xff]   ;;  %v23168_v44 = vld [vmem:[#allocation5 + $0x15c4] ss:$36 sps:$4 sm:$0xff]  }
 0x5b3   :  { %15158 = vmatprep.subr.bf16.mxu0 %v23123_v45  ;;  %15773 = vmatprep.subr.bf16.mxu1 %v23126_v46  ;;  %v23163_v45 = vld [vmem:[#allocation5 + $0x15b8] ss:$36 sps:$4 sm:$0xff]   ;;  %v23166_v46 = vld [vmem:[#allocation5 + $0x15c0] ss:$36 sps:$4 sm:$0xff]  }
 0x5b6   :  { %15159 = vmatpush1.bf16.msra.mxu0 %v23121_v41  ;;  %15774 = vmatpush1.bf16.msra.mxu1 %v23124_v49  ;;  %v23171_v41 = vld [vmem:[#allocation5 + $0x1604] ss:$36 sps:$4 sm:$0xff]   ;;  %v23174_v49 = vld [vmem:[#allocation5 + $0x160c] ss:$36 sps:$4 sm:$0xff]  }
 0x5b7   :  { %15160 = vmatprep.subr.bf16.mxu0 %v23129_v50  ;;  %15775 = vmatprep.subr.bf16.mxu1 %v23132_v51  ;;  %v23169_v50 = vld [vmem:[#allocation5 + $0x1600] ss:$36 sps:$4 sm:$0xff]   ;;  %v23172_v51 = vld [vmem:[#allocation5 + $0x1608] ss:$36 sps:$4 sm:$0xff]  }
 0x5ba   :  { %15161 = vmatpush1.bf16.msra.mxu0 %v23127_v52  ;;  %15776 = vmatpush1.bf16.msra.mxu1 %v23130_v53  ;;  %v23177_v52 = vld [vmem:[#allocation5 + $0x164c] ss:$36 sps:$4 sm:$0xff]   ;;  %v23180_v53 = vld [vmem:[#allocation5 + $0x1654] ss:$36 sps:$4 sm:$0xff]  }
 0x5bb   :  { %15162 = vmatprep.subr.bf16.mxu0 %v23135_v54  ;;  %15777 = vmatprep.subr.bf16.mxu1 %v23138_v55  ;;  %v23175_v54 = vld [vmem:[#allocation5 + $0x1648] ss:$36 sps:$4 sm:$0xff]   ;;  %v23178_v55 = vld [vmem:[#allocation5 + $0x1650] ss:$36 sps:$4 sm:$0xff]  }
 0x5be   :  { %15163 = vmatpush1.bf16.msra.mxu0 %v23133_v58  ;;  %15778 = vmatpush1.bf16.msra.mxu1 %v23136_v59  ;;  %v23183_v58 = vld [vmem:[#allocation5 + $0x1694] ss:$36 sps:$4 sm:$0xff]   ;;  %v23186_v59 = vld [vmem:[#allocation5 + $0x169c] ss:$36 sps:$4 sm:$0xff]  }
 0x5bf   :  { %15164 = vmatprep.subr.bf16.mxu0 %v23141_v1  ;;  %15779 = vmatprep.subr.bf16.mxu1 %v23144_v21  ;;  %v23181_v1 = vld [vmem:[#allocation5 + $0x1690] ss:$36 sps:$4 sm:$0xff]   ;;  %v23184_v21 = vld [vmem:[#allocation5 + $0x1698] ss:$36 sps:$4 sm:$0xff]  }
 0x5c2   :  { %15165 = vmatpush1.bf16.msra.mxu0 %v23139_v3  ;;  %15780 = vmatpush1.bf16.msra.mxu1 %v23142_v7  ;;  %v23189_v3 = vld [vmem:[#allocation5 + $0x16dc] ss:$36 sps:$4 sm:$0xff]   ;;  %v23192_v7 = vld [vmem:[#allocation5 + $0x16e4] ss:$36 sps:$4 sm:$0xff]  }
 0x5c3   :  { %15166 = vmatprep.subr.bf16.mxu0 %v23147_v8  ;;  %15781 = vmatprep.subr.bf16.mxu1 %v23150_v12  ;;  %v23187_v8 = vld [vmem:[#allocation5 + $0x16d8] ss:$36 sps:$4 sm:$0xff]   ;;  %v23190_v12 = vld [vmem:[#allocation5 + $0x16e0] ss:$36 sps:$4 sm:$0xff]  }
 0x5c6   :  { %15167 = vmatpush1.bf16.msra.mxu0 %v23145_v13  ;;  %15782 = vmatpush1.bf16.msra.mxu1 %v23148_v14  ;;  %v23195_v13 = vld [vmem:[#allocation5 + $0x1724] ss:$36 sps:$4 sm:$0xff]   ;;  %v23198_v14 = vld [vmem:[#allocation5 + $0x172c] ss:$36 sps:$4 sm:$0xff]  }
 0x5c7   :  { %15168 = vmatprep.subr.bf16.mxu0 %v23153_v23  ;;  %15783 = vmatprep.subr.bf16.mxu1 %v23156_v17  ;;  %v23193_v23 = vld [vmem:[#allocation5 + $0x1720] ss:$36 sps:$4 sm:$0xff]   ;;  %v23196_v17 = vld [vmem:[#allocation5 + $0x1728] ss:$36 sps:$4 sm:$0xff]  }
 0x5ca   :  { %15169 = vmatpush1.bf16.msra.mxu0 %v23151_v56  ;;  %15784 = vmatpush1.bf16.msra.mxu1 %v23154_v19  ;;  %v23201_v56 = vld [vmem:[#allocation5 + $0x176c] ss:$36 sps:$4 sm:$0xff]   ;;  %v23204_v19 = vld [vmem:[#allocation5 + $0x1774] ss:$36 sps:$4 sm:$0xff]  }
 0x5cb   :  { %15170 = vmatprep.subr.bf16.mxu0 %v23159_v33  ;;  %15785 = vmatprep.subr.bf16.mxu1 %v23162_v34  ;;  %v23199_v33 = vld [vmem:[#allocation5 + $0x1768] ss:$36 sps:$4 sm:$0xff]   ;;  %v23202_v34 = vld [vmem:[#allocation5 + $0x1770] ss:$36 sps:$4 sm:$0xff]  }
 0x5ce   :  { %15171 = vmatpush1.bf16.msra.mxu0 %v23157_v60  ;;  %15786 = vmatpush1.bf16.msra.mxu1 %v23160_v38  ;;  %v23207_v60 = vld [vmem:[#allocation5 + $0x17b4] ss:$36 sps:$4 sm:$0xff]   ;;  %v23210_v38 = vld [vmem:[#allocation5 + $0x17bc] ss:$36 sps:$4 sm:$0xff]  }
 0x5cf   :  { %15172 = vmatprep.subr.bf16.mxu0 %v23165_v9  ;;  %15787 = vmatprep.subr.bf16.mxu1 %v23168_v44  ;;  %v23205_v9 = vld [vmem:[#allocation5 + $0x17b0] ss:$36 sps:$4 sm:$0xff]   ;;  %v23208_v44 = vld [vmem:[#allocation5 + $0x17b8] ss:$36 sps:$4 sm:$0xff]  }
 0x5d2   :  { %15173 = vmatpush1.bf16.msra.mxu0 %v23163_v45  ;;  %15788 = vmatpush1.bf16.msra.mxu1 %v23166_v46  ;;  %v23213_v45 = vld [vmem:[#allocation5 + $0x17fc] ss:$36 sps:$4 sm:$0xff]   ;;  %v23216_v46 = vld [vmem:[#allocation5 + $0x1804] ss:$36 sps:$4 sm:$0xff]  }
 0x5d3   :  { %15174 = vmatprep.subr.bf16.mxu0 %v23171_v41  ;;  %15789 = vmatprep.subr.bf16.mxu1 %v23174_v49  ;;  %v23211_v41 = vld [vmem:[#allocation5 + $0x17f8] ss:$36 sps:$4 sm:$0xff]   ;;  %v23214_v49 = vld [vmem:[#allocation5 + $0x1800] ss:$36 sps:$4 sm:$0xff]  }
 0x5d6   :  { %15175 = vmatpush1.bf16.msra.mxu0 %v23169_v50  ;;  %15790 = vmatpush1.bf16.msra.mxu1 %v23172_v51  ;;  %v23219_v50 = vld [vmem:[#allocation5 + $0x1844] ss:$36 sps:$4 sm:$0xff]   ;;  %v23222_v51 = vld [vmem:[#allocation5 + $0x184c] ss:$36 sps:$4 sm:$0xff]  }
 0x5d7   :  { %15176 = vmatprep.subr.bf16.mxu0 %v23177_v52  ;;  %15791 = vmatprep.subr.bf16.mxu1 %v23180_v53  ;;  %v23217_v52 = vld [vmem:[#allocation5 + $0x1840] ss:$36 sps:$4 sm:$0xff]   ;;  %v23220_v53 = vld [vmem:[#allocation5 + $0x1848] ss:$36 sps:$4 sm:$0xff]  }
 0x5da   :  { %15177 = vmatpush1.bf16.msra.mxu0 %v23175_v54  ;;  %15792 = vmatpush1.bf16.msra.mxu1 %v23178_v55  ;;  %v23225_v54 = vld [vmem:[#allocation5 + $0x188c] ss:$36 sps:$4 sm:$0xff]   ;;  %v23228_v55 = vld [vmem:[#allocation5 + $0x1894] ss:$36 sps:$4 sm:$0xff]  }
 0x5db   :  { %15187 = vmatprep.subr.bf16.mxu0 %v23183_v58  ;;  %15802 = vmatprep.subr.bf16.mxu1 %v23186_v59  ;;  %v23223_v58 = vld [vmem:[#allocation5 + $0x1888] ss:$36 sps:$4 sm:$0xff]   ;;  %v23226_v59 = vld [vmem:[#allocation5 + $0x1890] ss:$36 sps:$4 sm:$0xff]  }
 0x5dd   :  { %15179 = vmatmul.mubr.bf16.vlgmr.msra.gmra.mrb[4].mxu0 %v25112_v42  ;;  %15794 = vmatmul.mubr.bf16.vlgmr.msra.gmra.mrb[4].mxu1 %v25112_v42 }
 0x5de   :  { %15188 = vmatpush1.bf16.msra.mxu0 %v23181_v1  ;;  %15803 = vmatpush1.bf16.msra.mxu1 %v23184_v21  ;;  %v23231_v1 = vld [vmem:[#allocation5 + $0x18d4] ss:$36 sps:$4 sm:$0xff]   ;;  %v23234_v21 = vld [vmem:[#allocation5 + $0x18dc] ss:$36 sps:$4 sm:$0xff]  }
 0x5df   :  { %15189 = vmatprep.subr.bf16.mxu0 %v23189_v3  ;;  %15804 = vmatprep.subr.bf16.mxu1 %v23192_v7  ;;  %v23229_v3 = vld [vmem:[#allocation5 + $0x18d0] ss:$36 sps:$4 sm:$0xff]   ;;  %v23232_v7 = vld [vmem:[#allocation5 + $0x18d8] ss:$36 sps:$4 sm:$0xff]  }
 0x5e0   :  { %15219 = vmatprep.mubr.bf16.mxu0 %v25116_v47  ;;  %15834 = vmatprep.mubr.bf16.mxu1 %v25116_v47 }
 0x5e2   :  { %15190 = vmatpush1.bf16.msra.mxu0 %v23187_v8  ;;  %15805 = vmatpush1.bf16.msra.mxu1 %v23190_v12  ;;  %v23237_v8 = vld [vmem:[#allocation5 + $0x191c] ss:$36 sps:$4 sm:$0xff]   ;;  %v23240_v12 = vld [vmem:[#allocation5 + $0x1924] ss:$36 sps:$4 sm:$0xff]  }
 0x5e3   :  { %15191 = vmatprep.subr.bf16.mxu0 %v23195_v13  ;;  %15806 = vmatprep.subr.bf16.mxu1 %v23198_v14  ;;  %v23235_v13 = vld [vmem:[#allocation5 + $0x1918] ss:$36 sps:$4 sm:$0xff]   ;;  %v23238_v14 = vld [vmem:[#allocation5 + $0x1920] ss:$36 sps:$4 sm:$0xff]  }
 0x5e6   :  { %15192 = vmatpush1.bf16.msra.mxu0 %v23193_v23  ;;  %15807 = vmatpush1.bf16.msra.mxu1 %v23196_v17  ;;  %v23243_v23 = vld [vmem:[#allocation5 + $0x1964] ss:$36 sps:$4 sm:$0xff]   ;;  %v23246_v17 = vld [vmem:[#allocation5 + $0x196c] ss:$36 sps:$4 sm:$0xff]  }
 0x5e7   :  { %15193 = vmatprep.subr.bf16.mxu0 %v23201_v56  ;;  %15808 = vmatprep.subr.bf16.mxu1 %v23204_v19  ;;  %v23241_v56 = vld [vmem:[#allocation5 + $0x1960] ss:$36 sps:$4 sm:$0xff]   ;;  %v23244_v19 = vld [vmem:[#allocation5 + $0x1968] ss:$36 sps:$4 sm:$0xff]  }
 0x5ea   :  { %15194 = vmatpush1.bf16.msra.mxu0 %v23199_v33  ;;  %15809 = vmatpush1.bf16.msra.mxu1 %v23202_v34  ;;  %v23249_v33 = vld [vmem:[#allocation5 + $0x19ac] ss:$36 sps:$4 sm:$0xff]   ;;  %v23252_v34 = vld [vmem:[#allocation5 + $0x19b4] ss:$36 sps:$4 sm:$0xff]  }
 0x5eb   :  { %15195 = vmatprep.subr.bf16.mxu0 %v23207_v60  ;;  %15810 = vmatprep.subr.bf16.mxu1 %v23210_v38  ;;  %v23247_v60 = vld [vmem:[#allocation5 + $0x19a8] ss:$36 sps:$4 sm:$0xff]   ;;  %v23250_v38 = vld [vmem:[#allocation5 + $0x19b0] ss:$36 sps:$4 sm:$0xff]  }
 0x5ee   :  { %15196 = vmatpush1.bf16.msra.mxu0 %v23205_v9  ;;  %15811 = vmatpush1.bf16.msra.mxu1 %v23208_v44  ;;  %v23255_v9 = vld [vmem:[#allocation5 + $0x19f4] ss:$36 sps:$4 sm:$0xff]   ;;  %v23258_v44 = vld [vmem:[#allocation5 + $0x19fc] ss:$36 sps:$4 sm:$0xff]  }
 0x5ef   :  { %15197 = vmatprep.subr.bf16.mxu0 %v23213_v45  ;;  %15812 = vmatprep.subr.bf16.mxu1 %v23216_v46  ;;  %v23253_v45 = vld [vmem:[#allocation5 + $0x19f0] ss:$36 sps:$4 sm:$0xff]   ;;  %v23256_v46 = vld [vmem:[#allocation5 + $0x19f8] ss:$36 sps:$4 sm:$0xff]  }
 0x5f2   :  { %15198 = vmatpush1.bf16.msra.mxu0 %v23211_v41  ;;  %15813 = vmatpush1.bf16.msra.mxu1 %v23214_v49  ;;  %v23261_v41 = vld [vmem:[#allocation5 + $0x1a3c] ss:$36 sps:$4 sm:$0xff]   ;;  %v23264_v49 = vld [vmem:[#allocation5 + $0x1a44] ss:$36 sps:$4 sm:$0xff]  }
 0x5f3   :  { %15199 = vmatprep.subr.bf16.mxu0 %v23219_v50  ;;  %15814 = vmatprep.subr.bf16.mxu1 %v23222_v51  ;;  %v23259_v50 = vld [vmem:[#allocation5 + $0x1a38] ss:$36 sps:$4 sm:$0xff]   ;;  %v23262_v51 = vld [vmem:[#allocation5 + $0x1a40] ss:$36 sps:$4 sm:$0xff]  }
 0x5f6   :  { %15200 = vmatpush1.bf16.msra.mxu0 %v23217_v52  ;;  %15815 = vmatpush1.bf16.msra.mxu1 %v23220_v53  ;;  %v23267_v52 = vld [vmem:[#allocation5 + $0x1a84] ss:$36 sps:$4 sm:$0xff]   ;;  %v23270_v53 = vld [vmem:[#allocation5 + $0x1a8c] ss:$36 sps:$4 sm:$0xff]  }
 0x5f7   :  { %15201 = vmatprep.subr.bf16.mxu0 %v23225_v54  ;;  %15816 = vmatprep.subr.bf16.mxu1 %v23228_v55  ;;  %v23265_v54 = vld [vmem:[#allocation5 + $0x1a80] ss:$36 sps:$4 sm:$0xff]   ;;  %v23268_v55 = vld [vmem:[#allocation5 + $0x1a88] ss:$36 sps:$4 sm:$0xff]  }
 0x5fa   :  { %15202 = vmatpush1.bf16.msra.mxu0 %v23223_v58  ;;  %15817 = vmatpush1.bf16.msra.mxu1 %v23226_v59  ;;  %v23273_v58 = vld [vmem:[#allocation5 + $0x1acc] ss:$36 sps:$4 sm:$0xff]   ;;  %v23276_v59 = vld [vmem:[#allocation5 + $0x1ad4] ss:$36 sps:$4 sm:$0xff]  }
 0x5fb   :  { %15203 = vmatprep.subr.bf16.mxu0 %v23231_v1  ;;  %15818 = vmatprep.subr.bf16.mxu1 %v23234_v21  ;;  %v23271_v1 = vld [vmem:[#allocation5 + $0x1ac8] ss:$36 sps:$4 sm:$0xff]   ;;  %v23274_v21 = vld [vmem:[#allocation5 + $0x1ad0] ss:$36 sps:$4 sm:$0xff]  }
 0x5fe   :  { %15204 = vmatpush1.bf16.msra.mxu0 %v23229_v3  ;;  %15819 = vmatpush1.bf16.msra.mxu1 %v23232_v7  ;;  %v23279_v3 = vld [vmem:[#allocation5 + $0x1b14] ss:$36 sps:$4 sm:$0xff]   ;;  %v23282_v7 = vld [vmem:[#allocation5 + $0x1b1c] ss:$36 sps:$4 sm:$0xff]  }
 0x5ff   :  { %15205 = vmatprep.subr.bf16.mxu0 %v23237_v8  ;;  %15820 = vmatprep.subr.bf16.mxu1 %v23240_v12  ;;  %v23277_v8 = vld [vmem:[#allocation5 + $0x1b10] ss:$36 sps:$4 sm:$0xff]   ;;  %v23280_v12 = vld [vmem:[#allocation5 + $0x1b18] ss:$36 sps:$4 sm:$0xff]  }
 0x602   :  { %15206 = vmatpush1.bf16.msra.mxu0 %v23235_v13  ;;  %15821 = vmatpush1.bf16.msra.mxu1 %v23238_v14  ;;  %v23285_v13 = vld [vmem:[#allocation5 + $0x1b5c] ss:$36 sps:$4 sm:$0xff]   ;;  %v23288_v14 = vld [vmem:[#allocation5 + $0x1b64] ss:$36 sps:$4 sm:$0xff]  }
 0x603   :  { %15207 = vmatprep.subr.bf16.mxu0 %v23243_v23  ;;  %15822 = vmatprep.subr.bf16.mxu1 %v23246_v17  ;;  %v23283_v23 = vld [vmem:[#allocation5 + $0x1b58] ss:$36 sps:$4 sm:$0xff]   ;;  %v23286_v17 = vld [vmem:[#allocation5 + $0x1b60] ss:$36 sps:$4 sm:$0xff]  }
 0x606   :  { %15208 = vmatpush1.bf16.msra.mxu0 %v23241_v56  ;;  %15823 = vmatpush1.bf16.msra.mxu1 %v23244_v19  ;;  %v23291_v56 = vld [vmem:[#allocation5 + $0x1ba4] ss:$36 sps:$4 sm:$0xff]   ;;  %v23294_v19 = vld [vmem:[#allocation5 + $0x1bac] ss:$36 sps:$4 sm:$0xff]  }
 0x607   :  { %15209 = vmatprep.subr.bf16.mxu0 %v23249_v33  ;;  %15824 = vmatprep.subr.bf16.mxu1 %v23252_v34  ;;  %v23289_v33 = vld [vmem:[#allocation5 + $0x1ba0] ss:$36 sps:$4 sm:$0xff]   ;;  %v23292_v34 = vld [vmem:[#allocation5 + $0x1ba8] ss:$36 sps:$4 sm:$0xff]  }
 0x60a   :  { %15210 = vmatpush1.bf16.msra.mxu0 %v23247_v60  ;;  %15825 = vmatpush1.bf16.msra.mxu1 %v23250_v38  ;;  %v23297_v60 = vld [vmem:[#allocation5 + $0x1bec] ss:$36 sps:$4 sm:$0xff]   ;;  %v23300_v38 = vld [vmem:[#allocation5 + $0x1bf4] ss:$36 sps:$4 sm:$0xff]  }
 0x60b   :  { %15211 = vmatprep.subr.bf16.mxu0 %v23255_v9  ;;  %15826 = vmatprep.subr.bf16.mxu1 %v23258_v44  ;;  %v23295_v9 = vld [vmem:[#allocation5 + $0x1be8] ss:$36 sps:$4 sm:$0xff]   ;;  %v23298_v44 = vld [vmem:[#allocation5 + $0x1bf0] ss:$36 sps:$4 sm:$0xff]  }
 0x60e   :  { %15212 = vmatpush1.bf16.msra.mxu0 %v23253_v45  ;;  %15827 = vmatpush1.bf16.msra.mxu1 %v23256_v46  ;;  %v23303_v45 = vld [vmem:[#allocation5 + $0x1c34] ss:$36 sps:$4 sm:$0xff]   ;;  %v23306_v46 = vld [vmem:[#allocation5 + $0x1c3c] ss:$36 sps:$4 sm:$0xff]  }
 0x60f   :  { %15213 = vmatprep.subr.bf16.mxu0 %v23261_v41  ;;  %15828 = vmatprep.subr.bf16.mxu1 %v23264_v49  ;;  %v23301_v41 = vld [vmem:[#allocation5 + $0x1c30] ss:$36 sps:$4 sm:$0xff]   ;;  %v23304_v49 = vld [vmem:[#allocation5 + $0x1c38] ss:$36 sps:$4 sm:$0xff]  }
 0x612   :  { %15214 = vmatpush1.bf16.msra.mxu0 %v23259_v50  ;;  %15829 = vmatpush1.bf16.msra.mxu1 %v23262_v51  ;;  %v23309_v50 = vld [vmem:[#allocation5 + $0x1c7c] ss:$36 sps:$4 sm:$0xff]   ;;  %v23312_v51 = vld [vmem:[#allocation5 + $0x1c84] ss:$36 sps:$4 sm:$0xff]  }
 0x613   :  { %15215 = vmatprep.subr.bf16.mxu0 %v23267_v52  ;;  %15830 = vmatprep.subr.bf16.mxu1 %v23270_v53  ;;  %v23307_v52 = vld [vmem:[#allocation5 + $0x1c78] ss:$36 sps:$4 sm:$0xff]   ;;  %v23310_v53 = vld [vmem:[#allocation5 + $0x1c80] ss:$36 sps:$4 sm:$0xff]  }
 0x616   :  { %15216 = vmatpush1.bf16.msra.mxu0 %v23265_v54  ;;  %15831 = vmatpush1.bf16.msra.mxu1 %v23268_v55  ;;  %v23315_v54 = vld [vmem:[#allocation5 + $0x1cc4] ss:$36 sps:$4 sm:$0xff]   ;;  %v23318_v55 = vld [vmem:[#allocation5 + $0x1ccc] ss:$36 sps:$4 sm:$0xff]  }
 0x617   :  { %15217 = vmatprep.subr.bf16.mxu0 %v23273_v58  ;;  %15832 = vmatprep.subr.bf16.mxu1 %v23276_v59  ;;  %v23313_v58 = vld [vmem:[#allocation5 + $0x1cc0] ss:$36 sps:$4 sm:$0xff]   ;;  %v23316_v59 = vld [vmem:[#allocation5 + $0x1cc8] ss:$36 sps:$4 sm:$0xff]  }
 0x61a   :  { %15218 = vmatpush1.bf16.msra.mxu0 %v23271_v1  ;;  %15833 = vmatpush1.bf16.msra.mxu1 %v23274_v21  ;;  %v23321_v1 = vld [vmem:[#allocation5 + $0x1d0c] ss:$36 sps:$4 sm:$0xff]   ;;  %v23324_v21 = vld [vmem:[#allocation5 + $0x1d14] ss:$36 sps:$4 sm:$0xff]  }
 0x61b   :  { %15228 = vmatprep.subr.bf16.mxu0 %v23279_v3  ;;  %15843 = vmatprep.subr.bf16.mxu1 %v23282_v7  ;;  %v23319_v3 = vld [vmem:[#allocation5 + $0x1d08] ss:$36 sps:$4 sm:$0xff]   ;;  %v23322_v7 = vld [vmem:[#allocation5 + $0x1d10] ss:$36 sps:$4 sm:$0xff]  }
 0x61d   :  { %15220 = vmatmul.mubr.bf16.vlgmr.msra.gmra.mrb[4].mxu0 %v25126_v57  ;;  %15835 = vmatmul.mubr.bf16.vlgmr.msra.gmra.mrb[4].mxu1 %v25126_v57 }
 0x61e   :  { %15229 = vmatpush1.bf16.msra.mxu0 %v23277_v8  ;;  %15844 = vmatpush1.bf16.msra.mxu1 %v23280_v12  ;;  %v23327_v8 = vld [vmem:[#allocation5 + $0x1d54] ss:$36 sps:$4 sm:$0xff]   ;;  %v23330_v12 = vld [vmem:[#allocation5 + $0x1d5c] ss:$36 sps:$4 sm:$0xff]  }
 0x61f   :  { %15230 = vmatprep.subr.bf16.mxu0 %v23285_v13  ;;  %15845 = vmatprep.subr.bf16.mxu1 %v23288_v14  ;;  %v23325_v13 = vld [vmem:[#allocation5 + $0x1d50] ss:$36 sps:$4 sm:$0xff]   ;;  %v23328_v14 = vld [vmem:[#allocation5 + $0x1d58] ss:$36 sps:$4 sm:$0xff]  }
 0x620   :  { %15260 = vmatprep.mubr.bf16.mxu0 %v25130_v62  ;;  %15875 = vmatprep.mubr.bf16.mxu1 %v25130_v62 }
 0x622   :  { %15231 = vmatpush1.bf16.msra.mxu0 %v23283_v23  ;;  %15846 = vmatpush1.bf16.msra.mxu1 %v23286_v17  ;;  %v23333_v23 = vld [vmem:[#allocation5 + $0x1d9c] ss:$36 sps:$4 sm:$0xff]   ;;  %v23336_v17 = vld [vmem:[#allocation5 + $0x1da4] ss:$36 sps:$4 sm:$0xff]  }
 0x623   :  { %15232 = vmatprep.subr.bf16.mxu0 %v23291_v56  ;;  %15847 = vmatprep.subr.bf16.mxu1 %v23294_v19  ;;  %v23331_v56 = vld [vmem:[#allocation5 + $0x1d98] ss:$36 sps:$4 sm:$0xff]   ;;  %v23334_v19 = vld [vmem:[#allocation5 + $0x1da0] ss:$36 sps:$4 sm:$0xff]  }
 0x626   :  { %15233 = vmatpush1.bf16.msra.mxu0 %v23289_v33  ;;  %15848 = vmatpush1.bf16.msra.mxu1 %v23292_v34  ;;  %v23339_v33 = vld [vmem:[#allocation5 + $0x1de4] ss:$36 sps:$4 sm:$0xff]   ;;  %v23342_v34 = vld [vmem:[#allocation5 + $0x1dec] ss:$36 sps:$4 sm:$0xff]  }
 0x627   :  { %15234 = vmatprep.subr.bf16.mxu0 %v23297_v60  ;;  %15849 = vmatprep.subr.bf16.mxu1 %v23300_v38  ;;  %v23337_v60 = vld [vmem:[#allocation5 + $0x1de0] ss:$36 sps:$4 sm:$0xff]   ;;  %v23340_v38 = vld [vmem:[#allocation5 + $0x1de8] ss:$36 sps:$4 sm:$0xff]  }
 0x62a   :  { %15235 = vmatpush1.bf16.msra.mxu0 %v23295_v9  ;;  %15850 = vmatpush1.bf16.msra.mxu1 %v23298_v44  ;;  %v23345_v9 = vld [vmem:[#allocation5 + $0x1e2c] ss:$36 sps:$4 sm:$0xff]   ;;  %v23348_v44 = vld [vmem:[#allocation5 + $0x1e34] ss:$36 sps:$4 sm:$0xff]  }
 0x62b   :  { %15236 = vmatprep.subr.bf16.mxu0 %v23303_v45  ;;  %15851 = vmatprep.subr.bf16.mxu1 %v23306_v46  ;;  %v23343_v45 = vld [vmem:[#allocation5 + $0x1e28] ss:$36 sps:$4 sm:$0xff]   ;;  %v23346_v46 = vld [vmem:[#allocation5 + $0x1e30] ss:$36 sps:$4 sm:$0xff]  }
 0x62e   :  { %15237 = vmatpush1.bf16.msra.mxu0 %v23301_v41  ;;  %15852 = vmatpush1.bf16.msra.mxu1 %v23304_v49  ;;  %v23351_v41 = vld [vmem:[#allocation5 + $0x1e74] ss:$36 sps:$4 sm:$0xff]   ;;  %v23354_v49 = vld [vmem:[#allocation5 + $0x1e7c] ss:$36 sps:$4 sm:$0xff]  }
 0x62f   :  { %15238 = vmatprep.subr.bf16.mxu0 %v23309_v50  ;;  %15853 = vmatprep.subr.bf16.mxu1 %v23312_v51  ;;  %v23349_v50 = vld [vmem:[#allocation5 + $0x1e70] ss:$36 sps:$4 sm:$0xff]   ;;  %v23352_v51 = vld [vmem:[#allocation5 + $0x1e78] ss:$36 sps:$4 sm:$0xff]  }
 0x632   :  { %15239 = vmatpush1.bf16.msra.mxu0 %v23307_v52  ;;  %15854 = vmatpush1.bf16.msra.mxu1 %v23310_v53  ;;  %v23357_v52 = vld [vmem:[#allocation5 + $0x1ebc] ss:$36 sps:$4 sm:$0xff]   ;;  %v23360_v53 = vld [vmem:[#allocation5 + $0x1ec4] ss:$36 sps:$4 sm:$0xff]  }
 0x633   :  { %15240 = vmatprep.subr.bf16.mxu0 %v23315_v54  ;;  %15855 = vmatprep.subr.bf16.mxu1 %v23318_v55  ;;  %v23355_v54 = vld [vmem:[#allocation5 + $0x1eb8] ss:$36 sps:$4 sm:$0xff]   ;;  %v23358_v55 = vld [vmem:[#allocation5 + $0x1ec0] ss:$36 sps:$4 sm:$0xff]  }
 0x636   :  { %15241 = vmatpush1.bf16.msra.mxu0 %v23313_v58  ;;  %15856 = vmatpush1.bf16.msra.mxu1 %v23316_v59  ;;  %v23363_v58 = vld [vmem:[#allocation5 + $0x1f04] ss:$36 sps:$4 sm:$0xff]   ;;  %v23366_v59 = vld [vmem:[#allocation5 + $0x1f0c] ss:$36 sps:$4 sm:$0xff]  }
 0x637   :  { %15242 = vmatprep.subr.bf16.mxu0 %v23321_v1  ;;  %15857 = vmatprep.subr.bf16.mxu1 %v23324_v21  ;;  %v23361_v1 = vld [vmem:[#allocation5 + $0x1f00] ss:$36 sps:$4 sm:$0xff]   ;;  %v23364_v21 = vld [vmem:[#allocation5 + $0x1f08] ss:$36 sps:$4 sm:$0xff]  }
 0x63a   :  { %15243 = vmatpush1.bf16.msra.mxu0 %v23319_v3  ;;  %15858 = vmatpush1.bf16.msra.mxu1 %v23322_v7  ;;  %v23369_v3 = vld [vmem:[#allocation5 + $0x1f4c] ss:$36 sps:$4 sm:$0xff]   ;;  %v23372_v7 = vld [vmem:[#allocation5 + $0x1f54] ss:$36 sps:$4 sm:$0xff]  }
 0x63b   :  { %15244 = vmatprep.subr.bf16.mxu0 %v23327_v8  ;;  %15859 = vmatprep.subr.bf16.mxu1 %v23330_v12  ;;  %v23367_v8 = vld [vmem:[#allocation5 + $0x1f48] ss:$36 sps:$4 sm:$0xff]   ;;  %v23370_v12 = vld [vmem:[#allocation5 + $0x1f50] ss:$36 sps:$4 sm:$0xff]  }
 0x63e   :  { %15245 = vmatpush1.bf16.msra.mxu0 %v23325_v13  ;;  %15860 = vmatpush1.bf16.msra.mxu1 %v23328_v14  ;;  %v23375_v13 = vld [vmem:[#allocation5 + $0x1f94] ss:$36 sps:$4 sm:$0xff]   ;;  %v23378_v14 = vld [vmem:[#allocation5 + $0x1f9c] ss:$36 sps:$4 sm:$0xff]  }
 0x63f   :  { %15246 = vmatprep.subr.bf16.mxu0 %v23333_v23  ;;  %15861 = vmatprep.subr.bf16.mxu1 %v23336_v17  ;;  %v23373_v23 = vld [vmem:[#allocation5 + $0x1f90] ss:$36 sps:$4 sm:$0xff]   ;;  %v23376_v17 = vld [vmem:[#allocation5 + $0x1f98] ss:$36 sps:$4 sm:$0xff]  }
 0x642   :  { %15247 = vmatpush1.bf16.msra.mxu0 %v23331_v56  ;;  %15862 = vmatpush1.bf16.msra.mxu1 %v23334_v19  ;;  %v23381_v56 = vld [vmem:[#allocation5 + $0x1fdc] ss:$36 sps:$4 sm:$0xff]   ;;  %v23384_v19 = vld [vmem:[#allocation5 + $0x1fe4] ss:$36 sps:$4 sm:$0xff]  }
 0x643   :  { %15248 = vmatprep.subr.bf16.mxu0 %v23339_v33  ;;  %15863 = vmatprep.subr.bf16.mxu1 %v23342_v34  ;;  %v23379_v33 = vld [vmem:[#allocation5 + $0x1fd8] ss:$36 sps:$4 sm:$0xff]   ;;  %v23382_v34 = vld [vmem:[#allocation5 + $0x1fe0] ss:$36 sps:$4 sm:$0xff]  }
 0x646   :  { %15249 = vmatpush1.bf16.msra.mxu0 %v23337_v60  ;;  %15864 = vmatpush1.bf16.msra.mxu1 %v23340_v38  ;;  %v23387_v60 = vld [vmem:[#allocation5 + $0x2024] ss:$36 sps:$4 sm:$0xff]   ;;  %v23390_v38 = vld [vmem:[#allocation5 + $0x202c] ss:$36 sps:$4 sm:$0xff]  }
 0x647   :  { %15250 = vmatprep.subr.bf16.mxu0 %v23345_v9  ;;  %15865 = vmatprep.subr.bf16.mxu1 %v23348_v44  ;;  %v23385_v9 = vld [vmem:[#allocation5 + $0x2020] ss:$36 sps:$4 sm:$0xff]   ;;  %v23388_v44 = vld [vmem:[#allocation5 + $0x2028] ss:$36 sps:$4 sm:$0xff]  }
 0x64a   :  { %15251 = vmatpush1.bf16.msra.mxu0 %v23343_v45  ;;  %15866 = vmatpush1.bf16.msra.mxu1 %v23346_v46  ;;  %v23393_v45 = vld [vmem:[#allocation5 + $0x206c] ss:$36 sps:$4 sm:$0xff]   ;;  %v23396_v46 = vld [vmem:[#allocation5 + $0x2074] ss:$36 sps:$4 sm:$0xff]  }
 0x64b   :  { %15252 = vmatprep.subr.bf16.mxu0 %v23351_v41  ;;  %15867 = vmatprep.subr.bf16.mxu1 %v23354_v49  ;;  %v23391_v41 = vld [vmem:[#allocation5 + $0x2068] ss:$36 sps:$4 sm:$0xff]   ;;  %v23394_v49 = vld [vmem:[#allocation5 + $0x2070] ss:$36 sps:$4 sm:$0xff]  }
 0x64e   :  { %15253 = vmatpush1.bf16.msra.mxu0 %v23349_v50  ;;  %15868 = vmatpush1.bf16.msra.mxu1 %v23352_v51  ;;  %v23399_v50 = vld [vmem:[#allocation5 + $0x20b4] ss:$36 sps:$4 sm:$0xff]   ;;  %v23402_v51 = vld [vmem:[#allocation5 + $0x20bc] ss:$36 sps:$4 sm:$0xff]  }
 0x64f   :  { %15254 = vmatprep.subr.bf16.mxu0 %v23357_v52  ;;  %15869 = vmatprep.subr.bf16.mxu1 %v23360_v53  ;;  %v23397_v52 = vld [vmem:[#allocation5 + $0x20b0] ss:$36 sps:$4 sm:$0xff]   ;;  %v23400_v53 = vld [vmem:[#allocation5 + $0x20b8] ss:$36 sps:$4 sm:$0xff]  }
 0x652   :  { %15255 = vmatpush1.bf16.msra.mxu0 %v23355_v54  ;;  %15870 = vmatpush1.bf16.msra.mxu1 %v23358_v55  ;;  %v23405_v54 = vld [vmem:[#allocation5 + $0x20fc] ss:$36 sps:$4 sm:$0xff]   ;;  %v23408_v55 = vld [vmem:[#allocation5 + $0x2104] ss:$36 sps:$4 sm:$0xff]  }
 0x653   :  { %15256 = vmatprep.subr.bf16.mxu0 %v23363_v58  ;;  %15871 = vmatprep.subr.bf16.mxu1 %v23366_v59  ;;  %v23403_v58 = vld [vmem:[#allocation5 + $0x20f8] ss:$36 sps:$4 sm:$0xff]   ;;  %v23406_v59 = vld [vmem:[#allocation5 + $0x2100] ss:$36 sps:$4 sm:$0xff]  }
 0x656   :  { %15257 = vmatpush1.bf16.msra.mxu0 %v23361_v1  ;;  %15872 = vmatpush1.bf16.msra.mxu1 %v23364_v21  ;;  %v23411_v1 = vld [vmem:[#allocation5 + $0x2144] ss:$36 sps:$4 sm:$0xff]   ;;  %v23414_v21 = vld [vmem:[#allocation5 + $0x214c] ss:$36 sps:$4 sm:$0xff]  }
 0x657   :  { %15258 = vmatprep.subr.bf16.mxu0 %v23369_v3  ;;  %15873 = vmatprep.subr.bf16.mxu1 %v23372_v7  ;;  %v23409_v3 = vld [vmem:[#allocation5 + $0x2140] ss:$36 sps:$4 sm:$0xff]   ;;  %v23412_v7 = vld [vmem:[#allocation5 + $0x2148] ss:$36 sps:$4 sm:$0xff]  }
 0x65a   :  { %15259 = vmatpush1.bf16.msra.mxu0 %v23367_v8  ;;  %15874 = vmatpush1.bf16.msra.mxu1 %v23370_v12  ;;  %v23417_v8 = vld [vmem:[#allocation5 + $0x218c] ss:$36 sps:$4 sm:$0xff]   ;;  %v23420_v12 = vld [vmem:[#allocation5 + $0x2194] ss:$36 sps:$4 sm:$0xff]  }
 0x65b   :  { %15269 = vmatprep.subr.bf16.mxu0 %v23375_v13  ;;  %15884 = vmatprep.subr.bf16.mxu1 %v23378_v14  ;;  %v23415_v13 = vld [vmem:[#allocation5 + $0x2188] ss:$36 sps:$4 sm:$0xff]   ;;  %v23418_v14 = vld [vmem:[#allocation5 + $0x2190] ss:$36 sps:$4 sm:$0xff]  }
 0x65d   :  { %15261 = vmatmul.mubr.bf16.vlgmr.msra.gmra.mrb[4].mxu0 %v25140_v11  ;;  %15876 = vmatmul.mubr.bf16.vlgmr.msra.gmra.mrb[4].mxu1 %v25140_v11 }
 0x65e   :  { %15270 = vmatpush1.bf16.msra.mxu0 %v23373_v23  ;;  %15885 = vmatpush1.bf16.msra.mxu1 %v23376_v17  ;;  %v23423_v23 = vld [vmem:[#allocation5 + $0x21d4] ss:$36 sps:$4 sm:$0xff]   ;;  %v23426_v17 = vld [vmem:[#allocation5 + $0x21dc] ss:$36 sps:$4 sm:$0xff]  }
 0x65f   :  { %15271 = vmatprep.subr.bf16.mxu0 %v23381_v56  ;;  %15886 = vmatprep.subr.bf16.mxu1 %v23384_v19  ;;  %v23421_v56 = vld [vmem:[#allocation5 + $0x21d0] ss:$36 sps:$4 sm:$0xff]   ;;  %v23424_v19 = vld [vmem:[#allocation5 + $0x21d8] ss:$36 sps:$4 sm:$0xff]  }
 0x660   :  { %15301 = vmatprep.mubr.bf16.mxu0 %v25144_v18  ;;  %15916 = vmatprep.mubr.bf16.mxu1 %v25144_v18 }
 0x662   :  { %15272 = vmatpush1.bf16.msra.mxu0 %v23379_v33  ;;  %15887 = vmatpush1.bf16.msra.mxu1 %v23382_v34  ;;  %v23429_v33 = vld [vmem:[#allocation5 + $0x221c] ss:$36 sps:$4 sm:$0xff]   ;;  %v23432_v34 = vld [vmem:[#allocation5 + $0x2224] ss:$36 sps:$4 sm:$0xff]  }
 0x663   :  { %15273 = vmatprep.subr.bf16.mxu0 %v23387_v60  ;;  %15888 = vmatprep.subr.bf16.mxu1 %v23390_v38  ;;  %v23427_v60 = vld [vmem:[#allocation5 + $0x2218] ss:$36 sps:$4 sm:$0xff]   ;;  %v23430_v38 = vld [vmem:[#allocation5 + $0x2220] ss:$36 sps:$4 sm:$0xff]  }
 0x666   :  { %15274 = vmatpush1.bf16.msra.mxu0 %v23385_v9  ;;  %15889 = vmatpush1.bf16.msra.mxu1 %v23388_v44  ;;  %v23435_v9 = vld [vmem:[#allocation5 + $0x2264] ss:$36 sps:$4 sm:$0xff]   ;;  %v23438_v44 = vld [vmem:[#allocation5 + $0x226c] ss:$36 sps:$4 sm:$0xff]  }
 0x667   :  { %15275 = vmatprep.subr.bf16.mxu0 %v23393_v45  ;;  %15890 = vmatprep.subr.bf16.mxu1 %v23396_v46  ;;  %v23433_v45 = vld [vmem:[#allocation5 + $0x2260] ss:$36 sps:$4 sm:$0xff]   ;;  %v23436_v46 = vld [vmem:[#allocation5 + $0x2268] ss:$36 sps:$4 sm:$0xff]  }
 0x66a   :  { %15276 = vmatpush1.bf16.msra.mxu0 %v23391_v41  ;;  %15891 = vmatpush1.bf16.msra.mxu1 %v23394_v49  ;;  %v23441_v41 = vld [vmem:[#allocation5 + $0x22ac] ss:$36 sps:$4 sm:$0xff]   ;;  %v23444_v49 = vld [vmem:[#allocation5 + $0x22b4] ss:$36 sps:$4 sm:$0xff]  }
 0x66b   :  { %15277 = vmatprep.subr.bf16.mxu0 %v23399_v50  ;;  %15892 = vmatprep.subr.bf16.mxu1 %v23402_v51  ;;  %v23439_v50 = vld [vmem:[#allocation5 + $0x22a8] ss:$36 sps:$4 sm:$0xff]   ;;  %v23442_v51 = vld [vmem:[#allocation5 + $0x22b0] ss:$36 sps:$4 sm:$0xff]  }
 0x66e   :  { %15278 = vmatpush1.bf16.msra.mxu0 %v23397_v52  ;;  %15893 = vmatpush1.bf16.msra.mxu1 %v23400_v53  ;;  %v23447_v52 = vld [vmem:[#allocation5 + $0x22f4] ss:$36 sps:$4 sm:$0xff]   ;;  %v23450_v53 = vld [vmem:[#allocation5 + $0x22fc] ss:$36 sps:$4 sm:$0xff]  }
 0x66f   :  { %15279 = vmatprep.subr.bf16.mxu0 %v23405_v54  ;;  %15894 = vmatprep.subr.bf16.mxu1 %v23408_v55  ;;  %v23445_v54 = vld [vmem:[#allocation5 + $0x22f0] ss:$36 sps:$4 sm:$0xff]   ;;  %v23448_v55 = vld [vmem:[#allocation5 + $0x22f8] ss:$36 sps:$4 sm:$0xff]  }
 0x672   :  { %15280 = vmatpush1.bf16.msra.mxu0 %v23403_v58  ;;  %15895 = vmatpush1.bf16.msra.mxu1 %v23406_v59  ;;  %v23453_v58 = vld [vmem:[#allocation5 + $0x233c] ss:$36 sps:$4 sm:$0xff]   ;;  %v23456_v59 = vld [vmem:[#allocation5 + $0x2344] ss:$36 sps:$4 sm:$0xff]  }
 0x673   :  { %15281 = vmatprep.subr.bf16.mxu0 %v23411_v1  ;;  %15896 = vmatprep.subr.bf16.mxu1 %v23414_v21  ;;  %v23451_v1 = vld [vmem:[#allocation5 + $0x2338] ss:$36 sps:$4 sm:$0xff]   ;;  %v23454_v21 = vld [vmem:[#allocation5 + $0x2340] ss:$36 sps:$4 sm:$0xff]  }
 0x676   :  { %15282 = vmatpush1.bf16.msra.mxu0 %v23409_v3  ;;  %15897 = vmatpush1.bf16.msra.mxu1 %v23412_v7  ;;  %v23459_v3 = vld [vmem:[#allocation5 + $0x2384] ss:$36 sps:$4 sm:$0xff]   ;;  %v23462_v7 = vld [vmem:[#allocation5 + $0x238c] ss:$36 sps:$4 sm:$0xff]  }
 0x677   :  { %15283 = vmatprep.subr.bf16.mxu0 %v23417_v8  ;;  %15898 = vmatprep.subr.bf16.mxu1 %v23420_v12  ;;  %v23457_v8 = vld [vmem:[#allocation5 + $0x2380] ss:$36 sps:$4 sm:$0xff]   ;;  %v23460_v12 = vld [vmem:[#allocation5 + $0x2388] ss:$36 sps:$4 sm:$0xff]  }
 0x67a   :  { %15284 = vmatpush1.bf16.msra.mxu0 %v23415_v13  ;;  %15899 = vmatpush1.bf16.msra.mxu1 %v23418_v14  ;;  %v23465_v13 = vld [vmem:[#allocation5 + $0x23cc] ss:$36 sps:$4 sm:$0xff]   ;;  %v23468_v14 = vld [vmem:[#allocation5 + $0x23d4] ss:$36 sps:$4 sm:$0xff]  }
 0x67b   :  { %15285 = vmatprep.subr.bf16.mxu0 %v23423_v23  ;;  %15900 = vmatprep.subr.bf16.mxu1 %v23426_v17  ;;  %v23463_v23 = vld [vmem:[#allocation5 + $0x23c8] ss:$36 sps:$4 sm:$0xff]   ;;  %v23466_v17 = vld [vmem:[#allocation5 + $0x23d0] ss:$36 sps:$4 sm:$0xff]  }
 0x67e   :  { %15286 = vmatpush1.bf16.msra.mxu0 %v23421_v56  ;;  %15901 = vmatpush1.bf16.msra.mxu1 %v23424_v19  ;;  %v23471_v56 = vld [vmem:[#allocation5 + $0x2414] ss:$36 sps:$4 sm:$0xff]   ;;  %v23474_v19 = vld [vmem:[#allocation5 + $0x241c] ss:$36 sps:$4 sm:$0xff]  }
 0x67f   :  { %15287 = vmatprep.subr.bf16.mxu0 %v23429_v33  ;;  %15902 = vmatprep.subr.bf16.mxu1 %v23432_v34  ;;  %v23469_v33 = vld [vmem:[#allocation5 + $0x2410] ss:$36 sps:$4 sm:$0xff]   ;;  %v23472_v34 = vld [vmem:[#allocation5 + $0x2418] ss:$36 sps:$4 sm:$0xff]  }
 0x682   :  { %15288 = vmatpush1.bf16.msra.mxu0 %v23427_v60  ;;  %15903 = vmatpush1.bf16.msra.mxu1 %v23430_v38  ;;  %v23477_v60 = vld [vmem:[#allocation5 + $0x245c] ss:$36 sps:$4 sm:$0xff]   ;;  %v23480_v38 = vld [vmem:[#allocation5 + $0x2464] ss:$36 sps:$4 sm:$0xff]  }
 0x683   :  { %15289 = vmatprep.subr.bf16.mxu0 %v23435_v9  ;;  %15904 = vmatprep.subr.bf16.mxu1 %v23438_v44  ;;  %v23475_v9 = vld [vmem:[#allocation5 + $0x2458] ss:$36 sps:$4 sm:$0xff]   ;;  %v23478_v44 = vld [vmem:[#allocation5 + $0x2460] ss:$36 sps:$4 sm:$0xff]  }
 0x686   :  { %15290 = vmatpush1.bf16.msra.mxu0 %v23433_v45  ;;  %15905 = vmatpush1.bf16.msra.mxu1 %v23436_v46  ;;  %v23483_v45 = vld [vmem:[#allocation5 + $0x24a4] ss:$36 sps:$4 sm:$0xff]   ;;  %v23486_v46 = vld [vmem:[#allocation5 + $0x24ac] ss:$36 sps:$4 sm:$0xff]  }
 0x687   :  { %15291 = vmatprep.subr.bf16.mxu0 %v23441_v41  ;;  %15906 = vmatprep.subr.bf16.mxu1 %v23444_v49  ;;  %v23481_v41 = vld [vmem:[#allocation5 + $0x24a0] ss:$36 sps:$4 sm:$0xff]   ;;  %v23484_v49 = vld [vmem:[#allocation5 + $0x24a8] ss:$36 sps:$4 sm:$0xff]  }
 0x68a   :  { %15292 = vmatpush1.bf16.msra.mxu0 %v23439_v50  ;;  %15907 = vmatpush1.bf16.msra.mxu1 %v23442_v51  ;;  %v23489_v50 = vld [vmem:[#allocation5 + $0x24ec] ss:$36 sps:$4 sm:$0xff]   ;;  %v23492_v51 = vld [vmem:[#allocation5 + $0x24f4] ss:$36 sps:$4 sm:$0xff]  }
 0x68b   :  { %15293 = vmatprep.subr.bf16.mxu0 %v23447_v52  ;;  %15908 = vmatprep.subr.bf16.mxu1 %v23450_v53  ;;  %v23487_v52 = vld [vmem:[#allocation5 + $0x24e8] ss:$36 sps:$4 sm:$0xff]   ;;  %v23490_v53 = vld [vmem:[#allocation5 + $0x24f0] ss:$36 sps:$4 sm:$0xff]  }
 0x68e   :  { %15294 = vmatpush1.bf16.msra.mxu0 %v23445_v54  ;;  %15909 = vmatpush1.bf16.msra.mxu1 %v23448_v55  ;;  %v23495_v54 = vld [vmem:[#allocation5 + $0x2534] ss:$36 sps:$4 sm:$0xff]   ;;  %v23498_v55 = vld [vmem:[#allocation5 + $0x253c] ss:$36 sps:$4 sm:$0xff]  }
 0x68f   :  { %15295 = vmatprep.subr.bf16.mxu0 %v23453_v58  ;;  %15910 = vmatprep.subr.bf16.mxu1 %v23456_v59  ;;  %v23493_v58 = vld [vmem:[#allocation5 + $0x2530] ss:$36 sps:$4 sm:$0xff]   ;;  %v23496_v59 = vld [vmem:[#allocation5 + $0x2538] ss:$36 sps:$4 sm:$0xff]  }
 0x692   :  { %15296 = vmatpush1.bf16.msra.mxu0 %v23451_v1  ;;  %15911 = vmatpush1.bf16.msra.mxu1 %v23454_v21  ;;  %v23501_v1 = vld [vmem:[#allocation5 + $0x257c] ss:$36 sps:$4 sm:$0xff]   ;;  %v23504_v21 = vld [vmem:[#allocation5 + $0x2584] ss:$36 sps:$4 sm:$0xff]  }
 0x693   :  { %15297 = vmatprep.subr.bf16.mxu0 %v23459_v3  ;;  %15912 = vmatprep.subr.bf16.mxu1 %v23462_v7  ;;  %v23499_v3 = vld [vmem:[#allocation5 + $0x2578] ss:$36 sps:$4 sm:$0xff]   ;;  %v23502_v7 = vld [vmem:[#allocation5 + $0x2580] ss:$36 sps:$4 sm:$0xff]  }
 0x696   :  { %15298 = vmatpush1.bf16.msra.mxu0 %v23457_v8  ;;  %15913 = vmatpush1.bf16.msra.mxu1 %v23460_v12  ;;  %v23507_v8 = vld [vmem:[#allocation5 + $0x25c4] ss:$36 sps:$4 sm:$0xff]   ;;  %v23510_v12 = vld [vmem:[#allocation5 + $0x25cc] ss:$36 sps:$4 sm:$0xff]  }
 0x697   :  { %15299 = vmatprep.subr.bf16.mxu0 %v23465_v13  ;;  %15914 = vmatprep.subr.bf16.mxu1 %v23468_v14  ;;  %v23505_v13 = vld [vmem:[#allocation5 + $0x25c0] ss:$36 sps:$4 sm:$0xff]   ;;  %v23508_v14 = vld [vmem:[#allocation5 + $0x25c8] ss:$36 sps:$4 sm:$0xff]  }
 0x69a   :  { %15300 = vmatpush1.bf16.msra.mxu0 %v23463_v23  ;;  %15915 = vmatpush1.bf16.msra.mxu1 %v23466_v17  ;;  %v23513_v23 = vld [vmem:[#allocation5 + $0x260c] ss:$36 sps:$4 sm:$0xff]   ;;  %v23516_v17 = vld [vmem:[#allocation5 + $0x2614] ss:$36 sps:$4 sm:$0xff]  }
 0x69b   :  { %15310 = vmatprep.subr.bf16.mxu0 %v23471_v56  ;;  %15925 = vmatprep.subr.bf16.mxu1 %v23474_v19  ;;  %v23511_v56 = vld [vmem:[#allocation5 + $0x2608] ss:$36 sps:$4 sm:$0xff]   ;;  %v23514_v19 = vld [vmem:[#allocation5 + $0x2610] ss:$36 sps:$4 sm:$0xff]  }
 0x69d   :  { %15302 = vmatmul.mubr.bf16.vlgmr.msra.gmra.mrb[4].mxu0 %v25154_v36  ;;  %15917 = vmatmul.mubr.bf16.vlgmr.msra.gmra.mrb[4].mxu1 %v25154_v36 }
 0x69e   :  { %15311 = vmatpush1.bf16.msra.mxu0 %v23469_v33  ;;  %15926 = vmatpush1.bf16.msra.mxu1 %v23472_v34  ;;  %v23519_v33 = vld [vmem:[#allocation5 + $0x2654] ss:$36 sps:$4 sm:$0xff]   ;;  %v23522_v34 = vld [vmem:[#allocation5 + $0x265c] ss:$36 sps:$4 sm:$0xff]  }
 0x69f   :  { %15312 = vmatprep.subr.bf16.mxu0 %v23477_v60  ;;  %15927 = vmatprep.subr.bf16.mxu1 %v23480_v38  ;;  %v23517_v60 = vld [vmem:[#allocation5 + $0x2650] ss:$36 sps:$4 sm:$0xff]   ;;  %v23520_v38 = vld [vmem:[#allocation5 + $0x2658] ss:$36 sps:$4 sm:$0xff]  }
 0x6a0   :  { %15342 = vmatprep.mubr.bf16.mxu0 %v25158_v43  ;;  %15957 = vmatprep.mubr.bf16.mxu1 %v25158_v43 }
 0x6a2   :  { %15313 = vmatpush1.bf16.msra.mxu0 %v23475_v9  ;;  %15928 = vmatpush1.bf16.msra.mxu1 %v23478_v44  ;;  %v23525_v9 = vld [vmem:[#allocation5 + $0x269c] ss:$36 sps:$4 sm:$0xff]   ;;  %v23528_v44 = vld [vmem:[#allocation5 + $0x26a4] ss:$36 sps:$4 sm:$0xff]  }
 0x6a3   :  { %15314 = vmatprep.subr.bf16.mxu0 %v23483_v45  ;;  %15929 = vmatprep.subr.bf16.mxu1 %v23486_v46  ;;  %v23523_v45 = vld [vmem:[#allocation5 + $0x2698] ss:$36 sps:$4 sm:$0xff]   ;;  %v23526_v46 = vld [vmem:[#allocation5 + $0x26a0] ss:$36 sps:$4 sm:$0xff]  }
 0x6a6   :  { %15315 = vmatpush1.bf16.msra.mxu0 %v23481_v41  ;;  %15930 = vmatpush1.bf16.msra.mxu1 %v23484_v49  ;;  %v23531_v41 = vld [vmem:[#allocation5 + $0x26e4] ss:$36 sps:$4 sm:$0xff]   ;;  %v23534_v49 = vld [vmem:[#allocation5 + $0x26ec] ss:$36 sps:$4 sm:$0xff]  }
 0x6a7   :  { %15316 = vmatprep.subr.bf16.mxu0 %v23489_v50  ;;  %15931 = vmatprep.subr.bf16.mxu1 %v23492_v51  ;;  %v23529_v50 = vld [vmem:[#allocation5 + $0x26e0] ss:$36 sps:$4 sm:$0xff]   ;;  %v23532_v51 = vld [vmem:[#allocation5 + $0x26e8] ss:$36 sps:$4 sm:$0xff]  }
 0x6aa   :  { %15317 = vmatpush1.bf16.msra.mxu0 %v23487_v52  ;;  %15932 = vmatpush1.bf16.msra.mxu1 %v23490_v53  ;;  %v23537_v52 = vld [vmem:[#allocation5 + $0x272c] ss:$36 sps:$4 sm:$0xff]   ;;  %v23540_v53 = vld [vmem:[#allocation5 + $0x2734] ss:$36 sps:$4 sm:$0xff]  }
 0x6ab   :  { %15318 = vmatprep.subr.bf16.mxu0 %v23495_v54  ;;  %15933 = vmatprep.subr.bf16.mxu1 %v23498_v55  ;;  %v23535_v54 = vld [vmem:[#allocation5 + $0x2728] ss:$36 sps:$4 sm:$0xff]   ;;  %v23538_v55 = vld [vmem:[#allocation5 + $0x2730] ss:$36 sps:$4 sm:$0xff]  }
 0x6ae   :  { %15319 = vmatpush1.bf16.msra.mxu0 %v23493_v58  ;;  %15934 = vmatpush1.bf16.msra.mxu1 %v23496_v59  ;;  %v23543_v58 = vld [vmem:[#allocation5 + $0x2774] ss:$36 sps:$4 sm:$0xff]   ;;  %v23546_v59 = vld [vmem:[#allocation5 + $0x277c] ss:$36 sps:$4 sm:$0xff]  }
 0x6af   :  { %15320 = vmatprep.subr.bf16.mxu0 %v23501_v1  ;;  %15935 = vmatprep.subr.bf16.mxu1 %v23504_v21  ;;  %v23541_v1 = vld [vmem:[#allocation5 + $0x2770] ss:$36 sps:$4 sm:$0xff]   ;;  %v23544_v21 = vld [vmem:[#allocation5 + $0x2778] ss:$36 sps:$4 sm:$0xff]  }
 0x6b2   :  { %15321 = vmatpush1.bf16.msra.mxu0 %v23499_v3  ;;  %15936 = vmatpush1.bf16.msra.mxu1 %v23502_v7  ;;  %v23549_v3 = vld [vmem:[#allocation5 + $0x27bc] ss:$36 sps:$4 sm:$0xff]   ;;  %v23552_v7 = vld [vmem:[#allocation5 + $0x27c4] ss:$36 sps:$4 sm:$0xff]  }
 0x6b3   :  { %15322 = vmatprep.subr.bf16.mxu0 %v23507_v8  ;;  %15937 = vmatprep.subr.bf16.mxu1 %v23510_v12  ;;  %v23547_v8 = vld [vmem:[#allocation5 + $0x27b8] ss:$36 sps:$4 sm:$0xff]   ;;  %v23550_v12 = vld [vmem:[#allocation5 + $0x27c0] ss:$36 sps:$4 sm:$0xff]  }
 0x6b6   :  { %15323 = vmatpush1.bf16.msra.mxu0 %v23505_v13  ;;  %15938 = vmatpush1.bf16.msra.mxu1 %v23508_v14  ;;  %v23555_v13 = vld [vmem:[#allocation5 + $0x2804] ss:$36 sps:$4 sm:$0xff]   ;;  %v23558_v14 = vld [vmem:[#allocation5 + $0x280c] ss:$36 sps:$4 sm:$0xff]  }
 0x6b7   :  { %15324 = vmatprep.subr.bf16.mxu0 %v23513_v23  ;;  %15939 = vmatprep.subr.bf16.mxu1 %v23516_v17  ;;  %v23553_v23 = vld [vmem:[#allocation5 + $0x2800] ss:$36 sps:$4 sm:$0xff]   ;;  %v23556_v17 = vld [vmem:[#allocation5 + $0x2808] ss:$36 sps:$4 sm:$0xff]  }
 0x6ba   :  { %15325 = vmatpush1.bf16.msra.mxu0 %v23511_v56  ;;  %15940 = vmatpush1.bf16.msra.mxu1 %v23514_v19  ;;  %v23561_v56 = vld [vmem:[#allocation5 + $0x284c] ss:$36 sps:$4 sm:$0xff]   ;;  %v23564_v19 = vld [vmem:[#allocation5 + $0x2854] ss:$36 sps:$4 sm:$0xff]  }
 0x6bb   :  { %15326 = vmatprep.subr.bf16.mxu0 %v23519_v33  ;;  %15941 = vmatprep.subr.bf16.mxu1 %v23522_v34  ;;  %v23559_v33 = vld [vmem:[#allocation5 + $0x2848] ss:$36 sps:$4 sm:$0xff]   ;;  %v23562_v34 = vld [vmem:[#allocation5 + $0x2850] ss:$36 sps:$4 sm:$0xff]  }
 0x6be   :  { %15327 = vmatpush1.bf16.msra.mxu0 %v23517_v60  ;;  %15942 = vmatpush1.bf16.msra.mxu1 %v23520_v38  ;;  %v23567_v60 = vld [vmem:[#allocation5 + $0x2894] ss:$36 sps:$4 sm:$0xff]   ;;  %v23570_v38 = vld [vmem:[#allocation5 + $0x289c] ss:$36 sps:$4 sm:$0xff]  }
 0x6bf   :  { %15328 = vmatprep.subr.bf16.mxu0 %v23525_v9  ;;  %15943 = vmatprep.subr.bf16.mxu1 %v23528_v44  ;;  %v23565_v9 = vld [vmem:[#allocation5 + $0x2890] ss:$36 sps:$4 sm:$0xff]   ;;  %v23568_v44 = vld [vmem:[#allocation5 + $0x2898] ss:$36 sps:$4 sm:$0xff]  }
 0x6c2   :  { %15329 = vmatpush1.bf16.msra.mxu0 %v23523_v45  ;;  %15944 = vmatpush1.bf16.msra.mxu1 %v23526_v46  ;;  %v23573_v45 = vld [vmem:[#allocation5 + $0x28dc] ss:$36 sps:$4 sm:$0xff]   ;;  %v23576_v46 = vld [vmem:[#allocation5 + $0x28e4] ss:$36 sps:$4 sm:$0xff]  }
 0x6c3   :  { %15330 = vmatprep.subr.bf16.mxu0 %v23531_v41  ;;  %15945 = vmatprep.subr.bf16.mxu1 %v23534_v49  ;;  %v23571_v41 = vld [vmem:[#allocation5 + $0x28d8] ss:$36 sps:$4 sm:$0xff]   ;;  %v23574_v49 = vld [vmem:[#allocation5 + $0x28e0] ss:$36 sps:$4 sm:$0xff]  }
 0x6c6   :  { %15331 = vmatpush1.bf16.msra.mxu0 %v23529_v50  ;;  %15946 = vmatpush1.bf16.msra.mxu1 %v23532_v51  ;;  %v23579_v50 = vld [vmem:[#allocation5 + $0x2924] ss:$36 sps:$4 sm:$0xff]   ;;  %v23582_v51 = vld [vmem:[#allocation5 + $0x292c] ss:$36 sps:$4 sm:$0xff]  }
 0x6c7   :  { %15332 = vmatprep.subr.bf16.mxu0 %v23537_v52  ;;  %15947 = vmatprep.subr.bf16.mxu1 %v23540_v53  ;;  %v23577_v52 = vld [vmem:[#allocation5 + $0x2920] ss:$36 sps:$4 sm:$0xff]   ;;  %v23580_v53 = vld [vmem:[#allocation5 + $0x2928] ss:$36 sps:$4 sm:$0xff]  }
 0x6ca   :  { %15333 = vmatpush1.bf16.msra.mxu0 %v23535_v54  ;;  %15948 = vmatpush1.bf16.msra.mxu1 %v23538_v55  ;;  %v23585_v54 = vld [vmem:[#allocation5 + $0x296c] ss:$36 sps:$4 sm:$0xff]   ;;  %v23588_v55 = vld [vmem:[#allocation5 + $0x2974] ss:$36 sps:$4 sm:$0xff]  }
 0x6cb   :  { %15334 = vmatprep.subr.bf16.mxu0 %v23543_v58  ;;  %15949 = vmatprep.subr.bf16.mxu1 %v23546_v59  ;;  %v23583_v58 = vld [vmem:[#allocation5 + $0x2968] ss:$36 sps:$4 sm:$0xff]   ;;  %v23586_v59 = vld [vmem:[#allocation5 + $0x2970] ss:$36 sps:$4 sm:$0xff]  }
 0x6ce   :  { %15335 = vmatpush1.bf16.msra.mxu0 %v23541_v1  ;;  %15950 = vmatpush1.bf16.msra.mxu1 %v23544_v21  ;;  %v23591_v1 = vld [vmem:[#allocation5 + $0x29b4] ss:$36 sps:$4 sm:$0xff]   ;;  %v23594_v21 = vld [vmem:[#allocation5 + $0x29bc] ss:$36 sps:$4 sm:$0xff]  }
 0x6cf   :  { %15336 = vmatprep.subr.bf16.mxu0 %v23549_v3  ;;  %15951 = vmatprep.subr.bf16.mxu1 %v23552_v7  ;;  %v23589_v3 = vld [vmem:[#allocation5 + $0x29b0] ss:$36 sps:$4 sm:$0xff]   ;;  %v23592_v7 = vld [vmem:[#allocation5 + $0x29b8] ss:$36 sps:$4 sm:$0xff]  }
 0x6d2   :  { %15337 = vmatpush1.bf16.msra.mxu0 %v23547_v8  ;;  %15952 = vmatpush1.bf16.msra.mxu1 %v23550_v12  ;;  %v23597_v8 = vld [vmem:[#allocation5 + $0x29fc] ss:$36 sps:$4 sm:$0xff]   ;;  %v23600_v12 = vld [vmem:[#allocation5 + $0x2a04] ss:$36 sps:$4 sm:$0xff]  }
 0x6d3   :  { %15338 = vmatprep.subr.bf16.mxu0 %v23555_v13  ;;  %15953 = vmatprep.subr.bf16.mxu1 %v23558_v14  ;;  %v23595_v13 = vld [vmem:[#allocation5 + $0x29f8] ss:$36 sps:$4 sm:$0xff]   ;;  %v23598_v14 = vld [vmem:[#allocation5 + $0x2a00] ss:$36 sps:$4 sm:$0xff]  }
 0x6d6   :  { %15339 = vmatpush1.bf16.msra.mxu0 %v23553_v23  ;;  %15954 = vmatpush1.bf16.msra.mxu1 %v23556_v17  ;;  %v23603_v23 = vld [vmem:[#allocation5 + $0x2a44] ss:$36 sps:$4 sm:$0xff]   ;;  %v23606_v17 = vld [vmem:[#allocation5 + $0x2a4c] ss:$36 sps:$4 sm:$0xff]  }
 0x6d7   :  { %15340 = vmatprep.subr.bf16.mxu0 %v23561_v56  ;;  %15955 = vmatprep.subr.bf16.mxu1 %v23564_v19  ;;  %v23601_v56 = vld [vmem:[#allocation5 + $0x2a40] ss:$36 sps:$4 sm:$0xff]   ;;  %v23604_v19 = vld [vmem:[#allocation5 + $0x2a48] ss:$36 sps:$4 sm:$0xff]  }
 0x6da   :  { %15341 = vmatpush1.bf16.msra.mxu0 %v23559_v33  ;;  %15956 = vmatpush1.bf16.msra.mxu1 %v23562_v34  ;;  %v23609_v33 = vld [vmem:[#allocation5 + $0x2a8c] ss:$36 sps:$4 sm:$0xff]   ;;  %v23612_v34 = vld [vmem:[#allocation5 + $0x2a94] ss:$36 sps:$4 sm:$0xff]  }
 0x6db   :  { %15351 = vmatprep.subr.bf16.mxu0 %v23567_v60  ;;  %15966 = vmatprep.subr.bf16.mxu1 %v23570_v38  ;;  %v23607_v60 = vld [vmem:[#allocation5 + $0x2a88] ss:$36 sps:$4 sm:$0xff]   ;;  %v23610_v38 = vld [vmem:[#allocation5 + $0x2a90] ss:$36 sps:$4 sm:$0xff]  }
 0x6dd   :  { %15343 = vmatmul.mubr.bf16.vlgmr.msra.gmra.mrb[4].mxu0 %v25168_v61  ;;  %15958 = vmatmul.mubr.bf16.vlgmr.msra.gmra.mrb[4].mxu1 %v25168_v61 }
 0x6de   :  { %15352 = vmatpush1.bf16.msra.mxu0 %v23565_v9  ;;  %15967 = vmatpush1.bf16.msra.mxu1 %v23568_v44  ;;  %v23615_v9 = vld [vmem:[#allocation5 + $0x2ad4] ss:$36 sps:$4 sm:$0xff]   ;;  %v23618_v44 = vld [vmem:[#allocation5 + $0x2adc] ss:$36 sps:$4 sm:$0xff]  }
 0x6df   :  { %15353 = vmatprep.subr.bf16.mxu0 %v23573_v45  ;;  %15968 = vmatprep.subr.bf16.mxu1 %v23576_v46  ;;  %v23613_v45 = vld [vmem:[#allocation5 + $0x2ad0] ss:$36 sps:$4 sm:$0xff]   ;;  %v23616_v46 = vld [vmem:[#allocation5 + $0x2ad8] ss:$36 sps:$4 sm:$0xff]  }
 0x6e0   :  { %15383 = vmatprep.mubr.bf16.mxu0 %v25172_v2  ;;  %15998 = vmatprep.mubr.bf16.mxu1 %v25172_v2 }
 0x6e2   :  { %15354 = vmatpush1.bf16.msra.mxu0 %v23571_v41  ;;  %15969 = vmatpush1.bf16.msra.mxu1 %v23574_v49  ;;  %v23621_v41 = vld [vmem:[#allocation5 + $0x2b1c] ss:$36 sps:$4 sm:$0xff]   ;;  %v23624_v49 = vld [vmem:[#allocation5 + $0x2b24] ss:$36 sps:$4 sm:$0xff]  }
 0x6e3   :  { %15355 = vmatprep.subr.bf16.mxu0 %v23579_v50  ;;  %15970 = vmatprep.subr.bf16.mxu1 %v23582_v51  ;;  %v23619_v50 = vld [vmem:[#allocation5 + $0x2b18] ss:$36 sps:$4 sm:$0xff]   ;;  %v23622_v51 = vld [vmem:[#allocation5 + $0x2b20] ss:$36 sps:$4 sm:$0xff]  }
 0x6e6   :  { %15356 = vmatpush1.bf16.msra.mxu0 %v23577_v52  ;;  %15971 = vmatpush1.bf16.msra.mxu1 %v23580_v53  ;;  %v23627_v52 = vld [vmem:[#allocation5 + $0x2b64] ss:$36 sps:$4 sm:$0xff]   ;;  %v23630_v53 = vld [vmem:[#allocation5 + $0x2b6c] ss:$36 sps:$4 sm:$0xff]  }
 0x6e7   :  { %15357 = vmatprep.subr.bf16.mxu0 %v23585_v54  ;;  %15972 = vmatprep.subr.bf16.mxu1 %v23588_v55  ;;  %v23625_v54 = vld [vmem:[#allocation5 + $0x2b60] ss:$36 sps:$4 sm:$0xff]   ;;  %v23628_v55 = vld [vmem:[#allocation5 + $0x2b68] ss:$36 sps:$4 sm:$0xff]  }
 0x6ea   :  { %15358 = vmatpush1.bf16.msra.mxu0 %v23583_v58  ;;  %15973 = vmatpush1.bf16.msra.mxu1 %v23586_v59  ;;  %v23633_v58 = vld [vmem:[#allocation5 + $0x2bac] ss:$36 sps:$4 sm:$0xff]   ;;  %v23636_v59 = vld [vmem:[#allocation5 + $0x2bb4] ss:$36 sps:$4 sm:$0xff]  }
 0x6eb   :  { %15359 = vmatprep.subr.bf16.mxu0 %v23591_v1  ;;  %15974 = vmatprep.subr.bf16.mxu1 %v23594_v21  ;;  %v23631_v1 = vld [vmem:[#allocation5 + $0x2ba8] ss:$36 sps:$4 sm:$0xff]   ;;  %v23634_v21 = vld [vmem:[#allocation5 + $0x2bb0] ss:$36 sps:$4 sm:$0xff]  }
 0x6ee   :  { %15360 = vmatpush1.bf16.msra.mxu0 %v23589_v3  ;;  %15975 = vmatpush1.bf16.msra.mxu1 %v23592_v7  ;;  %v23639_v3 = vld [vmem:[#allocation5 + $0x2bf4] ss:$36 sps:$4 sm:$0xff]   ;;  %v23642_v7 = vld [vmem:[#allocation5 + $0x2bfc] ss:$36 sps:$4 sm:$0xff]  }
 0x6ef   :  { %15361 = vmatprep.subr.bf16.mxu0 %v23597_v8  ;;  %15976 = vmatprep.subr.bf16.mxu1 %v23600_v12  ;;  %v23637_v8 = vld [vmem:[#allocation5 + $0x2bf0] ss:$36 sps:$4 sm:$0xff]   ;;  %v23640_v12 = vld [vmem:[#allocation5 + $0x2bf8] ss:$36 sps:$4 sm:$0xff]  }
 0x6f2   :  { %15362 = vmatpush1.bf16.msra.mxu0 %v23595_v13  ;;  %15977 = vmatpush1.bf16.msra.mxu1 %v23598_v14  ;;  %v23645_v13 = vld [vmem:[#allocation5 + $0x2c3c] ss:$36 sps:$4 sm:$0xff]   ;;  %v23648_v14 = vld [vmem:[#allocation5 + $0x2c44] ss:$36 sps:$4 sm:$0xff]  }
 0x6f3   :  { %15363 = vmatprep.subr.bf16.mxu0 %v23603_v23  ;;  %15978 = vmatprep.subr.bf16.mxu1 %v23606_v17  ;;  %v23643_v23 = vld [vmem:[#allocation5 + $0x2c38] ss:$36 sps:$4 sm:$0xff]   ;;  %v23646_v17 = vld [vmem:[#allocation5 + $0x2c40] ss:$36 sps:$4 sm:$0xff]  }
 0x6f6   :  { %15364 = vmatpush1.bf16.msra.mxu0 %v23601_v56  ;;  %15979 = vmatpush1.bf16.msra.mxu1 %v23604_v19  ;;  %v23651_v56 = vld [vmem:[#allocation5 + $0x2c84] ss:$36 sps:$4 sm:$0xff]   ;;  %v23654_v19 = vld [vmem:[#allocation5 + $0x2c8c] ss:$36 sps:$4 sm:$0xff]  }
 0x6f7   :  { %15365 = vmatprep.subr.bf16.mxu0 %v23609_v33  ;;  %15980 = vmatprep.subr.bf16.mxu1 %v23612_v34  ;;  %v23649_v33 = vld [vmem:[#allocation5 + $0x2c80] ss:$36 sps:$4 sm:$0xff]   ;;  %v23652_v34 = vld [vmem:[#allocation5 + $0x2c88] ss:$36 sps:$4 sm:$0xff]  }
 0x6fa   :  { %15366 = vmatpush1.bf16.msra.mxu0 %v23607_v60  ;;  %15981 = vmatpush1.bf16.msra.mxu1 %v23610_v38  ;;  %v23657_v60 = vld [vmem:[#allocation5 + $0x2ccc] ss:$36 sps:$4 sm:$0xff]   ;;  %v23660_v38 = vld [vmem:[#allocation5 + $0x2cd4] ss:$36 sps:$4 sm:$0xff]  }
 0x6fb   :  { %15367 = vmatprep.subr.bf16.mxu0 %v23615_v9  ;;  %15982 = vmatprep.subr.bf16.mxu1 %v23618_v44  ;;  %v23655_v9 = vld [vmem:[#allocation5 + $0x2cc8] ss:$36 sps:$4 sm:$0xff]   ;;  %v23658_v44 = vld [vmem:[#allocation5 + $0x2cd0] ss:$36 sps:$4 sm:$0xff]  }
 0x6fe   :  { %15368 = vmatpush1.bf16.msra.mxu0 %v23613_v45  ;;  %15983 = vmatpush1.bf16.msra.mxu1 %v23616_v46  ;;  %v23663_v45 = vld [vmem:[#allocation5 + $0x2d14] ss:$36 sps:$4 sm:$0xff]   ;;  %v23666_v46 = vld [vmem:[#allocation5 + $0x2d1c] ss:$36 sps:$4 sm:$0xff]  }
 0x6ff   :  { %15369 = vmatprep.subr.bf16.mxu0 %v23621_v41  ;;  %15984 = vmatprep.subr.bf16.mxu1 %v23624_v49  ;;  %v23661_v41 = vld [vmem:[#allocation5 + $0x2d10] ss:$36 sps:$4 sm:$0xff]   ;;  %v23664_v49 = vld [vmem:[#allocation5 + $0x2d18] ss:$36 sps:$4 sm:$0xff]  }
 0x702   :  { %15370 = vmatpush1.bf16.msra.mxu0 %v23619_v50  ;;  %15985 = vmatpush1.bf16.msra.mxu1 %v23622_v51  ;;  %v23669_v50 = vld [vmem:[#allocation5 + $0x2d5c] ss:$36 sps:$4 sm:$0xff]   ;;  %v23672_v51 = vld [vmem:[#allocation5 + $0x2d64] ss:$36 sps:$4 sm:$0xff]  }
 0x703   :  { %15371 = vmatprep.subr.bf16.mxu0 %v23627_v52  ;;  %15986 = vmatprep.subr.bf16.mxu1 %v23630_v53  ;;  %v23667_v52 = vld [vmem:[#allocation5 + $0x2d58] ss:$36 sps:$4 sm:$0xff]   ;;  %v23670_v53 = vld [vmem:[#allocation5 + $0x2d60] ss:$36 sps:$4 sm:$0xff]  }
 0x706   :  { %15372 = vmatpush1.bf16.msra.mxu0 %v23625_v54  ;;  %15987 = vmatpush1.bf16.msra.mxu1 %v23628_v55  ;;  %v23675_v54 = vld [vmem:[#allocation5 + $0x2da4] ss:$36 sps:$4 sm:$0xff]   ;;  %v23678_v55 = vld [vmem:[#allocation5 + $0x2dac] ss:$36 sps:$4 sm:$0xff]  }
 0x707   :  { %15373 = vmatprep.subr.bf16.mxu0 %v23633_v58  ;;  %15988 = vmatprep.subr.bf16.mxu1 %v23636_v59  ;;  %v23673_v58 = vld [vmem:[#allocation5 + $0x2da0] ss:$36 sps:$4 sm:$0xff]   ;;  %v23676_v59 = vld [vmem:[#allocation5 + $0x2da8] ss:$36 sps:$4 sm:$0xff]  }
 0x70a   :  { %15374 = vmatpush1.bf16.msra.mxu0 %v23631_v1  ;;  %15989 = vmatpush1.bf16.msra.mxu1 %v23634_v21  ;;  %v23681_v1 = vld [vmem:[#allocation5 + $0x2dec] ss:$36 sps:$4 sm:$0xff]   ;;  %v23684_v21 = vld [vmem:[#allocation5 + $0x2df4] ss:$36 sps:$4 sm:$0xff]  }
 0x70b   :  { %15375 = vmatprep.subr.bf16.mxu0 %v23639_v3  ;;  %15990 = vmatprep.subr.bf16.mxu1 %v23642_v7  ;;  %v23679_v3 = vld [vmem:[#allocation5 + $0x2de8] ss:$36 sps:$4 sm:$0xff]   ;;  %v23682_v7 = vld [vmem:[#allocation5 + $0x2df0] ss:$36 sps:$4 sm:$0xff]  }
 0x70e   :  { %15376 = vmatpush1.bf16.msra.mxu0 %v23637_v8  ;;  %15991 = vmatpush1.bf16.msra.mxu1 %v23640_v12  ;;  %v23687_v8 = vld [vmem:[#allocation5 + $0x2e34] ss:$36 sps:$4 sm:$0xff]   ;;  %v23690_v12 = vld [vmem:[#allocation5 + $0x2e3c] ss:$36 sps:$4 sm:$0xff]  }
 0x70f   :  { %15377 = vmatprep.subr.bf16.mxu0 %v23645_v13  ;;  %15992 = vmatprep.subr.bf16.mxu1 %v23648_v14  ;;  %v23685_v13 = vld [vmem:[#allocation5 + $0x2e30] ss:$36 sps:$4 sm:$0xff]   ;;  %v23688_v14 = vld [vmem:[#allocation5 + $0x2e38] ss:$36 sps:$4 sm:$0xff]  }
 0x712   :  { %15378 = vmatpush1.bf16.msra.mxu0 %v23643_v23  ;;  %15993 = vmatpush1.bf16.msra.mxu1 %v23646_v17  ;;  %v23693_v23 = vld [vmem:[#allocation5 + $0x2e7c] ss:$36 sps:$4 sm:$0xff]   ;;  %v23696_v17 = vld [vmem:[#allocation5 + $0x2e84] ss:$36 sps:$4 sm:$0xff]  }
 0x713   :  { %15379 = vmatprep.subr.bf16.mxu0 %v23651_v56  ;;  %15994 = vmatprep.subr.bf16.mxu1 %v23654_v19  ;;  %v23691_v56 = vld [vmem:[#allocation5 + $0x2e78] ss:$36 sps:$4 sm:$0xff]   ;;  %v23694_v19 = vld [vmem:[#allocation5 + $0x2e80] ss:$36 sps:$4 sm:$0xff]  }
 0x716   :  { %15380 = vmatpush1.bf16.msra.mxu0 %v23649_v33  ;;  %15995 = vmatpush1.bf16.msra.mxu1 %v23652_v34  ;;  %v23699_v33 = vld [vmem:[#allocation5 + $0x2ec4] ss:$36 sps:$4 sm:$0xff]   ;;  %v23702_v34 = vld [vmem:[#allocation5 + $0x2ecc] ss:$36 sps:$4 sm:$0xff]  }
 0x717   :  { %15381 = vmatprep.subr.bf16.mxu0 %v23657_v60  ;;  %15996 = vmatprep.subr.bf16.mxu1 %v23660_v38  ;;  %v23697_v60 = vld [vmem:[#allocation5 + $0x2ec0] ss:$36 sps:$4 sm:$0xff]   ;;  %v23700_v38 = vld [vmem:[#allocation5 + $0x2ec8] ss:$36 sps:$4 sm:$0xff]  }
 0x71a   :  { %15382 = vmatpush1.bf16.msra.mxu0 %v23655_v9  ;;  %15997 = vmatpush1.bf16.msra.mxu1 %v23658_v44  ;;  %v23705_v9 = vld [vmem:[#allocation5 + $0x2f0c] ss:$36 sps:$4 sm:$0xff]   ;;  %v23708_v44 = vld [vmem:[#allocation5 + $0x2f14] ss:$36 sps:$4 sm:$0xff]  }
 0x71b   :  { %15392 = vmatprep.subr.bf16.mxu0 %v23663_v45  ;;  %16007 = vmatprep.subr.bf16.mxu1 %v23666_v46  ;;  %v23703_v45 = vld [vmem:[#allocation5 + $0x2f08] ss:$36 sps:$4 sm:$0xff]   ;;  %v23706_v46 = vld [vmem:[#allocation5 + $0x2f10] ss:$36 sps:$4 sm:$0xff]  }
 0x71d   :  { %15384 = vmatmul.mubr.bf16.vlgmr.msra.gmra.mrb[4].mxu0 %v25182_v27  ;;  %15999 = vmatmul.mubr.bf16.vlgmr.msra.gmra.mrb[4].mxu1 %v25182_v27 }
 0x71e   :  { %15393 = vmatpush1.bf16.msra.mxu0 %v23661_v41  ;;  %16008 = vmatpush1.bf16.msra.mxu1 %v23664_v49  ;;  %v23711_v41 = vld [vmem:[#allocation5 + $0x2f54] ss:$36 sps:$4 sm:$0xff]   ;;  %v23714_v49 = vld [vmem:[#allocation5 + $0x2f5c] ss:$36 sps:$4 sm:$0xff]  }
 0x71f   :  { %15394 = vmatprep.subr.bf16.mxu0 %v23669_v50  ;;  %16009 = vmatprep.subr.bf16.mxu1 %v23672_v51  ;;  %v23709_v50 = vld [vmem:[#allocation5 + $0x2f50] ss:$36 sps:$4 sm:$0xff]   ;;  %v23712_v51 = vld [vmem:[#allocation5 + $0x2f58] ss:$36 sps:$4 sm:$0xff]  }
 0x720   :  { %15424 = vmatprep.mubr.bf16.mxu0 %v25186_v37  ;;  %16039 = vmatprep.mubr.bf16.mxu1 %v25186_v37 }
 0x722   :  { %15395 = vmatpush1.bf16.msra.mxu0 %v23667_v52  ;;  %16010 = vmatpush1.bf16.msra.mxu1 %v23670_v53  ;;  %v23717_v52 = vld [vmem:[#allocation5 + $0x2f9c] ss:$36 sps:$4 sm:$0xff]   ;;  %v23720_v53 = vld [vmem:[#allocation5 + $0x2fa4] ss:$36 sps:$4 sm:$0xff]  }
 0x723   :  { %15396 = vmatprep.subr.bf16.mxu0 %v23675_v54  ;;  %16011 = vmatprep.subr.bf16.mxu1 %v23678_v55  ;;  %v23715_v54 = vld [vmem:[#allocation5 + $0x2f98] ss:$36 sps:$4 sm:$0xff]   ;;  %v23718_v55 = vld [vmem:[#allocation5 + $0x2fa0] ss:$36 sps:$4 sm:$0xff]  }
 0x726   :  { %15397 = vmatpush1.bf16.msra.mxu0 %v23673_v58  ;;  %16012 = vmatpush1.bf16.msra.mxu1 %v23676_v59  ;;  %v23723_v58 = vld [vmem:[#allocation5 + $0x2fe4] ss:$36 sps:$4 sm:$0xff]   ;;  %v23726_v59 = vld [vmem:[#allocation5 + $0x2fec] ss:$36 sps:$4 sm:$0xff]  }
 0x727   :  { %15398 = vmatprep.subr.bf16.mxu0 %v23681_v1  ;;  %16013 = vmatprep.subr.bf16.mxu1 %v23684_v21  ;;  %v23721_v1 = vld [vmem:[#allocation5 + $0x2fe0] ss:$36 sps:$4 sm:$0xff]   ;;  %v23724_v21 = vld [vmem:[#allocation5 + $0x2fe8] ss:$36 sps:$4 sm:$0xff]  }
 0x72a   :  { %15399 = vmatpush1.bf16.msra.mxu0 %v23679_v3  ;;  %16014 = vmatpush1.bf16.msra.mxu1 %v23682_v7  ;;  %v23729_v3 = vld [vmem:[#allocation5 + $0x302c] ss:$36 sps:$4 sm:$0xff]   ;;  %v23732_v7 = vld [vmem:[#allocation5 + $0x3034] ss:$36 sps:$4 sm:$0xff]  }
 0x72b   :  { %15400 = vmatprep.subr.bf16.mxu0 %v23687_v8  ;;  %16015 = vmatprep.subr.bf16.mxu1 %v23690_v12  ;;  %v23727_v8 = vld [vmem:[#allocation5 + $0x3028] ss:$36 sps:$4 sm:$0xff]   ;;  %v23730_v12 = vld [vmem:[#allocation5 + $0x3030] ss:$36 sps:$4 sm:$0xff]  }
 0x72e   :  { %15401 = vmatpush1.bf16.msra.mxu0 %v23685_v13  ;;  %16016 = vmatpush1.bf16.msra.mxu1 %v23688_v14  ;;  %v23735_v13 = vld [vmem:[#allocation5 + $0x3074] ss:$36 sps:$4 sm:$0xff]   ;;  %v23738_v14 = vld [vmem:[#allocation5 + $0x307c] ss:$36 sps:$4 sm:$0xff]  }
 0x72f   :  { %15402 = vmatprep.subr.bf16.mxu0 %v23693_v23  ;;  %16017 = vmatprep.subr.bf16.mxu1 %v23696_v17  ;;  %v23733_v23 = vld [vmem:[#allocation5 + $0x3070] ss:$36 sps:$4 sm:$0xff]   ;;  %v23736_v17 = vld [vmem:[#allocation5 + $0x3078] ss:$36 sps:$4 sm:$0xff]  }
 0x732   :  { %15403 = vmatpush1.bf16.msra.mxu0 %v23691_v56  ;;  %16018 = vmatpush1.bf16.msra.mxu1 %v23694_v19  ;;  %v23741_v56 = vld [vmem:[#allocation5 + $0x30bc] ss:$36 sps:$4 sm:$0xff]   ;;  %v23744_v19 = vld [vmem:[#allocation5 + $0x30c4] ss:$36 sps:$4 sm:$0xff]  }
 0x733   :  { %15404 = vmatprep.subr.bf16.mxu0 %v23699_v33  ;;  %16019 = vmatprep.subr.bf16.mxu1 %v23702_v34  ;;  %v23739_v33 = vld [vmem:[#allocation5 + $0x30b8] ss:$36 sps:$4 sm:$0xff]   ;;  %v23742_v34 = vld [vmem:[#allocation5 + $0x30c0] ss:$36 sps:$4 sm:$0xff]  }
 0x736   :  { %15405 = vmatpush1.bf16.msra.mxu0 %v23697_v60  ;;  %16020 = vmatpush1.bf16.msra.mxu1 %v23700_v38  ;;  %v23747_v60 = vld [vmem:[#allocation5 + $0x3104] ss:$36 sps:$4 sm:$0xff]   ;;  %v23750_v38 = vld [vmem:[#allocation5 + $0x310c] ss:$36 sps:$4 sm:$0xff]  }
 0x737   :  { %15406 = vmatprep.subr.bf16.mxu0 %v23705_v9  ;;  %16021 = vmatprep.subr.bf16.mxu1 %v23708_v44  ;;  %v23745_v9 = vld [vmem:[#allocation5 + $0x3100] ss:$36 sps:$4 sm:$0xff]   ;;  %v23748_v44 = vld [vmem:[#allocation5 + $0x3108] ss:$36 sps:$4 sm:$0xff]  }
 0x73a   :  { %15407 = vmatpush1.bf16.msra.mxu0 %v23703_v45  ;;  %16022 = vmatpush1.bf16.msra.mxu1 %v23706_v46  ;;  %v23753_v45 = vld [vmem:[#allocation5 + $0x314c] ss:$36 sps:$4 sm:$0xff]   ;;  %v23756_v46 = vld [vmem:[#allocation5 + $0x3154] ss:$36 sps:$4 sm:$0xff]  }
 0x73b   :  { %15408 = vmatprep.subr.bf16.mxu0 %v23711_v41  ;;  %16023 = vmatprep.subr.bf16.mxu1 %v23714_v49  ;;  %v23751_v41 = vld [vmem:[#allocation5 + $0x3148] ss:$36 sps:$4 sm:$0xff]   ;;  %v23754_v49 = vld [vmem:[#allocation5 + $0x3150] ss:$36 sps:$4 sm:$0xff]  }
 0x73e   :  { %15409 = vmatpush1.bf16.msra.mxu0 %v23709_v50  ;;  %16024 = vmatpush1.bf16.msra.mxu1 %v23712_v51  ;;  %v23759_v50 = vld [vmem:[#allocation5 + $0x3194] ss:$36 sps:$4 sm:$0xff]   ;;  %v23762_v51 = vld [vmem:[#allocation5 + $0x319c] ss:$36 sps:$4 sm:$0xff]  }
 0x73f   :  { %15410 = vmatprep.subr.bf16.mxu0 %v23717_v52  ;;  %16025 = vmatprep.subr.bf16.mxu1 %v23720_v53  ;;  %v23757_v52 = vld [vmem:[#allocation5 + $0x3190] ss:$36 sps:$4 sm:$0xff]   ;;  %v23760_v53 = vld [vmem:[#allocation5 + $0x3198] ss:$36 sps:$4 sm:$0xff]  }
 0x742   :  { %15411 = vmatpush1.bf16.msra.mxu0 %v23715_v54  ;;  %16026 = vmatpush1.bf16.msra.mxu1 %v23718_v55  ;;  %v23765_v54 = vld [vmem:[#allocation5 + $0x31dc] ss:$36 sps:$4 sm:$0xff]   ;;  %v23768_v55 = vld [vmem:[#allocation5 + $0x31e4] ss:$36 sps:$4 sm:$0xff]  }
 0x743   :  { %15412 = vmatprep.subr.bf16.mxu0 %v23723_v58  ;;  %16027 = vmatprep.subr.bf16.mxu1 %v23726_v59  ;;  %v23763_v58 = vld [vmem:[#allocation5 + $0x31d8] ss:$36 sps:$4 sm:$0xff]   ;;  %v23766_v59 = vld [vmem:[#allocation5 + $0x31e0] ss:$36 sps:$4 sm:$0xff]  }
 0x746   :  { %15413 = vmatpush1.bf16.msra.mxu0 %v23721_v1  ;;  %16028 = vmatpush1.bf16.msra.mxu1 %v23724_v21  ;;  %v23771_v1 = vld [vmem:[#allocation5 + $0x3224] ss:$36 sps:$4 sm:$0xff]   ;;  %v23774_v21 = vld [vmem:[#allocation5 + $0x322c] ss:$36 sps:$4 sm:$0xff]  }
 0x747   :  { %15414 = vmatprep.subr.bf16.mxu0 %v23729_v3  ;;  %16029 = vmatprep.subr.bf16.mxu1 %v23732_v7  ;;  %v23769_v3 = vld [vmem:[#allocation5 + $0x3220] ss:$36 sps:$4 sm:$0xff]   ;;  %v23772_v7 = vld [vmem:[#allocation5 + $0x3228] ss:$36 sps:$4 sm:$0xff]  }
 0x74a   :  { %15415 = vmatpush1.bf16.msra.mxu0 %v23727_v8  ;;  %16030 = vmatpush1.bf16.msra.mxu1 %v23730_v12  ;;  %v23777_v8 = vld [vmem:[#allocation5 + $0x326c] ss:$36 sps:$4 sm:$0xff]   ;;  %v23780_v12 = vld [vmem:[#allocation5 + $0x3274] ss:$36 sps:$4 sm:$0xff]  }
 0x74b   :  { %15416 = vmatprep.subr.bf16.mxu0 %v23735_v13  ;;  %16031 = vmatprep.subr.bf16.mxu1 %v23738_v14  ;;  %v23775_v13 = vld [vmem:[#allocation5 + $0x3268] ss:$36 sps:$4 sm:$0xff]   ;;  %v23778_v14 = vld [vmem:[#allocation5 + $0x3270] ss:$36 sps:$4 sm:$0xff]  }
 0x74e   :  { %15417 = vmatpush1.bf16.msra.mxu0 %v23733_v23  ;;  %16032 = vmatpush1.bf16.msra.mxu1 %v23736_v17  ;;  %v23783_v23 = vld [vmem:[#allocation5 + $0x32b4] ss:$36 sps:$4 sm:$0xff]   ;;  %v23786_v17 = vld [vmem:[#allocation5 + $0x32bc] ss:$36 sps:$4 sm:$0xff]  }
 0x74f   :  { %15418 = vmatprep.subr.bf16.mxu0 %v23741_v56  ;;  %16033 = vmatprep.subr.bf16.mxu1 %v23744_v19  ;;  %v23781_v56 = vld [vmem:[#allocation5 + $0x32b0] ss:$36 sps:$4 sm:$0xff]   ;;  %v23784_v19 = vld [vmem:[#allocation5 + $0x32b8] ss:$36 sps:$4 sm:$0xff]  }
 0x752   :  { %15419 = vmatpush1.bf16.msra.mxu0 %v23739_v33  ;;  %16034 = vmatpush1.bf16.msra.mxu1 %v23742_v34  ;;  %v23789_v33 = vld [vmem:[#allocation5 + $0x32fc] ss:$36 sps:$4 sm:$0xff]   ;;  %v23792_v34 = vld [vmem:[#allocation5 + $0x3304] ss:$36 sps:$4 sm:$0xff]  }
 0x753   :  { %15420 = vmatprep.subr.bf16.mxu0 %v23747_v60  ;;  %16035 = vmatprep.subr.bf16.mxu1 %v23750_v38  ;;  %v23787_v60 = vld [vmem:[#allocation5 + $0x32f8] ss:$36 sps:$4 sm:$0xff]   ;;  %v23790_v38 = vld [vmem:[#allocation5 + $0x3300] ss:$36 sps:$4 sm:$0xff]  }
 0x756   :  { %15421 = vmatpush1.bf16.msra.mxu0 %v23745_v9  ;;  %16036 = vmatpush1.bf16.msra.mxu1 %v23748_v44  ;;  %v23795_v9 = vld [vmem:[#allocation5 + $0x3344] ss:$36 sps:$4 sm:$0xff]   ;;  %v23798_v44 = vld [vmem:[#allocation5 + $0x334c] ss:$36 sps:$4 sm:$0xff]  }
 0x757   :  { %15422 = vmatprep.subr.bf16.mxu0 %v23753_v45  ;;  %16037 = vmatprep.subr.bf16.mxu1 %v23756_v46  ;;  %v23793_v45 = vld [vmem:[#allocation5 + $0x3340] ss:$36 sps:$4 sm:$0xff]   ;;  %v23796_v46 = vld [vmem:[#allocation5 + $0x3348] ss:$36 sps:$4 sm:$0xff]  }
 0x75a   :  { %15423 = vmatpush1.bf16.msra.mxu0 %v23751_v41  ;;  %16038 = vmatpush1.bf16.msra.mxu1 %v23754_v49  ;;  %v23801_v41 = vld [vmem:[#allocation5 + $0x338c] ss:$36 sps:$4 sm:$0xff]   ;;  %v23804_v49 = vld [vmem:[#allocation5 + $0x3394] ss:$36 sps:$4 sm:$0xff]  }
 0x75b   :  { %15433 = vmatprep.subr.bf16.mxu0 %v23759_v50  ;;  %16048 = vmatprep.subr.bf16.mxu1 %v23762_v51  ;;  %v23799_v50 = vld [vmem:[#allocation5 + $0x3388] ss:$36 sps:$4 sm:$0xff]   ;;  %v23802_v51 = vld [vmem:[#allocation5 + $0x3390] ss:$36 sps:$4 sm:$0xff]  }
 0x75d   :  { %15425 = vmatmul.mubr.bf16.vlgmr.msra.gmra.mrb[4].mxu0 %v25196_v63  ;;  %16040 = vmatmul.mubr.bf16.vlgmr.msra.gmra.mrb[4].mxu1 %v25196_v63 }
 0x75e   :  { %15434 = vmatpush1.bf16.msra.mxu0 %v23757_v52  ;;  %16049 = vmatpush1.bf16.msra.mxu1 %v23760_v53  ;;  %v23807_v52 = vld [vmem:[#allocation5 + $0x33d4] ss:$36 sps:$4 sm:$0xff]   ;;  %v23810_v53 = vld [vmem:[#allocation5 + $0x33dc] ss:$36 sps:$4 sm:$0xff]  }
 0x75f   :  { %15435 = vmatprep.subr.bf16.mxu0 %v23765_v54  ;;  %16050 = vmatprep.subr.bf16.mxu1 %v23768_v55  ;;  %v23805_v54 = vld [vmem:[#allocation5 + $0x33d0] ss:$36 sps:$4 sm:$0xff]   ;;  %v23808_v55 = vld [vmem:[#allocation5 + $0x33d8] ss:$36 sps:$4 sm:$0xff]  }
 0x760   :  { %15465 = vmatprep.mubr.bf16.mxu0 %v25200_v4  ;;  %16080 = vmatprep.mubr.bf16.mxu1 %v25200_v4 }
 0x762   :  { %15436 = vmatpush1.bf16.msra.mxu0 %v23763_v58  ;;  %16051 = vmatpush1.bf16.msra.mxu1 %v23766_v59  ;;  %v23813_v58 = vld [vmem:[#allocation5 + $0x341c] ss:$36 sps:$4 sm:$0xff]   ;;  %v23816_v59 = vld [vmem:[#allocation5 + $0x3424] ss:$36 sps:$4 sm:$0xff]  }
 0x763   :  { %15437 = vmatprep.subr.bf16.mxu0 %v23771_v1  ;;  %16052 = vmatprep.subr.bf16.mxu1 %v23774_v21  ;;  %v23811_v1 = vld [vmem:[#allocation5 + $0x3418] ss:$36 sps:$4 sm:$0xff]   ;;  %v23814_v21 = vld [vmem:[#allocation5 + $0x3420] ss:$36 sps:$4 sm:$0xff]  }
 0x766   :  { %15438 = vmatpush1.bf16.msra.mxu0 %v23769_v3  ;;  %16053 = vmatpush1.bf16.msra.mxu1 %v23772_v7  ;;  %v23819_v3 = vld [vmem:[#allocation5 + $0x3464] ss:$36 sps:$4 sm:$0xff]   ;;  %v23822_v7 = vld [vmem:[#allocation5 + $0x346c] ss:$36 sps:$4 sm:$0xff]  }
 0x767   :  { %15439 = vmatprep.subr.bf16.mxu0 %v23777_v8  ;;  %16054 = vmatprep.subr.bf16.mxu1 %v23780_v12  ;;  %v23817_v8 = vld [vmem:[#allocation5 + $0x3460] ss:$36 sps:$4 sm:$0xff]   ;;  %v23820_v12 = vld [vmem:[#allocation5 + $0x3468] ss:$36 sps:$4 sm:$0xff]  }
 0x76a   :  { %15440 = vmatpush1.bf16.msra.mxu0 %v23775_v13  ;;  %16055 = vmatpush1.bf16.msra.mxu1 %v23778_v14  ;;  %v23825_v13 = vld [vmem:[#allocation5 + $0x34ac] ss:$36 sps:$4 sm:$0xff]   ;;  %v23828_v14 = vld [vmem:[#allocation5 + $0x34b4] ss:$36 sps:$4 sm:$0xff]  }
 0x76b   :  { %15441 = vmatprep.subr.bf16.mxu0 %v23783_v23  ;;  %16056 = vmatprep.subr.bf16.mxu1 %v23786_v17  ;;  %v23823_v23 = vld [vmem:[#allocation5 + $0x34a8] ss:$36 sps:$4 sm:$0xff]   ;;  %v23826_v17 = vld [vmem:[#allocation5 + $0x34b0] ss:$36 sps:$4 sm:$0xff]  }
 0x76e   :  { %15442 = vmatpush1.bf16.msra.mxu0 %v23781_v56  ;;  %16057 = vmatpush1.bf16.msra.mxu1 %v23784_v19  ;;  %v23831_v56 = vld [vmem:[#allocation5 + $0x34f4] ss:$36 sps:$4 sm:$0xff]   ;;  %v23834_v19 = vld [vmem:[#allocation5 + $0x34fc] ss:$36 sps:$4 sm:$0xff]  }
 0x76f   :  { %15443 = vmatprep.subr.bf16.mxu0 %v23789_v33  ;;  %16058 = vmatprep.subr.bf16.mxu1 %v23792_v34  ;;  %v23829_v33 = vld [vmem:[#allocation5 + $0x34f0] ss:$36 sps:$4 sm:$0xff]   ;;  %v23832_v34 = vld [vmem:[#allocation5 + $0x34f8] ss:$36 sps:$4 sm:$0xff]  }
 0x772   :  { %15444 = vmatpush1.bf16.msra.mxu0 %v23787_v60  ;;  %16059 = vmatpush1.bf16.msra.mxu1 %v23790_v38  ;;  %v23837_v60 = vld [vmem:[#allocation5 + $0x353c] ss:$36 sps:$4 sm:$0xff]   ;;  %v23840_v38 = vld [vmem:[#allocation5 + $0x3544] ss:$36 sps:$4 sm:$0xff]  }
 0x773   :  { %15445 = vmatprep.subr.bf16.mxu0 %v23795_v9  ;;  %16060 = vmatprep.subr.bf16.mxu1 %v23798_v44  ;;  %v23835_v9 = vld [vmem:[#allocation5 + $0x3538] ss:$36 sps:$4 sm:$0xff]   ;;  %v23838_v44 = vld [vmem:[#allocation5 + $0x3540] ss:$36 sps:$4 sm:$0xff]  }
 0x776   :  { %15446 = vmatpush1.bf16.msra.mxu0 %v23793_v45  ;;  %16061 = vmatpush1.bf16.msra.mxu1 %v23796_v46  ;;  %v23843_v45 = vld [vmem:[#allocation5 + $0x3584] ss:$36 sps:$4 sm:$0xff]   ;;  %v23846_v46 = vld [vmem:[#allocation5 + $0x358c] ss:$36 sps:$4 sm:$0xff]  }
 0x777   :  { %15447 = vmatprep.subr.bf16.mxu0 %v23801_v41  ;;  %16062 = vmatprep.subr.bf16.mxu1 %v23804_v49  ;;  %v23841_v41 = vld [vmem:[#allocation5 + $0x3580] ss:$36 sps:$4 sm:$0xff]   ;;  %v23844_v49 = vld [vmem:[#allocation5 + $0x3588] ss:$36 sps:$4 sm:$0xff]  }
 0x77a   :  { %15448 = vmatpush1.bf16.msra.mxu0 %v23799_v50  ;;  %16063 = vmatpush1.bf16.msra.mxu1 %v23802_v51  ;;  %v23849_v50 = vld [vmem:[#allocation5 + $0x35cc] ss:$36 sps:$4 sm:$0xff]   ;;  %v23852_v51 = vld [vmem:[#allocation5 + $0x35d4] ss:$36 sps:$4 sm:$0xff]  }
 0x77b   :  { %15449 = vmatprep.subr.bf16.mxu0 %v23807_v52  ;;  %16064 = vmatprep.subr.bf16.mxu1 %v23810_v53  ;;  %v23847_v52 = vld [vmem:[#allocation5 + $0x35c8] ss:$36 sps:$4 sm:$0xff]   ;;  %v23850_v53 = vld [vmem:[#allocation5 + $0x35d0] ss:$36 sps:$4 sm:$0xff]  }
 0x77e   :  { %15450 = vmatpush1.bf16.msra.mxu0 %v23805_v54  ;;  %16065 = vmatpush1.bf16.msra.mxu1 %v23808_v55  ;;  %v23855_v54 = vld [vmem:[#allocation5 + $0x3614] ss:$36 sps:$4 sm:$0xff]   ;;  %v23858_v55 = vld [vmem:[#allocation5 + $0x361c] ss:$36 sps:$4 sm:$0xff]  }
 0x77f   :  { %15451 = vmatprep.subr.bf16.mxu0 %v23813_v58  ;;  %16066 = vmatprep.subr.bf16.mxu1 %v23816_v59  ;;  %v23853_v58 = vld [vmem:[#allocation5 + $0x3610] ss:$36 sps:$4 sm:$0xff]   ;;  %v23856_v59 = vld [vmem:[#allocation5 + $0x3618] ss:$36 sps:$4 sm:$0xff]  }
 0x782   :  { %15452 = vmatpush1.bf16.msra.mxu0 %v23811_v1  ;;  %16067 = vmatpush1.bf16.msra.mxu1 %v23814_v21  ;;  %v23861_v1 = vld [vmem:[#allocation5 + $0x365c] ss:$36 sps:$4 sm:$0xff]   ;;  %v23864_v21 = vld [vmem:[#allocation5 + $0x3664] ss:$36 sps:$4 sm:$0xff]  }
 0x783   :  { %15453 = vmatprep.subr.bf16.mxu0 %v23819_v3  ;;  %16068 = vmatprep.subr.bf16.mxu1 %v23822_v7  ;;  %v23859_v3 = vld [vmem:[#allocation5 + $0x3658] ss:$36 sps:$4 sm:$0xff]   ;;  %v23862_v7 = vld [vmem:[#allocation5 + $0x3660] ss:$36 sps:$4 sm:$0xff]  }
 0x786   :  { %15454 = vmatpush1.bf16.msra.mxu0 %v23817_v8  ;;  %16069 = vmatpush1.bf16.msra.mxu1 %v23820_v12  ;;  %v23867_v8 = vld [vmem:[#allocation5 + $0x36a4] ss:$36 sps:$4 sm:$0xff]   ;;  %v23870_v12 = vld [vmem:[#allocation5 + $0x36ac] ss:$36 sps:$4 sm:$0xff]  }
 0x787   :  { %15455 = vmatprep.subr.bf16.mxu0 %v23825_v13  ;;  %16070 = vmatprep.subr.bf16.mxu1 %v23828_v14  ;;  %v23865_v13 = vld [vmem:[#allocation5 + $0x36a0] ss:$36 sps:$4 sm:$0xff]   ;;  %v23868_v14 = vld [vmem:[#allocation5 + $0x36a8] ss:$36 sps:$4 sm:$0xff]  }
 0x78a   :  { %15456 = vmatpush1.bf16.msra.mxu0 %v23823_v23  ;;  %16071 = vmatpush1.bf16.msra.mxu1 %v23826_v17  ;;  %v23873_v23 = vld [vmem:[#allocation5 + $0x36ec] ss:$36 sps:$4 sm:$0xff]   ;;  %v23876_v17 = vld [vmem:[#allocation5 + $0x36f4] ss:$36 sps:$4 sm:$0xff]  }
 0x78b   :  { %15457 = vmatprep.subr.bf16.mxu0 %v23831_v56  ;;  %16072 = vmatprep.subr.bf16.mxu1 %v23834_v19  ;;  %v23871_v56 = vld [vmem:[#allocation5 + $0x36e8] ss:$36 sps:$4 sm:$0xff]   ;;  %v23874_v19 = vld [vmem:[#allocation5 + $0x36f0] ss:$36 sps:$4 sm:$0xff]  }
 0x78e   :  { %15458 = vmatpush1.bf16.msra.mxu0 %v23829_v33  ;;  %16073 = vmatpush1.bf16.msra.mxu1 %v23832_v34  ;;  %v23879_v33 = vld [vmem:[#allocation5 + $0x3734] ss:$36 sps:$4 sm:$0xff]   ;;  %v23882_v34 = vld [vmem:[#allocation5 + $0x373c] ss:$36 sps:$4 sm:$0xff]  }
 0x78f   :  { %15459 = vmatprep.subr.bf16.mxu0 %v23837_v60  ;;  %16074 = vmatprep.subr.bf16.mxu1 %v23840_v38  ;;  %v23877_v60 = vld [vmem:[#allocation5 + $0x3730] ss:$36 sps:$4 sm:$0xff]   ;;  %v23880_v38 = vld [vmem:[#allocation5 + $0x3738] ss:$36 sps:$4 sm:$0xff]  }
 0x792   :  { %15460 = vmatpush1.bf16.msra.mxu0 %v23835_v9  ;;  %16075 = vmatpush1.bf16.msra.mxu1 %v23838_v44  ;;  %v23885_v9 = vld [vmem:[#allocation5 + $0x377c] ss:$36 sps:$4 sm:$0xff]   ;;  %v23888_v44 = vld [vmem:[#allocation5 + $0x3784] ss:$36 sps:$4 sm:$0xff]  }
 0x793   :  { %15461 = vmatprep.subr.bf16.mxu0 %v23843_v45  ;;  %16076 = vmatprep.subr.bf16.mxu1 %v23846_v46  ;;  %v23883_v45 = vld [vmem:[#allocation5 + $0x3778] ss:$36 sps:$4 sm:$0xff]   ;;  %v23886_v46 = vld [vmem:[#allocation5 + $0x3780] ss:$36 sps:$4 sm:$0xff]  }
 0x796   :  { %15462 = vmatpush1.bf16.msra.mxu0 %v23841_v41  ;;  %16077 = vmatpush1.bf16.msra.mxu1 %v23844_v49  ;;  %v23891_v41 = vld [vmem:[#allocation5 + $0x37c4] ss:$36 sps:$4 sm:$0xff]   ;;  %v23894_v49 = vld [vmem:[#allocation5 + $0x37cc] ss:$36 sps:$4 sm:$0xff]  }
 0x797   :  { %15463 = vmatprep.subr.bf16.mxu0 %v23849_v50  ;;  %16078 = vmatprep.subr.bf16.mxu1 %v23852_v51  ;;  %v23889_v50 = vld [vmem:[#allocation5 + $0x37c0] ss:$36 sps:$4 sm:$0xff]   ;;  %v23892_v51 = vld [vmem:[#allocation5 + $0x37c8] ss:$36 sps:$4 sm:$0xff]  }
 0x79a   :  { %15464 = vmatpush1.bf16.msra.mxu0 %v23847_v52  ;;  %16079 = vmatpush1.bf16.msra.mxu1 %v23850_v53  ;;  %v23897_v52 = vld [vmem:[#allocation5 + $0x380c] ss:$36 sps:$4 sm:$0xff]   ;;  %v23900_v53 = vld [vmem:[#allocation5 + $0x3814] ss:$36 sps:$4 sm:$0xff]  }
 0x79b   :  { %15474 = vmatprep.subr.bf16.mxu0 %v23855_v54  ;;  %16089 = vmatprep.subr.bf16.mxu1 %v23858_v55  ;;  %v23895_v54 = vld [vmem:[#allocation5 + $0x3808] ss:$36 sps:$4 sm:$0xff]   ;;  %v23898_v55 = vld [vmem:[#allocation5 + $0x3810] ss:$36 sps:$4 sm:$0xff]  }
 0x79d   :  { %15466 = vmatmul.mubr.bf16.vlgmr.msra.gmra.mrb[4].mxu0 %v25210_v40  ;;  %16081 = vmatmul.mubr.bf16.vlgmr.msra.gmra.mrb[4].mxu1 %v25210_v40 }
 0x79e   :  { %15475 = vmatpush1.bf16.msra.mxu0 %v23853_v58  ;;  %16090 = vmatpush1.bf16.msra.mxu1 %v23856_v59  ;;  %v23903_v58 = vld [vmem:[#allocation5 + $0x3854] ss:$36 sps:$4 sm:$0xff]   ;;  %v23906_v59 = vld [vmem:[#allocation5 + $0x385c] ss:$36 sps:$4 sm:$0xff]  }
 0x79f   :  { %15476 = vmatprep.subr.bf16.mxu0 %v23861_v1  ;;  %16091 = vmatprep.subr.bf16.mxu1 %v23864_v21  ;;  %v23901_v1 = vld [vmem:[#allocation5 + $0x3850] ss:$36 sps:$4 sm:$0xff]   ;;  %v23904_v21 = vld [vmem:[#allocation5 + $0x3858] ss:$36 sps:$4 sm:$0xff]  }
 0x7a0   :  { %15506 = vmatprep.mubr.bf16.mxu0 %v25214_v31  ;;  %16121 = vmatprep.mubr.bf16.mxu1 %v25214_v31 }
 0x7a2   :  { %15477 = vmatpush1.bf16.msra.mxu0 %v23859_v3  ;;  %16092 = vmatpush1.bf16.msra.mxu1 %v23862_v7  ;;  %v23909_v3 = vld [vmem:[#allocation5 + $0x389c] ss:$36 sps:$4 sm:$0xff]   ;;  %v23912_v7 = vld [vmem:[#allocation5 + $0x38a4] ss:$36 sps:$4 sm:$0xff]  }
 0x7a3   :  { %15478 = vmatprep.subr.bf16.mxu0 %v23867_v8  ;;  %16093 = vmatprep.subr.bf16.mxu1 %v23870_v12  ;;  %v23907_v8 = vld [vmem:[#allocation5 + $0x3898] ss:$36 sps:$4 sm:$0xff]   ;;  %v23910_v12 = vld [vmem:[#allocation5 + $0x38a0] ss:$36 sps:$4 sm:$0xff]  }
 0x7a6   :  { %15479 = vmatpush1.bf16.msra.mxu0 %v23865_v13  ;;  %16094 = vmatpush1.bf16.msra.mxu1 %v23868_v14  ;;  %v23915_v13 = vld [vmem:[#allocation5 + $0x38e4] ss:$36 sps:$4 sm:$0xff]   ;;  %v23918_v14 = vld [vmem:[#allocation5 + $0x38ec] ss:$36 sps:$4 sm:$0xff]  }
 0x7a7   :  { %15480 = vmatprep.subr.bf16.mxu0 %v23873_v23  ;;  %16095 = vmatprep.subr.bf16.mxu1 %v23876_v17  ;;  %v23913_v23 = vld [vmem:[#allocation5 + $0x38e0] ss:$36 sps:$4 sm:$0xff]   ;;  %v23916_v17 = vld [vmem:[#allocation5 + $0x38e8] ss:$36 sps:$4 sm:$0xff]  }
 0x7aa   :  { %15481 = vmatpush1.bf16.msra.mxu0 %v23871_v56  ;;  %16096 = vmatpush1.bf16.msra.mxu1 %v23874_v19  ;;  %v23921_v56 = vld [vmem:[#allocation5 + $0x392c] ss:$36 sps:$4 sm:$0xff]   ;;  %v23924_v19 = vld [vmem:[#allocation5 + $0x3934] ss:$36 sps:$4 sm:$0xff]  }
 0x7ab   :  { %15482 = vmatprep.subr.bf16.mxu0 %v23879_v33  ;;  %16097 = vmatprep.subr.bf16.mxu1 %v23882_v34  ;;  %v23919_v33 = vld [vmem:[#allocation5 + $0x3928] ss:$36 sps:$4 sm:$0xff]   ;;  %v23922_v34 = vld [vmem:[#allocation5 + $0x3930] ss:$36 sps:$4 sm:$0xff]  }
 0x7ae   :  { %15483 = vmatpush1.bf16.msra.mxu0 %v23877_v60  ;;  %16098 = vmatpush1.bf16.msra.mxu1 %v23880_v38  ;;  %v23927_v60 = vld [vmem:[#allocation5 + $0x3974] ss:$36 sps:$4 sm:$0xff]   ;;  %v23930_v38 = vld [vmem:[#allocation5 + $0x397c] ss:$36 sps:$4 sm:$0xff]  }
 0x7af   :  { %15484 = vmatprep.subr.bf16.mxu0 %v23885_v9  ;;  %16099 = vmatprep.subr.bf16.mxu1 %v23888_v44  ;;  %v23925_v9 = vld [vmem:[#allocation5 + $0x3970] ss:$36 sps:$4 sm:$0xff]   ;;  %v23928_v44 = vld [vmem:[#allocation5 + $0x3978] ss:$36 sps:$4 sm:$0xff]  }
 0x7b2   :  { %15485 = vmatpush1.bf16.msra.mxu0 %v23883_v45  ;;  %16100 = vmatpush1.bf16.msra.mxu1 %v23886_v46  ;;  %v23933_v45 = vld [vmem:[#allocation5 + $0x39bc] ss:$36 sps:$4 sm:$0xff]   ;;  %v23936_v46 = vld [vmem:[#allocation5 + $0x39c4] ss:$36 sps:$4 sm:$0xff]  }
 0x7b3   :  { %15486 = vmatprep.subr.bf16.mxu0 %v23891_v41  ;;  %16101 = vmatprep.subr.bf16.mxu1 %v23894_v49  ;;  %v23931_v41 = vld [vmem:[#allocation5 + $0x39b8] ss:$36 sps:$4 sm:$0xff]   ;;  %v23934_v49 = vld [vmem:[#allocation5 + $0x39c0] ss:$36 sps:$4 sm:$0xff]  }
 0x7b6   :  { %15487 = vmatpush1.bf16.msra.mxu0 %v23889_v50  ;;  %16102 = vmatpush1.bf16.msra.mxu1 %v23892_v51  ;;  %v23939_v50 = vld [vmem:[#allocation5 + $0x3a04] ss:$36 sps:$4 sm:$0xff]   ;;  %v23942_v51 = vld [vmem:[#allocation5 + $0x3a0c] ss:$36 sps:$4 sm:$0xff]  }
 0x7b7   :  { %15488 = vmatprep.subr.bf16.mxu0 %v23897_v52  ;;  %16103 = vmatprep.subr.bf16.mxu1 %v23900_v53  ;;  %v23937_v52 = vld [vmem:[#allocation5 + $0x3a00] ss:$36 sps:$4 sm:$0xff]   ;;  %v23940_v53 = vld [vmem:[#allocation5 + $0x3a08] ss:$36 sps:$4 sm:$0xff]  }
 0x7ba   :  { %15489 = vmatpush1.bf16.msra.mxu0 %v23895_v54  ;;  %16104 = vmatpush1.bf16.msra.mxu1 %v23898_v55  ;;  %v23945_v54 = vld [vmem:[#allocation5 + $0x3a4c] ss:$36 sps:$4 sm:$0xff]   ;;  %v23948_v55 = vld [vmem:[#allocation5 + $0x3a54] ss:$36 sps:$4 sm:$0xff]  }
 0x7bb   :  { %15490 = vmatprep.subr.bf16.mxu0 %v23903_v58  ;;  %16105 = vmatprep.subr.bf16.mxu1 %v23906_v59  ;;  %v23943_v58 = vld [vmem:[#allocation5 + $0x3a48] ss:$36 sps:$4 sm:$0xff]   ;;  %v23946_v59 = vld [vmem:[#allocation5 + $0x3a50] ss:$36 sps:$4 sm:$0xff]  }
 0x7be   :  { %15491 = vmatpush1.bf16.msra.mxu0 %v23901_v1  ;;  %16106 = vmatpush1.bf16.msra.mxu1 %v23904_v21  ;;  %v23951_v1 = vld [vmem:[#allocation5 + $0x3a94] ss:$36 sps:$4 sm:$0xff]   ;;  %v23954_v21 = vld [vmem:[#allocation5 + $0x3a9c] ss:$36 sps:$4 sm:$0xff]  }
 0x7bf   :  { %15492 = vmatprep.subr.bf16.mxu0 %v23909_v3  ;;  %16107 = vmatprep.subr.bf16.mxu1 %v23912_v7  ;;  %v23949_v3 = vld [vmem:[#allocation5 + $0x3a90] ss:$36 sps:$4 sm:$0xff]   ;;  %v23952_v7 = vld [vmem:[#allocation5 + $0x3a98] ss:$36 sps:$4 sm:$0xff]  }
 0x7c2   :  { %15493 = vmatpush1.bf16.msra.mxu0 %v23907_v8  ;;  %16108 = vmatpush1.bf16.msra.mxu1 %v23910_v12  ;;  %v23957_v8 = vld [vmem:[#allocation5 + $0x3adc] ss:$36 sps:$4 sm:$0xff]   ;;  %v23960_v12 = vld [vmem:[#allocation5 + $0x3ae4] ss:$36 sps:$4 sm:$0xff]  }
 0x7c3   :  { %15494 = vmatprep.subr.bf16.mxu0 %v23915_v13  ;;  %16109 = vmatprep.subr.bf16.mxu1 %v23918_v14  ;;  %v23955_v13 = vld [vmem:[#allocation5 + $0x3ad8] ss:$36 sps:$4 sm:$0xff]   ;;  %v23958_v14 = vld [vmem:[#allocation5 + $0x3ae0] ss:$36 sps:$4 sm:$0xff]  }
 0x7c6   :  { %15495 = vmatpush1.bf16.msra.mxu0 %v23913_v23  ;;  %16110 = vmatpush1.bf16.msra.mxu1 %v23916_v17  ;;  %v23963_v23 = vld [vmem:[#allocation5 + $0x3b24] ss:$36 sps:$4 sm:$0xff]   ;;  %v23966_v17 = vld [vmem:[#allocation5 + $0x3b2c] ss:$36 sps:$4 sm:$0xff]  }
 0x7c7   :  { %15496 = vmatprep.subr.bf16.mxu0 %v23921_v56  ;;  %16111 = vmatprep.subr.bf16.mxu1 %v23924_v19  ;;  %v23961_v56 = vld [vmem:[#allocation5 + $0x3b20] ss:$36 sps:$4 sm:$0xff]   ;;  %v23964_v19 = vld [vmem:[#allocation5 + $0x3b28] ss:$36 sps:$4 sm:$0xff]  }
 0x7ca   :  { %15497 = vmatpush1.bf16.msra.mxu0 %v23919_v33  ;;  %16112 = vmatpush1.bf16.msra.mxu1 %v23922_v34  ;;  %v23969_v33 = vld [vmem:[#allocation5 + $0x3b6c] ss:$36 sps:$4 sm:$0xff]   ;;  %v23972_v34 = vld [vmem:[#allocation5 + $0x3b74] ss:$36 sps:$4 sm:$0xff]  }
 0x7cb   :  { %15498 = vmatprep.subr.bf16.mxu0 %v23927_v60  ;;  %16113 = vmatprep.subr.bf16.mxu1 %v23930_v38  ;;  %v23967_v60 = vld [vmem:[#allocation5 + $0x3b68] ss:$36 sps:$4 sm:$0xff]   ;;  %v23970_v38 = vld [vmem:[#allocation5 + $0x3b70] ss:$36 sps:$4 sm:$0xff]  }
 0x7ce   :  { %15499 = vmatpush1.bf16.msra.mxu0 %v23925_v9  ;;  %16114 = vmatpush1.bf16.msra.mxu1 %v23928_v44  ;;  %v23975_v9 = vld [vmem:[#allocation5 + $0x3bb4] ss:$36 sps:$4 sm:$0xff]   ;;  %v23978_v44 = vld [vmem:[#allocation5 + $0x3bbc] ss:$36 sps:$4 sm:$0xff]  }
 0x7cf   :  { %15500 = vmatprep.subr.bf16.mxu0 %v23933_v45  ;;  %16115 = vmatprep.subr.bf16.mxu1 %v23936_v46  ;;  %v23973_v45 = vld [vmem:[#allocation5 + $0x3bb0] ss:$36 sps:$4 sm:$0xff]   ;;  %v23976_v46 = vld [vmem:[#allocation5 + $0x3bb8] ss:$36 sps:$4 sm:$0xff]  }
 0x7d2   :  { %15501 = vmatpush1.bf16.msra.mxu0 %v23931_v41  ;;  %16116 = vmatpush1.bf16.msra.mxu1 %v23934_v49  ;;  %v23981_v41 = vld [vmem:[#allocation5 + $0x3bfc] ss:$36 sps:$4 sm:$0xff]   ;;  %v23984_v49 = vld [vmem:[#allocation5 + $0x3c04] ss:$36 sps:$4 sm:$0xff]  }
 0x7d3   :  { %15502 = vmatprep.subr.bf16.mxu0 %v23939_v50  ;;  %16117 = vmatprep.subr.bf16.mxu1 %v23942_v51  ;;  %v23979_v50 = vld [vmem:[#allocation5 + $0x3bf8] ss:$36 sps:$4 sm:$0xff]   ;;  %v23982_v51 = vld [vmem:[#allocation5 + $0x3c00] ss:$36 sps:$4 sm:$0xff]  }
 0x7d6   :  { %15503 = vmatpush1.bf16.msra.mxu0 %v23937_v52  ;;  %16118 = vmatpush1.bf16.msra.mxu1 %v23940_v53  ;;  %v23987_v52 = vld [vmem:[#allocation5 + $0x3c44] ss:$36 sps:$4 sm:$0xff]   ;;  %v23990_v53 = vld [vmem:[#allocation5 + $0x3c4c] ss:$36 sps:$4 sm:$0xff]  }
 0x7d7   :  { %15504 = vmatprep.subr.bf16.mxu0 %v23945_v54  ;;  %16119 = vmatprep.subr.bf16.mxu1 %v23948_v55  ;;  %v23985_v54 = vld [vmem:[#allocation5 + $0x3c40] ss:$36 sps:$4 sm:$0xff]   ;;  %v23988_v55 = vld [vmem:[#allocation5 + $0x3c48] ss:$36 sps:$4 sm:$0xff]  }
 0x7da   :  { %15505 = vmatpush1.bf16.msra.mxu0 %v23943_v58  ;;  %16120 = vmatpush1.bf16.msra.mxu1 %v23946_v59  ;;  %v23993_v58 = vld [vmem:[#allocation5 + $0x3c8c] ss:$36 sps:$4 sm:$0xff]   ;;  %v23996_v59 = vld [vmem:[#allocation5 + $0x3c94] ss:$36 sps:$4 sm:$0xff]  }
 0x7db   :  { %15515 = vmatprep.subr.bf16.mxu0 %v23951_v1  ;;  %16130 = vmatprep.subr.bf16.mxu1 %v23954_v21  ;;  %v23991_v1 = vld [vmem:[#allocation5 + $0x3c88] ss:$36 sps:$4 sm:$0xff]   ;;  %v23994_v21 = vld [vmem:[#allocation5 + $0x3c90] ss:$36 sps:$4 sm:$0xff]  }
 0x7dd   :  { %15507 = vmatmul.mubr.bf16.vlgmr.msra.gmra.mrb[4].mxu0 %v25222_v22  ;;  %16122 = vmatmul.mubr.bf16.vlgmr.msra.gmra.mrb[4].mxu1 %v25222_v22 }
 0x7de   :  { %15516 = vmatpush1.bf16.msra.mxu0 %v23949_v3  ;;  %16131 = vmatpush1.bf16.msra.mxu1 %v23952_v7  ;;  %v23999_v3 = vld [vmem:[#allocation5 + $0x3cd4] ss:$36 sps:$4 sm:$0xff]   ;;  %v24002_v7 = vld [vmem:[#allocation5 + $0x3cdc] ss:$36 sps:$4 sm:$0xff]  }
 0x7df   :  { %15517 = vmatprep.subr.bf16.mxu0 %v23957_v8  ;;  %16132 = vmatprep.subr.bf16.mxu1 %v23960_v12  ;;  %v23997_v8 = vld [vmem:[#allocation5 + $0x3cd0] ss:$36 sps:$4 sm:$0xff]   ;;  %v24000_v12 = vld [vmem:[#allocation5 + $0x3cd8] ss:$36 sps:$4 sm:$0xff]  }
 0x7e0   :  { %15547 = vmatprep.mubr.bf16.mxu0 %v25228_v28  ;;  %16162 = vmatprep.mubr.bf16.mxu1 %v25228_v28 }
 0x7e2   :  { %15518 = vmatpush1.bf16.msra.mxu0 %v23955_v13  ;;  %16133 = vmatpush1.bf16.msra.mxu1 %v23958_v14  ;;  %v24005_v13 = vld [vmem:[#allocation5 + $0x3d1c] ss:$36 sps:$4 sm:$0xff]   ;;  %v24008_v14 = vld [vmem:[#allocation5 + $0x3d24] ss:$36 sps:$4 sm:$0xff]  }
 0x7e3   :  { %15519 = vmatprep.subr.bf16.mxu0 %v23963_v23  ;;  %16134 = vmatprep.subr.bf16.mxu1 %v23966_v17  ;;  %v24003_v23 = vld [vmem:[#allocation5 + $0x3d18] ss:$36 sps:$4 sm:$0xff]   ;;  %v24006_v17 = vld [vmem:[#allocation5 + $0x3d20] ss:$36 sps:$4 sm:$0xff]  }
 0x7e6   :  { %15520 = vmatpush1.bf16.msra.mxu0 %v23961_v56  ;;  %16135 = vmatpush1.bf16.msra.mxu1 %v23964_v19  ;;  %v24011_v56 = vld [vmem:[#allocation5 + $0x3d64] ss:$36 sps:$4 sm:$0xff]   ;;  %v24014_v19 = vld [vmem:[#allocation5 + $0x3d6c] ss:$36 sps:$4 sm:$0xff]  }
 0x7e7   :  { %15521 = vmatprep.subr.bf16.mxu0 %v23969_v33  ;;  %16136 = vmatprep.subr.bf16.mxu1 %v23972_v34  ;;  %v24009_v33 = vld [vmem:[#allocation5 + $0x3d60] ss:$36 sps:$4 sm:$0xff]   ;;  %v24012_v34 = vld [vmem:[#allocation5 + $0x3d68] ss:$36 sps:$4 sm:$0xff]  }
 0x7ea   :  { %15522 = vmatpush1.bf16.msra.mxu0 %v23967_v60  ;;  %16137 = vmatpush1.bf16.msra.mxu1 %v23970_v38  ;;  %v24017_v60 = vld [vmem:[#allocation5 + $0x3dac] ss:$36 sps:$4 sm:$0xff]   ;;  %v24020_v38 = vld [vmem:[#allocation5 + $0x3db4] ss:$36 sps:$4 sm:$0xff]  }
 0x7eb   :  { %15523 = vmatprep.subr.bf16.mxu0 %v23975_v9  ;;  %16138 = vmatprep.subr.bf16.mxu1 %v23978_v44  ;;  %v24015_v9 = vld [vmem:[#allocation5 + $0x3da8] ss:$36 sps:$4 sm:$0xff]   ;;  %v24018_v44 = vld [vmem:[#allocation5 + $0x3db0] ss:$36 sps:$4 sm:$0xff]  }
 0x7ee   :  { %15524 = vmatpush1.bf16.msra.mxu0 %v23973_v45  ;;  %16139 = vmatpush1.bf16.msra.mxu1 %v23976_v46  ;;  %v24023_v45 = vld [vmem:[#allocation5 + $0x3df4] ss:$36 sps:$4 sm:$0xff]   ;;  %v24026_v46 = vld [vmem:[#allocation5 + $0x3dfc] ss:$36 sps:$4 sm:$0xff]  }
 0x7ef   :  { %15525 = vmatprep.subr.bf16.mxu0 %v23981_v41  ;;  %16140 = vmatprep.subr.bf16.mxu1 %v23984_v49  ;;  %v24021_v41 = vld [vmem:[#allocation5 + $0x3df0] ss:$36 sps:$4 sm:$0xff]   ;;  %v24024_v49 = vld [vmem:[#allocation5 + $0x3df8] ss:$36 sps:$4 sm:$0xff]  }
 0x7f2   :  { %15526 = vmatpush1.bf16.msra.mxu0 %v23979_v50  ;;  %16141 = vmatpush1.bf16.msra.mxu1 %v23982_v51  ;;  %v24029_v50 = vld [vmem:[#allocation5 + $0x3e3c] ss:$36 sps:$4 sm:$0xff]   ;;  %v24032_v51 = vld [vmem:[#allocation5 + $0x3e44] ss:$36 sps:$4 sm:$0xff]  }
 0x7f3   :  { %15527 = vmatprep.subr.bf16.mxu0 %v23987_v52  ;;  %16142 = vmatprep.subr.bf16.mxu1 %v23990_v53  ;;  %v24027_v52 = vld [vmem:[#allocation5 + $0x3e38] ss:$36 sps:$4 sm:$0xff]   ;;  %v24030_v53 = vld [vmem:[#allocation5 + $0x3e40] ss:$36 sps:$4 sm:$0xff]  }
 0x7f6   :  { %15528 = vmatpush1.bf16.msra.mxu0 %v23985_v54  ;;  %16143 = vmatpush1.bf16.msra.mxu1 %v23988_v55  ;;  %v24035_v54 = vld [vmem:[#allocation5 + $0x3e84] ss:$36 sps:$4 sm:$0xff]   ;;  %v24038_v55 = vld [vmem:[#allocation5 + $0x3e8c] ss:$36 sps:$4 sm:$0xff]  }
 0x7f7   :  { %15529 = vmatprep.subr.bf16.mxu0 %v23993_v58  ;;  %16144 = vmatprep.subr.bf16.mxu1 %v23996_v59  ;;  %v24033_v58 = vld [vmem:[#allocation5 + $0x3e80] ss:$36 sps:$4 sm:$0xff]   ;;  %v24036_v59 = vld [vmem:[#allocation5 + $0x3e88] ss:$36 sps:$4 sm:$0xff]  }
 0x7fa   :  { %15530 = vmatpush1.bf16.msra.mxu0 %v23991_v1  ;;  %16145 = vmatpush1.bf16.msra.mxu1 %v23994_v21  ;;  %v24041_v1 = vld [vmem:[#allocation5 + $0x3ecc] ss:$36 sps:$4 sm:$0xff]   ;;  %v24044_v21 = vld [vmem:[#allocation5 + $0x3ed4] ss:$36 sps:$4 sm:$0xff]  }
 0x7fb   :  { %15531 = vmatprep.subr.bf16.mxu0 %v23999_v3  ;;  %16146 = vmatprep.subr.bf16.mxu1 %v24002_v7  ;;  %v24039_v3 = vld [vmem:[#allocation5 + $0x3ec8] ss:$36 sps:$4 sm:$0xff]   ;;  %v24042_v7 = vld [vmem:[#allocation5 + $0x3ed0] ss:$36 sps:$4 sm:$0xff]  }
 0x7fe   :  { %15532 = vmatpush1.bf16.msra.mxu0 %v23997_v8  ;;  %16147 = vmatpush1.bf16.msra.mxu1 %v24000_v12  ;;  %v24047_v8 = vld [vmem:[#allocation5 + $0x3f14] ss:$36 sps:$4 sm:$0xff]   ;;  %v24050_v12 = vld [vmem:[#allocation5 + $0x3f1c] ss:$36 sps:$4 sm:$0xff]  }
 0x7ff   :  { %15533 = vmatprep.subr.bf16.mxu0 %v24005_v13  ;;  %16148 = vmatprep.subr.bf16.mxu1 %v24008_v14  ;;  %v24045_v13 = vld [vmem:[#allocation5 + $0x3f10] ss:$36 sps:$4 sm:$0xff]   ;;  %v24048_v14 = vld [vmem:[#allocation5 + $0x3f18] ss:$36 sps:$4 sm:$0xff]  }
 0x802   :  { %15534 = vmatpush1.bf16.msra.mxu0 %v24003_v23  ;;  %16149 = vmatpush1.bf16.msra.mxu1 %v24006_v17  ;;  %v24053_v23 = vld [vmem:[#allocation5 + $0x3f5c] ss:$36 sps:$4 sm:$0xff]   ;;  %v24056_v17 = vld [vmem:[#allocation5 + $0x3f64] ss:$36 sps:$4 sm:$0xff]  }
 0x803   :  { %15535 = vmatprep.subr.bf16.mxu0 %v24011_v56  ;;  %16150 = vmatprep.subr.bf16.mxu1 %v24014_v19  ;;  %v24051_v56 = vld [vmem:[#allocation5 + $0x3f58] ss:$36 sps:$4 sm:$0xff]   ;;  %v24054_v19 = vld [vmem:[#allocation5 + $0x3f60] ss:$36 sps:$4 sm:$0xff]  }
 0x806   :  { %15536 = vmatpush1.bf16.msra.mxu0 %v24009_v33  ;;  %16151 = vmatpush1.bf16.msra.mxu1 %v24012_v34  ;;  %v24059_v33 = vld [vmem:[#allocation5 + $0x3fa4] ss:$36 sps:$4 sm:$0xff]   ;;  %v24062_v34 = vld [vmem:[#allocation5 + $0x3fac] ss:$36 sps:$4 sm:$0xff]  }
 0x807   :  { %15537 = vmatprep.subr.bf16.mxu0 %v24017_v60  ;;  %16152 = vmatprep.subr.bf16.mxu1 %v24020_v38  ;;  %v24057_v60 = vld [vmem:[#allocation5 + $0x3fa0] ss:$36 sps:$4 sm:$0xff]   ;;  %v24060_v38 = vld [vmem:[#allocation5 + $0x3fa8] ss:$36 sps:$4 sm:$0xff]  }
 0x80a   :  { %15538 = vmatpush1.bf16.msra.mxu0 %v24015_v9  ;;  %16153 = vmatpush1.bf16.msra.mxu1 %v24018_v44  ;;  %v24065_v9 = vld [vmem:[#allocation5 + $0x3fec] ss:$36 sps:$4 sm:$0xff]   ;;  %v24068_v44 = vld [vmem:[#allocation5 + $0x3ff4] ss:$36 sps:$4 sm:$0xff]  }
 0x80b   :  { %15539 = vmatprep.subr.bf16.mxu0 %v24023_v45  ;;  %16154 = vmatprep.subr.bf16.mxu1 %v24026_v46  ;;  %v24063_v45 = vld [vmem:[#allocation5 + $0x3fe8] ss:$36 sps:$4 sm:$0xff]   ;;  %v24066_v46 = vld [vmem:[#allocation5 + $0x3ff0] ss:$36 sps:$4 sm:$0xff]  }
 0x80e   :  { %15540 = vmatpush1.bf16.msra.mxu0 %v24021_v41  ;;  %16155 = vmatpush1.bf16.msra.mxu1 %v24024_v49  ;;  %v24071_v41 = vld [vmem:[#allocation5 + $0x4034] ss:$36 sps:$4 sm:$0xff]   ;;  %v24074_v49 = vld [vmem:[#allocation5 + $0x403c] ss:$36 sps:$4 sm:$0xff]  }
 0x80f   :  { %15541 = vmatprep.subr.bf16.mxu0 %v24029_v50  ;;  %16156 = vmatprep.subr.bf16.mxu1 %v24032_v51  ;;  %v24069_v50 = vld [vmem:[#allocation5 + $0x4030] ss:$36 sps:$4 sm:$0xff]   ;;  %v24072_v51 = vld [vmem:[#allocation5 + $0x4038] ss:$36 sps:$4 sm:$0xff]  }
 0x812   :  { %15542 = vmatpush1.bf16.msra.mxu0 %v24027_v52  ;;  %16157 = vmatpush1.bf16.msra.mxu1 %v24030_v53  ;;  %v24077_v52 = vld [vmem:[#allocation5 + $0x407c] ss:$36 sps:$4 sm:$0xff]   ;;  %v24080_v53 = vld [vmem:[#allocation5 + $0x4084] ss:$36 sps:$4 sm:$0xff]  }
 0x813   :  { %15543 = vmatprep.subr.bf16.mxu0 %v24035_v54  ;;  %16158 = vmatprep.subr.bf16.mxu1 %v24038_v55  ;;  %v24075_v54 = vld [vmem:[#allocation5 + $0x4078] ss:$36 sps:$4 sm:$0xff]   ;;  %v24078_v55 = vld [vmem:[#allocation5 + $0x4080] ss:$36 sps:$4 sm:$0xff]  }
 0x816   :  { %15544 = vmatpush1.bf16.msra.mxu0 %v24033_v58  ;;  %16159 = vmatpush1.bf16.msra.mxu1 %v24036_v59  ;;  %v24083_v58 = vld [vmem:[#allocation5 + $0x40c4] ss:$36 sps:$4 sm:$0xff]   ;;  %v24086_v59 = vld [vmem:[#allocation5 + $0x40cc] ss:$36 sps:$4 sm:$0xff]  }
 0x817   :  { %15545 = vmatprep.subr.bf16.mxu0 %v24041_v1  ;;  %16160 = vmatprep.subr.bf16.mxu1 %v24044_v21  ;;  %v24081_v1 = vld [vmem:[#allocation5 + $0x40c0] ss:$36 sps:$4 sm:$0xff]   ;;  %v24084_v21 = vld [vmem:[#allocation5 + $0x40c8] ss:$36 sps:$4 sm:$0xff]  }
 0x81a   :  { %15546 = vmatpush1.bf16.msra.mxu0 %v24039_v3  ;;  %16161 = vmatpush1.bf16.msra.mxu1 %v24042_v7  ;;  %v24089_v3 = vld [vmem:[#allocation5 + $0x410c] ss:$36 sps:$4 sm:$0xff]   ;;  %v24092_v7 = vld [vmem:[#allocation5 + $0x4114] ss:$36 sps:$4 sm:$0xff]  }
 0x81b   :  { %15556 = vmatprep.subr.bf16.mxu0 %v24047_v8  ;;  %16171 = vmatprep.subr.bf16.mxu1 %v24050_v12  ;;  %v24087_v8 = vld [vmem:[#allocation5 + $0x4108] ss:$36 sps:$4 sm:$0xff]   ;;  %v24090_v12 = vld [vmem:[#allocation5 + $0x4110] ss:$36 sps:$4 sm:$0xff]  }
 0x81d   :  { %15548 = vmatmul.mubr.bf16.vlgmr.msra.gmra.mrb[4].mxu0 %v25238_v6  ;;  %16163 = vmatmul.mubr.bf16.vlgmr.msra.gmra.mrb[4].mxu1 %v25238_v6 }
 0x81e   :  { %15557 = vmatpush1.bf16.msra.mxu0 %v24045_v13  ;;  %16172 = vmatpush1.bf16.msra.mxu1 %v24048_v14  ;;  %v24095_v13 = vld [vmem:[#allocation5 + $0x4154] ss:$36 sps:$4 sm:$0xff]   ;;  %v24098_v14 = vld [vmem:[#allocation5 + $0x415c] ss:$36 sps:$4 sm:$0xff]  }
 0x81f   :  { %15558 = vmatprep.subr.bf16.mxu0 %v24053_v23  ;;  %16173 = vmatprep.subr.bf16.mxu1 %v24056_v17  ;;  %v24093_v23 = vld [vmem:[#allocation5 + $0x4150] ss:$36 sps:$4 sm:$0xff]   ;;  %v24096_v17 = vld [vmem:[#allocation5 + $0x4158] ss:$36 sps:$4 sm:$0xff]  }
 0x820   :  { %15588 = vmatprep.mubr.bf16.mxu0 %v25242_v16  ;;  %16203 = vmatprep.mubr.bf16.mxu1 %v25242_v16 }
 0x822   :  { %15559 = vmatpush1.bf16.msra.mxu0 %v24051_v56  ;;  %16174 = vmatpush1.bf16.msra.mxu1 %v24054_v19  ;;  %v24101_v56 = vld [vmem:[#allocation5 + $0x419c] ss:$36 sps:$4 sm:$0xff]   ;;  %v24104_v19 = vld [vmem:[#allocation5 + $0x41a4] ss:$36 sps:$4 sm:$0xff]  }
 0x823   :  { %15560 = vmatprep.subr.bf16.mxu0 %v24059_v33  ;;  %16175 = vmatprep.subr.bf16.mxu1 %v24062_v34  ;;  %v24099_v33 = vld [vmem:[#allocation5 + $0x4198] ss:$36 sps:$4 sm:$0xff]   ;;  %v24102_v34 = vld [vmem:[#allocation5 + $0x41a0] ss:$36 sps:$4 sm:$0xff]  }
 0x826   :  { %15561 = vmatpush1.bf16.msra.mxu0 %v24057_v60  ;;  %16176 = vmatpush1.bf16.msra.mxu1 %v24060_v38  ;;  %v24107_v60 = vld [vmem:[#allocation5 + $0x41e4] ss:$36 sps:$4 sm:$0xff]   ;;  %v24110_v38 = vld [vmem:[#allocation5 + $0x41ec] ss:$36 sps:$4 sm:$0xff]  }
 0x827   :  { %15562 = vmatprep.subr.bf16.mxu0 %v24065_v9  ;;  %16177 = vmatprep.subr.bf16.mxu1 %v24068_v44  ;;  %v24105_v9 = vld [vmem:[#allocation5 + $0x41e0] ss:$36 sps:$4 sm:$0xff]   ;;  %v24108_v44 = vld [vmem:[#allocation5 + $0x41e8] ss:$36 sps:$4 sm:$0xff]  }
 0x82a   :  { %15563 = vmatpush1.bf16.msra.mxu0 %v24063_v45  ;;  %16178 = vmatpush1.bf16.msra.mxu1 %v24066_v46  ;;  %v24113_v45 = vld [vmem:[#allocation5 + $0x422c] ss:$36 sps:$4 sm:$0xff]   ;;  %v24116_v46 = vld [vmem:[#allocation5 + $0x4234] ss:$36 sps:$4 sm:$0xff]  }
 0x82b   :  { %15564 = vmatprep.subr.bf16.mxu0 %v24071_v41  ;;  %16179 = vmatprep.subr.bf16.mxu1 %v24074_v49  ;;  %v24111_v41 = vld [vmem:[#allocation5 + $0x4228] ss:$36 sps:$4 sm:$0xff]   ;;  %v24114_v49 = vld [vmem:[#allocation5 + $0x4230] ss:$36 sps:$4 sm:$0xff]  }
 0x82e   :  { %15565 = vmatpush1.bf16.msra.mxu0 %v24069_v50  ;;  %16180 = vmatpush1.bf16.msra.mxu1 %v24072_v51  ;;  %v24119_v50 = vld [vmem:[#allocation5 + $0x4274] ss:$36 sps:$4 sm:$0xff]   ;;  %v24122_v51 = vld [vmem:[#allocation5 + $0x427c] ss:$36 sps:$4 sm:$0xff]  }
 0x82f   :  { %15566 = vmatprep.subr.bf16.mxu0 %v24077_v52  ;;  %16181 = vmatprep.subr.bf16.mxu1 %v24080_v53  ;;  %v24117_v52 = vld [vmem:[#allocation5 + $0x4270] ss:$36 sps:$4 sm:$0xff]   ;;  %v24120_v53 = vld [vmem:[#allocation5 + $0x4278] ss:$36 sps:$4 sm:$0xff]  }
 0x832   :  { %15567 = vmatpush1.bf16.msra.mxu0 %v24075_v54  ;;  %16182 = vmatpush1.bf16.msra.mxu1 %v24078_v55  ;;  %v24125_v54 = vld [vmem:[#allocation5 + $0x42bc] ss:$36 sps:$4 sm:$0xff]   ;;  %v24128_v55 = vld [vmem:[#allocation5 + $0x42c4] ss:$36 sps:$4 sm:$0xff]  }
 0x833   :  { %15568 = vmatprep.subr.bf16.mxu0 %v24083_v58  ;;  %16183 = vmatprep.subr.bf16.mxu1 %v24086_v59  ;;  %v24123_v58 = vld [vmem:[#allocation5 + $0x42b8] ss:$36 sps:$4 sm:$0xff]   ;;  %v24126_v59 = vld [vmem:[#allocation5 + $0x42c0] ss:$36 sps:$4 sm:$0xff]  }
 0x836   :  { %15569 = vmatpush1.bf16.msra.mxu0 %v24081_v1  ;;  %16184 = vmatpush1.bf16.msra.mxu1 %v24084_v21  ;;  %v24131_v1 = vld [vmem:[#allocation5 + $0x4304] ss:$36 sps:$4 sm:$0xff]   ;;  %v24134_v21 = vld [vmem:[#allocation5 + $0x430c] ss:$36 sps:$4 sm:$0xff]  }
 0x837   :  { %15570 = vmatprep.subr.bf16.mxu0 %v24089_v3  ;;  %16185 = vmatprep.subr.bf16.mxu1 %v24092_v7  ;;  %v24129_v3 = vld [vmem:[#allocation5 + $0x4300] ss:$36 sps:$4 sm:$0xff]   ;;  %v24132_v7 = vld [vmem:[#allocation5 + $0x4308] ss:$36 sps:$4 sm:$0xff]  }
 0x83a   :  { %15571 = vmatpush1.bf16.msra.mxu0 %v24087_v8  ;;  %16186 = vmatpush1.bf16.msra.mxu1 %v24090_v12  ;;  %v24137_v8 = vld [vmem:[#allocation5 + $0x434c] ss:$36 sps:$4 sm:$0xff]   ;;  %v24140_v12 = vld [vmem:[#allocation5 + $0x4354] ss:$36 sps:$4 sm:$0xff]  }
 0x83b   :  { %15572 = vmatprep.subr.bf16.mxu0 %v24095_v13  ;;  %16187 = vmatprep.subr.bf16.mxu1 %v24098_v14  ;;  %v24135_v13 = vld [vmem:[#allocation5 + $0x4348] ss:$36 sps:$4 sm:$0xff]   ;;  %v24138_v14 = vld [vmem:[#allocation5 + $0x4350] ss:$36 sps:$4 sm:$0xff]  }
 0x83e   :  { %15573 = vmatpush1.bf16.msra.mxu0 %v24093_v23  ;;  %16188 = vmatpush1.bf16.msra.mxu1 %v24096_v17  ;;  %v24141_v23 = vld [vmem:[#allocation5 + $0x260] ss:$36 sps:$4 sm:$0xff]  }
 0x83f   :  { %15574 = vmatprep.subr.bf16.mxu0 %v24101_v56  ;;  %16189 = vmatprep.subr.bf16.mxu1 %v24104_v19  ;;  %v24142_v17 = vld [vmem:[#allocation5 + $0x6e0] ss:$36 sps:$4 sm:$0xff]  }
 0x840   :  { %v24143_v56 = vld [vmem:[#allocation5 + $0x20] ss:$36 sps:$4 sm:$0xff]  }
 0x841   :  { %v24144_v19 = vld [vmem:[#allocation5 + $0x4a0] ss:$36 sps:$4 sm:$0xff]  }
 0x842   :  { %15575 = vmatpush1.bf16.msra.mxu0 %v24099_v33  ;;  %16190 = vmatpush1.bf16.msra.mxu1 %v24102_v34  ;;  %v24145_v33 = vld [vmem:[#allocation5 + $0x2a8] ss:$36 sps:$4 sm:$0xff]  }
 0x843   :  { %15576 = vmatprep.subr.bf16.mxu0 %v24107_v60  ;;  %16191 = vmatprep.subr.bf16.mxu1 %v24110_v38  ;;  %v24146_v34 = vld [vmem:[#allocation5 + $0x728] ss:$36 sps:$4 sm:$0xff]  }
 0x844   :  { %v24147_v60 = vld [vmem:[#allocation5 + $0x68] ss:$36 sps:$4 sm:$0xff]  }
 0x845   :  { %v24148_v38 = vld [vmem:[#allocation5 + $0x4e8] ss:$36 sps:$4 sm:$0xff]  }
 0x846   :  { %15577 = vmatpush1.bf16.msra.mxu0 %v24105_v9  ;;  %16192 = vmatpush1.bf16.msra.mxu1 %v24108_v44  ;;  %v24149_v9 = vld [vmem:[#allocation5 + $0x2f0] ss:$36 sps:$4 sm:$0xff]  }
 0x847   :  { %15578 = vmatprep.subr.bf16.mxu0 %v24113_v45  ;;  %16193 = vmatprep.subr.bf16.mxu1 %v24116_v46  ;;  %v24150_v44 = vld [vmem:[#allocation5 + $0x770] ss:$36 sps:$4 sm:$0xff]  }
 0x848   :  { %v24151_v45 = vld [vmem:[#allocation5 + $0xb0] ss:$36 sps:$4 sm:$0xff]  }
 0x849   :  { %v24152_v46 = vld [vmem:[#allocation5 + $0x530] ss:$36 sps:$4 sm:$0xff]  }
 0x84a   :  { %15579 = vmatpush1.bf16.msra.mxu0 %v24111_v41  ;;  %16194 = vmatpush1.bf16.msra.mxu1 %v24114_v49  ;;  %v24153_v41 = vld [vmem:[#allocation5 + $0x338] ss:$36 sps:$4 sm:$0xff]  }
 0x84b   :  { %15580 = vmatprep.subr.bf16.mxu0 %v24119_v50  ;;  %16195 = vmatprep.subr.bf16.mxu1 %v24122_v51  ;;  %v24154_v49 = vld [vmem:[#allocation5 + $0x7b8] ss:$36 sps:$4 sm:$0xff]  }
 0x84c   :  { %v24155_v50 = vld [vmem:[#allocation5 + $0xf8] ss:$36 sps:$4 sm:$0xff]  }
 0x84d   :  { %v24156_v51 = vld [vmem:[#allocation5 + $0x578] ss:$36 sps:$4 sm:$0xff]  }
 0x84e   :  { %15581 = vmatpush1.bf16.msra.mxu0 %v24117_v52  ;;  %16196 = vmatpush1.bf16.msra.mxu1 %v24120_v53  ;;  %v24157_v52 = vld [vmem:[#allocation5 + $0x380] ss:$36 sps:$4 sm:$0xff]  }
 0x84f   :  { %15582 = vmatprep.subr.bf16.mxu0 %v24125_v54  ;;  %16197 = vmatprep.subr.bf16.mxu1 %v24128_v55  ;;  %v24158_v53 = vld [vmem:[#allocation5 + $0x800] ss:$36 sps:$4 sm:$0xff]   ;;  %v24161_v54 = vld [vmem:[#allocation5 + $0x3c8] ss:$36 sps:$4 sm:$0xff]  }
 0x850   :  { %v24162_v55 = vld [vmem:[#allocation5 + $0x848] ss:$36 sps:$4 sm:$0xff]  }
 0x852   :  { %15583 = vmatpush1.bf16.msra.mxu0 %v24123_v58  ;;  %16198 = vmatpush1.bf16.msra.mxu1 %v24126_v59  ;;  %v24163_v58 = vld [vmem:[#allocation5 + $0x188] ss:$36 sps:$4 sm:$0xff]  }
 0x853   :  { %15584 = vmatprep.subr.bf16.mxu0 %v24131_v1  ;;  %16199 = vmatprep.subr.bf16.mxu1 %v24134_v21  ;;  %v24164_v59 = vld [vmem:[#allocation5 + $0x608] ss:$36 sps:$4 sm:$0xff]   ;;  %v24165_v1 = vld [vmem:[#allocation5 + $0x410] ss:$36 sps:$4 sm:$0xff]  }
 0x854   :  { %v24166_v21 = vld [vmem:[#allocation5 + $0x890] ss:$36 sps:$4 sm:$0xff]  }
 0x856   :  { %15585 = vmatpush1.bf16.msra.mxu0 %v24129_v3  ;;  %16200 = vmatpush1.bf16.msra.mxu1 %v24132_v7  ;;  %v24167_v3 = vld [vmem:[#allocation5 + $0x1d0] ss:$36 sps:$4 sm:$0xff]  }
 0x857   :  { %15586 = vmatprep.subr.bf16.mxu0 %v24137_v8  ;;  %16201 = vmatprep.subr.bf16.mxu1 %v24140_v12  ;;  %v24168_v7 = vld [vmem:[#allocation5 + $0x650] ss:$36 sps:$4 sm:$0xff]   ;;  %v24169_v8 = vld [vmem:[#allocation5 + $0x458] ss:$36 sps:$4 sm:$0xff]  }
 0x858   :  { %v24170_v12 = vld [vmem:[#allocation5 + $0x8d8] ss:$36 sps:$4 sm:$0xff]  }
 0x85a   :  { %15587 = vmatpush1.bf16.msra.mxu0 %v24135_v13  ;;  %16202 = vmatpush1.bf16.msra.mxu1 %v24138_v14  ;;  %v24171_v13 = vld [vmem:[#allocation5 + $0x218] ss:$36 sps:$4 sm:$0xff]  }
 0x85b   :  { %20454 = vmatprep.subr.bf16.mxu0 %v24141_v23  ;;  %20476 = vmatprep.subr.bf16.mxu1 %v24142_v17  ;;  %v24172_v14 = vld [vmem:[#allocation5 + $0x698] ss:$36 sps:$4 sm:$0xff]   ;;  %v24173_v23 = vld [vmem:[#allocation5 + $0xb60] ss:$36 sps:$4 sm:$0xff]  }
 0x85c   :  { %v24174_v17 = vld [vmem:[#allocation5 + $0xfe0] ss:$36 sps:$4 sm:$0xff]  }
 0x85d   :  { %15589 = vmatmul.mubr.bf16.vlgmr.msra.gmra.mrb[4].mxu0 %v25250_v0  ;;  %16204 = vmatmul.mubr.bf16.vlgmr.msra.gmra.mrb[4].mxu1 %v25250_v0 }
 0x85e   :  { %20455 = vmatpush3.bf16.msra.mxu0 %v24143_v56  ;;  %20477 = vmatpush3.bf16.msra.mxu1 %v24144_v19  ;;  %v24175_v56 = vld [vmem:[#allocation5 + $0x920] ss:$36 sps:$4 sm:$0xff]  }
 0x85f   :  { %20456 = vmatprep.subr.bf16.mxu0 %v24145_v33  ;;  %20478 = vmatprep.subr.bf16.mxu1 %v24146_v34  ;;  %v24176_v19 = vld [vmem:[#allocation5 + $0xda0] ss:$36 sps:$4 sm:$0xff]   ;;  %v24177_v33 = vld [vmem:[#allocation5 + $0xba8] ss:$36 sps:$4 sm:$0xff]  }
 0x860   :  { %16244 = vmatprep.mubr.bf16.mxu0 %v25050_v48  ;;  %16284 = vmatprep.mubr.bf16.mxu1 %v25062_v30  ;;  %v24159_v48 = vld [vmem:[#allocation5 + $0x140] ss:$36 sps:$4 sm:$0xff]   ;;  %v24178_v34 = vld [vmem:[#allocation5 + $0x1028] ss:$36 sps:$4 sm:$0xff]  }
 0x861   :  { %v24160_v30 = vld [vmem:[#allocation5 + $0x5c0] ss:$36 sps:$4 sm:$0xff]  }
 0x862   :  { %20457 = vmatpush3.bf16.msra.mxu0 %v24147_v60  ;;  %20479 = vmatpush3.bf16.msra.mxu1 %v24148_v38  ;;  %v24179_v60 = vld [vmem:[#allocation5 + $0x968] ss:$36 sps:$4 sm:$0xff]  }
 0x863   :  { %20458 = vmatprep.subr.bf16.mxu0 %v24149_v9  ;;  %20480 = vmatprep.subr.bf16.mxu1 %v24150_v44  ;;  %v24180_v38 = vld [vmem:[#allocation5 + $0xde8] ss:$36 sps:$4 sm:$0xff]   ;;  %v24181_v9 = vld [vmem:[#allocation5 + $0xbf0] ss:$36 sps:$4 sm:$0xff]  }
 0x864   :  { %v24182_v44 = vld [vmem:[#allocation5 + $0x1070] ss:$36 sps:$4 sm:$0xff]  }
 0x866   :  { %20459 = vmatpush3.bf16.msra.mxu0 %v24151_v45  ;;  %20481 = vmatpush3.bf16.msra.mxu1 %v24152_v46  ;;  %v24183_v45 = vld [vmem:[#allocation5 + $0x9b0] ss:$36 sps:$4 sm:$0xff]  }
 0x867   :  { %20460 = vmatprep.subr.bf16.mxu0 %v24153_v41  ;;  %20482 = vmatprep.subr.bf16.mxu1 %v24154_v49  ;;  %v24184_v46 = vld [vmem:[#allocation5 + $0xe30] ss:$36 sps:$4 sm:$0xff]   ;;  %v24187_v41 = vld [vmem:[#allocation5 + $0x9f8] ss:$36 sps:$4 sm:$0xff]  }
 0x868   :  { %v24188_v49 = vld [vmem:[#allocation5 + $0xe78] ss:$36 sps:$4 sm:$0xff]  }
 0x86a   :  { %20461 = vmatpush3.bf16.msra.mxu0 %v24155_v50  ;;  %20483 = vmatpush3.bf16.msra.mxu1 %v24156_v51  ;;  %v24189_v50 = vld [vmem:[#allocation5 + $0xc80] ss:$36 sps:$4 sm:$0xff]  }
 0x86b   :  { %20462 = vmatprep.subr.bf16.mxu0 %v24157_v52  ;;  %20484 = vmatprep.subr.bf16.mxu1 %v24158_v53  ;;  %v24190_v51 = vld [vmem:[#allocation5 + $0x1100] ss:$36 sps:$4 sm:$0xff]   ;;  %v24193_v52 = vld [vmem:[#allocation5 + $0xcc8] ss:$36 sps:$4 sm:$0xff]  }
 0x86c   :  { %v24194_v53 = vld [vmem:[#allocation5 + $0x1148] ss:$36 sps:$4 sm:$0xff]  }
 0x86e   :  { %20463 = vmatpush3.bf16.msra.mxu0 %v24159_v48  ;;  %20485 = vmatpush3.bf16.msra.mxu1 %v24160_v30  ;;  %v24195_v48 = vld [vmem:[#allocation5 + $0xa88] ss:$36 sps:$4 sm:$0xff]  }
 0x86f   :  { %20464 = vmatprep.subr.bf16.mxu0 %v24161_v54  ;;  %20486 = vmatprep.subr.bf16.mxu1 %v24162_v55  ;;  %v24196_v30 = vld [vmem:[#allocation5 + $0xf08] ss:$36 sps:$4 sm:$0xff]   ;;  %v24197_v54 = vld [vmem:[#allocation5 + $0xd10] ss:$36 sps:$4 sm:$0xff]  }
 0x870   :  { %v24198_v55 = vld [vmem:[#allocation5 + $0x1190] ss:$36 sps:$4 sm:$0xff]  }
 0x872   :  { %20465 = vmatpush3.bf16.msra.mxu0 %v24163_v58  ;;  %20487 = vmatpush3.bf16.msra.mxu1 %v24164_v59  ;;  %v24199_v58 = vld [vmem:[#allocation5 + $0xad0] ss:$36 sps:$4 sm:$0xff]  }
 0x873   :  { %20466 = vmatprep.subr.bf16.mxu0 %v24165_v1  ;;  %20488 = vmatprep.subr.bf16.mxu1 %v24166_v21  ;;  %v24200_v59 = vld [vmem:[#allocation5 + $0xf50] ss:$36 sps:$4 sm:$0xff]   ;;  %v24201_v1 = vld [vmem:[#allocation5 + $0xd58] ss:$36 sps:$4 sm:$0xff]  }
 0x874   :  { %v24202_v21 = vld [vmem:[#allocation5 + $0x11d8] ss:$36 sps:$4 sm:$0xff]  }
 0x876   :  { %20467 = vmatpush3.bf16.msra.mxu0 %v24167_v3  ;;  %20489 = vmatpush3.bf16.msra.mxu1 %v24168_v7  ;;  %v24203_v3 = vld [vmem:[#allocation5 + $0xb18] ss:$36 sps:$4 sm:$0xff]  }
 0x877   :  { %20468 = vmatprep.subr.bf16.mxu0 %v24169_v8  ;;  %20490 = vmatprep.subr.bf16.mxu1 %v24170_v12  ;;  %v24204_v7 = vld [vmem:[#allocation5 + $0xf98] ss:$36 sps:$4 sm:$0xff]   ;;  %v24205_v8 = vld [vmem:[#allocation5 + $0x1460] ss:$36 sps:$4 sm:$0xff]  }
 0x878   :  { %v24206_v12 = vld [vmem:[#allocation5 + $0x18e0] ss:$36 sps:$4 sm:$0xff]  }
 0x87a   :  { %20469 = vmatpush3.bf16.msra.mxu0 %v24171_v13  ;;  %20491 = vmatpush3.bf16.msra.mxu1 %v24172_v14  ;;  %v24207_v13 = vld [vmem:[#allocation5 + $0x1220] ss:$36 sps:$4 sm:$0xff]  }
 0x87b   :  { %20498 = vmatprep.subr.bf16.mxu0 %v24173_v23  ;;  %20520 = vmatprep.subr.bf16.mxu1 %v24174_v17  ;;  %v24208_v14 = vld [vmem:[#allocation5 + $0x16a0] ss:$36 sps:$4 sm:$0xff]   ;;  %v24209_v23 = vld [vmem:[#allocation5 + $0x14a8] ss:$36 sps:$4 sm:$0xff]  }
 0x87c   :  { %v24210_v17 = vld [vmem:[#allocation5 + $0x1928] ss:$36 sps:$4 sm:$0xff]  }
 0x87d   :  { %16245 = vmatmul.mubr.bf16.vlgmr.msra.gmra.mrb[8].mxu0 %v25054_v5  ;;  %16285 = vmatmul.mubr.bf16.vlgmr.msra.gmra.mrb[8].mxu1 %v25068_v10  ;;  %v24185_v5 = vld [vmem:[#allocation5 + $0xc38] ss:$36 sps:$4 sm:$0xff]  }
 0x87e   :  { %20499 = vmatpush3.bf16.msra.mxu0 %v24175_v56  ;;  %20521 = vmatpush3.bf16.msra.mxu1 %v24176_v19  ;;  %v24186_v10 = vld [vmem:[#allocation5 + $0x10b8] ss:$36 sps:$4 sm:$0xff]   ;;  %v24211_v56 = vld [vmem:[#allocation5 + $0x1268] ss:$36 sps:$4 sm:$0xff]  }
 0x87f   :  { %20500 = vmatprep.subr.bf16.mxu0 %v24177_v33  ;;  %20522 = vmatprep.subr.bf16.mxu1 %v24178_v34  ;;  %v24212_v19 = vld [vmem:[#allocation5 + $0x16e8] ss:$36 sps:$4 sm:$0xff]   ;;  %v24213_v33 = vld [vmem:[#allocation5 + $0x14f0] ss:$36 sps:$4 sm:$0xff]  }
 0x880   :  { %16324 = vmatprep.mubr.bf16.mxu0 %v25074_v15  ;;  %16364 = vmatprep.mubr.bf16.mxu1 %v25088_v24  ;;  %v24191_v15 = vld [vmem:[#allocation5 + $0xa40] ss:$36 sps:$4 sm:$0xff]   ;;  %v24214_v34 = vld [vmem:[#allocation5 + $0x1970] ss:$36 sps:$4 sm:$0xff]  }
 0x881   :  { %v24192_v24 = vld [vmem:[#allocation5 + $0xec0] ss:$36 sps:$4 sm:$0xff]  }
 0x882   :  { %20501 = vmatpush3.bf16.msra.mxu0 %v24179_v60  ;;  %20523 = vmatpush3.bf16.msra.mxu1 %v24180_v38  ;;  %v24215_v60 = vld [vmem:[#allocation5 + $0x12b0] ss:$36 sps:$4 sm:$0xff]  }
 0x883   :  { %20502 = vmatprep.subr.bf16.mxu0 %v24181_v9  ;;  %20524 = vmatprep.subr.bf16.mxu1 %v24182_v44  ;;  %v24216_v38 = vld [vmem:[#allocation5 + $0x1730] ss:$36 sps:$4 sm:$0xff]   ;;  %v24219_v9 = vld [vmem:[#allocation5 + $0x12f8] ss:$36 sps:$4 sm:$0xff]  }
 0x884   :  { %v24220_v44 = vld [vmem:[#allocation5 + $0x1778] ss:$36 sps:$4 sm:$0xff]  }
 0x886   :  { %20503 = vmatpush3.bf16.msra.mxu0 %v24183_v45  ;;  %20525 = vmatpush3.bf16.msra.mxu1 %v24184_v46  ;;  %v24221_v45 = vld [vmem:[#allocation5 + $0x1580] ss:$36 sps:$4 sm:$0xff]  }
 0x887   :  { %20504 = vmatprep.subr.bf16.mxu0 %v24185_v5  ;;  %20526 = vmatprep.subr.bf16.mxu1 %v24186_v10  ;;  %v24222_v46 = vld [vmem:[#allocation5 + $0x1a00] ss:$36 sps:$4 sm:$0xff]   ;;  %v24225_v5 = vld [vmem:[#allocation5 + $0x15c8] ss:$36 sps:$4 sm:$0xff]  }
 0x888   :  { %v24226_v10 = vld [vmem:[#allocation5 + $0x1a48] ss:$36 sps:$4 sm:$0xff]  }
 0x88a   :  { %20505 = vmatpush3.bf16.msra.mxu0 %v24187_v41  ;;  %20527 = vmatpush3.bf16.msra.mxu1 %v24188_v49  ;;  %v24227_v41 = vld [vmem:[#allocation5 + $0x1388] ss:$36 sps:$4 sm:$0xff]  }
 0x88b   :  { %20506 = vmatprep.subr.bf16.mxu0 %v24189_v50  ;;  %20528 = vmatprep.subr.bf16.mxu1 %v24190_v51  ;;  %v24228_v49 = vld [vmem:[#allocation5 + $0x1808] ss:$36 sps:$4 sm:$0xff]   ;;  %v24229_v50 = vld [vmem:[#allocation5 + $0x1610] ss:$36 sps:$4 sm:$0xff]  }
 0x88c   :  { %v24230_v51 = vld [vmem:[#allocation5 + $0x1a90] ss:$36 sps:$4 sm:$0xff]  }
 0x88e   :  { %20507 = vmatpush3.bf16.msra.mxu0 %v24191_v15  ;;  %20529 = vmatpush3.bf16.msra.mxu1 %v24192_v24  ;;  %v24231_v15 = vld [vmem:[#allocation5 + $0x13d0] ss:$36 sps:$4 sm:$0xff]  }
 0x88f   :  { %20508 = vmatprep.subr.bf16.mxu0 %v24193_v52  ;;  %20530 = vmatprep.subr.bf16.mxu1 %v24194_v53  ;;  %v24232_v24 = vld [vmem:[#allocation5 + $0x1850] ss:$36 sps:$4 sm:$0xff]   ;;  %v24233_v52 = vld [vmem:[#allocation5 + $0x1658] ss:$36 sps:$4 sm:$0xff]  }
 0x890   :  { %v24234_v53 = vld [vmem:[#allocation5 + $0x1ad8] ss:$36 sps:$4 sm:$0xff]  }
 0x892   :  { %20509 = vmatpush3.bf16.msra.mxu0 %v24195_v48  ;;  %20531 = vmatpush3.bf16.msra.mxu1 %v24196_v30  ;;  %v24235_v48 = vld [vmem:[#allocation5 + $0x1418] ss:$36 sps:$4 sm:$0xff]  }
 0x893   :  { %20510 = vmatprep.subr.bf16.mxu0 %v24197_v54  ;;  %20532 = vmatprep.subr.bf16.mxu1 %v24198_v55  ;;  %v24236_v30 = vld [vmem:[#allocation5 + $0x1898] ss:$36 sps:$4 sm:$0xff]   ;;  %v24237_v54 = vld [vmem:[#allocation5 + $0x1d60] ss:$36 sps:$4 sm:$0xff]  }
 0x894   :  { %v24238_v55 = vld [vmem:[#allocation5 + $0x21e0] ss:$36 sps:$4 sm:$0xff]  }
 0x896   :  { %20511 = vmatpush3.bf16.msra.mxu0 %v24199_v58  ;;  %20533 = vmatpush3.bf16.msra.mxu1 %v24200_v59  ;;  %v24239_v58 = vld [vmem:[#allocation5 + $0x1b20] ss:$36 sps:$4 sm:$0xff]  }
 0x897   :  { %20512 = vmatprep.subr.bf16.mxu0 %v24201_v1  ;;  %20534 = vmatprep.subr.bf16.mxu1 %v24202_v21  ;;  %v24240_v59 = vld [vmem:[#allocation5 + $0x1fa0] ss:$36 sps:$4 sm:$0xff]   ;;  %v24241_v1 = vld [vmem:[#allocation5 + $0x1da8] ss:$36 sps:$4 sm:$0xff]  }
 0x898   :  { %v24242_v21 = vld [vmem:[#allocation5 + $0x2228] ss:$36 sps:$4 sm:$0xff]  }
 0x89a   :  { %20513 = vmatpush3.bf16.msra.mxu0 %v24203_v3  ;;  %20535 = vmatpush3.bf16.msra.mxu1 %v24204_v7  ;;  %v24243_v3 = vld [vmem:[#allocation5 + $0x1b68] ss:$36 sps:$4 sm:$0xff]  }
 0x89b   :  { %20542 = vmatprep.subr.bf16.mxu0 %v24205_v8  ;;  %20564 = vmatprep.subr.bf16.mxu1 %v24206_v12  ;;  %v24244_v7 = vld [vmem:[#allocation5 + $0x1fe8] ss:$36 sps:$4 sm:$0xff]   ;;  %v24245_v8 = vld [vmem:[#allocation5 + $0x1df0] ss:$36 sps:$4 sm:$0xff]  }
 0x89c   :  { %v24246_v12 = vld [vmem:[#allocation5 + $0x2270] ss:$36 sps:$4 sm:$0xff]  }
 0x89d   :  { %16325 = vmatmul.mubr.bf16.vlgmr.msra.gmra.mrb[12].mxu0 %v25082_v20  ;;  %16365 = vmatmul.mubr.bf16.vlgmr.msra.gmra.mrb[12].mxu1 %v25096_v29  ;;  %v24217_v20 = vld [vmem:[#allocation5 + $0x1538] ss:$36 sps:$4 sm:$0xff]  }
 0x89e   :  { %20543 = vmatpush3.bf16.msra.mxu0 %v24207_v13  ;;  %20565 = vmatpush3.bf16.msra.mxu1 %v24208_v14  ;;  %v24218_v29 = vld [vmem:[#allocation5 + $0x19b8] ss:$36 sps:$4 sm:$0xff]   ;;  %v24247_v13 = vld [vmem:[#allocation5 + $0x1bb0] ss:$36 sps:$4 sm:$0xff]  }
 0x89f   :  { %20544 = vmatprep.subr.bf16.mxu0 %v24209_v23  ;;  %20566 = vmatprep.subr.bf16.mxu1 %v24210_v17  ;;  %v24248_v14 = vld [vmem:[#allocation5 + $0x2030] ss:$36 sps:$4 sm:$0xff]   ;;  %v24251_v23 = vld [vmem:[#allocation5 + $0x1bf8] ss:$36 sps:$4 sm:$0xff]  }
 0x8a0   :  { %16404 = vmatprep.mubr.bf16.mxu0 %v25102_v35  ;;  %16444 = vmatprep.mubr.bf16.mxu1 %v25116_v47  ;;  %v24223_v35 = vld [vmem:[#allocation5 + $0x1340] ss:$36 sps:$4 sm:$0xff]   ;;  %v24252_v17 = vld [vmem:[#allocation5 + $0x2078] ss:$36 sps:$4 sm:$0xff]  }
 0x8a1   :  { %v24224_v47 = vld [vmem:[#allocation5 + $0x17c0] ss:$36 sps:$4 sm:$0xff]  }
 0x8a2   :  { %20545 = vmatpush3.bf16.msra.mxu0 %v24211_v56  ;;  %20567 = vmatpush3.bf16.msra.mxu1 %v24212_v19  ;;  %v24253_v56 = vld [vmem:[#allocation5 + $0x1e80] ss:$36 sps:$4 sm:$0xff]  }
 0x8a3   :  { %20546 = vmatprep.subr.bf16.mxu0 %v24213_v33  ;;  %20568 = vmatprep.subr.bf16.mxu1 %v24214_v34  ;;  %v24254_v19 = vld [vmem:[#allocation5 + $0x2300] ss:$36 sps:$4 sm:$0xff]   ;;  %v24257_v33 = vld [vmem:[#allocation5 + $0x1ec8] ss:$36 sps:$4 sm:$0xff]  }
 0x8a4   :  { %v24258_v34 = vld [vmem:[#allocation5 + $0x2348] ss:$36 sps:$4 sm:$0xff]  }
 0x8a6   :  { %20547 = vmatpush3.bf16.msra.mxu0 %v24215_v60  ;;  %20569 = vmatpush3.bf16.msra.mxu1 %v24216_v38  ;;  %v24259_v60 = vld [vmem:[#allocation5 + $0x1c88] ss:$36 sps:$4 sm:$0xff]  }
 0x8a7   :  { %20548 = vmatprep.subr.bf16.mxu0 %v24217_v20  ;;  %20570 = vmatprep.subr.bf16.mxu1 %v24218_v29  ;;  %v24260_v38 = vld [vmem:[#allocation5 + $0x2108] ss:$36 sps:$4 sm:$0xff]   ;;  %v24261_v20 = vld [vmem:[#allocation5 + $0x1f10] ss:$36 sps:$4 sm:$0xff]  }
 0x8a8   :  { %v24262_v29 = vld [vmem:[#allocation5 + $0x2390] ss:$36 sps:$4 sm:$0xff]  }
 0x8aa   :  { %20549 = vmatpush3.bf16.msra.mxu0 %v24219_v9  ;;  %20571 = vmatpush3.bf16.msra.mxu1 %v24220_v44  ;;  %v24263_v9 = vld [vmem:[#allocation5 + $0x1cd0] ss:$36 sps:$4 sm:$0xff]  }
 0x8ab   :  { %20550 = vmatprep.subr.bf16.mxu0 %v24221_v45  ;;  %20572 = vmatprep.subr.bf16.mxu1 %v24222_v46  ;;  %v24264_v44 = vld [vmem:[#allocation5 + $0x2150] ss:$36 sps:$4 sm:$0xff]   ;;  %v24265_v45 = vld [vmem:[#allocation5 + $0x1f58] ss:$36 sps:$4 sm:$0xff]  }
 0x8ac   :  { %v24266_v46 = vld [vmem:[#allocation5 + $0x23d8] ss:$36 sps:$4 sm:$0xff]  }
 0x8ae   :  { %20551 = vmatpush3.bf16.msra.mxu0 %v24223_v35  ;;  %20573 = vmatpush3.bf16.msra.mxu1 %v24224_v47  ;;  %v24267_v35 = vld [vmem:[#allocation5 + $0x1d18] ss:$36 sps:$4 sm:$0xff]  }
 0x8af   :  { %20552 = vmatprep.subr.bf16.mxu0 %v24225_v5  ;;  %20574 = vmatprep.subr.bf16.mxu1 %v24226_v10  ;;  %v24268_v47 = vld [vmem:[#allocation5 + $0x2198] ss:$36 sps:$4 sm:$0xff]   ;;  %v24269_v5 = vld [vmem:[#allocation5 + $0x2660] ss:$36 sps:$4 sm:$0xff]  }
 0x8b0   :  { %v24270_v10 = vld [vmem:[#allocation5 + $0x2ae0] ss:$36 sps:$4 sm:$0xff]  }
 0x8b2   :  { %20553 = vmatpush3.bf16.msra.mxu0 %v24227_v41  ;;  %20575 = vmatpush3.bf16.msra.mxu1 %v24228_v49  ;;  %v24271_v41 = vld [vmem:[#allocation5 + $0x2420] ss:$36 sps:$4 sm:$0xff]  }
 0x8b3   :  { %20554 = vmatprep.subr.bf16.mxu0 %v24229_v50  ;;  %20576 = vmatprep.subr.bf16.mxu1 %v24230_v51  ;;  %v24272_v49 = vld [vmem:[#allocation5 + $0x28a0] ss:$36 sps:$4 sm:$0xff]   ;;  %v24273_v50 = vld [vmem:[#allocation5 + $0x26a8] ss:$36 sps:$4 sm:$0xff]  }
 0x8b4   :  { %v24274_v51 = vld [vmem:[#allocation5 + $0x2b28] ss:$36 sps:$4 sm:$0xff]  }
 0x8b6   :  { %20555 = vmatpush3.bf16.msra.mxu0 %v24231_v15  ;;  %20577 = vmatpush3.bf16.msra.mxu1 %v24232_v24  ;;  %v24275_v15 = vld [vmem:[#allocation5 + $0x2468] ss:$36 sps:$4 sm:$0xff]  }
 0x8b7   :  { %20556 = vmatprep.subr.bf16.mxu0 %v24233_v52  ;;  %20578 = vmatprep.subr.bf16.mxu1 %v24234_v53  ;;  %v24276_v24 = vld [vmem:[#allocation5 + $0x28e8] ss:$36 sps:$4 sm:$0xff]   ;;  %v24277_v52 = vld [vmem:[#allocation5 + $0x26f0] ss:$36 sps:$4 sm:$0xff]  }
 0x8b8   :  { %v24278_v53 = vld [vmem:[#allocation5 + $0x2b70] ss:$36 sps:$4 sm:$0xff]  }
 0x8ba   :  { %20557 = vmatpush3.bf16.msra.mxu0 %v24235_v48  ;;  %20579 = vmatpush3.bf16.msra.mxu1 %v24236_v30  ;;  %v24279_v48 = vld [vmem:[#allocation5 + $0x24b0] ss:$36 sps:$4 sm:$0xff]  }
 0x8bb   :  { %20586 = vmatprep.subr.bf16.mxu0 %v24237_v54  ;;  %20608 = vmatprep.subr.bf16.mxu1 %v24238_v55  ;;  %v24280_v30 = vld [vmem:[#allocation5 + $0x2930] ss:$36 sps:$4 sm:$0xff]   ;;  %v24283_v54 = vld [vmem:[#allocation5 + $0x24f8] ss:$36 sps:$4 sm:$0xff]  }
 0x8bc   :  { %v24284_v55 = vld [vmem:[#allocation5 + $0x2978] ss:$36 sps:$4 sm:$0xff]  }
 0x8bd   :  { %16405 = vmatmul.mubr.bf16.vlgmr.msra.gmra.mrb[16].mxu0 %v25112_v42  ;;  %16445 = vmatmul.mubr.bf16.vlgmr.msra.gmra.mrb[16].mxu1 %v25126_v57  ;;  %v24249_v42 = vld [vmem:[#allocation5 + $0x1e38] ss:$36 sps:$4 sm:$0xff]  }
 0x8be   :  { %20587 = vmatpush3.bf16.msra.mxu0 %v24239_v58  ;;  %20609 = vmatpush3.bf16.msra.mxu1 %v24240_v59  ;;  %v24250_v57 = vld [vmem:[#allocation5 + $0x22b8] ss:$36 sps:$4 sm:$0xff]   ;;  %v24285_v58 = vld [vmem:[#allocation5 + $0x2780] ss:$36 sps:$4 sm:$0xff]  }
 0x8bf   :  { %20588 = vmatprep.subr.bf16.mxu0 %v24241_v1  ;;  %20610 = vmatprep.subr.bf16.mxu1 %v24242_v21  ;;  %v24286_v59 = vld [vmem:[#allocation5 + $0x2c00] ss:$36 sps:$4 sm:$0xff]   ;;  %v24289_v1 = vld [vmem:[#allocation5 + $0x27c8] ss:$36 sps:$4 sm:$0xff]  }
 0x8c0   :  { %16484 = vmatprep.mubr.bf16.mxu0 %v25130_v62  ;;  %16524 = vmatprep.mubr.bf16.mxu1 %v25144_v18  ;;  %v24255_v62 = vld [vmem:[#allocation5 + $0x1c40] ss:$36 sps:$4 sm:$0xff]   ;;  %v24290_v21 = vld [vmem:[#allocation5 + $0x2c48] ss:$36 sps:$4 sm:$0xff]  }
 0x8c1   :  { %v24256_v18 = vld [vmem:[#allocation5 + $0x20c0] ss:$36 sps:$4 sm:$0xff]  }
 0x8c2   :  { %20589 = vmatpush3.bf16.msra.mxu0 %v24243_v3  ;;  %20611 = vmatpush3.bf16.msra.mxu1 %v24244_v7  ;;  %v24291_v3 = vld [vmem:[#allocation5 + $0x2588] ss:$36 sps:$4 sm:$0xff]  }
 0x8c3   :  { %20590 = vmatprep.subr.bf16.mxu0 %v24245_v8  ;;  %20612 = vmatprep.subr.bf16.mxu1 %v24246_v12  ;;  %v24292_v7 = vld [vmem:[#allocation5 + $0x2a08] ss:$36 sps:$4 sm:$0xff]   ;;  %v24293_v8 = vld [vmem:[#allocation5 + $0x2810] ss:$36 sps:$4 sm:$0xff]  }
 0x8c4   :  { %v24294_v12 = vld [vmem:[#allocation5 + $0x2c90] ss:$36 sps:$4 sm:$0xff]  }
 0x8c6   :  { %20591 = vmatpush3.bf16.msra.mxu0 %v24247_v13  ;;  %20613 = vmatpush3.bf16.msra.mxu1 %v24248_v14  ;;  %v24295_v13 = vld [vmem:[#allocation5 + $0x25d0] ss:$36 sps:$4 sm:$0xff]  }
 0x8c7   :  { %20592 = vmatprep.subr.bf16.mxu0 %v24249_v42  ;;  %20614 = vmatprep.subr.bf16.mxu1 %v24250_v57  ;;  %v24296_v14 = vld [vmem:[#allocation5 + $0x2a50] ss:$36 sps:$4 sm:$0xff]   ;;  %v24297_v42 = vld [vmem:[#allocation5 + $0x2858] ss:$36 sps:$4 sm:$0xff]  }
 0x8c8   :  { %v24298_v57 = vld [vmem:[#allocation5 + $0x2cd8] ss:$36 sps:$4 sm:$0xff]  }
 0x8ca   :  { %20593 = vmatpush3.bf16.msra.mxu0 %v24251_v23  ;;  %20615 = vmatpush3.bf16.msra.mxu1 %v24252_v17  ;;  %v24299_v23 = vld [vmem:[#allocation5 + $0x2618] ss:$36 sps:$4 sm:$0xff]  }
 0x8cb   :  { %20594 = vmatprep.subr.bf16.mxu0 %v24253_v56  ;;  %20616 = vmatprep.subr.bf16.mxu1 %v24254_v19  ;;  %v24300_v17 = vld [vmem:[#allocation5 + $0x2a98] ss:$36 sps:$4 sm:$0xff]   ;;  %v24301_v56 = vld [vmem:[#allocation5 + $0x2f60] ss:$36 sps:$4 sm:$0xff]  }
 0x8cc   :  { %v24302_v19 = vld [vmem:[#allocation5 + $0x33e0] ss:$36 sps:$4 sm:$0xff]  }
 0x8ce   :  { %20595 = vmatpush3.bf16.msra.mxu0 %v24255_v62  ;;  %20617 = vmatpush3.bf16.msra.mxu1 %v24256_v18  ;;  %v24303_v62 = vld [vmem:[#allocation5 + $0x2d20] ss:$36 sps:$4 sm:$0xff]  }
 0x8cf   :  { %20596 = vmatprep.subr.bf16.mxu0 %v24257_v33  ;;  %20618 = vmatprep.subr.bf16.mxu1 %v24258_v34  ;;  %v24304_v18 = vld [vmem:[#allocation5 + $0x31a0] ss:$36 sps:$4 sm:$0xff]   ;;  %v24305_v33 = vld [vmem:[#allocation5 + $0x2fa8] ss:$36 sps:$4 sm:$0xff]  }
 0x8d0   :  { %v24306_v34 = vld [vmem:[#allocation5 + $0x3428] ss:$36 sps:$4 sm:$0xff]  }
 0x8d2   :  { %20597 = vmatpush3.bf16.msra.mxu0 %v24259_v60  ;;  %20619 = vmatpush3.bf16.msra.mxu1 %v24260_v38  ;;  %v24307_v60 = vld [vmem:[#allocation5 + $0x2d68] ss:$36 sps:$4 sm:$0xff]  }
 0x8d3   :  { %20598 = vmatprep.subr.bf16.mxu0 %v24261_v20  ;;  %20620 = vmatprep.subr.bf16.mxu1 %v24262_v29  ;;  %v24308_v38 = vld [vmem:[#allocation5 + $0x31e8] ss:$36 sps:$4 sm:$0xff]   ;;  %v24309_v20 = vld [vmem:[#allocation5 + $0x2ff0] ss:$36 sps:$4 sm:$0xff]  }
 0x8d4   :  { %v24310_v29 = vld [vmem:[#allocation5 + $0x3470] ss:$36 sps:$4 sm:$0xff]  }
 0x8d6   :  { %20599 = vmatpush3.bf16.msra.mxu0 %v24263_v9  ;;  %20621 = vmatpush3.bf16.msra.mxu1 %v24264_v44  ;;  %v24311_v9 = vld [vmem:[#allocation5 + $0x2db0] ss:$36 sps:$4 sm:$0xff]  }
 0x8d7   :  { %20600 = vmatprep.subr.bf16.mxu0 %v24265_v45  ;;  %20622 = vmatprep.subr.bf16.mxu1 %v24266_v46  ;;  %v24312_v44 = vld [vmem:[#allocation5 + $0x3230] ss:$36 sps:$4 sm:$0xff]   ;;  %v24315_v45 = vld [vmem:[#allocation5 + $0x2df8] ss:$36 sps:$4 sm:$0xff]  }
 0x8d8   :  { %v24316_v46 = vld [vmem:[#allocation5 + $0x3278] ss:$36 sps:$4 sm:$0xff]  }
 0x8da   :  { %20601 = vmatpush3.bf16.msra.mxu0 %v24267_v35  ;;  %20623 = vmatpush3.bf16.msra.mxu1 %v24268_v47  ;;  %v24317_v35 = vld [vmem:[#allocation5 + $0x3080] ss:$36 sps:$4 sm:$0xff]  }
 0x8db   :  { %20630 = vmatprep.subr.bf16.mxu0 %v24269_v5  ;;  %20652 = vmatprep.subr.bf16.mxu1 %v24270_v10  ;;  %v24318_v47 = vld [vmem:[#allocation5 + $0x3500] ss:$36 sps:$4 sm:$0xff]   ;;  %v16816_v5 = vlaneseq  ;;  %v24321_v10 = vld [vmem:[#allocation5 + $0x30c8] ss:$36 sps:$4 sm:$0xff]  }
 0x8dd   :  { %16485 = vmatmul.mubr.bf16.vlgmr.msra.gmra.mrb[20].mxu0 %v25140_v11  ;;  %16525 = vmatmul.mubr.bf16.vlgmr.msra.gmra.mrb[20].mxu1 %v25154_v36  ;;  %v24281_v11 = vld [vmem:[#allocation5 + $0x2738] ss:$36 sps:$4 sm:$0xff]  }
 0x8de   :  { %20631 = vmatpush3.bf16.msra.mxu0 %v24271_v41  ;;  %20653 = vmatpush3.bf16.msra.mxu1 %v24272_v49  ;;  %v24282_v36 = vld [vmem:[#allocation5 + $0x2bb8] ss:$36 sps:$4 sm:$0xff]   ;;  %v24322_v41 = vld [vmem:[#allocation5 + $0x3548] ss:$36 sps:$4 sm:$0xff]   ;;  %v25344_v49 = vshrl.u32 %v16816_v5, 7 }
 0x8df   :  { %20632 = vmatprep.subr.bf16.mxu0 %v24273_v50  ;;  %20654 = vmatprep.subr.bf16.mxu1 %v24274_v51  ;;  %v24323_v50 = vld [vmem:[#allocation5 + $0x2e88] ss:$36 sps:$4 sm:$0xff]  }
 0x8e0   :  { %16564 = vmatprep.mubr.bf16.mxu0 %v25158_v43  ;;  %16604 = vmatprep.mubr.bf16.mxu1 %v25172_v2  ;;  %v24287_v43 = vld [vmem:[#allocation5 + $0x2540] ss:$36 sps:$4 sm:$0xff]   ;;  %v24324_v51 = vld [vmem:[#allocation5 + $0x3308] ss:$36 sps:$4 sm:$0xff]  }
 0x8e1   :  { %v24288_v2 = vld [vmem:[#allocation5 + $0x29c0] ss:$36 sps:$4 sm:$0xff]  }
 0x8e2   :  { %20633 = vmatpush3.bf16.msra.mxu0 %v24275_v15  ;;  %20655 = vmatpush3.bf16.msra.mxu1 %v24276_v24  ;;  %v24325_v15 = vld [vmem:[#allocation5 + $0x3110] ss:$36 sps:$4 sm:$0xff]  }
 0x8e3   :  { %20634 = vmatprep.subr.bf16.mxu0 %v24277_v52  ;;  %20656 = vmatprep.subr.bf16.mxu1 %v24278_v53  ;;  %v24326_v24 = vld [vmem:[#allocation5 + $0x3590] ss:$36 sps:$4 sm:$0xff]   ;;  %v16822_v52 = vsub.s32 1, %v25344_v49  ;;  %v25347_v53 = vld [vmem:[#allocation7] sm:$0xff] }
 0x8e6   :  { %20635 = vmatpush3.bf16.msra.mxu0 %v24279_v48  ;;  %20657 = vmatpush3.bf16.msra.mxu1 %v24280_v30  ;;  %v24327_v48 = vld [vmem:[#allocation5 + $0x2ed0] ss:$36 sps:$4 sm:$0xff]  }
 0x8e7   :  { %20636 = vmatprep.subr.bf16.mxu0 %v24281_v11  ;;  %20658 = vmatprep.subr.bf16.mxu1 %v24282_v36  ;;  %v24328_v30 = vld [vmem:[#allocation5 + $0x3350] ss:$36 sps:$4 sm:$0xff]   ;;  %v24329_v11 = vld [vmem:[#allocation5 + $0x3158] ss:$36 sps:$4 sm:$0xff]  }
 0x8e8   :  { %v24330_v36 = vld [vmem:[#allocation5 + $0x35d8] ss:$36 sps:$4 sm:$0xff]  }
 0x8ea   :  { %20637 = vmatpush3.bf16.msra.mxu0 %v24283_v54  ;;  %20659 = vmatpush3.bf16.msra.mxu1 %v24284_v55  ;;  %v16823_v54 = vrot.slane %v25347_v53, %v16822_v52  ;;  %v25350_v55 = vld [vmem:[#allocation8] sm:$0xff] }
 0x8eb   :  { %20638 = vmatprep.subr.bf16.mxu0 %v24285_v58  ;;  %20660 = vmatprep.subr.bf16.mxu1 %v24286_v59  ;;  %v24331_v58 = vld [vmem:[#allocation5 + $0x2f18] ss:$36 sps:$4 sm:$0xff]  }
 0x8ec   :  { %v24332_v59 = vld [vmem:[#allocation5 + $0x3398] ss:$36 sps:$4 sm:$0xff]  }
 0x8ee   :  { %20639 = vmatpush3.bf16.msra.mxu0 %v24287_v43  ;;  %20661 = vmatpush3.bf16.msra.mxu1 %v24288_v2  ;;  %v24333_v43 = vld [vmem:[#allocation5 + $0x3860] ss:$36 sps:$4 sm:$0xff]  }
 0x8ef   :  { %20640 = vmatprep.subr.bf16.mxu0 %v24289_v1  ;;  %20662 = vmatprep.subr.bf16.mxu1 %v24290_v21  ;;  %v24334_v2 = vld [vmem:[#allocation5 + $0x3ce0] ss:$36 sps:$4 sm:$0xff]   ;;  %v16862_v1 = vmul.f32 %v16823_v54, %v25272_v39  ;;  %v16881_v21 = vrot.slane %v25350_v55, %v16822_v52  ;;  %v24340_v39 = vld [vmem:[#allocation5 + $0x3ae8] ss:$36 sps:$4 sm:$0xff]   ;;  %v24361_v52 = vld [vmem:[#allocation5 + $0x3a58] ss:$36 sps:$4 sm:$0xff]  }
 0x8f0   :  { %v24364_v54 = vld [vmem:[#allocation5 + $0x3c98] ss:$36 sps:$4 sm:$0xff]  }
 0x8f2   :  { %20641 = vmatpush3.bf16.msra.mxu0 %v24291_v3  ;;  %20663 = vmatpush3.bf16.msra.mxu1 %v24292_v7  ;;  %v24335_v3 = vld [vmem:[#allocation5 + $0x3620] ss:$36 sps:$4 sm:$0xff]  }
 0x8f3   :  { %20642 = vmatprep.subr.bf16.mxu0 %v24293_v8  ;;  %20664 = vmatprep.subr.bf16.mxu1 %v24294_v12  ;;  %v24336_v7 = vld [vmem:[#allocation5 + $0x3aa0] ss:$36 sps:$4 sm:$0xff]   ;;  %v24337_v8 = vld [vmem:[#allocation5 + $0x38a8] ss:$36 sps:$4 sm:$0xff]  }
 0x8f4   :  { %v24338_v12 = vld [vmem:[#allocation5 + $0x3d28] ss:$36 sps:$4 sm:$0xff]  }
 0x8f6   :  { %20643 = vmatpush3.bf16.msra.mxu0 %v24295_v13  ;;  %20665 = vmatpush3.bf16.msra.mxu1 %v24296_v14  ;;  %v25354_v13 = vadd.f32 %v16881_v21, %v16862_v1  ;;  %v24339_v14 = vld [vmem:[#allocation5 + $0x3668] ss:$36 sps:$4 sm:$0xff]   ;;  %v24366_v1 = vld [vmem:[#allocation10 + $0x40] sm:$0xff]  }
 0x8f7   :  { %20644 = vmatprep.subr.bf16.mxu0 %v24297_v42  ;;  %20666 = vmatprep.subr.bf16.mxu1 %v24298_v57  ;;  %v24341_v42 = vld [vmem:[#allocation5 + $0x38f0] ss:$36 sps:$4 sm:$0xff]  }
 0x8f8   :  { %v24342_v57 = vld [vmem:[#allocation5 + $0x3d70] ss:$36 sps:$4 sm:$0xff]   ;;  %vm16929_vm0 = vcmp.gt.f32.partialorder %v25354_v13, 0.0 }
 0x8fa   :  { %20645 = vmatpush3.bf16.msra.mxu0 %v24299_v23  ;;  %20667 = vmatpush3.bf16.msra.mxu1 %v24300_v17  ;;  %v16938_v23 = vmin.f32 %v25354_v13, 0.0  ;;  %v24343_v17 = vld [vmem:[#allocation5 + $0x36b0] ss:$36 sps:$4 sm:$0xff]  }
 0x8fb   :  { %20674 = vmatprep.subr.bf16.mxu0 %v24301_v56  ;;  %20696 = vmatprep.subr.bf16.mxu1 %v24302_v19  ;;  %v24346_v56 = vld [vmem:[#allocation5 + $0x3db8] ss:$36 sps:$4 sm:$0xff]  }
 0x8fc   :  { %v16948_v19 = vmul.f32 1.442695, %v16938_v23 }
 0x8fd   :  { %16565 = vmatmul.mubr.bf16.vlgmr.msra.gmra.mrb[24].mxu0 %v25168_v61  ;;  %16605 = vmatmul.mubr.bf16.vlgmr.msra.gmra.mrb[24].mxu1 %v25182_v27  ;;  %v24313_v61 = vld [vmem:[#allocation5 + $0x3038] ss:$36 sps:$4 sm:$0xff]  }
 0x8fe   :  { %20675 = vmatpush3.bf16.msra.mxu0 %v24303_v62  ;;  %20697 = vmatpush3.bf16.msra.mxu1 %v24304_v18  ;;  %v24314_v27 = vld [vmem:[#allocation5 + $0x34b8] ss:$36 sps:$4 sm:$0xff]   ;;  %24477 = vpow2.f32 %v16948_v19  ;;  %v24374_v19 = vld [vmem:[#allocation10 + $0x50] sm:$0xff]  }
 0x8ff   :  { %20676 = vmatprep.subr.bf16.mxu0 %v24305_v33  ;;  %20698 = vmatprep.subr.bf16.mxu1 %v24306_v34  ;;  %v24347_v62 = vld [vmem:[#allocation5 + $0x36f8] ss:$36 sps:$4 sm:$0xff]   ;;  %v24350_v33 = vld [vmem:[#allocation5 + $0x3e00] ss:$36 sps:$4 sm:$0xff]  }
 0x900   :  { %16644 = vmatprep.mubr.bf16.mxu0 %v25186_v37  ;;  %16684 = vmatprep.mubr.bf16.mxu1 %v25200_v4  ;;  %v24319_v37 = vld [vmem:[#allocation5 + $0x2e40] ss:$36 sps:$4 sm:$0xff]   ;;  %v24348_v18 = vld [vmem:[#allocation5 + $0x3b78] ss:$36 sps:$4 sm:$0xff]  }
 0x901   :  { %v24320_v4 = vld [vmem:[#allocation5 + $0x32c0] ss:$36 sps:$4 sm:$0xff]  }
 0x902   :  { %20677 = vmatpush3.bf16.msra.mxu0 %v24307_v60  ;;  %20699 = vmatpush3.bf16.msra.mxu1 %v24308_v38  ;;  %v24352_v34 = vld [vmem:[#allocation5 + $0x3bc0] ss:$36 sps:$4 sm:$0xff]   ;;  %v24353_v60 = vld [vmem:[#allocation5 + $0x39c8] ss:$36 sps:$4 sm:$0xff]  }
 0x903   :  { %20678 = vmatprep.subr.bf16.mxu0 %v24309_v20  ;;  %20700 = vmatprep.subr.bf16.mxu1 %v24310_v29  ;;  %v24354_v38 = vld [vmem:[#allocation5 + $0x3e48] ss:$36 sps:$4 sm:$0xff]  }
 0x904   :  { %v24355_v20 = vld [vmem:[#allocation5 + $0x3788] ss:$36 sps:$4 sm:$0xff]  }
 0x905   :  { %v24356_v29 = vld [vmem:[#allocation5 + $0x3c08] ss:$36 sps:$4 sm:$0xff]  }
 0x906   :  { %20679 = vmatpush3.bf16.msra.mxu0 %v24311_v9  ;;  %20701 = vmatpush3.bf16.msra.mxu1 %v24312_v44  ;;  %v16818_v9 = vsub.s32 0, %v25344_v49  ;;  %v24357_v44 = vld [vmem:[#allocation5 + $0x3a10] ss:$36 sps:$4 sm:$0xff]  }
 0x907   :  { %20680 = vmatprep.subr.bf16.mxu0 %v24313_v61  ;;  %20702 = vmatprep.subr.bf16.mxu1 %v24314_v27  ;;  %v24358_v61 = vld [vmem:[#allocation5 + $0x3e90] ss:$36 sps:$4 sm:$0xff]   ;;  %v16830_v27 = vsub.s32 3, %v25344_v49 }
 0x90a   :  { %20681 = vmatpush3.bf16.msra.mxu0 %v24315_v45  ;;  %20703 = vmatpush3.bf16.msra.mxu1 %v24316_v46 }
 0x90b   :  { %20682 = vmatprep.subr.bf16.mxu0 %v24317_v35  ;;  %20704 = vmatprep.subr.bf16.mxu1 %v24318_v47  ;;  %v16838_v47 = vsub.s32 5, %v25344_v49 }
 0x90e   :  { %20683 = vmatpush3.bf16.msra.mxu0 %v24319_v37  ;;  %20705 = vmatpush3.bf16.msra.mxu1 %v24320_v4 }
 0x90f   :  { %20684 = vmatprep.subr.bf16.mxu0 %v24321_v10  ;;  %20706 = vmatprep.subr.bf16.mxu1 %v24322_v41  ;;  %v24359_v10 = vld [vmem:[#allocation5 + $0x37d0] ss:$36 sps:$4 sm:$0xff]  }
 0x910   :  { %v24360_v41 = vld [vmem:[#allocation5 + $0x3c50] ss:$36 sps:$4 sm:$0xff]  }
 0x912   :  { %20685 = vmatpush3.bf16.msra.mxu0 %v24323_v50  ;;  %20707 = vmatpush3.bf16.msra.mxu1 %v24324_v51  ;;  %v24478_v50 = vpop.eup %24477  ;;  %v16819_v51 = vrot.slane %v25347_v53, %v16818_v9 }
 0x913   :  { %20686 = vmatprep.subr.bf16.mxu0 %v24325_v15  ;;  %20708 = vmatprep.subr.bf16.mxu1 %v24326_v24 }
 0x916   :  { %20687 = vmatpush3.bf16.msra.mxu0 %v24327_v48  ;;  %20709 = vmatpush3.bf16.msra.mxu1 %v24328_v30  ;;  %v24362_v48 = vld [vmem:[#allocation5 + $0x3ed8] ss:$36 sps:$4 sm:$0xff]   ;;  %v16831_v30 = vrot.slane %v25347_v53, %v16830_v27 }
 0x917   :  { %20688 = vmatprep.subr.bf16.mxu0 %v24329_v11  ;;  %20710 = vmatprep.subr.bf16.mxu1 %v24330_v36  ;;  %v16839_v11 = vrot.slane %v25347_v53, %v16838_v47  ;;  %v24363_v36 = vld [vmem:[#allocation5 + $0x3818] ss:$36 sps:$4 sm:$0xff]  }
 0x918   :  { %v16864_v21 = vmul.f32 %v16831_v30, %v25274_v32  ;;  %v24370_v32 = vld [vmem:[#allocation10 + $0x48] sm:$0xff]  }
 0x91a   :  { %20689 = vmatpush3.bf16.msra.mxu0 %v24331_v58  ;;  %20711 = vmatpush3.bf16.msra.mxu1 %v24332_v59  ;;  %v20343_v58 = vadd.f32 -1.0, %v24478_v50  ;;  %v16861_v59 = vmul.f32 %v16819_v51, %v25268_v25 }
 0x91b   :  { %20718 = vmatprep.subr.bf16.mxu0 %v24333_v43  ;;  %20740 = vmatprep.subr.bf16.mxu1 %v24334_v2  ;;  %v16877_v43 = vrot.slane %v25350_v55, %v16818_v9  ;;  %v24365_v2 = vld [vmem:[#allocation5 + $0x4160] ss:$36 sps:$4 sm:$0xff]  }
 0x91c   :  { %v16974_v25 = vsel %vm16929_vm0, %v25354_v13, %v20343_v58  ;;  %v24383_v9 = vld [vmem:[#allocation5 + $0x4040] ss:$36 sps:$4 sm:$0xff]   ;;  %v24391_v58 = vld [vmem:[#allocation5 + $0x40d0] ss:$36 sps:$4 sm:$0xff]  }
 0x91d   :  { %16645 = vmatmul.mubr.bf16.vlgmr.msra.gmra.mrb[28].mxu0 %v25196_v63  ;;  %16685 = vmatmul.mubr.bf16.vlgmr.msra.gmra.mrb[28].mxu1 %v25210_v40  ;;  %v24344_v63 = vld [vmem:[#allocation5 + $0x3b30] ss:$36 sps:$4 sm:$0xff]   ;;  %v24345_v40 = vld [vmem:[#allocation5 + $0x3938] ss:$36 sps:$4 sm:$0xff]  }
 0x91e   :  { %20719 = vmatpush3.bf16.msra.mxu0 %v24335_v3  ;;  %20741 = vmatpush3.bf16.msra.mxu1 %v24336_v7  ;;  %v16889_v3 = vrot.slane %v25350_v55, %v16830_v27  ;;  %v24386_v27 = vld [vmem:[#allocation10 + $0x68] sm:$0xff]  }
 0x91f   :  { %20720 = vmatprep.subr.bf16.mxu0 %v24337_v8  ;;  %20742 = vmatprep.subr.bf16.mxu1 %v24338_v12  ;;  %v16897_v8 = vrot.slane %v25350_v55, %v16838_v47  ;;  %v24367_v12 = vld [vmem:[#allocation5 + $0x3f20] ss:$36 sps:$4 sm:$0xff]  }
 0x920   :  { %16724 = vmatprep.mubr.bf16.mxu0 %v25214_v31  ;;  %16764 = vmatprep.mubr.bf16.mxu1 %v25228_v28  ;;  %v24349_v31 = vld [vmem:[#allocation5 + $0x3980] ss:$36 sps:$4 sm:$0xff]  }
 0x921   :  { %v24351_v28 = vld [vmem:[#allocation5 + $0x3740] ss:$36 sps:$4 sm:$0xff]  }
 0x922   :  { %20721 = vmatpush3.bf16.msra.mxu0 %v24339_v14  ;;  %20743 = vmatpush3.bf16.msra.mxu1 %v24340_v39  ;;  %v24368_v14 = vld [vmem:[#allocation10] sm:$0xff]   ;;  %v25380_v39 = vadd.f32 %v16877_v43, %v16861_v59  ;;  %v24388_v47 = vld [vmem:[#allocation10 + $0x28] sm:$0xff]   ;;  %v24392_v59 = vld [vmem:[#allocation10 + $0x30] sm:$0xff]  }
 0x923   :  { %20722 = vmatprep.subr.bf16.mxu0 %v24341_v42  ;;  %20744 = vmatprep.subr.bf16.mxu1 %v24342_v57  ;;  %v24369_v42 = vld [vmem:[#allocation5 + $0x41a8] ss:$36 sps:$4 sm:$0xff]   ;;  %v25382_v57 = vadd.f32 %v16889_v3, %v16864_v21  ;;  %v24393_v3 = vld [vmem:[#allocation5 + $0x4358] ss:$36 sps:$4 sm:$0xff]  }
 0x924   :  { %v16937_v13 = vmin.f32 %v25380_v39, 0.0  ;;  %vm16928_vm1 = vcmp.gt.f32.partialorder %v25380_v39, 0.0 }
 0x925   :  { %vm16931_vm2 = vcmp.gt.f32.partialorder %v25382_v57, 0.0 }
 0x926   :  { %20723 = vmatpush3.bf16.msra.mxu0 %v24343_v17  ;;  %20745 = vmatpush3.bf16.msra.mxu1 %v24344_v63  ;;  %v16983_v17 = vpack.c.bf16 %v16974_v25, %v16974_v25  ;;  %v24371_v63 = vld [vmem:[#allocation5 + $0x3f68] ss:$36 sps:$4 sm:$0xff]  }
 0x927   :  { %20724 = vmatprep.subr.bf16.mxu0 %v24345_v40  ;;  %20746 = vmatprep.subr.bf16.mxu1 %v24346_v56  ;;  %v24372_v40 = vld [vmem:[#allocation10 + $0x8] sm:$0xff]   ;;  %v24373_v56 = vld [vmem:[#allocation5 + $0x41f0] ss:$36 sps:$4 sm:$0xff]  }
 0x92a   :  { %20725 = vmatpush3.bf16.msra.mxu0 %v24347_v62  ;;  %20747 = vmatpush3.bf16.msra.mxu1 %v24348_v18  ;;  %v16940_v62 = vmin.f32 %v25382_v57, 0.0  ;;  %v24376_v18 = vld [vmem:[#allocation10 + $0x10] sm:$0xff]  }
 0x92b   :  { %20726 = vmatprep.subr.bf16.mxu0 %v24349_v31  ;;  %20748 = vmatprep.subr.bf16.mxu1 %v24350_v33  ;;  %v16946_v31 = vmul.f32 1.442695, %v16937_v13  ;;  %v24377_v33 = vld [vmem:[#allocation5 + $0x4238] ss:$36 sps:$4 sm:$0xff]  }
 0x92d   :  { %24479 = vpow2.f32 %v16946_v31 }
 0x92e   :  { %20727 = vmatpush3.bf16.msra.mxu0 %v24351_v28  ;;  %20749 = vmatpush3.bf16.msra.mxu1 %v24352_v34  ;;  %v24378_v28 = vld [vmem:[#allocation10 + $0x58] sm:$0xff]   ;;  %v16952_v34 = vmul.f32 1.442695, %v16940_v62  ;;  %v24398_v62 = vld [vmem:[#allocation10 + $0x140] sm:$0xff]  }
 0x92f   :  { %20728 = vmatprep.subr.bf16.mxu0 %v24353_v60  ;;  %20750 = vmatprep.subr.bf16.mxu1 %v24354_v38  ;;  %v24379_v38 = vld [vmem:[#allocation5 + $0x3ff8] ss:$36 sps:$4 sm:$0xff]  }
 0x930   :  { %v25363_v45 = vpop.f32.mrb[4].mxu0  ;;  %v25365_v46 = vpop.f32.mrb[4].mxu1  ;;  %24481 = vpow2.f32 %v16952_v34 }
 0x931   :  { %v15592_v35 = vpop.f32.mrb[5].mxu0  ;;  %v25368_v5 = vpop.f32.mrb[5].mxu1 }
 0x932   :  { %v15594_v37 = vpop.f32.mrb[6].mxu0  ;;  %v16209_v4 = vpop.f32.mrb[6].mxu1  ;;  %20729 = vmatpush3.bf16.msra.mxu0 %v24355_v20  ;;  %20751 = vmatpush3.bf16.msra.mxu1 %v24356_v29  ;;  %v16866_v7 = vmul.f32 %v16839_v11, %v15592_v35  ;;  %v24380_v20 = vld [vmem:[#allocation10 + $0x18] sm:$0xff]   ;;  %v24382_v29 = vld [vmem:[#allocation10 + $0x60] sm:$0xff]  }
 0x933   :  { %v15595_v15 = vpop.f32.mrb[7].mxu0  ;;  %v16210_v24 = vpop.f32.mrb[7].mxu1  ;;  %20730 = vmatprep.subr.bf16.mxu0 %v24357_v44  ;;  %20752 = vmatprep.subr.bf16.mxu1 %v24358_v61  ;;  %v24384_v44 = vld [vmem:[#allocation10 + $0x20] sm:$0xff]   ;;  %v24385_v61 = vld [vmem:[#allocation5 + $0x42c8] ss:$36 sps:$4 sm:$0xff]   ;;  %v16826_v37 = vsub.s32 2, %v25344_v49 }
 0x934   :  { %v25384_v23 = vadd.f32 %v16897_v8, %v16866_v7  ;;  %v24387_v35 = vld [vmem:[#allocation5 + $0x4088] ss:$36 sps:$4 sm:$0xff]   ;;  %v24389_v4 = vld [vmem:[#allocation5 + $0x4310] ss:$36 sps:$4 sm:$0xff]   ;;  %v16846_v24 = vsub.s32 7, %v25344_v49 }
 0x935   :  { %v24394_v7 = vld [vmem:[#allocation10 + $0x78] sm:$0xff]  }
 0x936   :  { %20731 = vmatpush3.bf16.msra.mxu0 %v24359_v10  ;;  %20753 = vmatpush3.bf16.msra.mxu1 %v24360_v41  ;;  %v24390_v10 = vld [vmem:[#allocation10 + $0x70] sm:$0xff]   ;;  %v16834_v41 = vsub.s32 4, %v25344_v49  ;;  %vm16933_vm3 = vcmp.gt.f32.partialorder %v25384_v23, 0.0 }
 0x937   :  { %20732 = vmatprep.subr.bf16.mxu0 %v24361_v52  ;;  %20754 = vmatprep.subr.bf16.mxu1 %v24362_v48  ;;  %v24480_v15 = vpop.eup %24479 }
 0x93a   :  { %20733 = vmatpush3.bf16.msra.mxu0 %v24363_v36  ;;  %20755 = vmatpush3.bf16.msra.mxu1 %v24364_v54  ;;  %v24482_v30 = vpop.eup %24481 }
 0x93b   :  { %20762 = vmatprep.subr.bf16.mxu0 %v24365_v2  ;;  %20784 = vmatprep.subr.bf16.mxu1 %v24366_v1  ;;  %v16827_v1 = vrot.slane %v25347_v53, %v16826_v37 }
 0x93d   :  { %16725 = vmatmul.mubr.bf16.vlgmr.msra.gmra.mrb[32].mxu0 %v25222_v22  ;;  %16765 = vmatmul.mubr.bf16.vlgmr.msra.gmra.mrb[32].mxu1 %v25238_v6  ;;  %v16942_v22 = vmin.f32 %v25384_v23, 0.0  ;;  %v24375_v6 = vld [vmem:[#allocation5 + $0x3fb0] ss:$36 sps:$4 sm:$0xff]   ;;  %v16863_v13 = vmul.f32 %v16827_v1, %v25270_v26 }
 0x93e   :  { %20763 = vmatpush3.bf16.msra.mxu0 %v24367_v12  ;;  %20785 = vmatpush3.bf16.msra.mxu1 %v24368_v14  ;;  %v20342_v12 = vadd.f32 -1.0, %v24480_v15  ;;  %v16835_v14 = vrot.slane %v25347_v53, %v16834_v41  ;;  %v24411_v15 = vld [vmem:[#allocation10 + $0x98] sm:$0xff]  }
 0x93f   :  { %17606 = vmatprep.mubr.bf16.mxu1 %v16983_v17  ;;  %20764 = vmatprep.subr.bf16.mxu0 %v24369_v42  ;;  %v16956_v60 = vmul.f32 1.442695, %v16942_v22  ;;  %v16847_v42 = vrot.slane %v25347_v53, %v16846_v24  ;;  %v24395_v17 = vld [vmem:[#allocation5 + $0x4118] ss:$36 sps:$4 sm:$0xff]  }
 0x940   :  { %20786 = vmatprep.subr.bf16.mxu1 %v24370_v32  ;;  %16804 = vmatprep.mubr.bf16.mxu0 %v25242_v16  ;;  %v24381_v16 = vld [vmem:[#allocation5 + $0x4280] ss:$36 sps:$4 sm:$0xff]   ;;  %v20345_v32 = vadd.f32 -1.0, %v24482_v30  ;;  %v16973_v22 = vsel %vm16928_vm1, %v25380_v39, %v20342_v12  ;;  %v24415_v30 = vld [vmem:[#allocation10 + $0xa0] sm:$0xff]  }
 0x941   :  { %24483 = vpow2.f32 %v16956_v60  ;;  %v16868_v31 = vmul.f32 %v16847_v42, %v25368_v5  ;;  %v16982_v39 = vpack.c.bf16 %v16973_v22, %v16973_v22 }
 0x942   :  { %20765 = vmatpush3.bf16.msra.mxu0 %v24371_v63  ;;  %20787 = vmatpush3.bf16.msra.mxu1 %v24372_v40  ;;  %v24396_v63 = vld [vmem:[#allocation10 + $0x38] sm:$0xff]   ;;  %v16976_v26 = vsel %vm16931_vm2, %v25382_v57, %v20345_v32 }
 0x943   :  { %20766 = vmatprep.subr.bf16.mxu0 %v24373_v56  ;;  %20788 = vmatprep.subr.bf16.mxu1 %v24374_v19  ;;  %v16885_v56 = vrot.slane %v25350_v55, %v16826_v37  ;;  %v24397_v19 = vld [vmem:[#allocation10 + $0xc0] sm:$0xff]   ;;  %v16985_v5 = vpack.c.bf16 %v16976_v26, %v16976_v26 }
 0x945   :  { %v25412_v60 = vadd.f32 %v16885_v56, %v16863_v13 }
 0x946   :  { %20767 = vmatpush3.bf16.msra.mxu0 %v24375_v6  ;;  %20789 = vmatpush3.bf16.msra.mxu1 %v24376_v18  ;;  %v16865_v6 = vmul.f32 %v16835_v14, %v25363_v45  ;;  %v16893_v18 = vrot.slane %v25350_v55, %v16834_v41  ;;  %v24400_v45 = vld [vmem:[#allocation10 + $0x100] sm:$0xff]  }
 0x947   :  { %20768 = vmatprep.subr.bf16.mxu0 %v24377_v33  ;;  %20790 = vmatprep.subr.bf16.mxu1 %v24378_v28  ;;  %v16905_v33 = vrot.slane %v25350_v55, %v16846_v24  ;;  %v24399_v28 = vld [vmem:[#allocation10 + $0x80] sm:$0xff]   ;;  %v24412_v24 = vld [vmem:[#allocation10 + $0x118] sm:$0xff]   ;;  %vm16930_vm4 = vcmp.gt.f32.partialorder %v25412_v60, 0.0 }
 0x94a   :  { %20769 = vmatpush3.bf16.msra.mxu0 %v24379_v38  ;;  %20791 = vmatpush3.bf16.msra.mxu1 %v24380_v20  ;;  %v25414_v38 = vadd.f32 %v16893_v18, %v16865_v6  ;;  %v24401_v20 = vld [vmem:[#allocation10 + $0xc8] sm:$0xff]  }
 0x94b   :  { %20770 = vmatprep.subr.bf16.mxu0 %v24381_v16  ;;  %20792 = vmatprep.subr.bf16.mxu1 %v24382_v29  ;;  %v24484_v2 = vpop.eup %24483  ;;  %v24402_v16 = vld [vmem:[#allocation10 + $0x148] sm:$0xff]   ;;  %v25416_v29 = vadd.f32 %v16905_v33, %v16868_v31  ;;  %v24426_v31 = vld [vmem:[#allocation10 + $0x178] sm:$0xff]  }
 0x94c   :  { %v20347_v40 = vadd.f32 -1.0, %v24484_v2  ;;  %v24421_v2 = vld [vmem:[#allocation10 + $0xf0] sm:$0xff]   ;;  %vm16932_vm5 = vcmp.gt.f32.partialorder %v25414_v38, 0.0 }
 0x94d   :  { %vm16935_vm6 = vcmp.gt.f32.partialorder %v25416_v29, 0.0 }
 0x94e   :  { %20771 = vmatpush3.bf16.msra.mxu0 %v24383_v9  ;;  %20793 = vmatpush3.bf16.msra.mxu1 %v24384_v44  ;;  %v16978_v34 = vsel %vm16933_vm3, %v25384_v23, %v20347_v40  ;;  %v24403_v23 = vld [vmem:[#allocation10 + $0x88] sm:$0xff]   ;;  %v16939_v9 = vmin.f32 %v25412_v60, 0.0 }
 0x94f   :  { %20772 = vmatprep.subr.bf16.mxu0 %v24385_v61  ;;  %20794 = vmatprep.subr.bf16.mxu1 %v24386_v27  ;;  %v16987_v57 = vpack.c.bf16 %v16978_v34, %v16978_v34  ;;  %v24404_v44 = vld [vmem:[#allocation10 + $0x108] sm:$0xff]   ;;  %v24405_v61 = vld [vmem:[#allocation10 + $0xd0] sm:$0xff]   ;;  %v16941_v27 = vmin.f32 %v25414_v38, 0.0 }
 0x950   :  { %v20470_v50 = vpop.f32.mrb[8].mxu0  ;;  %v20492_v51 = vpop.f32.mrb[8].mxu1  ;;  %v16950_v37 = vmul.f32 1.442695, %v16939_v9 }
 0x951   :  { %v20471_v52 = vpop.f32.mrb[9].mxu0  ;;  %v20493_v48 = vpop.f32.mrb[9].mxu1  ;;  %v16954_v41 = vmul.f32 1.442695, %v16941_v27  ;;  %v24434_v27 = vld [vmem:[#allocation10 + $0x190] sm:$0xff]  }
 0x952   :  { %v20472_v11 = vadd.f32 %v20471_v52, %v20470_v50  ;;  %v20494_v36 = vadd.f32 %v20493_v48, %v20492_v51  ;;  %v20473_v54 = vpop.f32.mrb[10].mxu0  ;;  %20773 = vmatpush3.bf16.msra.mxu0 %v24387_v35  ;;  %20795 = vmatpush3.bf16.msra.mxu1 %v24388_v47  ;;  %v20495_v43 = vpop.f32.mrb[10].mxu1  ;;  %v24406_v35 = vld [vmem:[#allocation10 + $0x150] sm:$0xff]   ;;  %v16944_v47 = vmin.f32 %v25416_v29, 0.0  ;;  %v24410_v50 = vld [vmem:[#allocation10 + $0x158] sm:$0xff]   ;;  %24485 = vpow2.f32 %v16950_v37  ;;  %v24413_v52 = vld [vmem:[#allocation10 + $0xe0] sm:$0xff]  }
 0x953   :  { %v20474_v21 = vpop.f32.mrb[11].mxu0  ;;  %20774 = vmatprep.subr.bf16.mxu0 %v24389_v4  ;;  %20796 = vmatprep.subr.bf16.mxu1 %v24390_v10  ;;  %v20496_v8 = vpop.f32.mrb[11].mxu1  ;;  %v24408_v4 = vld [vmem:[#allocation10 + $0x110] sm:$0xff]   ;;  %v24409_v10 = vld [vmem:[#allocation10 + $0xd8] sm:$0xff]   ;;  %24487 = vpow2.f32 %v16954_v41  ;;  %v24414_v48 = vld [vmem:[#allocation10 + $0x160] sm:$0xff]  }
 0x954   :  { %v25397_v25 = vadd.f32 %v20494_v36, %v20472_v11  ;;  %v16960_v51 = vmul.f32 1.442695, %v16944_v47  ;;  %v24416_v11 = vld [vmem:[#allocation10 + $0x120] sm:$0xff]   ;;  %v24417_v36 = vld [vmem:[#allocation10 + $0xe8] sm:$0xff]   ;;  %v24436_v47 = vld [vmem:[#allocation10 + $0x198] sm:$0xff]  }
 0x955   :  { %v24418_v54 = vld [vmem:[#allocation10 + $0x168] sm:$0xff]   ;;  %v24438_v37 = vld [vmem:[#allocation10 + $0x1a0] sm:$0xff]   ;;  %v24441_v41 = vld [vmem:[#allocation10 + $0x1f0] sm:$0xff]  }
 0x956   :  { %20775 = vmatpush3.bf16.msra.mxu0 %v24391_v58  ;;  %20797 = vmatpush3.bf16.msra.mxu1 %v24392_v59  ;;  %24489 = vpow2.f32 %v16960_v51  ;;  %v24419_v58 = vld [vmem:[#allocation10 + $0xa8] sm:$0xff]   ;;  %v16842_v59 = vsub.s32 6, %v25344_v49 }
 0x957   :  { %20776 = vmatprep.subr.bf16.mxu0 %v24393_v3  ;;  %20798 = vmatprep.subr.bf16.mxu1 %v24394_v7  ;;  %v24420_v43 = vld [vmem:[#allocation10 + $0x128] sm:$0xff]   ;;  %v24422_v3 = vld [vmem:[#allocation10 + $0x170] sm:$0xff]  }
 0x958   :  { %v16843_v49 = vrot.slane %v25347_v53, %v16842_v59 }
 0x95a   :  { %20777 = vmatpush3.bf16.msra.mxu0 %v24395_v17  ;;  %20799 = vmatpush3.bf16.msra.mxu1 %v24396_v63  ;;  %v24423_v63 = vld [vmem:[#allocation10 + $0xb0] sm:$0xff]   ;;  %v16867_v53 = vmul.f32 %v16843_v49, %v25365_v46 }
 0x95b   :  { %20806 = vmatprep.subr.bf16.mxu0 %v24397_v19  ;;  %20828 = vmatprep.subr.bf16.mxu1 %v24398_v62  ;;  %v24424_v19 = vld [vmem:[#allocation10 + $0x130] sm:$0xff]   ;;  %v24425_v62 = vld [vmem:[#allocation10 + $0xf8] sm:$0xff]  }
 0x95c   :  { %v24486_v7 = vpop.eup %24485 }
 0x95d   :  { %16805 = vmatmul.mubr.bf16.vlgmr.msra.gmra.mrb[36].mxu0 %v25250_v0  ;;  %17607 = vmatmul.mubr.bf16.vlgmr.msra.gmra.mrb[36].mxu1 %v16982_v39  ;;  %v24407_v0 = vld [vmem:[#allocation10 + $0x90] sm:$0xff]   ;;  %v24488_v14 = vpop.eup %24487  ;;  %v20344_v6 = vadd.f32 -1.0, %v24486_v7  ;;  %v16901_v39 = vrot.slane %v25350_v55, %v16842_v59  ;;  %v24431_v55 = vld [vmem:[#allocation10 + $0x1c8] sm:$0xff]   ;;  %v24443_v59 = vld [vmem:[#allocation10 + $0x1f8] sm:$0xff]  }
 0x95e   :  { %20807 = vmatpush3.bf16.msra.mxu0 %v24399_v28  ;;  %17646 = vmatprep.mubr.bf16.mxu0 %v16985_v5  ;;  %v20346_v33 = vadd.f32 -1.0, %v24488_v14  ;;  %v24427_v28 = vld [vmem:[#allocation10 + $0xb8] sm:$0xff]   ;;  %v24429_v5 = vld [vmem:[#allocation10 + $0x1c0] sm:$0xff]  }
 0x95f   :  { %20829 = vmatpush3.bf16.msra.mxu1 %v24400_v45  ;;  %17686 = vmatprep.mubr.bf16.mxu1 %v16987_v57  ;;  %v24428_v45 = vld [vmem:[#allocation10 + $0x138] sm:$0xff]   ;;  %v24445_v7 = vld [vmem:[#allocation10 + $0x200] sm:$0xff]  }
 0x960   :  { %20808 = vmatprep.subr.bf16.mxu0 %v24401_v20  ;;  %20830 = vmatprep.subr.bf16.mxu1 %v24402_v16  ;;  %v24490_v13 = vpop.eup %24489  ;;  %v16977_v20 = vsel %vm16932_vm5, %v25414_v38, %v20346_v33  ;;  %v24430_v16 = vld [vmem:[#allocation10 + $0x180] sm:$0xff]   ;;  %v24433_v38 = vld [vmem:[#allocation10 + $0x1d0] sm:$0xff]   ;;  %v24448_v33 = vld [vmem:[#allocation10 + $0x218] sm:$0xff]  }
 0x961   :  { %v20349_v34 = vadd.f32 -1.0, %v24490_v13  ;;  %v16986_v9 = vpack.c.bf16 %v16977_v20, %v16977_v20 }
 0x962   :  { %20809 = vmatpush3.bf16.msra.mxu0 %v24403_v23  ;;  %v16925_v23 = vadd.f32 %v16901_v39, %v16867_v53  ;;  %v24451_v39 = vld [vmem:[#allocation10 + $0x230] sm:$0xff]  }
 0x963   :  { %20831 = vmatpush3.bf16.msra.mxu1 %v24404_v44  ;;  %20810 = vmatprep.subr.bf16.mxu0 %v24405_v61  ;;  %v16980_v57 = vsel %vm16935_vm6, %v25416_v29, %v20349_v34  ;;  %v24435_v29 = vld [vmem:[#allocation10 + $0x1d8] sm:$0xff]  }
 0x964   :  { %20832 = vmatprep.subr.bf16.mxu1 %v24406_v35  ;;  %v16989_v44 = vpack.c.bf16 %v16980_v57, %v16980_v57  ;;  %v16943_v61 = vmin.f32 %v16925_v23, 0.0  ;;  %vm16934_vm7 = vcmp.gt.f32.partialorder %v16925_v23, 0.0 }
 0x966   :  { %20811 = vmatpush3.bf16.msra.mxu0 %v24407_v0  ;;  %v16958_v35 = vmul.f32 1.442695, %v16943_v61  ;;  %v24437_v0 = vld [vmem:[#allocation10 + $0x1e0] sm:$0xff]  }
 0x967   :  { %20833 = vmatpush3.bf16.msra.mxu1 %v24408_v4  ;;  %20812 = vmatprep.subr.bf16.mxu0 %v24409_v10  ;;  %v24439_v4 = vld [vmem:[#allocation10 + $0x1e8] sm:$0xff]  }
 0x968   :  { %20834 = vmatprep.subr.bf16.mxu1 %v24410_v50  ;;  %24491 = vpow2.f32 %v16958_v35  ;;  %v24440_v10 = vld [vmem:[#allocation10 + $0x1a8] sm:$0xff]  }
 0x96a   :  { %20813 = vmatpush3.bf16.msra.mxu0 %v24411_v15 }
 0x96b   :  { %20835 = vmatpush3.bf16.msra.mxu1 %v24412_v24  ;;  %20814 = vmatprep.subr.bf16.mxu0 %v24413_v52 }
 0x96c   :  { %20836 = vmatprep.subr.bf16.mxu1 %v24414_v48 }
 0x96e   :  { %20815 = vmatpush3.bf16.msra.mxu0 %v24415_v30 }
 0x96f   :  { %20837 = vmatpush3.bf16.msra.mxu1 %v24416_v11  ;;  %20816 = vmatprep.subr.bf16.mxu0 %v24417_v36  ;;  %v24442_v36 = vld [vmem:[#allocation10 + $0x1b0] sm:$0xff]  }
 0x970   :  { %v20514_v1 = vpop.f32.mrb[12].mxu0  ;;  %20838 = vmatprep.subr.bf16.mxu1 %v24418_v54  ;;  %v20536_v21 = vpop.f32.mrb[12].mxu1 }
 0x971   :  { %v20515_v8 = vpop.f32.mrb[13].mxu0  ;;  %v20537_v12 = vpop.f32.mrb[13].mxu1 }
 0x972   :  { %v20516_v42 = vadd.f32 %v20515_v8, %v20514_v1  ;;  %v20517_v32 = vpop.f32.mrb[14].mxu0  ;;  %20817 = vmatpush3.bf16.msra.mxu0 %v24419_v58  ;;  %v20538_v17 = vadd.f32 %v20537_v12, %v20536_v21  ;;  %v20539_v40 = vpop.f32.mrb[14].mxu1  ;;  %v24819_v8 = vmov 0.0  }
 0x973   :  { %20839 = vmatpush3.bf16.msra.mxu1 %v24420_v43  ;;  %v20518_v56 = vpop.f32.mrb[15].mxu0  ;;  %20818 = vmatprep.subr.bf16.mxu0 %v24421_v2  ;;  %v20540_v22 = vpop.f32.mrb[15].mxu1 }
 0x974   :  { %v16327_v18 = vadd.f32 %v20516_v42, %v25397_v25  ;;  %20840 = vmatprep.subr.bf16.mxu1 %v24422_v3  ;;  %v16975_v25 = vsel %vm16930_vm4, %v25412_v60, %v20344_v6  ;;  %v24432_v60 = vld [vmem:[#allocation10 + $0x188] sm:$0xff]   ;;  %v24492_v15 = vpop.eup %24491  ;;  %v24444_v3 = vld [vmem:[#allocation10 + $0x1b8] sm:$0xff]  }
 0x975   :  { %v16984_v46 = vpack.c.bf16 %v16975_v25, %v16975_v25  ;;  %v20348_v2 = vadd.f32 -1.0, %v24492_v15 }
 0x976   :  { %v25425_v26 = vadd.f32 %v20538_v17, %v16327_v18  ;;  %20819 = vmatpush3.bf16.msra.mxu0 %v24423_v63  ;;  %v24446_v18 = vld [vmem:[#allocation10 + $0x208] sm:$0xff]  }
 0x977   :  { %20841 = vmatpush3.bf16.msra.mxu1 %v24424_v19  ;;  %20820 = vmatprep.subr.bf16.mxu0 %v24425_v62  ;;  %v16979_v12 = vsel %vm16934_vm7, %v16925_v23, %v20348_v2 }
 0x978   :  { %20842 = vmatprep.subr.bf16.mxu1 %v24426_v31  ;;  %v16988_v14 = vpack.c.bf16 %v16979_v12, %v16979_v12  ;;  %v24447_v31 = vld [vmem:[#allocation10 + $0x210] sm:$0xff]  }
 0x97a   :  { %20821 = vmatpush3.bf16.msra.mxu0 %v24427_v28  ;;  %v24450_v28 = vld [vmem:[#allocation10 + $0x228] sm:$0xff]  }
 0x97b   :  { %20843 = vmatpush3.bf16.msra.mxu1 %v24428_v45  ;;  %20850 = vmatprep.subr.bf16.mxu0 %v24429_v5 }
 0x97c   :  { %20908 = vmatprep.subr.bf16.mxu1 %v24819_v8 }
 0x97d   :  { %17647 = vmatmul.mubr.bf16.vlgmr.msra.gmra.mrb[40].mxu0 %v16984_v46 }
 0x97e   :  { %17687 = vmatmul.mubr.bf16.vlgmr.msra.gmra.mrb[40].mxu1 %v16986_v9  ;;  %20851 = vmatpush3.bf16.msra.mxu0 %v24430_v16  ;;  %v24452_v9 = vld [vmem:[#allocation10 + $0x238] sm:$0xff]  }
 0x97f   :  { %17726 = vmatprep.mubr.bf16.mxu0 %v16989_v44  ;;  %20852 = vmatprep.subr.bf16.mxu0 %v24431_v55 }
 0x980   :  { %20909 = vmatpush3.bf16.msra.mxu1 %v24445_v7  ;;  %20924 = vmatprep.mubr.msk.bf16.mxu1 %vm24820_vm8, %v24819_v8 }
 0x981   :  { %20910 = vmatprep.subr.bf16.mxu1 %v24819_v8 }
 0x982   :  { %20853 = vmatpush3.bf16.msra.mxu0 %v24432_v60 }
 0x983   :  { %20854 = vmatprep.subr.bf16.mxu0 %v24433_v38 }
 0x984   :  { %20911 = vmatpush3.bf16.msra.mxu1 %v24446_v18 }
 0x985   :  { %20912 = vmatprep.subr.bf16.mxu1 %v24819_v8 }
 0x986   :  { %20855 = vmatpush3.bf16.msra.mxu0 %v24434_v27 }
 0x987   :  { %20856 = vmatprep.subr.bf16.mxu0 %v24435_v29 }
 0x988   :  { %20913 = vmatpush3.bf16.msra.mxu1 %v24447_v31 }
 0x989   :  { %20914 = vmatprep.subr.bf16.mxu1 %v24819_v8 }
 0x98a   :  { %20857 = vmatpush3.bf16.msra.mxu0 %v24436_v47 }
 0x98b   :  { %20858 = vmatprep.subr.bf16.mxu0 %v24437_v0 }
 0x98c   :  { %20915 = vmatpush3.bf16.msra.mxu1 %v24448_v33 }
 0x98d   :  { %20916 = vmatprep.subr.bf16.mxu1 %v24819_v8 }
 0x98e   :  { %20859 = vmatpush3.bf16.msra.mxu0 %v24438_v37 }
 0x98f   :  { %20860 = vmatprep.subr.bf16.mxu0 %v24439_v4 }
 0x990   :  { %v20558_v50 = vpop.f32.mrb[16].mxu0  ;;  %v20580_v51 = vpop.f32.mrb[16].mxu1 }
 0x991   :  { %v20559_v24 = vpop.f32.mrb[17].mxu0  ;;  %v20581_v52 = vpop.f32.mrb[17].mxu1 }
 0x992   :  { %v20560_v48 = vadd.f32 %v20559_v24, %v20558_v50  ;;  %v20561_v30 = vpop.f32.mrb[18].mxu0  ;;  %20861 = vmatpush3.bf16.msra.mxu0 %v24440_v10  ;;  %v20582_v11 = vadd.f32 %v20581_v52, %v20580_v51  ;;  %v20583_v54 = vpop.f32.mrb[18].mxu1  ;;  %v24453_v10 = vld [vmem:[#allocation13] sm:$0xff]   ;;  %v24454_v50 = vld [vmem:[#allocation13 + $0x8] sm:$0xff]  }
 0x993   :  { %v20562_v58 = vpop.f32.mrb[19].mxu0  ;;  %20862 = vmatprep.subr.bf16.mxu0 %v24441_v41  ;;  %v20584_v43 = vpop.f32.mrb[19].mxu1 }
 0x994   :  { %v16407_v1 = vadd.f32 %v20560_v48, %v25425_v26  ;;  %v24449_v26 = vld [vmem:[#allocation10 + $0x220] sm:$0xff]  }
 0x995   :  { %20917 = vmatpush3.bf16.msra.mxu1 %v24449_v26  ;;  %v20351_v26 = vld [vmem:[#allocation11] ss:$0 sm:$0xff] }
 0x996   :  { %v16447_v21 = vadd.f32 %v20582_v11, %v16407_v1  ;;  %20863 = vmatpush3.bf16.msra.mxu0 %v24442_v36  ;;  %20918 = vmatprep.subr.bf16.mxu1 %v24819_v8 }
 0x997   :  { %20864 = vmatprep.subr.bf16.mxu0 %v24443_v59 }
 0x999   :  { %20919 = vmatpush3.bf16.msra.mxu1 %v24450_v28 }
 0x99a   :  { %20865 = vmatpush3.bf16.msra.mxu0 %v24444_v3  ;;  %20920 = vmatprep.subr.bf16.mxu1 %v24819_v8 }
 0x99b   :  { %20928 = vmatprep.subr.bf16.mxu0 %v24819_v8 }
 0x99d   :  { %17727 = vmatmul.mubr.bf16.vlgmr.msra.gmra.mrb[44].mxu0 %v16988_v14  ;;  %20921 = vmatpush3.bf16.msra.mxu1 %v24451_v39 }
 0x99e   :  { %20944 = vmatprep.mubr.msk.bf16.mxu0 %vm24820_vm8, %v24819_v8  ;;  %20922 = vmatprep.subr.bf16.mxu1 %v24819_v8 }
 0x99f   :  { %20929 = vmatpush3.bf16.msra.mxu0 %v24453_v10  ;;  %v24459_v10 = vld [vmem:[#allocation13 + $0x30] sm:$0xff]  }
 0x9a0   :  { %20930 = vmatprep.subr.bf16.mxu0 %v24819_v8 }
 0x9a1   :  { %20923 = vmatpush3.bf16.msra.mxu1 %v24452_v9 }
 0x9a2   :  { %20948 = vmatprep.subr.bf16.mxu1 %v24819_v8 }
 0x9a3   :  { %20931 = vmatpush3.bf16.msra.mxu0 %v24454_v50 }
 0x9a4   :  { %20932 = vmatprep.subr.bf16.mxu0 %v24819_v8 }
 0x9b0   :  { %v20602_v42 = vpop.f32.mrb[20].mxu0  ;;  %v20624_v32 = vpop.f32.mrb[20].mxu1 }
 0x9b1   :  { %v20603_v17 = vpop.f32.mrb[21].mxu0  ;;  %v20625_v63 = vpop.f32.mrb[21].mxu1 }
 0x9b2   :  { %v20604_v40 = vadd.f32 %v20603_v17, %v20602_v42  ;;  %v20605_v13 = vpop.f32.mrb[22].mxu0  ;;  %v20626_v49 = vadd.f32 %v20625_v63, %v20624_v32  ;;  %v20627_v56 = vpop.f32.mrb[22].mxu1  ;;  %v20340_v17 = vld [vmem:[#allocation7 + $0x8] ss:$0 sm:$0xff] }
 0x9b3   :  { %v20606_v19 = vpop.f32.mrb[23].mxu0  ;;  %v20628_v62 = vpop.f32.mrb[23].mxu1 }
 0x9b4   :  { %v16487_v22 = vadd.f32 %v20604_v40, %v16447_v21 }
 0x9b6   :  { %v16527_v6 = vadd.f32 %v20626_v49, %v16487_v22  ;;  %v20341_v49 = vld [vmem:[#allocation8 + $0x8] ss:$0 sm:$0xff] }
 0x9d0   :  { %v20646_v34 = vpop.f32.mrb[24].mxu0  ;;  %v20668_v53 = vpop.f32.mrb[24].mxu1 }
 0x9d1   :  { %v20647_v45 = vpop.f32.mrb[25].mxu0  ;;  %v20669_v5 = vpop.f32.mrb[25].mxu1 }
 0x9d2   :  { %v20648_v25 = vadd.f32 %v20647_v45, %v20646_v34  ;;  %v20649_v20 = vpop.f32.mrb[26].mxu0  ;;  %v20670_v16 = vadd.f32 %v20669_v5, %v20668_v53  ;;  %v20671_v57 = vpop.f32.mrb[26].mxu1 }
 0x9d3   :  { %v20650_v46 = vpop.f32.mrb[27].mxu0  ;;  %v20672_v23 = vpop.f32.mrb[27].mxu1 }
 0x9d4   :  { %v16567_v55 = vadd.f32 %v20648_v25, %v16527_v6 }
 0x9d6   :  { %v16607_v44 = vadd.f32 %v20670_v16, %v16567_v55 }
 0x9f0   :  { %v20690_v60 = vpop.f32.mrb[28].mxu0  ;;  %v20712_v61 = vpop.f32.mrb[28].mxu1 }
 0x9f1   :  { %v20691_v38 = vpop.f32.mrb[29].mxu0  ;;  %v20713_v27 = vpop.f32.mrb[29].mxu1 }
 0x9f2   :  { %v20692_v35 = vadd.f32 %v20691_v38, %v20690_v60  ;;  %v20693_v29 = vpop.f32.mrb[30].mxu0  ;;  %v20714_v47 = vadd.f32 %v20713_v27, %v20712_v61  ;;  %v20715_v0 = vpop.f32.mrb[30].mxu1 }
 0x9f3   :  { %v20694_v37 = vpop.f32.mrb[31].mxu0  ;;  %v20716_v4 = vpop.f32.mrb[31].mxu1  ;;  %v24456_v29 = vld [vmem:[#allocation13 + $0x18] sm:$0xff]   ;;  %v24462_v0 = vld [vmem:[#allocation16 + $0x8] sm:$0xff]  }
 0x9f4   :  { %v16647_v41 = vadd.f32 %v20692_v35, %v16607_v44  ;;  %v24455_v35 = vld [vmem:[#allocation13 + $0x10] sm:$0xff]   ;;  %v24457_v37 = vld [vmem:[#allocation13 + $0x20] sm:$0xff]   ;;  %v24458_v4 = vld [vmem:[#allocation13 + $0x28] sm:$0xff]  }
 0x9f5   :  { %20933 = vmatpush3.bf16.msra.mxu0 %v24455_v35 }
 0x9f6   :  { %v16687_v51 = vadd.f32 %v20714_v47, %v16647_v41  ;;  %v24461_v47 = vld [vmem:[#allocation16] sm:$0xff]   ;;  %20934 = vmatprep.subr.bf16.mxu0 %v24819_v8  ;;  %v24460_v41 = vld [vmem:[#allocation13 + $0x38] sm:$0xff]  }
 0x9f9   :  { %20935 = vmatpush3.bf16.msra.mxu0 %v24456_v29 }
 0x9fa   :  { %20936 = vmatprep.subr.bf16.mxu0 %v24819_v8 }
 0x9fd   :  { %20937 = vmatpush3.bf16.msra.mxu0 %v24457_v37 }
 0x9fe   :  { %20938 = vmatprep.subr.bf16.mxu0 %v24819_v8 }
 0xa01   :  { %20939 = vmatpush3.bf16.msra.mxu0 %v24458_v4 }
 0xa02   :  { %20940 = vmatprep.subr.bf16.mxu0 %v24819_v8 }
 0xa05   :  { %20941 = vmatpush3.bf16.msra.mxu0 %v24459_v10 }
 0xa06   :  { %20942 = vmatprep.subr.bf16.mxu0 %v24819_v8 }
 0xa09   :  { %20943 = vmatpush3.bf16.msra.mxu0 %v24460_v41 }
 0xa0a   :  { %20968 = vmatprep.subr.bf16.mxu0 %v24819_v8 }
 0xa10   :  { %v20734_v15 = vpop.f32.mrb[32].mxu0  ;;  %v20756_v24 = vpop.f32.mrb[32].mxu1 }
 0xa11   :  { %v20735_v52 = vpop.f32.mrb[33].mxu0  ;;  %v20757_v48 = vpop.f32.mrb[33].mxu1 }
 0xa12   :  { %v20736_v30 = vadd.f32 %v20735_v52, %v20734_v15  ;;  %v20737_v11 = vpop.f32.mrb[34].mxu0  ;;  %v20758_v36 = vadd.f32 %v20757_v48, %v20756_v24  ;;  %v20759_v54 = vpop.f32.mrb[34].mxu1 }
 0xa13   :  { %v20738_v58 = vpop.f32.mrb[35].mxu0  ;;  %v20760_v59 = vpop.f32.mrb[35].mxu1 }
 0xa14   :  { %v16727_v43 = vadd.f32 %v20736_v30, %v16687_v51  ;;  %v24463_v59 = vld [vmem:[#allocation16 + $0x10] sm:$0xff]  }
 0xa16   :  { %v16767_v2 = vadd.f32 %v20758_v36, %v16727_v43  ;;  %v24464_v43 = vld [vmem:[#allocation16 + $0x18] sm:$0xff]  }
 0xa30   :  { %v20778_v1 = vpop.f32.mrb[36].mxu0  ;;  %v20800_v21 = vpop.f32.mrb[36].mxu1 }
 0xa31   :  { %v20779_v3 = vpop.f32.mrb[37].mxu0  ;;  %v20801_v7 = vpop.f32.mrb[37].mxu1 }
 0xa32   :  { %v20780_v12 = vadd.f32 %v20779_v3, %v20778_v1  ;;  %v20802_v14 = vadd.f32 %v20801_v7, %v20800_v21  ;;  %v20781_v42 = vpop.f32.mrb[38].mxu0  ;;  %v20803_v32 = vpop.f32.mrb[38].mxu1  ;;  %v24470_v1 = vld [vmem:[#allocation19 + $0x8] sm:$0xff]   ;;  %v24465_v21 = vld [vmem:[#allocation16 + $0x20] sm:$0xff]  }
 0xa33   :  { %v20782_v63 = vpop.f32.mrb[39].mxu0  ;;  %v20804_v40 = vpop.f32.mrb[39].mxu1  ;;  %v24466_v3 = vld [vmem:[#allocation16 + $0x28] sm:$0xff]   ;;  %v24467_v7 = vld [vmem:[#allocation16 + $0x30] sm:$0xff]  }
 0xa34   :  { %v16807_v13 = vadd.f32 %v20780_v12, %v16767_v2  ;;  %v17609_v39 = vadd.f32 %v20802_v14, %v20351_v26  ;;  %v24469_v2 = vld [vmem:[#allocation19] sm:$0xff]   ;;  %v24468_v12 = vld [vmem:[#allocation16 + $0x38] sm:$0xff]  }
 0xa35   :  { %v20425_v14 = vld [vmem:[#allocation14] ss:$0 sm:$0xff]  ;;  %v24475_v26 = vld [vmem:[#allocation19 + $0x30] sm:$0xff]  }
 0xa36   :  { %v16869_v56 = vmul.f32 %v20340_v17, %v16807_v13 }
 0xa38   :  { %v16927_v19 = vadd.f32 %v20341_v49, %v16869_v56 }
 0xa3a   :  { %v16945_v62 = vmin.f32 %v16927_v19, 0.0  ;;  %vm16936_vm9 = vcmp.gt.f32.partialorder %v16927_v19, 0.0 }
 0xa3c   :  { %v16962_v22 = vmul.f32 1.442695, %v16945_v62 }
 0xa3e   :  { %24493 = vpow2.f32 %v16962_v22 }
 0xa48   :  { %v24494_v6 = vpop.eup %24493 }
 0xa49   :  { %v20350_v18 = vadd.f32 -1.0, %v24494_v6  ;;  %v24471_v6 = vld [vmem:[#allocation19 + $0x10] sm:$0xff]  }
 0xa4b   :  { %v16981_v31 = vsel %vm16936_vm9, %v16927_v19, %v20350_v18  ;;  %v24472_v18 = vld [vmem:[#allocation19 + $0x18] sm:$0xff]  }
 0xa4c   :  { %v16990_v33 = vpack.c.bf16 %v16981_v31, %v16981_v31  ;;  %v24473_v31 = vld [vmem:[#allocation19 + $0x20] sm:$0xff]  }
 0xa4e   :  { %20925 = vmatmul.mubr.bf16.vlgmr.msra.gmra.mrb[44].mxu1 %v16990_v33  ;;  %v24474_v33 = vld [vmem:[#allocation19 + $0x28] sm:$0xff]  }
 0xa4f   :  { %20964 = vmatprep.mubr.msk.bf16.mxu1 %vm24820_vm8, %v24819_v8  ;;  %20949 = vmatpush3.bf16.msra.mxu1 %v24461_v47 }
 0xa50   :  { %v20822_v28 = vpop.f32.mrb[40].mxu0  ;;  %20950 = vmatprep.subr.bf16.mxu1 %v24819_v8 }
 0xa51   :  { %v20844_v34 = vpop.f32.mrb[40].mxu1  ;;  %v20823_v53 = vpop.f32.mrb[41].mxu0 }
 0xa52   :  { %v20824_v45 = vadd.f32 %v20823_v53, %v20822_v28  ;;  %v20845_v5 = vpop.f32.mrb[41].mxu1  ;;  %v20825_v25 = vpop.f32.mrb[42].mxu0  ;;  %v24476_v28 = vld [vmem:[#allocation19 + $0x38] sm:$0xff]  }
 0xa53   :  { %v20846_v20 = vadd.f32 %v20845_v5, %v20844_v34  ;;  %v20847_v16 = vpop.f32.mrb[42].mxu1  ;;  %v20826_v57 = vpop.f32.mrb[43].mxu0  ;;  %20951 = vmatpush3.bf16.msra.mxu1 %v24462_v0  ;;  %v20435_v34 = vld [vmem:[#allocation17] ss:$0 sm:$0xff] }
 0xa54   :  { %v17649_v46 = vadd.f32 %v20824_v45, %v17609_v39  ;;  %v20848_v23 = vpop.f32.mrb[43].mxu1  ;;  %20952 = vmatprep.subr.bf16.mxu1 %v24819_v8 }
 0xa56   :  { %v17689_v55 = vadd.f32 %v20846_v20, %v17649_v46 }
 0xa57   :  { %20953 = vmatpush3.bf16.msra.mxu1 %v24463_v59 }
 0xa58   :  { %20954 = vmatprep.subr.bf16.mxu1 %v24819_v8 }
 0xa5b   :  { %20955 = vmatpush3.bf16.msra.mxu1 %v24464_v43 }
 0xa5c   :  { %20956 = vmatprep.subr.bf16.mxu1 %v24819_v8 }
 0xa5f   :  { %20957 = vmatpush3.bf16.msra.mxu1 %v24465_v21 }
 0xa60   :  { %20958 = vmatprep.subr.bf16.mxu1 %v24819_v8 }
 0xa63   :  { %20959 = vmatpush3.bf16.msra.mxu1 %v24466_v3 }
 0xa64   :  { %20960 = vmatprep.subr.bf16.mxu1 %v24819_v8 }
 0xa67   :  { %20961 = vmatpush3.bf16.msra.mxu1 %v24467_v7 }
 0xa68   :  { %20962 = vmatprep.subr.bf16.mxu1 %v24819_v8 }
 0xa6b   :  { %20963 = vmatpush3.bf16.msra.mxu1 %v24468_v12 }
 0xa70   :  { %v20866_v9 = vpop.f32.mrb[44].mxu0 }
 0xa71   :  { %v20867_v44 = vpop.f32.mrb[45].mxu0 }
 0xa72   :  { %v20868_v60 = vadd.f32 %v20867_v44, %v20866_v9  ;;  %v20869_v61 = vpop.f32.mrb[46].mxu0  ;;  %v20445_v9 = vld [vmem:[#allocation20] ss:$0 sm:$0xff] }
 0xa73   :  { %v20870_v38 = vpop.f32.mrb[47].mxu0 }
 0xa74   :  { %v17729_v27 = vadd.f32 %v20868_v60, %v17689_v55 }
 0xb21   :  { %v17768_v50 = vpop.f32.mrb[44].mxu1 }
 0xb22   :  { %v17769_v51 = vadd.f32 %v17768_v50, %v17729_v27  ;;  %v20926_v15 = vpop.f32.mrb[45].mxu1 }
 0xb23   :  { %v17771_v24 = vpop.f32.mrb[46].mxu1 }
 0xb24   :  { %v17775_v52 = vmin.f32 %v17769_v51, 0.0  ;;  %v20927_v48 = vpop.f32.mrb[47].mxu1  ;;  %vm17774_vm10 = vcmp.gt.f32.partialorder %v17769_v51, 0.0 }
 0xb26   :  { %v17776_v30 = vmul.f32 1.442695, %v17775_v52 }
 0xb28   :  { %24495 = vpow2.f32 %v17776_v30 }
 0xb32   :  { %v24496_v11 = vpop.eup %24495 }
 0xb33   :  { %v20424_v36 = vadd.f32 -1.0, %v24496_v11 }
 0xb35   :  { %v17779_v54 = vsel %vm17774_vm10, %v17769_v51, %v20424_v36 }
 0xb36   :  { %v17780_v58 = vpack.c.bf16 %v17779_v54, %v17779_v54 }
 0xb38   :  { %20945 = vmatmul.mubr.bf16.vlgmr.msra.gmra.mrb[48].mxu0 %v17780_v58 }
 0xb39   :  { %20984 = vmatprep.mubr.msk.bf16.mxu0 %vm24820_vm8, %v24819_v8  ;;  %20969 = vmatpush3.bf16.msra.mxu0 %v24469_v2 }
 0xb3a   :  { %20970 = vmatprep.subr.bf16.mxu0 %v24819_v8 }
 0xb3d   :  { %20971 = vmatpush3.bf16.msra.mxu0 %v24470_v1 }
 0xb3e   :  { %20972 = vmatprep.subr.bf16.mxu0 %v24819_v8 }
 0xb41   :  { %20973 = vmatpush3.bf16.msra.mxu0 %v24471_v6 }
 0xb42   :  { %20974 = vmatprep.subr.bf16.mxu0 %v24819_v8 }
 0xb45   :  { %20975 = vmatpush3.bf16.msra.mxu0 %v24472_v18 }
 0xb46   :  { %20976 = vmatprep.subr.bf16.mxu0 %v24819_v8 }
 0xb49   :  { %20977 = vmatpush3.bf16.msra.mxu0 %v24473_v31 }
 0xb4a   :  { %20978 = vmatprep.subr.bf16.mxu0 %v24819_v8 }
 0xb4d   :  { %20979 = vmatpush3.bf16.msra.mxu0 %v24474_v33 }
 0xb4e   :  { %20980 = vmatprep.subr.bf16.mxu0 %v24819_v8 }
 0xb51   :  { %20981 = vmatpush3.bf16.msra.mxu0 %v24475_v26 }
 0xb52   :  { %20982 = vmatprep.subr.bf16.mxu0 %v24819_v8 }
 0xb55   :  { %20983 = vmatpush3.bf16.msra.mxu0 %v24476_v28 }
 0xc0b   :  { %v17886_v42 = vpop.f32.mrb[48].mxu0 }
 0xc0c   :  { %v17887_v32 = vadd.f32 %v20425_v14, %v17886_v42  ;;  %v20946_v17 = vpop.f32.mrb[49].mxu0 }
 0xc0d   :  { %v17889_v63 = vpop.f32.mrb[50].mxu0 }
 0xc0e   :  { %v17893_v40 = vmin.f32 %v17887_v32, 0.0  ;;  %v20947_v13 = vpop.f32.mrb[51].mxu0  ;;  %vm17892_vm11 = vcmp.gt.f32.partialorder %v17887_v32, 0.0 }
 0xc10   :  { %v17894_v49 = vmul.f32 1.442695, %v17893_v40 }
 0xc12   :  { %24497 = vpow2.f32 %v17894_v49 }
 0xc1c   :  { %v24498_v56 = vpop.eup %24497 }
 0xc1d   :  { %v20434_v19 = vadd.f32 -1.0, %v24498_v56 }
 0xc1f   :  { %v17897_v62 = vsel %vm17892_vm11, %v17887_v32, %v20434_v19 }
 0xc20   :  { %v17898_v22 = vpack.c.bf16 %v17897_v62, %v17897_v62 }
 0xc22   :  { %20965 = vmatmul.mubr.bf16.vlgmr.msra.gmra.mrb[48].mxu1 %v17898_v22 }
 0xcf5   :  { %v18004_v53 = vpop.f32.mrb[48].mxu1 }
 0xcf6   :  { %v18005_v39 = vadd.f32 %v20435_v34, %v18004_v53  ;;  %v20966_v45 = vpop.f32.mrb[49].mxu1 }
 0xcf7   :  { %v18007_v5 = vpop.f32.mrb[50].mxu1 }
 0xcf8   :  { %v18011_v25 = vmin.f32 %v18005_v39, 0.0  ;;  %v20967_v20 = vpop.f32.mrb[51].mxu1  ;;  %vm18010_vm12 = vcmp.gt.f32.partialorder %v18005_v39, 0.0 }
 0xcfa   :  { %v18012_v16 = vmul.f32 1.442695, %v18011_v25 }
 0xcfc   :  { %24499 = vpow2.f32 %v18012_v16 }
 0xd06   :  { %v24500_v57 = vpop.eup %24499 }
 0xd07   :  { %v20444_v46 = vadd.f32 -1.0, %v24500_v57 }
 0xd09   :  { %v18015_v23 = vsel %vm18010_vm12, %v18005_v39, %v20444_v46 }
 0xd0a   :  { %v18016_v55 = vpack.c.bf16 %v18015_v23, %v18015_v23 }
 0xd0c   :  { %20985 = vmatmul.mubr.bf16.vlgmr.msra.gmra.mrb[52].mxu0 %v18016_v55 }
 0xddf   :  { %v18122_v8 = vpop.f32.mrb[52].mxu0 }
 0xde0   :  { %v18123_v44 = vadd.f32 %v20445_v9, %v18122_v8  ;;  %v20986_v60 = vpop.f32.mrb[53].mxu0 }
 0xde1   :  { %v18125_v61 = vpop.f32.mrb[54].mxu0 }
 0xde2   :  { %18128 = vst [vmem:[#allocation22] sm:$0xff] %v18123_v44  ;;  %v20987_v38 = vpop.f32.mrb[55].mxu0 }
 0xde3   :  { %24776 = shalt.err (!%p24773_p2)
}
 0xde4   :  { %s24777_s21 = scalar_lea.hbm %s25500_s12, 128 }
 0xde5   :  { %p24778_p3 = scmp.ne.s32.totalorder %s25500_s12, %s24777_s21  ;;  %p24781_p4 = scmp.lt.u32.totalorder %s24777_s21, %s25500_s12 }
 0xde7   :  { %p24783_p5 = pnand %p24781_p4, %p24778_p3 }
 0xde9   :  { %24786 = shalt.err (!%p24783_p5)
}
 0xdea   :  { %18138 = dma.vmem_to_hbm [thread:$0]  %s18136_s13, 128, %s25500_s12, [#allocation4]  }
 0xdeb   :  { %24801 = dma.done.wait [#allocation4], 128  }
 0xdec   :  { %24802 = vsyncadd [#allocation4], 4294967168 }
 0xded   :  { %18142 = vsyncpa [#allocation3], 1 }
 0xdee   :  { %18143 = vsyncpa [#allocation6], 1 }
 0xdef   :  { %18144 = vsyncpa [#allocation9], 1 }
 0xdf0   :  { %18145 = vsyncpa [#allocation12], 1 }
 0xdf1   :  { %18146 = vsyncpa [#allocation15], 1 }
 0xdf2   :  { %18147 = vsyncpa [#allocation18], 1 }
 0xdf3   :  { %18148 = vsyncpa [#allocation21], 1 }
 0xdf4   :  { %18149 = vsyncpa [#allocation4], 1 }

</bundles_post_ra>
